<compile_context>
chip_gen: v7x
topology: tpu7x:2x2x1
jax: 0.10.0
libtpu: 0.0.40
codegen_flags: <defaults>
</compile_context>

<pallas_src>
import functools

import jax
import jax.numpy as jnp
import numpy as np
from jax.experimental import pallas as pl
from jax.experimental.pallas import tpu as pltpu


def _round_up(x, m):
    return ((x + m - 1) // m) * m


# ---------------------------------------------------------------------------
# Fused kernel: (bf16 x bf16 -> f32) matmul + folded BN + activation
# ---------------------------------------------------------------------------
def _fused_matmul_bn_act_kernel(x_ref, w_ref, scale_ref, shift_ref, o_ref, *, act):
    # conv-as-matmul on the MXU (bf16 operands), accumulate in f32
    acc = jnp.dot(x_ref[...], w_ref[...], preferred_element_type=jnp.float32)
    # folded BatchNorm (eval): y = conv * scale + shift  (scale=1, shift=0 if bn=False)
    y = acc * scale_ref[...] + shift_ref[...]
    if act == "relu":
        y = jnp.maximum(y, 0.0)
    elif act == "tanh":
        y = jnp.tanh(y)
    o_ref[...] = y.astype(o_ref.dtype)


def fused_matmul_bn_act(x, w, scale, shift, *, act):
    """out = act((x @ w) * scale + shift), x:(M,K), w:(K,N), scale/shift:(N,)."""
    M, K = x.shape
    Kw, N = w.shape
    assert K == Kw

    # bf16 operands for the MXU; epilogue params stay f32.
    x = x.astype(jnp.bfloat16)
    w = w.astype(jnp.bfloat16)
    scale = scale.reshape(1, -1).astype(jnp.float32)
    shift = shift.reshape(1, -1).astype(jnp.float32)

    # Pad contraction dim to a multiple of 128 (unmasked loads, fuller MXU depth).
    Kp = _round_up(K, 128)
    if Kp != K:
        x = jnp.pad(x, ((0, 0), (0, Kp - K)))
        w = jnp.pad(w, ((0, Kp - K), (0, 0)))

    # Pad output channels to a multiple of 128 (lane-dense, unmasked stores).
    Np = _round_up(N, 128)
    if Np != N:
        w = jnp.pad(w, ((0, 0), (0, Np - N)))
        scale = jnp.pad(scale, ((0, 0), (0, Np - N)))
        shift = jnp.pad(shift, ((0, 0), (0, Np - N)))

    # Single grid step while the block is small (per-step overhead dominates at
    # these sizes); pad + tile M for larger batches.
    if M <= 2048:
        tm, Mp = M, M
    else:
        tm = 512
        Mp = _round_up(M, tm)
        if Mp != M:
            x = jnp.pad(x, ((0, Mp - M), (0, 0)))

    kernel = functools.partial(_fused_matmul_bn_act_kernel, act=act)
    out = pl.pallas_call(
        kernel,
        out_shape=jax.ShapeDtypeStruct((Mp, Np), jnp.float32),
        grid=(Mp // tm,),
        in_specs=[
            pl.BlockSpec((tm, Kp), lambda i: (i, 0)),   # im2col rows, tiled over M
            pl.BlockSpec((Kp, Np), lambda i: (0, 0)),   # flattened (transposed-)conv weight
            pl.BlockSpec((1, Np), lambda i: (0, 0)),    # folded BN scale
            pl.BlockSpec((1, Np), lambda i: (0, 0)),    # folded BN shift
        ],
        out_specs=pl.BlockSpec((tm, Np), lambda i: (i, 0)),
        compiler_params=pltpu.CompilerParams(dimension_semantics=("parallel",)),
        cost_estimate=pl.CostEstimate(
            flops=2 * Mp * Kp * Np,
            transcendentals=Mp * Np if act == "tanh" else 0,
            bytes_accessed=(Mp * Kp + Kp * Np) * 2 + 2 * Np * 4 + Mp * Np * 4,
        ),
    )(x, w, scale, shift)

    if Mp != M or Np != N:
        out = out[:M, :N]
    return out


# ---------------------------------------------------------------------------
# ConvTranspose2d -> im2col of the dilated/padded input (plain-JAX glue)
# ---------------------------------------------------------------------------
def im2col_convT(x, k, s, p):
    """x: (B, H, W, C) NHWC.  ConvTranspose(k, s, p) == stride-1 conv over the
    s-dilated input padded by (k-1-p); returns (B*Ho*Wo, k*k*C) patches."""
    B, H, W, C = x.shape
    q = k - 1 - p
    xp = jax.lax.pad(
        x,
        jnp.array(0, dtype=x.dtype),
        ((0, 0, 0), (q, q, s - 1), (q, q, s - 1), (0, 0, 0)),
    )
    Hp, Wp = xp.shape[1], xp.shape[2]
    Ho, Wo = Hp - k + 1, Wp - k + 1
    cols = []
    for i in range(k):
        for j in range(k):
            cols.append(xp[:, i:i + Ho, j:j + Wo, :])  # (B, Ho, Wo, C)
    patches = jnp.stack(cols, axis=3)                  # (B, Ho, Wo, k*k, C)
    return patches.reshape(B * Ho * Wo, k * k * C), (B, Ho, Wo)


def convT_weight_to_matmul(w_t):
    """PyTorch ConvTranspose2d weight (Cin, Cout, kh, kw) -> (kh*kw*Cin, Cout)
    matmul weight for the equivalent stride-1 conv (spatially flipped)."""
    cin, cout, kh, kw = w_t.shape
    w_flip = w_t[:, :, ::-1, ::-1]
    return jnp.transpose(w_flip, (2, 3, 0, 1)).reshape(kh * kw * cin, cout)


# ---------------------------------------------------------------------------
# Parameters (eval-mode BN folded into per-channel scale/shift)
# ---------------------------------------------------------------------------
def init_params(key):
    ngf = 32
    latent_dim = 64
    channels = 3
    cfgs = [
        dict(cin=latent_dim, cout=ngf * 4, k=4, s=1, p=0, bn=True),   # 1  -> 4
        dict(cin=ngf * 4,    cout=ngf * 2, k=3, s=2, p=1, bn=True),   # 4  -> 7
        dict(cin=ngf * 2,    cout=ngf,     k=4, s=2, p=1, bn=True),   # 7  -> 14
        dict(cin=ngf,        cout=channels, k=4, s=2, p=1, bn=False), # 14 -> 28
    ]
    params = []
    for cfg in cfgs:
        key, kw_, kg, kb, km, kv = jax.random.split(key, 6)
        # PyTorch ConvTranspose2d weight layout: (Cin, Cout, kH, kW)
        w = 0.02 * jax.random.normal(
            kw_, (cfg["cin"], cfg["cout"], cfg["k"], cfg["k"]), jnp.float32
        )
        if cfg["bn"]:
            gamma = 1.0 + 0.1 * jax.random.normal(kg, (cfg["cout"],), jnp.float32)
            beta = 0.1 * jax.random.normal(kb, (cfg["cout"],), jnp.float32)
            rmean = 0.1 * jax.random.normal(km, (cfg["cout"],), jnp.float32)
            rvar = jax.random.uniform(kv, (cfg["cout"],), jnp.float32, 0.5, 1.5)
            scale = gamma / jnp.sqrt(rvar + 1e-5)
            shift = beta - rmean * scale
        else:
            scale = jnp.ones((cfg["cout"],), jnp.float32)
            shift = jnp.zeros((cfg["cout"],), jnp.float32)
        params.append(dict(cfg=cfg, w=w, scale=scale, shift=shift))
    return params


# ---------------------------------------------------------------------------
# Forward pass (eval mode)
# ---------------------------------------------------------------------------
def generator_forward(z, params):
    """z: (B, latent_dim) -> image (B, channels, 28, 28), NCHW like PyTorch."""
    B = z.shape[0]

    # Layer 1: ConvTranspose2d on a 1x1 input (s=1, p=0) is a plain matmul:
    #   out[b, o, ky, kx] = sum_i z[b, i] * W[i, o, ky, kx]
    p1 = params[0]
    cfg1 = p1["cfg"]
    k1, cin1, cout1 = cfg1["k"], cfg1["cin"], cfg1["cout"]
    w1 = jnp.transpose(p1["w"], (0, 2, 3, 1)).reshape(cin1, k1 * k1 * cout1)
    scale1 = jnp.tile(p1["scale"], k1 * k1)   # column order is (ky, kx, Cout)
    shift1 = jnp.tile(p1["shift"], k1 * k1)
    h = fused_matmul_bn_act(z, w1, scale1, shift1, act="relu")
    x = h.reshape(B, k1, k1, cout1)           # NHWC

    n_layers = len(params)
    for idx in range(1, n_layers):
        p = params[idx]
        cfg = p["cfg"]
        patches, (B, Ho, Wo) = im2col_convT(x, cfg["k"], cfg["s"], cfg["p"])
        w2d = convT_weight_to_matmul(p["w"])
        act = "tanh" if idx == n_layers - 1 else "relu"
        y = fused_matmul_bn_act(patches, w2d, p["scale"], p["shift"], act=act)
        x = y.reshape(B, Ho, Wo, cfg["cout"])

    return jnp.transpose(x, (0, 3, 1, 2))     # NHWC -> NCHW image


def reference_forward(z, params):
    """Pure-JAX reference with matching bf16-operand / f32-accumulate numerics."""
    B = z.shape[0]
    x = z.reshape(B, params[0]["cfg"]["cin"], 1, 1)
    n_layers = len(params)
    for idx, p in enumerate(params):
        cfg = p["cfg"]
        k, s, pad = cfg["k"], cfg["s"], cfg["p"]
        q = k - 1 - pad
        # ConvTranspose2d == conv over s-dilated, q-padded input, flipped kernel.
        w_conv = jnp.transpose(p["w"][:, :, ::-1, ::-1], (1, 0, 2, 3))  # OIHW
        x = jax.lax.conv_general_dilated(
            x.astype(jnp.bfloat16),
            w_conv.astype(jnp.bfloat16),
            window_strides=(1, 1),
            padding=[(q, q), (q, q)],
            lhs_dilation=(s, s),
            dimension_numbers=("NCHW", "OIHW", "NCHW"),
            preferred_element_type=jnp.float32,
        )
        x = x * p["scale"][None, :, None, None] + p["shift"][None, :, None, None]
        if idx < n_layers - 1:
            x = jnp.maximum(x, 0.0)
        else:
            x = jnp.tanh(x)
    return x


if __name__ == "__main__":
    key = jax.random.PRNGKey(0)
    kz, kp = jax.random.split(key)
    # batch=2, latent_dim=64 (the PyTorch module views z to (B, 64, 1, 1))
    z = jax.random.normal(kz, (2, 64), jnp.float32)
    params = init_params(kp)

    fwd = jax.jit(lambda zz: generator_forward(zz, params))
    out = jax.block_until_ready(fwd(z))

    assert out.shape == (2, 3, 28, 28)
    ref = reference_forward(z, params)
    np.testing.assert_allclose(np.asarray(out), np.asarray(ref), atol=2e-3, rtol=2e-2)
    print("KERNEL_OK")
</pallas_src>

<mosaic_0001>
module attributes {stable_mosaic.version = 11 : i64} {
  func.func @_fused_matmul_bn_act_kernel(%arg0: i32, %arg1: memref<2x128xbf16, #tpu.memory_space<vmem>>, %arg2: memref<128x2048xbf16, #tpu.memory_space<vmem>>, %arg3: memref<1x2048xf32, #tpu.memory_space<vmem>>, %arg4: memref<1x2048xf32, #tpu.memory_space<vmem>>, %arg5: memref<2x2048xf32, #tpu.memory_space<vmem>>) attributes {dimension_semantics = [#tpu.dimension_semantics<parallel>], iteration_bounds = array<i64: 1>, scalar_prefetch = 0 : i64, scratch_operands = 0 : i64, tpu.core_type = #tpu.core_type<tc>, window_params = [{transform_indices = @transform_0, window_bounds = array<i64: 2, 128>}, {pipeline_mode = #tpu.pipeline_mode<synchronous>, transform_indices = @transform_1, window_bounds = array<i64: 128, 2048>}, {pipeline_mode = #tpu.pipeline_mode<synchronous>, transform_indices = @transform_2, window_bounds = array<i64: 1, 2048>}, {pipeline_mode = #tpu.pipeline_mode<synchronous>, transform_indices = @transform_3, window_bounds = array<i64: 1, 2048>}, {transform_indices = @transform_4, window_bounds = array<i64: 2, 2048>}]} {
    %c0 = arith.constant 0 : index
    %c0_0 = arith.constant 0 : index
    %0 = vector.load %arg1[%c0, %c0_0] : memref<2x128xbf16, #tpu.memory_space<vmem>>, vector<2x128xbf16>
    %c0_1 = arith.constant 0 : index
    %c0_2 = arith.constant 0 : index
    %1 = vector.load %arg2[%c0_1, %c0_2] : memref<128x2048xbf16, #tpu.memory_space<vmem>>, vector<128x2048xbf16>
    %cst = arith.constant dense<0.000000e+00> : vector<2x2048xf32>
    %2 = tpu.matmul %0, %1, %cst {dimension_numbers = #tpu.dot_dimension_numbers<[1], [0], [0], [1], [0, 0, 1, 1], [], []>} : vector<2x128xbf16>, vector<128x2048xbf16>, vector<2x2048xf32> -> vector<2x2048xf32>
    %c0_3 = arith.constant 0 : index
    %c0_4 = arith.constant 0 : index
    %3 = vector.load %arg3[%c0_3, %c0_4] : memref<1x2048xf32, #tpu.memory_space<vmem>>, vector<1x2048xf32>
    %4 = vector.broadcast %3 : vector<1x2048xf32> to vector<2x2048xf32>
    %5 = arith.mulf %2, %4 : vector<2x2048xf32>
    %c0_5 = arith.constant 0 : index
    %c0_6 = arith.constant 0 : index
    %6 = vector.load %arg4[%c0_5, %c0_6] : memref<1x2048xf32, #tpu.memory_space<vmem>>, vector<1x2048xf32>
    %7 = vector.broadcast %6 : vector<1x2048xf32> to vector<2x2048xf32>
    %8 = arith.addf %5, %7 : vector<2x2048xf32>
    %cst_7 = arith.constant 0.000000e+00 : f32
    %9 = vector.broadcast %cst_7 : f32 to vector<2x2048xf32>
    %10 = arith.maximumf %8, %9 : vector<2x2048xf32>
    %c0_8 = arith.constant 0 : index
    %c0_9 = arith.constant 0 : index
    %11 = vector.load %arg5[%c0_8, %c0_9] : memref<2x2048xf32, #tpu.memory_space<vmem>>, vector<2x2048xf32>
    tpu.vector_store %arg5[%c0_8, %c0_9], %10 {strides = array<i32>} : memref<2x2048xf32, #tpu.memory_space<vmem>>, vector<2x2048xf32>,
    return
  }
  func.func @transform_0(%arg0: i32) -> (i32, i32) {
    %c0_i32 = arith.constant 0 : i32
    %c0_i32_0 = arith.constant 0 : i32
    return %arg0, %c0_i32 : i32, i32
  }
  func.func @transform_1(%arg0: i32) -> (i32, i32) {
    %c0_i32 = arith.constant 0 : i32
    %c0_i32_0 = arith.constant 0 : i32
    %c0_i32_1 = arith.constant 0 : i32
    return %c0_i32, %c0_i32_0 : i32, i32
  }
  func.func @transform_2(%arg0: i32) -> (i32, i32) {
    %c0_i32 = arith.constant 0 : i32
    %c0_i32_0 = arith.constant 0 : i32
    %c0_i32_1 = arith.constant 0 : i32
    return %c0_i32, %c0_i32_0 : i32, i32
  }
  func.func @transform_3(%arg0: i32) -> (i32, i32) {
    %c0_i32 = arith.constant 0 : i32
    %c0_i32_0 = arith.constant 0 : i32
    %c0_i32_1 = arith.constant 0 : i32
    return %c0_i32, %c0_i32_0 : i32, i32
  }
  func.func @transform_4(%arg0: i32) -> (i32, i32) {
    %c0_i32 = arith.constant 0 : i32
    %c0_i32_0 = arith.constant 0 : i32
    return %arg0, %c0_i32 : i32, i32
  }
}

module attributes {stable_mosaic.version = 11 : i64} {
  func.func @_fused_matmul_bn_act_kernel(%arg0: i32, %arg1: memref<98x1152xbf16, #tpu.memory_space<vmem>>, %arg2: memref<1152x128xbf16, #tpu.memory_space<vmem>>, %arg3: memref<1x128xf32, #tpu.memory_space<vmem>>, %arg4: memref<1x128xf32, #tpu.memory_space<vmem>>, %arg5: memref<98x128xf32, #tpu.memory_space<vmem>>) attributes {dimension_semantics = [#tpu.dimension_semantics<parallel>], iteration_bounds = array<i64: 1>, scalar_prefetch = 0 : i64, scratch_operands = 0 : i64, tpu.core_type = #tpu.core_type<tc>, window_params = [{transform_indices = @transform_0, window_bounds = array<i64: 98, 1152>}, {pipeline_mode = #tpu.pipeline_mode<synchronous>, transform_indices = @transform_1, window_bounds = array<i64: 1152, 128>}, {pipeline_mode = #tpu.pipeline_mode<synchronous>, transform_indices = @transform_2, window_bounds = array<i64: 1, 128>}, {pipeline_mode = #tpu.pipeline_mode<synchronous>, transform_indices = @transform_3, window_bounds = array<i64: 1, 128>}, {transform_indices = @transform_4, window_bounds = array<i64: 98, 128>}]} {
    %c0 = arith.constant 0 : index
    %c0_0 = arith.constant 0 : index
    %0 = vector.load %arg1[%c0, %c0_0] : memref<98x1152xbf16, #tpu.memory_space<vmem>>, vector<98x1152xbf16>
    %c0_1 = arith.constant 0 : index
    %c0_2 = arith.constant 0 : index
    %1 = vector.load %arg2[%c0_1, %c0_2] : memref<1152x128xbf16, #tpu.memory_space<vmem>>, vector<1152x128xbf16>
    %cst = arith.constant dense<0.000000e+00> : vector<98x128xf32>
    %2 = tpu.matmul %0, %1, %cst {dimension_numbers = #tpu.dot_dimension_numbers<[1], [0], [0], [1], [0, 0, 1, 1], [], []>} : vector<98x1152xbf16>, vector<1152x128xbf16>, vector<98x128xf32> -> vector<98x128xf32>
    %c0_3 = arith.constant 0 : index
    %c0_4 = arith.constant 0 : index
    %3 = vector.load %arg3[%c0_3, %c0_4] : memref<1x128xf32, #tpu.memory_space<vmem>>, vector<1x128xf32>
    %4 = vector.broadcast %3 : vector<1x128xf32> to vector<98x128xf32>
    %5 = arith.mulf %2, %4 : vector<98x128xf32>
    %c0_5 = arith.constant 0 : index
    %c0_6 = arith.constant 0 : index
    %6 = vector.load %arg4[%c0_5, %c0_6] : memref<1x128xf32, #tpu.memory_space<vmem>>, vector<1x128xf32>
    %7 = vector.broadcast %6 : vector<1x128xf32> to vector<98x128xf32>
    %8 = arith.addf %5, %7 : vector<98x128xf32>
    %cst_7 = arith.constant 0.000000e+00 : f32
    %9 = vector.broadcast %cst_7 : f32 to vector<98x128xf32>
    %10 = arith.maximumf %8, %9 : vector<98x128xf32>
    %c0_8 = arith.constant 0 : index
    %c0_9 = arith.constant 0 : index
    %11 = vector.load %arg5[%c0_8, %c0_9] : memref<98x128xf32, #tpu.memory_space<vmem>>, vector<98x128xf32>
    tpu.vector_store %arg5[%c0_8, %c0_9], %10 {strides = array<i32>} : memref<98x128xf32, #tpu.memory_space<vmem>>, vector<98x128xf32>,
    return
  }
  func.func @transform_0(%arg0: i32) -> (i32, i32) {
    %c0_i32 = arith.constant 0 : i32
    %c0_i32_0 = arith.constant 0 : i32
    return %arg0, %c0_i32 : i32, i32
  }
  func.func @transform_1(%arg0: i32) -> (i32, i32) {
    %c0_i32 = arith.constant 0 : i32
    %c0_i32_0 = arith.constant 0 : i32
    %c0_i32_1 = arith.constant 0 : i32
    return %c0_i32, %c0_i32_0 : i32, i32
  }
  func.func @transform_2(%arg0: i32) -> (i32, i32) {
    %c0_i32 = arith.constant 0 : i32
    %c0_i32_0 = arith.constant 0 : i32
    %c0_i32_1 = arith.constant 0 : i32
    return %c0_i32, %c0_i32_0 : i32, i32
  }
  func.func @transform_3(%arg0: i32) -> (i32, i32) {
    %c0_i32 = arith.constant 0 : i32
    %c0_i32_0 = arith.constant 0 : i32
    %c0_i32_1 = arith.constant 0 : i32
    return %c0_i32, %c0_i32_0 : i32, i32
  }
  func.func @transform_4(%arg0: i32) -> (i32, i32) {
    %c0_i32 = arith.constant 0 : i32
    %c0_i32_0 = arith.constant 0 : i32
    return %arg0, %c0_i32 : i32, i32
  }
}

module attributes {stable_mosaic.version = 11 : i64} {
  func.func @_fused_matmul_bn_act_kernel(%arg0: i32, %arg1: memref<392x1024xbf16, #tpu.memory_space<vmem>>, %arg2: memref<1024x128xbf16, #tpu.memory_space<vmem>>, %arg3: memref<1x128xf32, #tpu.memory_space<vmem>>, %arg4: memref<1x128xf32, #tpu.memory_space<vmem>>, %arg5: memref<392x128xf32, #tpu.memory_space<vmem>>) attributes {dimension_semantics = [#tpu.dimension_semantics<parallel>], iteration_bounds = array<i64: 1>, scalar_prefetch = 0 : i64, scratch_operands = 0 : i64, tpu.core_type = #tpu.core_type<tc>, window_params = [{transform_indices = @transform_0, window_bounds = array<i64: 392, 1024>}, {pipeline_mode = #tpu.pipeline_mode<synchronous>, transform_indices = @transform_1, window_bounds = array<i64: 1024, 128>}, {pipeline_mode = #tpu.pipeline_mode<synchronous>, transform_indices = @transform_2, window_bounds = array<i64: 1, 128>}, {pipeline_mode = #tpu.pipeline_mode<synchronous>, transform_indices = @transform_3, window_bounds = array<i64: 1, 128>}, {transform_indices = @transform_4, window_bounds = array<i64: 392, 128>}]} {
    %c0 = arith.constant 0 : index
    %c0_0 = arith.constant 0 : index
    %0 = vector.load %arg1[%c0, %c0_0] : memref<392x1024xbf16, #tpu.memory_space<vmem>>, vector<392x1024xbf16>
    %c0_1 = arith.constant 0 : index
    %c0_2 = arith.constant 0 : index
    %1 = vector.load %arg2[%c0_1, %c0_2] : memref<1024x128xbf16, #tpu.memory_space<vmem>>, vector<1024x128xbf16>
    %cst = arith.constant dense<0.000000e+00> : vector<392x128xf32>
    %2 = tpu.matmul %0, %1, %cst {dimension_numbers = #tpu.dot_dimension_numbers<[1], [0], [0], [1], [0, 0, 1, 1], [], []>} : vector<392x1024xbf16>, vector<1024x128xbf16>, vector<392x128xf32> -> vector<392x128xf32>
    %c0_3 = arith.constant 0 : index
    %c0_4 = arith.constant 0 : index
    %3 = vector.load %arg3[%c0_3, %c0_4] : memref<1x128xf32, #tpu.memory_space<vmem>>, vector<1x128xf32>
    %4 = vector.broadcast %3 : vector<1x128xf32> to vector<392x128xf32>
    %5 = arith.mulf %2, %4 : vector<392x128xf32>
    %c0_5 = arith.constant 0 : index
    %c0_6 = arith.constant 0 : index
    %6 = vector.load %arg4[%c0_5, %c0_6] : memref<1x128xf32, #tpu.memory_space<vmem>>, vector<1x128xf32>
    %7 = vector.broadcast %6 : vector<1x128xf32> to vector<392x128xf32>
    %8 = arith.addf %5, %7 : vector<392x128xf32>
    %cst_7 = arith.constant 0.000000e+00 : f32
    %9 = vector.broadcast %cst_7 : f32 to vector<392x128xf32>
    %10 = arith.maximumf %8, %9 : vector<392x128xf32>
    %c0_8 = arith.constant 0 : index
    %c0_9 = arith.constant 0 : index
    %11 = vector.load %arg5[%c0_8, %c0_9] : memref<392x128xf32, #tpu.memory_space<vmem>>, vector<392x128xf32>
    tpu.vector_store %arg5[%c0_8, %c0_9], %10 {strides = array<i32>} : memref<392x128xf32, #tpu.memory_space<vmem>>, vector<392x128xf32>,
    return
  }
  func.func @transform_0(%arg0: i32) -> (i32, i32) {
    %c0_i32 = arith.constant 0 : i32
    %c0_i32_0 = arith.constant 0 : i32
    return %arg0, %c0_i32 : i32, i32
  }
  func.func @transform_1(%arg0: i32) -> (i32, i32) {
    %c0_i32 = arith.constant 0 : i32
    %c0_i32_0 = arith.constant 0 : i32
    %c0_i32_1 = arith.constant 0 : i32
    return %c0_i32, %c0_i32_0 : i32, i32
  }
  func.func @transform_2(%arg0: i32) -> (i32, i32) {
    %c0_i32 = arith.constant 0 : i32
    %c0_i32_0 = arith.constant 0 : i32
    %c0_i32_1 = arith.constant 0 : i32
    return %c0_i32, %c0_i32_0 : i32, i32
  }
  func.func @transform_3(%arg0: i32) -> (i32, i32) {
    %c0_i32 = arith.constant 0 : i32
    %c0_i32_0 = arith.constant 0 : i32
    %c0_i32_1 = arith.constant 0 : i32
    return %c0_i32, %c0_i32_0 : i32, i32
  }
  func.func @transform_4(%arg0: i32) -> (i32, i32) {
    %c0_i32 = arith.constant 0 : i32
    %c0_i32_0 = arith.constant 0 : i32
    return %arg0, %c0_i32 : i32, i32
  }
}

module attributes {stable_mosaic.version = 11 : i64} {
  func.func @_fused_matmul_bn_act_kernel(%arg0: i32, %arg1: memref<1568x512xbf16, #tpu.memory_space<vmem>>, %arg2: memref<512x128xbf16, #tpu.memory_space<vmem>>, %arg3: memref<1x128xf32, #tpu.memory_space<vmem>>, %arg4: memref<1x128xf32, #tpu.memory_space<vmem>>, %arg5: memref<1568x128xf32, #tpu.memory_space<vmem>>) attributes {dimension_semantics = [#tpu.dimension_semantics<parallel>], iteration_bounds = array<i64: 1>, scalar_prefetch = 0 : i64, scratch_operands = 0 : i64, tpu.core_type = #tpu.core_type<tc>, window_params = [{transform_indices = @transform_0, window_bounds = array<i64: 1568, 512>}, {pipeline_mode = #tpu.pipeline_mode<synchronous>, transform_indices = @transform_1, window_bounds = array<i64: 512, 128>}, {pipeline_mode = #tpu.pipeline_mode<synchronous>, transform_indices = @transform_2, window_bounds = array<i64: 1, 128>}, {pipeline_mode = #tpu.pipeline_mode<synchronous>, transform_indices = @transform_3, window_bounds = array<i64: 1, 128>}, {transform_indices = @transform_4, window_bounds = array<i64: 1568, 128>}]} {
    %c0 = arith.constant 0 : index
    %c0_0 = arith.constant 0 : index
    %0 = vector.load %arg1[%c0, %c0_0] : memref<1568x512xbf16, #tpu.memory_space<vmem>>, vector<1568x512xbf16>
    %c0_1 = arith.constant 0 : index
    %c0_2 = arith.constant 0 : index
    %1 = vector.load %arg2[%c0_1, %c0_2] : memref<512x128xbf16, #tpu.memory_space<vmem>>, vector<512x128xbf16>
    %cst = arith.constant dense<0.000000e+00> : vector<1568x128xf32>
    %2 = tpu.matmul %0, %1, %cst {dimension_numbers = #tpu.dot_dimension_numbers<[1], [0], [0], [1], [0, 0, 1, 1], [], []>} : vector<1568x512xbf16>, vector<512x128xbf16>, vector<1568x128xf32> -> vector<1568x128xf32>
    %c0_3 = arith.constant 0 : index
    %c0_4 = arith.constant 0 : index
    %3 = vector.load %arg3[%c0_3, %c0_4] : memref<1x128xf32, #tpu.memory_space<vmem>>, vector<1x128xf32>
    %4 = vector.broadcast %3 : vector<1x128xf32> to vector<1568x128xf32>
    %5 = arith.mulf %2, %4 : vector<1568x128xf32>
    %c0_5 = arith.constant 0 : index
    %c0_6 = arith.constant 0 : index
    %6 = vector.load %arg4[%c0_5, %c0_6] : memref<1x128xf32, #tpu.memory_space<vmem>>, vector<1x128xf32>
    %7 = vector.broadcast %6 : vector<1x128xf32> to vector<1568x128xf32>
    %8 = arith.addf %5, %7 : vector<1568x128xf32>
    %9 = math.tanh %8 : vector<1568x128xf32>
    %c0_7 = arith.constant 0 : index
    %c0_8 = arith.constant 0 : index
    %10 = vector.load %arg5[%c0_7, %c0_8] : memref<1568x128xf32, #tpu.memory_space<vmem>>, vector<1568x128xf32>
    tpu.vector_store %arg5[%c0_7, %c0_8], %9 {strides = array<i32>} : memref<1568x128xf32, #tpu.memory_space<vmem>>, vector<1568x128xf32>,
    return
  }
  func.func @transform_0(%arg0: i32) -> (i32, i32) {
    %c0_i32 = arith.constant 0 : i32
    %c0_i32_0 = arith.constant 0 : i32
    return %arg0, %c0_i32 : i32, i32
  }
  func.func @transform_1(%arg0: i32) -> (i32, i32) {
    %c0_i32 = arith.constant 0 : i32
    %c0_i32_0 = arith.constant 0 : i32
    %c0_i32_1 = arith.constant 0 : i32
    return %c0_i32, %c0_i32_0 : i32, i32
  }
  func.func @transform_2(%arg0: i32) -> (i32, i32) {
    %c0_i32 = arith.constant 0 : i32
    %c0_i32_0 = arith.constant 0 : i32
    %c0_i32_1 = arith.constant 0 : i32
    return %c0_i32, %c0_i32_0 : i32, i32
  }
  func.func @transform_3(%arg0: i32) -> (i32, i32) {
    %c0_i32 = arith.constant 0 : i32
    %c0_i32_0 = arith.constant 0 : i32
    %c0_i32_1 = arith.constant 0 : i32
    return %c0_i32, %c0_i32_0 : i32, i32
  }
  func.func @transform_4(%arg0: i32) -> (i32, i32) {
    %c0_i32 = arith.constant 0 : i32
    %c0_i32_0 = arith.constant 0 : i32
    return %arg0, %c0_i32 : i32, i32
  }
}

</mosaic_0001>

<bundles_post_ra>
// kernel: tile.10
= control target key start
LH: loop header
LB: loop body
LE: loop exit
PB: predicated region body
PF: predicated region fallthrough
CT: control target
= control target key end

     0   :  { %2 = vsyncpa [#allocation1], 0  ;;  %s47_s6 = smov [#allocation0]   ;;  %s76_s0 = inlined_call_operand.hbm [shape: f32[128], index: 0, kind: input, shape index: {}]   ;;  %s77_s1 = inlined_call_operand.vmem [shape: f32[16,128], index: 1, kind: output, shape index: {}]  }
   0x1   :  { %s9_s7 = sshll.u32 %s47_s6, 4  ;;  %s23_s10 = scalar_lea.hbm %s76_s0, 16  ;;  %s10_s7 = int_to_ptr.vmem [resolvable:$true] %s9_s7 }
   0x2   :  { %p24_p0 = scmp.ne.s32.totalorder %s76_s0, %s23_s10  ;;  %p27_p1 = scmp.lt.u32.totalorder %s23_s10, %s76_s0 }
   0x4   :  { %p29_p2 = pnand %p27_p1, %p24_p0 }
   0x6   :  { %32 = shalt.err (!%p29_p2)
}
   0x7   :  { %s33_s15 = scalar_lea.vmem %s10_s7, 16  ;;  %s37_s16 = scalar_lea.vmem %s10_s7, 32 }
   0x8   :  { %p34_p3 = scmp.ne.s32.totalorder %s10_s7, %s33_s15  ;;  %p38_p4 = scmp.lt.s32.totalorder %s10_s7, %s10_s7 }
   0x9   :  { %p39_p5 = scmp.lt.s32.totalorder %s37_s16, %s33_s15 }
   0xb   :  { %p40_p6 = por %p39_p5, %p38_p4 }
   0xd   :  { %p41_p7 = pnand %p40_p6, %p34_p3 }
   0xf   :  { %44 = shalt.err (!%p41_p7)
}
  0x10   :  { %12 = dma.hbm_to_vmem [thread:$0]  %s76_s0, 16, %s10_s7, [#allocation1]  }
  0x11   :  { %45 = dma.done.wait [#allocation1], 16  }
  0x12   :  { %46 = vsyncadd [#allocation1], 4294967280  ;;  %v16_v0 = vld [vmem:[#allocation0] ss:$0 sm:$0xff] }
  0x13   :  { %17 = vst [vmem:[%s77_s1] sm:$0xff] %v16_v0  ;;  %21 = vst [vmem:[%s77_s1 + $0x8] sm:$0xff] %v16_v0 }
  0x14   :  { %20 = vsyncpa [#allocation1], 1 }

// kernel: _lambda_.4
= control target key start
LH: loop header
LB: loop body
LE: loop exit
PB: predicated region body
PF: predicated region fallthrough
CT: control target
= control target key end

     0   :  { %v1557_v3 = vmov 0   ;;  %s2117_s1 = inlined_call_operand.vmem [shape: bf16[128,2048], index: 1, kind: input, shape index: {}]   ;;  %s2118_s0 = inlined_call_operand.vmem [shape: bf16[2,128], index: 0, kind: input, shape index: {}]   ;;  %s2119_s2 = inlined_call_operand.vmem [shape: f32[1,2048], index: 2, kind: input, shape index: {}]   ;;  %s2120_s3 = inlined_call_operand.vmem [shape: f32[1,2048], index: 3, kind: input, shape index: {}]   ;;  %s2121_s4 = inlined_call_operand.vmem [shape: f32[2,2048], index: 4, kind: output, shape index: {}]  }
   0x1   :  { %v19_v0 = vld [vmem:[%s2117_s1] sm:$0xff]  ;;  %v20_v2 = vld [vmem:[%s2117_s1 + $0x8] sm:$0xff]  ;;  %819 = vmatprep.mubr.bf16.mxu0 %v1557_v3  ;;  %860 = vmatprep.mubr.bf16.mxu1 %v1557_v3  ;;  %v21_v63 = vld [vmem:[%s2117_s1 + $0x10] sm:$0xff] }
   0x2   :  { %v27_v1 = vld [vmem:[%s2117_s1 + $0x40] sm:$0xff]  ;;  %v28_v5 = vld [vmem:[%s2117_s1 + $0x48] sm:$0xff] }
   0x3   :  { %v1428_v4 = vcombine.high %v19_v0, %v27_v1  ;;  %v1427_v6 = vcombine.low %v19_v0, %v27_v1  ;;  %v35_v7 = vld [vmem:[%s2117_s1 + $0x80] sm:$0xff]  ;;  %v1430_v9 = vcombine.high %v20_v2, %v28_v5  ;;  %v1429_v10 = vcombine.low %v20_v2, %v28_v5  ;;  %v36_v12 = vld [vmem:[%s2117_s1 + $0x88] sm:$0xff]  ;;  %v29_v0 = vld [vmem:[%s2117_s1 + $0x50] sm:$0xff] }
   0x4   :  { %v43_v8 = vld [vmem:[%s2117_s1 + $0xc0] sm:$0xff]  ;;  %v44_v13 = vld [vmem:[%s2117_s1 + $0xc8] sm:$0xff]  ;;  %v22_v1 = vld [vmem:[%s2117_s1 + $0x18] sm:$0xff] }
   0x5   :  { %v1444_v11 = vcombine.high %v35_v7, %v43_v8  ;;  %v51_v14 = vld [vmem:[%s2117_s1 + $0x100] sm:$0xff]  ;;  %787 = vmatprep.subr.bf16.mxu0 %v1428_v4  ;;  %v1446_v15 = vcombine.high %v36_v12, %v44_v13  ;;  %v52_v17 = vld [vmem:[%s2117_s1 + $0x108] sm:$0xff]  ;;  %828 = vmatprep.subr.bf16.mxu1 %v1430_v9  ;;  %v1443_v19 = vcombine.low %v35_v7, %v43_v8  ;;  %v30_v2 = vld [vmem:[%s2117_s1 + $0x58] sm:$0xff] }
   0x6   :  { %v59_v16 = vld [vmem:[%s2117_s1 + $0x140] sm:$0xff]  ;;  %v60_v18 = vld [vmem:[%s2117_s1 + $0x148] sm:$0xff]  ;;  %788 = vmatpush1.bf16.msra.mxu0 %v1427_v6  ;;  %829 = vmatpush1.bf16.msra.mxu1 %v1429_v10  ;;  %v1445_v20 = vcombine.low %v36_v12, %v44_v13  ;;  %v1432_v6 = vcombine.high %v21_v63, %v29_v0  ;;  %v1434_v7 = vcombine.high %v22_v1, %v30_v2  ;;  %v37_v8 = vld [vmem:[%s2117_s1 + $0x90] sm:$0xff] }
   0x7   :  { %789 = vmatprep.subr.bf16.mxu0 %v1444_v11  ;;  %v1460_v21 = vcombine.high %v51_v14, %v59_v16  ;;  %830 = vmatprep.subr.bf16.mxu1 %v1446_v15  ;;  %v1462_v22 = vcombine.high %v52_v17, %v60_v18  ;;  %v67_v23 = vld [vmem:[%s2117_s1 + $0x180] sm:$0xff]  ;;  %v68_v25 = vld [vmem:[%s2117_s1 + $0x188] sm:$0xff]  ;;  %v1459_v27 = vcombine.low %v51_v14, %v59_v16  ;;  %v45_v9 = vld [vmem:[%s2117_s1 + $0xd0] sm:$0xff] }
   0x8   :  { %v75_v24 = vld [vmem:[%s2117_s1 + $0x1c0] sm:$0xff]  ;;  %v76_v26 = vld [vmem:[%s2117_s1 + $0x1c8] sm:$0xff]  ;;  %v1461_v28 = vcombine.low %v52_v17, %v60_v18  ;;  %v38_v10 = vld [vmem:[%s2117_s1 + $0x98] sm:$0xff]  ;;  %v1431_v13 = vcombine.low %v21_v63, %v29_v0  ;;  %v1433_v14 = vcombine.low %v22_v1, %v30_v2  ;;  %v1448_v15 = vcombine.high %v37_v8, %v45_v9 }
   0x9   :  { %v1476_v29 = vcombine.high %v67_v23, %v75_v24  ;;  %v1478_v30 = vcombine.high %v68_v25, %v76_v26  ;;  %v83_v31 = vld [vmem:[%s2117_s1 + $0x200] sm:$0xff]  ;;  %v84_v33 = vld [vmem:[%s2117_s1 + $0x208] sm:$0xff]  ;;  %v1475_v35 = vcombine.low %v67_v23, %v75_v24  ;;  %v1477_v36 = vcombine.low %v68_v25, %v76_v26  ;;  %v46_v11 = vld [vmem:[%s2117_s1 + $0xd8] sm:$0xff] }
   0xa   :  { %790 = vmatpush1.bf16.msra.mxu0 %v1443_v19  ;;  %831 = vmatpush1.bf16.msra.mxu1 %v1445_v20  ;;  %v91_v32 = vld [vmem:[%s2117_s1 + $0x240] sm:$0xff]  ;;  %v92_v34 = vld [vmem:[%s2117_s1 + $0x248] sm:$0xff]  ;;  %v1450_v16 = vcombine.high %v38_v10, %v46_v11  ;;  %v53_v17 = vld [vmem:[%s2117_s1 + $0x110] sm:$0xff] }
   0xb   :  { %791 = vmatprep.subr.bf16.mxu0 %v1460_v21  ;;  %832 = vmatprep.subr.bf16.mxu1 %v1462_v22  ;;  %v1492_v37 = vcombine.high %v83_v31, %v91_v32  ;;  %v1494_v38 = vcombine.high %v84_v33, %v92_v34  ;;  %v99_v39 = vld [vmem:[%s2117_s1 + $0x280] sm:$0xff]  ;;  %v100_v41 = vld [vmem:[%s2117_s1 + $0x288] sm:$0xff]  ;;  %v1491_v43 = vcombine.low %v83_v31, %v91_v32  ;;  %v61_v18 = vld [vmem:[%s2117_s1 + $0x150] sm:$0xff] }
   0xc   :  { %v107_v40 = vld [vmem:[%s2117_s1 + $0x2c0] sm:$0xff]  ;;  %v108_v42 = vld [vmem:[%s2117_s1 + $0x2c8] sm:$0xff]  ;;  %v1493_v44 = vcombine.low %v84_v33, %v92_v34  ;;  %v54_v19 = vld [vmem:[%s2117_s1 + $0x118] sm:$0xff]  ;;  %v1447_v21 = vcombine.low %v37_v8, %v45_v9  ;;  %v1449_v22 = vcombine.low %v38_v10, %v46_v11  ;;  %v1464_v23 = vcombine.high %v53_v17, %v61_v18 }
   0xd   :  { %v1508_v45 = vcombine.high %v99_v39, %v107_v40  ;;  %v1510_v46 = vcombine.high %v100_v41, %v108_v42  ;;  %v115_v47 = vld [vmem:[%s2117_s1 + $0x300] sm:$0xff]  ;;  %v116_v49 = vld [vmem:[%s2117_s1 + $0x308] sm:$0xff]  ;;  %v1507_v51 = vcombine.low %v99_v39, %v107_v40  ;;  %v1509_v52 = vcombine.low %v100_v41, %v108_v42  ;;  %v62_v20 = vld [vmem:[%s2117_s1 + $0x158] sm:$0xff] }
   0xe   :  { %792 = vmatpush1.bf16.msra.mxu0 %v1459_v27  ;;  %833 = vmatpush1.bf16.msra.mxu1 %v1461_v28  ;;  %v123_v48 = vld [vmem:[%s2117_s1 + $0x340] sm:$0xff]  ;;  %v124_v50 = vld [vmem:[%s2117_s1 + $0x348] sm:$0xff]  ;;  %v1466_v24 = vcombine.high %v54_v19, %v62_v20  ;;  %v69_v25 = vld [vmem:[%s2117_s1 + $0x190] sm:$0xff] }
   0xf   :  { %793 = vmatprep.subr.bf16.mxu0 %v1476_v29  ;;  %834 = vmatprep.subr.bf16.mxu1 %v1478_v30  ;;  %v1524_v53 = vcombine.high %v115_v47, %v123_v48  ;;  %v1526_v54 = vcombine.high %v116_v49, %v124_v50  ;;  %v131_v55 = vld [vmem:[%s2117_s1 + $0x380] sm:$0xff]  ;;  %v132_v57 = vld [vmem:[%s2117_s1 + $0x388] sm:$0xff]  ;;  %v1523_v59 = vcombine.low %v115_v47, %v123_v48  ;;  %v77_v26 = vld [vmem:[%s2117_s1 + $0x1d0] sm:$0xff] }
  0x10   :  { %v139_v56 = vld [vmem:[%s2117_s1 + $0x3c0] sm:$0xff]  ;;  %v140_v58 = vld [vmem:[%s2117_s1 + $0x3c8] sm:$0xff]  ;;  %v1525_v60 = vcombine.low %v116_v49, %v124_v50  ;;  %v70_v27 = vld [vmem:[%s2117_s1 + $0x198] sm:$0xff]  ;;  %v1463_v29 = vcombine.low %v53_v17, %v61_v18  ;;  %v1465_v30 = vcombine.low %v54_v19, %v62_v20  ;;  %v1480_v31 = vcombine.high %v69_v25, %v77_v26 }
  0x11   :  { %v1540_v61 = vcombine.high %v131_v55, %v139_v56  ;;  %v1542_v62 = vcombine.high %v132_v57, %v140_v58  ;;  %v1539_v4 = vcombine.low %v131_v55, %v139_v56  ;;  %v1541_v5 = vcombine.low %v132_v57, %v140_v58  ;;  %v1709_v12 = vld [vmem:[%s2118_s0] sm:$0x1]  ;;  %v78_v28 = vld [vmem:[%s2117_s1 + $0x1d8] sm:$0xff]  ;;  %v85_v33 = vld [vmem:[%s2117_s1 + $0x210] sm:$0xff] }
  0x12   :  { %794 = vmatpush1.bf16.msra.mxu0 %v1475_v35  ;;  %835 = vmatpush1.bf16.msra.mxu1 %v1477_v36  ;;  %v1482_v32 = vcombine.high %v70_v27, %v78_v28  ;;  %v93_v34 = vld [vmem:[%s2117_s1 + $0x250] sm:$0xff]  ;;  %v86_v35 = vld [vmem:[%s2117_s1 + $0x218] sm:$0xff]  ;;  %v23_v1 = vld [vmem:[%s2117_s1 + $0x20] sm:$0xff] }
  0x13   :  { %795 = vmatprep.subr.bf16.mxu0 %v1492_v37  ;;  %836 = vmatprep.subr.bf16.mxu1 %v1494_v38  ;;  %v94_v36 = vld [vmem:[%s2117_s1 + $0x258] sm:$0xff]  ;;  %v1479_v37 = vcombine.low %v69_v25, %v77_v26  ;;  %v1481_v38 = vcombine.low %v70_v27, %v78_v28  ;;  %v1496_v39 = vcombine.high %v85_v33, %v93_v34  ;;  %v101_v41 = vld [vmem:[%s2117_s1 + $0x290] sm:$0xff]  ;;  %v31_v2 = vld [vmem:[%s2117_s1 + $0x60] sm:$0xff] }
  0x14   :  { %v1498_v40 = vcombine.high %v86_v35, %v94_v36  ;;  %v109_v42 = vld [vmem:[%s2117_s1 + $0x2d0] sm:$0xff]  ;;  %v1436_v8 = vcombine.high %v23_v1, %v31_v2  ;;  %v39_v10 = vld [vmem:[%s2117_s1 + $0xa0] sm:$0xff] }
  0x15   :  { %v1512_v47 = vcombine.high %v101_v41, %v109_v42  ;;  %v117_v49 = vld [vmem:[%s2117_s1 + $0x310] sm:$0xff]  ;;  %v47_v11 = vld [vmem:[%s2117_s1 + $0xe0] sm:$0xff] }
  0x16   :  { %796 = vmatpush1.bf16.msra.mxu0 %v1491_v43  ;;  %837 = vmatpush1.bf16.msra.mxu1 %v1493_v44  ;;  %v102_v43 = vld [vmem:[%s2117_s1 + $0x298] sm:$0xff]  ;;  %v125_v50 = vld [vmem:[%s2117_s1 + $0x350] sm:$0xff]  ;;  %v1452_v17 = vcombine.high %v39_v10, %v47_v11  ;;  %v55_v19 = vld [vmem:[%s2117_s1 + $0x120] sm:$0xff] }
  0x17   :  { %797 = vmatprep.subr.bf16.mxu0 %v1508_v45  ;;  %838 = vmatprep.subr.bf16.mxu1 %v1510_v46  ;;  %v110_v44 = vld [vmem:[%s2117_s1 + $0x2d8] sm:$0xff]  ;;  %v1495_v45 = vcombine.low %v85_v33, %v93_v34  ;;  %v1497_v46 = vcombine.low %v86_v35, %v94_v36  ;;  %v1528_v55 = vcombine.high %v117_v49, %v125_v50  ;;  %v133_v57 = vld [vmem:[%s2117_s1 + $0x390] sm:$0xff]  ;;  %v63_v20 = vld [vmem:[%s2117_s1 + $0x160] sm:$0xff] }
  0x18   :  { %v1514_v48 = vcombine.high %v102_v43, %v110_v44  ;;  %v141_v58 = vld [vmem:[%s2117_s1 + $0x3d0] sm:$0xff]  ;;  %v1468_v25 = vcombine.high %v55_v19, %v63_v20  ;;  %v71_v27 = vld [vmem:[%s2117_s1 + $0x1a0] sm:$0xff] }
  0x19   :  { %v1544_v63 = vcombine.high %v133_v57, %v141_v58  ;;  %v79_v28 = vld [vmem:[%s2117_s1 + $0x1e0] sm:$0xff] }
  0x1a   :  { %798 = vmatpush1.bf16.msra.mxu0 %v1507_v51  ;;  %839 = vmatpush1.bf16.msra.mxu1 %v1509_v52  ;;  %v118_v51 = vld [vmem:[%s2117_s1 + $0x318] sm:$0xff]  ;;  %v1484_v33 = vcombine.high %v71_v27, %v79_v28  ;;  %v87_v35 = vld [vmem:[%s2117_s1 + $0x220] sm:$0xff] }
  0x1b   :  { %799 = vmatprep.subr.bf16.mxu0 %v1524_v53  ;;  %840 = vmatprep.subr.bf16.mxu1 %v1526_v54  ;;  %v126_v52 = vld [vmem:[%s2117_s1 + $0x358] sm:$0xff]  ;;  %v1511_v53 = vcombine.low %v101_v41, %v109_v42  ;;  %v1513_v54 = vcombine.low %v102_v43, %v110_v44  ;;  %v95_v36 = vld [vmem:[%s2117_s1 + $0x260] sm:$0xff] }
  0x1c   :  { %v1530_v56 = vcombine.high %v118_v51, %v126_v52  ;;  %v1500_v41 = vcombine.high %v87_v35, %v95_v36  ;;  %v103_v43 = vld [vmem:[%s2117_s1 + $0x2a0] sm:$0xff] }
  0x1d   :  { %v111_v44 = vld [vmem:[%s2117_s1 + $0x2e0] sm:$0xff] }
  0x1e   :  { %800 = vmatpush1.bf16.msra.mxu0 %v1523_v59  ;;  %841 = vmatpush1.bf16.msra.mxu1 %v1525_v60  ;;  %v134_v59 = vld [vmem:[%s2117_s1 + $0x398] sm:$0xff] }
  0x1f   :  { %801 = vmatprep.subr.bf16.mxu0 %v1540_v61  ;;  %842 = vmatprep.subr.bf16.mxu1 %v1542_v62  ;;  %v142_v60 = vld [vmem:[%s2117_s1 + $0x3d8] sm:$0xff]  ;;  %v1527_v61 = vcombine.low %v117_v49, %v125_v50  ;;  %v1529_v62 = vcombine.low %v118_v51, %v126_v52  ;;  %v1516_v49 = vcombine.high %v103_v43, %v111_v44  ;;  %v119_v51 = vld [vmem:[%s2117_s1 + $0x320] sm:$0xff] }
  0x20   :  { %v1546_v0 = vcombine.high %v134_v59, %v142_v60  ;;  %v127_v52 = vld [vmem:[%s2117_s1 + $0x360] sm:$0xff] }
  0x22   :  { %802 = vmatpush1.bf16.msra.mxu0 %v1539_v4  ;;  %843 = vmatpush1.bf16.msra.mxu1 %v1541_v5  ;;  %v24_v4 = vld [vmem:[%s2117_s1 + $0x28] sm:$0xff] }
  0x23   :  { %869 = vmatprep.subr.bf16.mxu0 %v1432_v6  ;;  %910 = vmatprep.subr.bf16.mxu1 %v1434_v7  ;;  %v32_v5 = vld [vmem:[%s2117_s1 + $0x68] sm:$0xff]  ;;  %v1543_v6 = vcombine.low %v133_v57, %v141_v58  ;;  %v1545_v7 = vcombine.low %v134_v59, %v142_v60  ;;  %v1532_v57 = vcombine.high %v119_v51, %v127_v52  ;;  %v135_v59 = vld [vmem:[%s2117_s1 + $0x3a0] sm:$0xff] }
  0x24   :  { %v1438_v9 = vcombine.high %v24_v4, %v32_v5  ;;  %v143_v60 = vld [vmem:[%s2117_s1 + $0x3e0] sm:$0xff] }
  0x25   :  { %820 = vmatmul.mubr.bf16.vlgmr.msra.gmra.mrb[0].mxu0 %v1709_v12  ;;  %861 = vmatmul.mubr.bf16.vlgmr.msra.gmra.mrb[0].mxu1 %v1709_v12 }
  0x26   :  { %870 = vmatpush1.bf16.msra.mxu0 %v1431_v13  ;;  %911 = vmatpush1.bf16.msra.mxu1 %v1433_v14  ;;  %v40_v13 = vld [vmem:[%s2117_s1 + $0xa8] sm:$0xff] }
  0x27   :  { %871 = vmatprep.subr.bf16.mxu0 %v1448_v15  ;;  %912 = vmatprep.subr.bf16.mxu1 %v1450_v16  ;;  %v48_v14 = vld [vmem:[%s2117_s1 + $0xe8] sm:$0xff]  ;;  %v1435_v15 = vcombine.low %v23_v1, %v31_v2  ;;  %v1437_v16 = vcombine.low %v24_v4, %v32_v5  ;;  %v1548_v1 = vcombine.high %v135_v59, %v143_v60  ;;  %v25_v4 = vld [vmem:[%s2117_s1 + $0x30] sm:$0xff] }
  0x28   :  { %901 = vmatprep.mubr.bf16.mxu0 %v1557_v3  ;;  %942 = vmatprep.mubr.bf16.mxu1 %v1557_v3  ;;  %v1454_v18 = vcombine.high %v40_v13, %v48_v14  ;;  %v33_v5 = vld [vmem:[%s2117_s1 + $0x70] sm:$0xff] }
  0x2a   :  { %872 = vmatpush1.bf16.msra.mxu0 %v1447_v21  ;;  %913 = vmatpush1.bf16.msra.mxu1 %v1449_v22  ;;  %v56_v21 = vld [vmem:[%s2117_s1 + $0x128] sm:$0xff] }
  0x2b   :  { %873 = vmatprep.subr.bf16.mxu0 %v1464_v23  ;;  %914 = vmatprep.subr.bf16.mxu1 %v1466_v24  ;;  %v64_v22 = vld [vmem:[%s2117_s1 + $0x168] sm:$0xff]  ;;  %v1451_v23 = vcombine.low %v39_v10, %v47_v11  ;;  %v1453_v24 = vcombine.low %v40_v13, %v48_v14  ;;  %v1440_v10 = vcombine.high %v25_v4, %v33_v5  ;;  %v41_v13 = vld [vmem:[%s2117_s1 + $0xb0] sm:$0xff] }
  0x2c   :  { %v1470_v26 = vcombine.high %v56_v21, %v64_v22  ;;  %v49_v14 = vld [vmem:[%s2117_s1 + $0xf0] sm:$0xff] }
  0x2e   :  { %874 = vmatpush1.bf16.msra.mxu0 %v1463_v29  ;;  %915 = vmatpush1.bf16.msra.mxu1 %v1465_v30  ;;  %v72_v29 = vld [vmem:[%s2117_s1 + $0x1a8] sm:$0xff] }
  0x2f   :  { %875 = vmatprep.subr.bf16.mxu0 %v1480_v31  ;;  %916 = vmatprep.subr.bf16.mxu1 %v1482_v32  ;;  %v80_v30 = vld [vmem:[%s2117_s1 + $0x1e8] sm:$0xff]  ;;  %v1467_v31 = vcombine.low %v55_v19, %v63_v20  ;;  %v1469_v32 = vcombine.low %v56_v21, %v64_v22  ;;  %v1456_v19 = vcombine.high %v41_v13, %v49_v14  ;;  %v57_v21 = vld [vmem:[%s2117_s1 + $0x130] sm:$0xff] }
  0x30   :  { %v1486_v34 = vcombine.high %v72_v29, %v80_v30  ;;  %v65_v22 = vld [vmem:[%s2117_s1 + $0x170] sm:$0xff] }
  0x32   :  { %876 = vmatpush1.bf16.msra.mxu0 %v1479_v37  ;;  %917 = vmatpush1.bf16.msra.mxu1 %v1481_v38  ;;  %v88_v37 = vld [vmem:[%s2117_s1 + $0x228] sm:$0xff] }
  0x33   :  { %877 = vmatprep.subr.bf16.mxu0 %v1496_v39  ;;  %918 = vmatprep.subr.bf16.mxu1 %v1498_v40  ;;  %v96_v38 = vld [vmem:[%s2117_s1 + $0x268] sm:$0xff]  ;;  %v1483_v39 = vcombine.low %v71_v27, %v79_v28  ;;  %v1485_v40 = vcombine.low %v72_v29, %v80_v30  ;;  %v1472_v27 = vcombine.high %v57_v21, %v65_v22  ;;  %v73_v29 = vld [vmem:[%s2117_s1 + $0x1b0] sm:$0xff] }
  0x34   :  { %v1502_v42 = vcombine.high %v88_v37, %v96_v38  ;;  %v81_v30 = vld [vmem:[%s2117_s1 + $0x1f0] sm:$0xff] }
  0x36   :  { %878 = vmatpush1.bf16.msra.mxu0 %v1495_v45  ;;  %919 = vmatpush1.bf16.msra.mxu1 %v1497_v46  ;;  %v104_v45 = vld [vmem:[%s2117_s1 + $0x2a8] sm:$0xff] }
  0x37   :  { %879 = vmatprep.subr.bf16.mxu0 %v1512_v47  ;;  %920 = vmatprep.subr.bf16.mxu1 %v1514_v48  ;;  %v112_v46 = vld [vmem:[%s2117_s1 + $0x2e8] sm:$0xff]  ;;  %v1499_v47 = vcombine.low %v87_v35, %v95_v36  ;;  %v1501_v48 = vcombine.low %v88_v37, %v96_v38  ;;  %v1488_v35 = vcombine.high %v73_v29, %v81_v30  ;;  %v89_v37 = vld [vmem:[%s2117_s1 + $0x230] sm:$0xff] }
  0x38   :  { %v1518_v50 = vcombine.high %v104_v45, %v112_v46  ;;  %v97_v38 = vld [vmem:[%s2117_s1 + $0x270] sm:$0xff] }
  0x3a   :  { %880 = vmatpush1.bf16.msra.mxu0 %v1511_v53  ;;  %921 = vmatpush1.bf16.msra.mxu1 %v1513_v54  ;;  %v120_v53 = vld [vmem:[%s2117_s1 + $0x328] sm:$0xff] }
  0x3b   :  { %881 = vmatprep.subr.bf16.mxu0 %v1528_v55  ;;  %922 = vmatprep.subr.bf16.mxu1 %v1530_v56  ;;  %v128_v54 = vld [vmem:[%s2117_s1 + $0x368] sm:$0xff]  ;;  %v1515_v55 = vcombine.low %v103_v43, %v111_v44  ;;  %v1517_v56 = vcombine.low %v104_v45, %v112_v46  ;;  %v105_v44 = vld [vmem:[%s2117_s1 + $0x2b0] sm:$0xff]  ;;  %v106_v46 = vld [vmem:[%s2117_s1 + $0x2b8] sm:$0xff] }
  0x3c   :  { %v1534_v58 = vcombine.high %v120_v53, %v128_v54  ;;  %v113_v45 = vld [vmem:[%s2117_s1 + $0x2f0] sm:$0xff] }
  0x3e   :  { %882 = vmatpush1.bf16.msra.mxu0 %v1527_v61  ;;  %923 = vmatpush1.bf16.msra.mxu1 %v1529_v62  ;;  %v136_v61 = vld [vmem:[%s2117_s1 + $0x3a8] sm:$0xff] }
  0x3f   :  { %883 = vmatprep.subr.bf16.mxu0 %v1544_v63  ;;  %924 = vmatprep.subr.bf16.mxu1 %v1546_v0  ;;  %v144_v62 = vld [vmem:[%s2117_s1 + $0x3e8] sm:$0xff]  ;;  %v1531_v63 = vcombine.low %v119_v51, %v127_v52  ;;  %v1533_v0 = vcombine.low %v120_v53, %v128_v54  ;;  %v121_v52 = vld [vmem:[%s2117_s1 + $0x330] sm:$0xff]  ;;  %v122_v54 = vld [vmem:[%s2117_s1 + $0x338] sm:$0xff] }
  0x40   :  { %v1550_v2 = vcombine.high %v136_v61, %v144_v62  ;;  %v129_v53 = vld [vmem:[%s2117_s1 + $0x370] sm:$0xff] }
  0x42   :  { %884 = vmatpush1.bf16.msra.mxu0 %v1543_v6  ;;  %925 = vmatpush1.bf16.msra.mxu1 %v1545_v7  ;;  %v26_v6 = vld [vmem:[%s2117_s1 + $0x38] sm:$0xff] }
  0x43   :  { %951 = vmatprep.subr.bf16.mxu0 %v1436_v8  ;;  %992 = vmatprep.subr.bf16.mxu1 %v1438_v9  ;;  %v34_v7 = vld [vmem:[%s2117_s1 + $0x78] sm:$0xff]  ;;  %v1547_v8 = vcombine.low %v135_v59, %v143_v60  ;;  %v1549_v9 = vcombine.low %v136_v61, %v144_v62  ;;  %v137_v60 = vld [vmem:[%s2117_s1 + $0x3b0] sm:$0xff] }
  0x44   :  { %v1442_v11 = vcombine.high %v26_v6, %v34_v7  ;;  %v145_v61 = vld [vmem:[%s2117_s1 + $0x3f0] sm:$0xff]  ;;  %v138_v62 = vld [vmem:[%s2117_s1 + $0x3b8] sm:$0xff] }
  0x45   :  { %902 = vmatmul.mubr.bf16.vlgmr.msra.gmra.mrb[4].mxu0 %v1709_v12  ;;  %943 = vmatmul.mubr.bf16.vlgmr.msra.gmra.mrb[4].mxu1 %v1709_v12 }
  0x46   :  { %952 = vmatpush1.bf16.msra.mxu0 %v1435_v15  ;;  %993 = vmatpush1.bf16.msra.mxu1 %v1437_v16  ;;  %v42_v15 = vld [vmem:[%s2117_s1 + $0xb8] sm:$0xff] }
  0x47   :  { %953 = vmatprep.subr.bf16.mxu0 %v1452_v17  ;;  %994 = vmatprep.subr.bf16.mxu1 %v1454_v18  ;;  %v50_v16 = vld [vmem:[%s2117_s1 + $0xf8] sm:$0xff]  ;;  %v1439_v17 = vcombine.low %v25_v4, %v33_v5  ;;  %v1441_v18 = vcombine.low %v26_v6, %v34_v7  ;;  %v1551_v5 = vcombine.low %v137_v60, %v145_v61  ;;  %v1119_v7 = vlaneseq }
  0x48   :  { %983 = vmatprep.mubr.bf16.mxu0 %v1557_v3  ;;  %1024 = vmatprep.mubr.bf16.mxu1 %v1557_v3  ;;  %v1458_v20 = vcombine.high %v42_v15, %v50_v16 }
  0x4a   :  { %954 = vmatpush1.bf16.msra.mxu0 %v1451_v23  ;;  %995 = vmatpush1.bf16.msra.mxu1 %v1453_v24  ;;  %v58_v23 = vld [vmem:[%s2117_s1 + $0x138] sm:$0xff] }
  0x4b   :  { %955 = vmatprep.subr.bf16.mxu0 %v1468_v25  ;;  %996 = vmatprep.subr.bf16.mxu1 %v1470_v26  ;;  %v66_v24 = vld [vmem:[%s2117_s1 + $0x178] sm:$0xff]  ;;  %v1455_v25 = vcombine.low %v41_v13, %v49_v14  ;;  %v1457_v26 = vcombine.low %v42_v15, %v50_v16  ;;  %v2010_v15 = vld [vmem:[%s2119_s2] sm:$0xff] }
  0x4c   :  { %v1474_v28 = vcombine.high %v58_v23, %v66_v24 }
  0x4e   :  { %956 = vmatpush1.bf16.msra.mxu0 %v1467_v31  ;;  %997 = vmatpush1.bf16.msra.mxu1 %v1469_v32  ;;  %v74_v31 = vld [vmem:[%s2117_s1 + $0x1b8] sm:$0xff] }
  0x4f   :  { %957 = vmatprep.subr.bf16.mxu0 %v1484_v33  ;;  %998 = vmatprep.subr.bf16.mxu1 %v1486_v34  ;;  %v82_v32 = vld [vmem:[%s2117_s1 + $0x1f8] sm:$0xff]  ;;  %v1471_v33 = vcombine.low %v57_v21, %v65_v22  ;;  %v1473_v34 = vcombine.low %v58_v23, %v66_v24  ;;  %v1558_v23 = vmov 1983009808  }
  0x50   :  { %v1490_v36 = vcombine.high %v74_v31, %v82_v32  ;;  %v1350_v24 = vunpack.c.l.s4 %v1558_v23 }
  0x52   :  { %958 = vmatpush1.bf16.msra.mxu0 %v1483_v39  ;;  %999 = vmatpush1.bf16.msra.mxu1 %v1485_v40  ;;  %v98_v39 = vld [vmem:[%s2117_s1 + $0x278] sm:$0xff]  ;;  %v1487_v40 = vcombine.low %v73_v29, %v81_v30 }
  0x53   :  { %959 = vmatprep.subr.bf16.mxu0 %v1500_v41  ;;  %1000 = vmatprep.subr.bf16.mxu1 %v1502_v42  ;;  %v1489_v41 = vcombine.low %v74_v31, %v82_v32  ;;  %v1504_v42 = vcombine.high %v89_v37, %v97_v38 }
  0x56   :  { %960 = vmatpush1.bf16.msra.mxu0 %v1499_v47  ;;  %1001 = vmatpush1.bf16.msra.mxu1 %v1501_v48  ;;  %v114_v47 = vld [vmem:[%s2117_s1 + $0x2f8] sm:$0xff]  ;;  %v1503_v48 = vcombine.low %v89_v37, %v97_v38 }
  0x57   :  { %961 = vmatprep.subr.bf16.mxu0 %v1516_v49  ;;  %1002 = vmatprep.subr.bf16.mxu1 %v1518_v50  ;;  %v1520_v50 = vcombine.high %v105_v44, %v113_v45  ;;  %v1522_v51 = vcombine.high %v106_v46, %v114_v47 }
  0x5a   :  { %962 = vmatpush1.bf16.msra.mxu0 %v1515_v55  ;;  %1003 = vmatpush1.bf16.msra.mxu1 %v1517_v56  ;;  %v130_v55 = vld [vmem:[%s2117_s1 + $0x378] sm:$0xff]  ;;  %v1519_v56 = vcombine.low %v105_v44, %v113_v45 }
  0x5b   :  { %963 = vmatprep.subr.bf16.mxu0 %v1532_v57  ;;  %1004 = vmatprep.subr.bf16.mxu1 %v1534_v58  ;;  %v1521_v57 = vcombine.low %v106_v46, %v114_v47  ;;  %v1536_v58 = vcombine.high %v121_v52, %v129_v53  ;;  %v1538_v59 = vcombine.high %v122_v54, %v130_v55 }
  0x5e   :  { %964 = vmatpush1.bf16.msra.mxu0 %v1531_v63  ;;  %1005 = vmatpush1.bf16.msra.mxu1 %v1533_v0  ;;  %v146_v63 = vld [vmem:[%s2117_s1 + $0x3f8] sm:$0xff]  ;;  %v1535_v0 = vcombine.low %v121_v52, %v129_v53 }
  0x5f   :  { %965 = vmatprep.subr.bf16.mxu0 %v1548_v1  ;;  %1006 = vmatprep.subr.bf16.mxu1 %v1550_v2  ;;  %v1537_v1 = vcombine.low %v122_v54, %v130_v55  ;;  %v1552_v2 = vcombine.high %v137_v60, %v145_v61  ;;  %v1554_v4 = vcombine.high %v138_v62, %v146_v63 }
  0x60   :  { %v1553_v6 = vcombine.low %v138_v62, %v146_v63 }
  0x62   :  { %966 = vmatpush1.bf16.msra.mxu0 %v1547_v8  ;;  %1007 = vmatpush1.bf16.msra.mxu1 %v1549_v9  ;;  %v1120_v8 = vshrl.u32 %v1119_v7, 7 }
  0x63   :  { %1033 = vmatprep.subr.bf16.mxu0 %v1440_v10  ;;  %1074 = vmatprep.subr.bf16.mxu1 %v1442_v11  ;;  %v1994_v10 = vld [vmem:[%s2119_s2 + $0x8] sm:$0xff] }
  0x64   :  { %v1989_v9 = vsub.s32 4, %v1120_v8  ;;  %v1999_v11 = vld [vmem:[%s2120_s3 + $0x8] sm:$0xff]  ;;  %v2005_v14 = vsub.s32 0, %v1120_v8  ;;  %v2012_v16 = vsub.s32 2, %v1120_v8 }
  0x65   :  { %984 = vmatmul.mubr.bf16.vlgmr.msra.gmra.mrb[8].mxu0 %v1709_v12  ;;  %1025 = vmatmul.mubr.bf16.vlgmr.msra.gmra.mrb[8].mxu1 %v1709_v12 }
  0x66   :  { %1034 = vmatpush1.bf16.msra.mxu0 %v1439_v17  ;;  %1075 = vmatpush1.bf16.msra.mxu1 %v1441_v18  ;;  %v1170_v13 = vrot.slane %v1994_v10, %v1989_v9  ;;  %v2014_v17 = vsub.s32 1, %v1120_v8  ;;  %v2016_v18 = vsub.s32 3, %v1120_v8  ;;  %v1130_v21 = vrot.slane %v2010_v15, %v2012_v16 }
  0x67   :  { %1035 = vmatprep.subr.bf16.mxu0 %v1456_v19  ;;  %1076 = vmatprep.subr.bf16.mxu1 %v1458_v20  ;;  %v2021_v19 = vld [vmem:[%s2120_s3] sm:$0xff]  ;;  %v1122_v20 = vrot.slane %v2010_v15, %v2005_v14 }
  0x68   :  { %1065 = vmatprep.mubr.bf16.mxu0 %v1557_v3  ;;  %1106 = vmatprep.mubr.bf16.mxu1 %v1557_v3  ;;  %v90_v3 = vld [vmem:[%s2117_s1 + $0x238] sm:$0xff]  ;;  %v1126_v22 = vrot.slane %v2010_v15, %v2014_v17  ;;  %v1226_v29 = vrot.slane %v2021_v19, %v2014_v17  ;;  %v1238_v62 = vrot.slane %v2021_v19, %v1989_v9 }
  0x69   :  { %v1506_v43 = vcombine.high %v90_v3, %v98_v39  ;;  %v1505_v49 = vcombine.low %v90_v3, %v98_v39 }
  0x6a   :  { %1036 = vmatpush1.bf16.msra.mxu0 %v1455_v25  ;;  %1077 = vmatpush1.bf16.msra.mxu1 %v1457_v26  ;;  %v1222_v25 = vrot.slane %v2021_v19, %v2005_v14  ;;  %v1134_v26 = vrot.slane %v2010_v15, %v2016_v18 }
  0x6b   :  { %1037 = vmatprep.subr.bf16.mxu0 %v1472_v27  ;;  %1078 = vmatprep.subr.bf16.mxu1 %v1474_v28  ;;  %v1230_v28 = vrot.slane %v2021_v19, %v2012_v16 }
  0x6e   :  { %1038 = vmatpush1.bf16.msra.mxu0 %v1471_v33  ;;  %1079 = vmatpush1.bf16.msra.mxu1 %v1473_v34  ;;  %v1234_v33 = vrot.slane %v2021_v19, %v2016_v18 }
  0x6f   :  { %1039 = vmatprep.subr.bf16.mxu0 %v1488_v35  ;;  %1080 = vmatprep.subr.bf16.mxu1 %v1490_v36  ;;  %v1351_v36 = vunpack.c.0.s8 %v1350_v24 }
  0x72   :  { %1040 = vmatpush1.bf16.msra.mxu0 %v1487_v40  ;;  %1081 = vmatpush1.bf16.msra.mxu1 %v1489_v41 }
  0x73   :  { %1041 = vmatprep.subr.bf16.mxu0 %v1504_v42  ;;  %1082 = vmatprep.subr.bf16.mxu1 %v1506_v43 }
  0x76   :  { %1042 = vmatpush1.bf16.msra.mxu0 %v1503_v48  ;;  %1083 = vmatpush1.bf16.msra.mxu1 %v1505_v49  ;;  %v2039_v49 = vsub.s32 %v1351_v36, %v1120_v8 }
  0x77   :  { %1043 = vmatprep.subr.bf16.mxu0 %v1520_v50  ;;  %1084 = vmatprep.subr.bf16.mxu1 %v1522_v51 }
  0x7a   :  { %1044 = vmatpush1.bf16.msra.mxu0 %v1519_v56  ;;  %1085 = vmatpush1.bf16.msra.mxu1 %v1521_v57  ;;  %v2046_v56 = vsub.s32 6, %v1120_v8  ;;  %v2048_v57 = vsub.s32 5, %v1120_v8 }
  0x7b   :  { %1045 = vmatprep.subr.bf16.mxu0 %v1536_v58  ;;  %1086 = vmatprep.subr.bf16.mxu1 %v1538_v59  ;;  %v2050_v58 = vsub.s32 7, %v1120_v8  ;;  %v1138_v59 = vrot.slane %v2010_v15, %v1989_v9 }
  0x7c   :  { %v1146_v60 = vrot.slane %v2010_v15, %v2046_v56  ;;  %v1142_v61 = vrot.slane %v2010_v15, %v2048_v57 }
  0x7d   :  { %v1150_v63 = vrot.slane %v2010_v15, %v2050_v58  ;;  %v1250_v7 = vrot.slane %v2021_v19, %v2050_v58 }
  0x7e   :  { %1046 = vmatpush1.bf16.msra.mxu0 %v1535_v0  ;;  %1087 = vmatpush1.bf16.msra.mxu1 %v1537_v1  ;;  %v1246_v1 = vrot.slane %v2021_v19, %v2046_v56 }
  0x7f   :  { %1047 = vmatprep.subr.bf16.mxu0 %v1552_v2  ;;  %1088 = vmatprep.subr.bf16.mxu1 %v1554_v4  ;;  %v1242_v2 = vrot.slane %v2021_v19, %v2048_v57 }
  0x82   :  { %1048 = vmatpush1.bf16.msra.mxu0 %v1551_v5  ;;  %1089 = vmatpush1.bf16.msra.mxu1 %v1553_v6 }
  0x85   :  { %1066 = vmatmul.mubr.bf16.vlgmr.msra.gmra.mrb[12].mxu0 %v1709_v12  ;;  %1107 = vmatmul.mubr.bf16.vlgmr.msra.gmra.mrb[12].mxu1 %v1709_v12  ;;  %v1270_v12 = vrot.slane %v1999_v11, %v1989_v9 }
  0xf8   :  { %v821_v27 = vpop.f32.mrb[0].mxu0  ;;  %v862_v31 = vpop.f32.mrb[0].mxu1 }
  0xf9   :  { %v1199_v30 = vmul.f32 %v1122_v20, %v821_v27  ;;  %v823_v32 = vpop.f32.mrb[1].mxu0  ;;  %v1201_v34 = vmul.f32 %v1130_v21, %v862_v31  ;;  %v864_v37 = vpop.f32.mrb[1].mxu1 }
  0xfa   :  { %v1200_v35 = vmul.f32 %v1126_v22, %v823_v32  ;;  %v825_v38 = vpop.f32.mrb[2].mxu0  ;;  %v1202_v39 = vmul.f32 %v1134_v26, %v864_v37  ;;  %v866_v40 = vpop.f32.mrb[2].mxu1 }
  0xfb   :  { %v1299_v3 = vadd.f32 %v1222_v25, %v1199_v30  ;;  %v826_v41 = vpop.f32.mrb[3].mxu0  ;;  %v1301_v42 = vadd.f32 %v1230_v28, %v1201_v34  ;;  %v867_v44 = vpop.f32.mrb[3].mxu1  ;;  %v1154_v38 = vrot.slane %v1994_v10, %v2005_v14  ;;  %v1254_v40 = vrot.slane %v1999_v11, %v2005_v14 }
  0xfc   :  { %v1300_v43 = vadd.f32 %v1226_v29, %v1200_v35  ;;  %v1302_v46 = vadd.f32 %v1234_v33, %v1202_v39  ;;  %v1158_v39 = vrot.slane %v1994_v10, %v2014_v17  ;;  %v1166_v41 = vrot.slane %v1994_v10, %v2016_v18 }
  0xfd   :  { %v1315_v45 = vmax.f32 %v1299_v3, 0.0  ;;  %v1317_v47 = vmax.f32 %v1301_v42, 0.0  ;;  %v1162_v3 = vrot.slane %v1994_v10, %v2012_v16  ;;  %v1258_v44 = vrot.slane %v1999_v11, %v2014_v17 }
  0xfe   :  { %v1316_v48 = vmax.f32 %v1300_v43, 0.0  ;;  %v1318_v50 = vmax.f32 %v1302_v46, 0.0  ;;  %v1262_v43 = vrot.slane %v1999_v11, %v2012_v16 }
 0x100   :  { %v1347_v51 = vcombine.low %v1315_v45, %v1316_v48  ;;  %v1348_v52 = vcombine.low %v1317_v47, %v1318_v50  ;;  %v1266_v48 = vrot.slane %v1999_v11, %v2016_v18 }
 0x102   :  { %v1355_v53 = vrot.slane %v1347_v51, %v2039_v49  ;;  %v1362_v54 = vrot.slane %v1348_v52, %v2039_v49 }
 0x104   :  { %v1363_v55 = vcombine.low %v1355_v53, %v1362_v54 }
 0x106   :  { %1419 = vst [vmem:[%s2121_s4] sm:$0xff] %v1363_v55 }
 0x118   :  { %v903_v0 = vpop.f32.mrb[4].mxu0  ;;  %v944_v5 = vpop.f32.mrb[4].mxu1 }
 0x119   :  { %v1203_v4 = vmul.f32 %v1138_v59, %v903_v0  ;;  %v905_v6 = vpop.f32.mrb[5].mxu0  ;;  %v1205_v8 = vmul.f32 %v1146_v60, %v944_v5  ;;  %v946_v21 = vpop.f32.mrb[5].mxu1 }
 0x11a   :  { %v1204_v20 = vmul.f32 %v1142_v61, %v905_v6  ;;  %v907_v22 = vpop.f32.mrb[6].mxu0  ;;  %v1206_v24 = vmul.f32 %v1150_v63, %v946_v21  ;;  %v948_v15 = vpop.f32.mrb[6].mxu1 }
 0x11b   :  { %v1303_v23 = vadd.f32 %v1238_v62, %v1203_v4  ;;  %v908_v25 = vpop.f32.mrb[7].mxu0  ;;  %v1305_v26 = vadd.f32 %v1246_v1, %v1205_v8  ;;  %v949_v28 = vpop.f32.mrb[7].mxu1  ;;  %v1174_v8 = vrot.slane %v1994_v10, %v2048_v57  ;;  %v1278_v22 = vrot.slane %v1999_v11, %v2046_v56 }
 0x11c   :  { %v1304_v27 = vadd.f32 %v1242_v2, %v1204_v20  ;;  %v1306_v30 = vadd.f32 %v1250_v7, %v1206_v24  ;;  %v1178_v7 = vrot.slane %v1994_v10, %v2046_v56  ;;  %v1182_v20 = vrot.slane %v1994_v10, %v2050_v58 }
 0x11d   :  { %v1319_v29 = vmax.f32 %v1303_v23, 0.0  ;;  %v1321_v31 = vmax.f32 %v1305_v26, 0.0  ;;  %v1274_v23 = vrot.slane %v1999_v11, %v2048_v57  ;;  %v1282_v26 = vrot.slane %v1999_v11, %v2050_v58 }
 0x11e   :  { %v1320_v32 = vmax.f32 %v1304_v27, 0.0  ;;  %v1322_v33 = vmax.f32 %v1306_v30, 0.0 }
 0x120   :  { %v1364_v34 = vcombine.low %v1319_v29, %v1320_v32  ;;  %v1365_v35 = vcombine.low %v1321_v31, %v1322_v33 }
 0x122   :  { %v1372_v19 = vrot.slane %v1364_v34, %v2039_v49  ;;  %v1379_v36 = vrot.slane %v1365_v35, %v2039_v49 }
 0x124   :  { %v1380_v37 = vcombine.low %v1372_v19, %v1379_v36 }
 0x126   :  { %1420 = vst [vmem:[%s2121_s4 + $0x8] sm:$0xff] %v1380_v37 }
 0x138   :  { %v985_v42 = vpop.f32.mrb[8].mxu0  ;;  %v1026_v46 = vpop.f32.mrb[8].mxu1 }
 0x139   :  { %v1207_v45 = vmul.f32 %v1154_v38, %v985_v42  ;;  %v987_v47 = vpop.f32.mrb[9].mxu0  ;;  %v1209_v50 = vmul.f32 %v1162_v3, %v1026_v46  ;;  %v1028_v52 = vpop.f32.mrb[9].mxu1 }
 0x13a   :  { %v1208_v51 = vmul.f32 %v1158_v39, %v987_v47  ;;  %v989_v14 = vpop.f32.mrb[10].mxu0  ;;  %v1210_v54 = vmul.f32 %v1166_v41, %v1028_v52  ;;  %v1030_v55 = vpop.f32.mrb[10].mxu1 }
 0x13b   :  { %v1307_v53 = vadd.f32 %v1254_v40, %v1207_v45  ;;  %v990_v59 = vpop.f32.mrb[11].mxu0  ;;  %v1309_v60 = vadd.f32 %v1262_v43, %v1209_v50  ;;  %v1031_v16 = vpop.f32.mrb[11].mxu1 }
 0x13c   :  { %v1308_v61 = vadd.f32 %v1258_v44, %v1208_v51  ;;  %v1310_v63 = vadd.f32 %v1266_v48, %v1210_v54 }
 0x13d   :  { %v1323_v62 = vmax.f32 %v1307_v53, 0.0  ;;  %v1325_v17 = vmax.f32 %v1309_v60, 0.0 }
 0x13e   :  { %v1324_v0 = vmax.f32 %v1308_v61, 0.0  ;;  %v1326_v1 = vmax.f32 %v1310_v63, 0.0 }
 0x140   :  { %v1381_v2 = vcombine.low %v1323_v62, %v1324_v0  ;;  %v1382_v4 = vcombine.low %v1325_v17, %v1326_v1 }
 0x142   :  { %v1389_v18 = vrot.slane %v1381_v2, %v2039_v49  ;;  %v1396_v5 = vrot.slane %v1382_v4, %v2039_v49 }
 0x144   :  { %v1397_v6 = vcombine.low %v1389_v18, %v1396_v5 }
 0x146   :  { %1421 = vst [vmem:[%s2121_s4 + $0x10] sm:$0xff] %v1397_v6 }
 0x158   :  { %v1067_v21 = vpop.f32.mrb[12].mxu0  ;;  %v1108_v15 = vpop.f32.mrb[12].mxu1 }
 0x159   :  { %v1211_v24 = vmul.f32 %v1170_v13, %v1067_v21  ;;  %v1069_v25 = vpop.f32.mrb[13].mxu0  ;;  %v1213_v27 = vmul.f32 %v1178_v7, %v1108_v15  ;;  %v1110_v29 = vpop.f32.mrb[13].mxu1 }
 0x15a   :  { %v1212_v28 = vmul.f32 %v1174_v8, %v1069_v25  ;;  %v1071_v30 = vpop.f32.mrb[14].mxu0  ;;  %v1214_v31 = vmul.f32 %v1182_v20, %v1110_v29  ;;  %v1112_v32 = vpop.f32.mrb[14].mxu1 }
 0x15b   :  { %v1311_v56 = vadd.f32 %v1270_v12, %v1211_v24  ;;  %v1072_v57 = vpop.f32.mrb[15].mxu0  ;;  %v1313_v33 = vadd.f32 %v1278_v22, %v1213_v27  ;;  %v1113_v10 = vpop.f32.mrb[15].mxu1 }
 0x15c   :  { %v1312_v34 = vadd.f32 %v1274_v23, %v1212_v28  ;;  %v1314_v35 = vadd.f32 %v1282_v26, %v1214_v31 }
 0x15d   :  { %v1327_v13 = vmax.f32 %v1311_v56, 0.0  ;;  %v1329_v19 = vmax.f32 %v1313_v33, 0.0 }
 0x15e   :  { %v1328_v36 = vmax.f32 %v1312_v34, 0.0  ;;  %v1330_v37 = vmax.f32 %v1314_v35, 0.0 }
 0x160   :  { %v1398_v58 = vcombine.low %v1327_v13, %v1328_v36  ;;  %v1399_v38 = vcombine.low %v1329_v19, %v1330_v37 }
 0x162   :  { %v1406_v3 = vrot.slane %v1398_v58, %v2039_v49  ;;  %v1413_v39 = vrot.slane %v1399_v38, %v2039_v49 }
 0x164   :  { %v1414_v40 = vcombine.low %v1406_v3, %v1413_v39 }
 0x166   :  { %1422 = vst [vmem:[%s2121_s4 + $0x18] sm:$0xff] %v1414_v40 }

// kernel: _lambda_.5
= control target key start
LH: loop header
LB: loop body
LE: loop exit
PB: predicated region body
PF: predicated region fallthrough
CT: control target
= control target key end

     0   :  { %vm2083_vm0 = vmmov 0   ;;  %s2653_s1 = inlined_call_operand.vmem [shape: bf16[1152,128], index: 1, kind: input, shape index: {}]   ;;  %s2654_s0 = inlined_call_operand.vmem [shape: bf16[98,1152], index: 0, kind: input, shape index: {}]   ;;  %s2655_s2 = inlined_call_operand.vmem [shape: f32[1,128], index: 2, kind: input, shape index: {}]   ;;  %s2656_s3 = inlined_call_operand.vmem [shape: f32[1,128], index: 3, kind: input, shape index: {}]   ;;  %s2657_s4 = inlined_call_operand.vmem [shape: f32[98,128], index: 4, kind: output, shape index: {}]  }
   0x1   :  { %v1923_v0 = vld [vmem:[%s2653_s1 + $0x40] sm:$0xff]   ;;  %v1925_v2 = vld [vmem:[%s2653_s1 + $0x48] sm:$0xff]   ;;  %v1927_v4 = vld [vmem:[%s2653_s1 + $0x50] sm:$0xff]  }
   0x2   :  { %v1924_v1 = vld [vmem:[%s2653_s1] sm:$0xff]   ;;  %1905 = vmatprep.subr.bf16.mxu1 %v1923_v0  ;;  %1614 = vmatprep.subr.bf16.mxu0 %v1923_v0  ;;  %v1926_v3 = vld [vmem:[%s2653_s1 + $0x8] sm:$0xff]   ;;  %v1928_v5 = vld [vmem:[%s2653_s1 + $0x10] sm:$0xff]  }
   0x3   :  { %1913 = vmatpush3.bf16.msra.mxu1 %v1924_v1  ;;  %1615 = vmatpush3.bf16.msra.mxu0 %v1924_v1  ;;  %v1929_v6 = vld [vmem:[%s2653_s1 + $0x58] sm:$0xff]   ;;  %v1931_v8 = vld [vmem:[%s2653_s1 + $0x60] sm:$0xff]   ;;  %v1933_v10 = vld [vmem:[%s2653_s1 + $0x68] sm:$0xff]  }
   0x4   :  { %1906 = vmatprep.subr.bf16.mxu1 %v1925_v2  ;;  %1616 = vmatprep.subr.bf16.mxu0 %v1925_v2  ;;  %v1930_v7 = vld [vmem:[%s2653_s1 + $0x18] sm:$0xff]   ;;  %v1932_v9 = vld [vmem:[%s2653_s1 + $0x20] sm:$0xff]   ;;  %v1934_v12 = vld [vmem:[%s2653_s1 + $0x28] sm:$0xff]  }
   0x5   :  { %v1941_v11 = vld [vmem:[%s2654_s0 + $0x124] ss:$36 sps:$4 sm:$0xff]   ;;  %v1935_v14 = vld [vmem:[%s2653_s1 + $0x70] sm:$0xff]   ;;  %v1937_v16 = vld [vmem:[%s2653_s1 + $0x78] sm:$0xff]  }
   0x6   :  { %v1945_v13 = vld [vmem:[%s2654_s0 + $0x4] ss:$36 sps:$4 sm:$0xff]   ;;  %1031 = vmatprep.mubr.bf16.mxu1 %v1941_v11  ;;  %v1936_v15 = vld [vmem:[%s2653_s1 + $0x30] sm:$0xff]   ;;  %v1938_v17 = vld [vmem:[%s2653_s1 + $0x38] sm:$0xff]  }
   0x7   :  { %1914 = vmatpush3.bf16.msra.mxu1 %v1926_v3  ;;  %1617 = vmatpush3.bf16.msra.mxu0 %v1926_v3  ;;  %v1942_v18 = vld [vmem:[%s2653_s1 + $0xc0] sm:$0xff]   ;;  %v1949_v24 = vld [vmem:[%s2653_s1 + $0xc8] sm:$0xff]   ;;  %v1953_v30 = vld [vmem:[%s2653_s1 + $0xd0] sm:$0xff]  }
   0x8   :  { %1907 = vmatprep.subr.bf16.mxu1 %v1927_v4  ;;  %1618 = vmatprep.subr.bf16.mxu0 %v1927_v4  ;;  %v1939_v19 = vld [vmem:[%s2654_s0 + $0x120] ss:$36 sps:$4 sm:$0xff]   ;;  %v1951_v25 = vld [vmem:[%s2653_s1 + $0x148] sm:$0xff]   ;;  %v1958_v31 = vld [vmem:[%s2653_s1 + $0x150] sm:$0xff]  }
   0x9   :  { %999 = vmatprep.mubr.bf16.mxu0 %v1945_v13  ;;  %v1943_v20 = vld [vmem:[%s2654_s0] ss:$36 sps:$4 sm:$0xff]   ;;  %v1954_v26 = vld [vmem:[%s2654_s0 + $0x4c] ss:$36 sps:$4 sm:$0xff]   ;;  %v1960_v36 = vld [vmem:[%s2653_s1 + $0xd8] sm:$0xff]  }
   0xa   :  { %v1947_v21 = vld [vmem:[%s2653_s1 + $0x140] sm:$0xff]   ;;  %v1950_v27 = vld [vmem:[%s2653_s1 + $0x88] sm:$0xff]   ;;  %v1956_v32 = vld [vmem:[%s2653_s1 + $0x90] sm:$0xff]  }
   0xb   :  { %1915 = vmatpush3.bf16.msra.mxu1 %v1928_v5  ;;  %1619 = vmatpush3.bf16.msra.mxu0 %v1928_v5  ;;  %v1946_v22 = vld [vmem:[%s2653_s1 + $0x80] sm:$0xff]   ;;  %v1961_v28 = vld [vmem:[%s2654_s0 + $0x16c] ss:$36 sps:$4 sm:$0xff]   ;;  %v1965_v37 = vld [vmem:[%s2653_s1 + $0x158] sm:$0xff]  }
   0xc   :  { %1908 = vmatprep.subr.bf16.mxu1 %v1929_v6  ;;  %1620 = vmatprep.subr.bf16.mxu0 %v1929_v6  ;;  %v1948_v23 = vld [vmem:[%s2653_s1 + $0x100] sm:$0xff]   ;;  %v1952_v29 = vld [vmem:[%s2653_s1 + $0x108] sm:$0xff]   ;;  %v1959_v35 = vld [vmem:[%s2653_s1 + $0x110] sm:$0xff]  }
   0xd   :  { %v1957_v33 = vld [vmem:[%s2654_s0 + $0x48] ss:$36 sps:$4 sm:$0xff]   ;;  %v1963_v38 = vld [vmem:[%s2653_s1 + $0x98] sm:$0xff]   ;;  %v1967_v41 = vld [vmem:[%s2653_s1 + $0xe0] sm:$0xff]  }
   0xe   :  { %v1964_v34 = vld [vmem:[%s2654_s0 + $0x168] ss:$36 sps:$4 sm:$0xff]   ;;  %v1968_v39 = vld [vmem:[%s2654_s0 + $0x94] ss:$36 sps:$4 sm:$0xff]   ;;  %v1972_v43 = vld [vmem:[%s2653_s1 + $0x160] sm:$0xff]  }
   0xf   :  { %1916 = vmatpush3.bf16.msra.mxu1 %v1930_v7  ;;  %1621 = vmatpush3.bf16.msra.mxu0 %v1930_v7  ;;  %v1966_v40 = vld [vmem:[%s2653_s1 + $0x118] sm:$0xff]   ;;  %v78_v42 = vld [vmem:[%s2654_s0 + $0x1b0] sm:$0x11]  ;;  %v1970_v45 = vld [vmem:[%s2653_s1 + $0xa0] sm:$0xff]   ;;  %v2082_v7 = vmov 0.0  }
  0x10   :  { %1909 = vmatprep.subr.bf16.mxu1 %v1931_v8  ;;  %1622 = vmatprep.subr.bf16.mxu0 %v1931_v8  ;;  %v1532_v44 = vcombine.high %v78_v42, %v78_v42  ;;  %v1971_v46 = vld [vmem:[%s2654_s0 + $0x90] ss:$36 sps:$4 sm:$0xff]   ;;  %v1973_v47 = vld [vmem:[%s2653_s1 + $0x120] sm:$0xff]   ;;  %v1531_v48 = vcombine.low %v78_v42, %v78_v42  ;;  %v1974_v49 = vld [vmem:[%s2653_s1 + $0xe8] sm:$0xff]  }
  0x11   :  { %v1978_v50 = vld [vmem:[%s2653_s1 + $0x168] sm:$0xff]   ;;  %v1981_v52 = vld [vmem:[%s2654_s0 + $0xdc] ss:$36 sps:$4 sm:$0xff]   ;;  %v1980_v54 = vld [vmem:[%s2653_s1 + $0xf0] sm:$0xff]  }
  0x12   :  { %v1976_v51 = vld [vmem:[%s2653_s1 + $0xa8] sm:$0xff]   ;;  %v1985_v55 = vld [vmem:[%s2653_s1 + $0x170] sm:$0xff]   ;;  %v1984_v57 = vld [vmem:[%s2654_s0 + $0xd8] ss:$36 sps:$4 sm:$0xff]  }
  0x13   :  { %1917 = vmatpush3.bf16.msra.mxu1 %v1932_v9  ;;  %1623 = vmatpush3.bf16.msra.mxu0 %v1932_v9  ;;  %v1979_v53 = vld [vmem:[%s2653_s1 + $0x128] sm:$0xff]   ;;  %v1983_v56 = vld [vmem:[%s2653_s1 + $0xb0] sm:$0xff]   ;;  %v1987_v59 = vld [vmem:[%s2653_s1 + $0xf8] sm:$0xff]  }
  0x14   :  { %1910 = vmatprep.subr.bf16.mxu1 %v1933_v10  ;;  %1624 = vmatprep.subr.bf16.mxu0 %v1933_v10  ;;  %v1986_v58 = vld [vmem:[%s2653_s1 + $0x130] sm:$0xff]   ;;  %v1989_v60 = vld [vmem:[%s2653_s1 + $0x178] sm:$0xff]   ;;  %v1994_v0 = vld [vmem:[%s2653_s1 + $0x1c0] sm:$0xff]  }
  0x15   :  { %v1992_v61 = vld [vmem:[%s2654_s0 + $0xc] ss:$36 sps:$4 sm:$0xff]   ;;  %v1988_v62 = vld [vmem:[%s2653_s1 + $0xb8] sm:$0xff]   ;;  %v1998_v4 = vld [vmem:[%s2653_s1 + $0x180] sm:$0xff]  }
  0x16   :  { %v1993_v63 = vld [vmem:[%s2653_s1 + $0x138] sm:$0xff]   ;;  %v1990_v2 = vld [vmem:[%s2654_s0 + $0x8] ss:$36 sps:$4 sm:$0xff]   ;;  %v1995_v3 = vld [vmem:[%s2654_s0 + $0x10] ss:$36 sps:$4 sm:$0xff]  }
  0x17   :  { %1918 = vmatpush3.bf16.msra.mxu1 %v1934_v12  ;;  %1625 = vmatpush3.bf16.msra.mxu0 %v1934_v12  ;;  %v1997_v1 = vld [vmem:[%s2654_s0 + $0x14] ss:$36 sps:$4 sm:$0xff]   ;;  %v1999_v5 = vld [vmem:[%s2653_s1 + $0x200] sm:$0xff]   ;;  %v2002_v8 = vld [vmem:[%s2653_s1 + $0x1c8] sm:$0xff]  }
  0x18   :  { %1911 = vmatprep.subr.bf16.mxu1 %v1935_v14  ;;  %1626 = vmatprep.subr.bf16.mxu0 %v1935_v14  ;;  %v2000_v6 = vld [vmem:[%s2654_s0 + $0x54] ss:$36 sps:$4 sm:$0xff]   ;;  %v2004_v9 = vld [vmem:[%s2653_s1 + $0x188] sm:$0xff]   ;;  %v2005_v10 = vld [vmem:[%s2654_s0 + $0x5c] ss:$36 sps:$4 sm:$0xff]  }
  0x19   :  { %v2008_v11 = vld [vmem:[%s2653_s1 + $0x208] sm:$0xff]   ;;  %v2009_v12 = vld [vmem:[%s2653_s1 + $0x1d0] sm:$0xff]   ;;  %v2007_v14 = vld [vmem:[%s2654_s0 + $0x58] ss:$36 sps:$4 sm:$0xff]  }
  0x1a   :  { %v2003_v13 = vld [vmem:[%s2654_s0 + $0x50] ss:$36 sps:$4 sm:$0xff]   ;;  %v2051_v42 = vld [vmem:[%s2653_s1 + $0x1f8] sm:$0xff]  }
  0x1b   :  { %1919 = vmatpush3.bf16.msra.mxu1 %v1936_v15  ;;  %1627 = vmatpush3.bf16.msra.mxu0 %v1936_v15  ;;  %v2010_v15 = vld [vmem:[%s2654_s0 + $0x9c] ss:$36 sps:$4 sm:$0xff]  }
  0x1c   :  { %1912 = vmatprep.subr.bf16.mxu1 %v1937_v16  ;;  %1628 = vmatprep.subr.bf16.mxu0 %v1937_v16  ;;  %v2012_v16 = vld [vmem:[%s2653_s1 + $0x190] sm:$0xff]  }
  0x1f   :  { %1920 = vmatpush3.bf16.msra.mxu1 %v1938_v17  ;;  %1629 = vmatpush3.bf16.msra.mxu0 %v1938_v17  ;;  %v2014_v17 = vld [vmem:[%s2654_s0 + $0xa4] ss:$36 sps:$4 sm:$0xff]  }
  0x20   :  { %1672 = vmatprep.subr.bf16.mxu1 %v1942_v18  ;;  %1730 = vmatprep.subr.bf16.mxu0 %v1947_v21  ;;  %v2017_v18 = vld [vmem:[%s2653_s1 + $0x210] sm:$0xff]   ;;  %v2013_v21 = vld [vmem:[%s2654_s0 + $0x98] ss:$36 sps:$4 sm:$0xff]  }
  0x22   :  { %1032 = vmatmul.mubr.bf16.vlgmr.msra.gmra.mrb[0].mxu1 %v1939_v19  ;;  %1000 = vmatmul.mubr.bf16.vlgmr.msra.gmra.mrb[0].mxu0 %v1943_v20  ;;  %v2018_v19 = vld [vmem:[%s2653_s1 + $0x1d8] sm:$0xff]  }
  0x23   :  { %1673 = vmatpush3.bf16.msra.mxu1 %v1946_v22  ;;  %1731 = vmatpush3.bf16.msra.mxu0 %v1948_v23  ;;  %v2019_v20 = vld [vmem:[%s2653_s1 + $0x198] sm:$0xff]   ;;  %v2016_v22 = vld [vmem:[%s2654_s0 + $0xa0] ss:$36 sps:$4 sm:$0xff]  }
  0x24   :  { %1674 = vmatprep.subr.bf16.mxu1 %v1949_v24  ;;  %1732 = vmatprep.subr.bf16.mxu0 %v1951_v25  ;;  %v2020_v23 = vld [vmem:[%s2654_s0 + $0xe4] ss:$36 sps:$4 sm:$0xff]   ;;  %v2023_v24 = vld [vmem:[%s2654_s0 + $0xec] ss:$36 sps:$4 sm:$0xff]   ;;  %v2026_v25 = vld [vmem:[%s2653_s1 + $0x218] sm:$0xff]  }
  0x25   :  { %1007 = vmatprep.mubr.bf16.mxu0 %v1954_v26  ;;  %1039 = vmatprep.mubr.bf16.mxu1 %v1961_v28  ;;  %v2027_v26 = vld [vmem:[%s2653_s1 + $0x1e0] sm:$0xff]  }
  0x26   :  { %v2022_v28 = vld [vmem:[%s2654_s0 + $0xe0] ss:$36 sps:$4 sm:$0xff]  }
  0x27   :  { %1675 = vmatpush3.bf16.msra.mxu1 %v1950_v27  ;;  %1733 = vmatpush3.bf16.msra.mxu0 %v1952_v29  ;;  %v2028_v27 = vld [vmem:[%s2653_s1 + $0x1a0] sm:$0xff]   ;;  %v2025_v29 = vld [vmem:[%s2654_s0 + $0xe8] ss:$36 sps:$4 sm:$0xff]  }
  0x28   :  { %1676 = vmatprep.subr.bf16.mxu1 %v1953_v30  ;;  %1734 = vmatprep.subr.bf16.mxu0 %v1958_v31  ;;  %v2035_v30 = vld [vmem:[%s2653_s1 + $0x220] sm:$0xff]   ;;  %v2036_v31 = vld [vmem:[%s2653_s1 + $0x1e8] sm:$0xff]  }
  0x2a   :  { %1008 = vmatmul.mubr.bf16.gmra.mrb[4].mxu0 %v1957_v33  ;;  %1040 = vmatmul.mubr.bf16.gmra.mrb[4].mxu1 %v1964_v34  ;;  %v2029_v33 = vld [vmem:[%s2654_s0 + $0x12c] ss:$36 sps:$4 sm:$0xff]   ;;  %v2032_v34 = vld [vmem:[%s2654_s0 + $0x134] ss:$36 sps:$4 sm:$0xff]  }
  0x2b   :  { %1677 = vmatpush3.bf16.msra.mxu1 %v1956_v32  ;;  %1735 = vmatpush3.bf16.msra.mxu0 %v1959_v35  ;;  %v2037_v32 = vld [vmem:[%s2653_s1 + $0x1a8] sm:$0xff]  }
  0x2c   :  { %1678 = vmatprep.subr.bf16.mxu1 %v1960_v36  ;;  %1736 = vmatprep.subr.bf16.mxu0 %v1965_v37  ;;  %v2043_v35 = vld [vmem:[%s2653_s1 + $0x228] sm:$0xff]   ;;  %v2045_v36 = vld [vmem:[%s2653_s1 + $0x1f0] sm:$0xff]  }
  0x2d   :  { %1015 = vmatprep.mubr.bf16.mxu0 %v1968_v39  ;;  %1047 = vmatprep.mubr.bf16.mxu1 %v1532_v44  ;;  %v2031_v37 = vld [vmem:[%s2654_s0 + $0x128] ss:$36 sps:$4 sm:$0xff]   ;;  %v2046_v39 = vld [vmem:[%s2653_s1 + $0x1b0] sm:$0xff]   ;;  %v2053_v44 = vld [vmem:[%s2653_s1 + $0x1b8] sm:$0xff]  }
  0x2f   :  { %1679 = vmatpush3.bf16.msra.mxu1 %v1963_v38  ;;  %1737 = vmatpush3.bf16.msra.mxu0 %v1966_v40  ;;  %v2034_v38 = vld [vmem:[%s2654_s0 + $0x130] ss:$36 sps:$4 sm:$0xff]  }
  0x30   :  { %1680 = vmatprep.subr.bf16.mxu1 %v1967_v41  ;;  %1738 = vmatprep.subr.bf16.mxu0 %v1972_v43  ;;  %v2038_v40 = vld [vmem:[%s2654_s0 + $0x174] ss:$36 sps:$4 sm:$0xff]   ;;  %v2041_v43 = vld [vmem:[%s2654_s0 + $0x17c] ss:$36 sps:$4 sm:$0xff]  }
  0x31   :  { %v2049_v41 = vld [vmem:[%s2653_s1 + $0x230] sm:$0xff]  }
  0x32   :  { %1016 = vmatmul.mubr.bf16.gmra.mrb[8].mxu0 %v1971_v46  ;;  %1048 = vmatmul.mubr.bf16.gmra.mrb[8].mxu1 %v1531_v48  ;;  %v79_v46 = vld [vmem:[%s2654_s0 + $0x1b8] sm:$0x11]  ;;  %v2040_v48 = vld [vmem:[%s2654_s0 + $0x170] ss:$36 sps:$4 sm:$0xff]  }
  0x33   :  { %1681 = vmatpush3.bf16.msra.mxu1 %v1970_v45  ;;  %1739 = vmatpush3.bf16.msra.mxu0 %v1973_v47  ;;  %v2057_v45 = vld [vmem:[%s2653_s1 + $0x238] sm:$0xff]   ;;  %v80_v47 = vld [vmem:[%s2654_s0 + $0x1c0] sm:$0x11] }
  0x34   :  { %1682 = vmatprep.subr.bf16.mxu1 %v1974_v49  ;;  %1740 = vmatprep.subr.bf16.mxu0 %v1978_v50  ;;  %v2044_v49 = vld [vmem:[%s2654_s0 + $0x178] ss:$36 sps:$4 sm:$0xff]   ;;  %v1534_v50 = vcombine.high %v79_v46, %v79_v46 }
  0x35   :  { %1023 = vmatprep.mubr.bf16.mxu0 %v1981_v52  ;;  %1087 = vmatprep.mubr.bf16.mxu1 %v1992_v61  ;;  %v1533_v52 = vcombine.low %v79_v46, %v79_v46  ;;  %v2065_v61 = vld [vmem:[%s2654_s0 + $0xa8] ss:$36 sps:$4 sm:$0xff]  }
  0x37   :  { %1683 = vmatpush3.bf16.msra.mxu1 %v1976_v51  ;;  %1741 = vmatpush3.bf16.msra.mxu0 %v1979_v53  ;;  %v1536_v51 = vcombine.high %v80_v47, %v80_v47  ;;  %v1535_v53 = vcombine.low %v80_v47, %v80_v47 }
  0x38   :  { %1684 = vmatprep.subr.bf16.mxu1 %v1980_v54  ;;  %1742 = vmatprep.subr.bf16.mxu0 %v1985_v55  ;;  %v2056_v54 = vld [vmem:[%s2654_s0 + $0x1c] ss:$36 sps:$4 sm:$0xff]  }
  0x39   :  { %v2054_v55 = vld [vmem:[%s2654_s0 + $0x18] ss:$36 sps:$4 sm:$0xff]  }
  0x3a   :  { %1024 = vmatmul.mubr.bf16.gmra.mrb[12].mxu0 %v1984_v57  ;;  %v2059_v57 = vld [vmem:[%s2654_s0 + $0x64] ss:$36 sps:$4 sm:$0xff]  }
  0x3b   :  { %1685 = vmatpush3.bf16.msra.mxu1 %v1983_v56  ;;  %1743 = vmatpush3.bf16.msra.mxu0 %v1986_v58  ;;  %v2058_v56 = vld [vmem:[%s2654_s0 + $0x20] ss:$36 sps:$4 sm:$0xff]  }
  0x3c   :  { %1686 = vmatprep.subr.bf16.mxu1 %v1987_v59  ;;  %1744 = vmatprep.subr.bf16.mxu0 %v1989_v60  ;;  %v2061_v58 = vld [vmem:[%s2654_s0 + $0x60] ss:$36 sps:$4 sm:$0xff]   ;;  %v2062_v59 = vld [vmem:[%s2654_s0 + $0x68] ss:$36 sps:$4 sm:$0xff]  }
  0x3d   :  { %1175 = vmatprep.mubr.bf16.mxu0 %v1997_v1  ;;  %v2063_v60 = vld [vmem:[%s2654_s0 + $0xac] ss:$36 sps:$4 sm:$0xff]   ;;  %v2070_v1 = vld [vmem:[%s2654_s0 + $0xf8] ss:$36 sps:$4 sm:$0xff]  }
  0x3f   :  { %1687 = vmatpush3.bf16.msra.mxu1 %v1988_v62  ;;  %1745 = vmatpush3.bf16.msra.mxu0 %v1993_v63  ;;  %v2066_v62 = vld [vmem:[%s2654_s0 + $0xb0] ss:$36 sps:$4 sm:$0xff]  }
  0x40   :  { %1788 = vmatprep.subr.bf16.mxu1 %v1994_v0  ;;  %1861 = vmatprep.subr.bf16.mxu0 %v2082_v7  ;;  %v2067_v63 = vld [vmem:[%s2654_s0 + $0xf4] ss:$36 sps:$4 sm:$0xff]  }
  0x41   :  { %v2069_v0 = vld [vmem:[%s2654_s0 + $0xf0] ss:$36 sps:$4 sm:$0xff]  }
  0x42   :  { %1088 = vmatmul.mubr.bf16.vlgmr.msra.gmra.mrb[12].mxu1 %v1990_v2  ;;  %1176 = vmatmul.mubr.bf16.vlgmr.msra.gmra.mrb[16].mxu0 %v1995_v3  ;;  %v2071_v2 = vld [vmem:[%s2654_s0 + $0x13c] ss:$36 sps:$4 sm:$0xff]  }
  0x43   :  { %1789 = vmatpush3.bf16.msra.mxu1 %v1998_v4  ;;  %1862 = vmatpush3.bf16.msra.mxu0 %v1999_v5  ;;  %v2073_v3 = vld [vmem:[%s2654_s0 + $0x138] ss:$36 sps:$4 sm:$0xff]   ;;  %v2074_v4 = vld [vmem:[%s2654_s0 + $0x140] ss:$36 sps:$4 sm:$0xff]  }
  0x44   :  { %1095 = vmatprep.mubr.bf16.mxu1 %v2000_v6  ;;  %1790 = vmatprep.subr.bf16.mxu1 %v2002_v8  ;;  %v2075_v5 = vld [vmem:[%s2654_s0 + $0x184] ss:$36 sps:$4 sm:$0xff]  }
  0x45   :  { %1183 = vmatprep.mubr.bf16.mxu0 %v2005_v10  ;;  %1863 = vmatprep.subr.bf16.mxu0 %v2082_v7  ;;  %v81_v6 = vld [vmem:[%s2654_s0 + $0x1c8] sm:$0x11]  ;;  %v2077_v8 = vld [vmem:[%s2654_s0 + $0x180] ss:$36 sps:$4 sm:$0xff]  }
  0x46   :  { %v1538_v10 = vcombine.high %v81_v6, %v81_v6 }
  0x47   :  { %1791 = vmatpush3.bf16.msra.mxu1 %v2004_v9  ;;  %1864 = vmatpush3.bf16.msra.mxu0 %v2008_v11  ;;  %v2078_v9 = vld [vmem:[%s2654_s0 + $0x188] ss:$36 sps:$4 sm:$0xff]   ;;  %v1537_v11 = vcombine.low %v81_v6, %v81_v6 }
  0x48   :  { %1792 = vmatprep.subr.bf16.mxu1 %v2009_v12  ;;  %1865 = vmatprep.subr.bf16.mxu0 %v2082_v7  ;;  %v2081_v12 = vld [vmem:[%s2654_s0 + $0x1d0] ss:$0 sps:$4 sm:$0x11]  }
  0x4a   :  { %1096 = vmatmul.mubr.bf16.gmra.mrb[16].mxu1 %v2003_v13  ;;  %1184 = vmatmul.mubr.bf16.gmra.mrb[20].mxu0 %v2007_v14 }
  0x4b   :  { %1103 = vmatprep.mubr.bf16.mxu1 %v2010_v15  ;;  %1793 = vmatpush3.bf16.msra.mxu1 %v2012_v16 }
  0x4c   :  { %1191 = vmatprep.mubr.bf16.mxu0 %v2014_v17  ;;  %1866 = vmatpush3.bf16.msra.mxu0 %v2017_v18 }
  0x4d   :  { %1794 = vmatprep.subr.bf16.mxu1 %v2018_v19  ;;  %1867 = vmatprep.subr.bf16.mxu0 %v2082_v7 }
  0x4f   :  { %1795 = vmatpush3.bf16.msra.mxu1 %v2019_v20 }
  0x50   :  { %1868 = vmatpush3.bf16.msra.mxu0 %v2026_v25  ;;  %1796 = vmatprep.subr.bf16.mxu1 %v2027_v26 }
  0x51   :  { %1869 = vmatprep.subr.bf16.mxu0 %v2082_v7 }
  0x52   :  { %1104 = vmatmul.mubr.bf16.gmra.mrb[20].mxu1 %v2013_v21  ;;  %1192 = vmatmul.mubr.bf16.gmra.mrb[24].mxu0 %v2016_v22 }
  0x53   :  { %1111 = vmatprep.mubr.bf16.mxu1 %v2020_v23  ;;  %1199 = vmatprep.mubr.bf16.mxu0 %v2023_v24 }
  0x54   :  { %1797 = vmatpush3.bf16.msra.mxu1 %v2028_v27  ;;  %1870 = vmatpush3.bf16.msra.mxu0 %v2035_v30 }
  0x55   :  { %1798 = vmatprep.subr.bf16.mxu1 %v2036_v31  ;;  %1871 = vmatprep.subr.bf16.mxu0 %v2082_v7 }
  0x58   :  { %1799 = vmatpush3.bf16.msra.mxu1 %v2037_v32  ;;  %1872 = vmatpush3.bf16.msra.mxu0 %v2043_v35 }
  0x59   :  { %1800 = vmatprep.subr.bf16.mxu1 %v2045_v36  ;;  %1873 = vmatprep.subr.bf16.mxu0 %v2082_v7 }
  0x5a   :  { %1112 = vmatmul.mubr.bf16.gmra.mrb[24].mxu1 %v2022_v28  ;;  %1200 = vmatmul.mubr.bf16.gmra.mrb[28].mxu0 %v2025_v29 }
  0x5b   :  { %1119 = vmatprep.mubr.bf16.mxu1 %v2029_v33  ;;  %1207 = vmatprep.mubr.bf16.mxu0 %v2032_v34 }
  0x5c   :  { %1801 = vmatpush3.bf16.msra.mxu1 %v2046_v39  ;;  %1874 = vmatpush3.bf16.msra.mxu0 %v2049_v41 }
  0x5d   :  { %1802 = vmatprep.subr.bf16.mxu1 %v2051_v42  ;;  %1875 = vmatprep.subr.bf16.mxu0 %v2082_v7 }
  0x60   :  { %1803 = vmatpush3.bf16.msra.mxu1 %v2053_v44  ;;  %1876 = vmatpush3.bf16.msra.mxu0 %v2057_v45 }
  0x62   :  { %1120 = vmatmul.mubr.bf16.gmra.mrb[28].mxu1 %v2031_v37  ;;  %1208 = vmatmul.mubr.bf16.gmra.mrb[32].mxu0 %v2034_v38 }
  0x63   :  { %1127 = vmatprep.mubr.bf16.mxu1 %v2038_v40  ;;  %1215 = vmatprep.mubr.bf16.mxu0 %v2041_v43 }
  0x6a   :  { %1128 = vmatmul.mubr.bf16.gmra.mrb[32].mxu1 %v2040_v48  ;;  %1216 = vmatmul.mubr.bf16.gmra.mrb[36].mxu0 %v2044_v49 }
  0x6b   :  { %1135 = vmatprep.mubr.bf16.mxu1 %v1534_v50  ;;  %1223 = vmatprep.mubr.bf16.mxu0 %v1536_v51 }
  0x72   :  { %1136 = vmatmul.mubr.bf16.gmra.mrb[36].mxu1 %v1533_v52  ;;  %1224 = vmatmul.mubr.bf16.gmra.mrb[40].mxu0 %v1535_v53 }
  0x73   :  { %1263 = vmatprep.mubr.bf16.mxu1 %v2056_v54  ;;  %1877 = vmatprep.mubr.msk.bf16.mxu0 %vm2083_vm0, %v2082_v7 }
  0x7a   :  { %1264 = vmatmul.mubr.bf16.vlgmr.msra.gmra.mrb[40].mxu1 %v2054_v55  ;;  %1878 = vmatmul.mubr.bf16.vlgmr.msra.gmra.mrb[44].mxu0 %v2058_v56 }
  0x7b   :  { %1271 = vmatprep.mubr.bf16.mxu1 %v2059_v57  ;;  %1881 = vmatprep.mubr.msk.bf16.mxu0 %vm2083_vm0, %v2082_v7 }
  0x82   :  { %1272 = vmatmul.mubr.bf16.gmra.mrb[44].mxu1 %v2061_v58  ;;  %1882 = vmatmul.mubr.bf16.gmra.mrb[48].mxu0 %v2062_v59 }
  0x83   :  { %1279 = vmatprep.mubr.bf16.mxu1 %v2063_v60  ;;  %1885 = vmatprep.mubr.msk.bf16.mxu0 %vm2083_vm0, %v2082_v7 }
  0x8a   :  { %1280 = vmatmul.mubr.bf16.gmra.mrb[48].mxu1 %v2065_v61  ;;  %1886 = vmatmul.mubr.bf16.gmra.mrb[52].mxu0 %v2066_v62 }
  0x8b   :  { %1287 = vmatprep.mubr.bf16.mxu1 %v2067_v63  ;;  %1889 = vmatprep.mubr.msk.bf16.mxu0 %vm2083_vm0, %v2082_v7 }
  0x92   :  { %1288 = vmatmul.mubr.bf16.gmra.mrb[52].mxu1 %v2069_v0  ;;  %1890 = vmatmul.mubr.bf16.gmra.mrb[56].mxu0 %v2070_v1 }
  0x93   :  { %1295 = vmatprep.mubr.bf16.mxu1 %v2071_v2  ;;  %1893 = vmatprep.mubr.msk.bf16.mxu0 %vm2083_vm0, %v2082_v7 }
  0x9a   :  { %1296 = vmatmul.mubr.bf16.gmra.mrb[56].mxu1 %v2073_v3  ;;  %1894 = vmatmul.mubr.bf16.gmra.mrb[60].mxu0 %v2074_v4 }
  0x9b   :  { %1303 = vmatprep.mubr.bf16.mxu1 %v2075_v5  ;;  %1897 = vmatprep.mubr.msk.bf16.mxu0 %vm2083_vm0, %v2082_v7 }
  0xa2   :  { %1304 = vmatmul.mubr.bf16.gmra.mrb[60].mxu1 %v2077_v8  ;;  %1898 = vmatmul.mubr.bf16.gmra.mrb[64].mxu0 %v2078_v9 }
  0xa3   :  { %1311 = vmatprep.mubr.bf16.mxu1 %v1538_v10  ;;  %1901 = vmatprep.mubr.msk.bf16.mxu0 %vm2083_vm0, %v2082_v7 }
  0xaa   :  { %1312 = vmatmul.mubr.bf16.gmra.mrb[64].mxu1 %v1537_v11  ;;  %1902 = vmatmul.mubr.bf16.gmra.mrb[68].mxu0 %v2081_v12 }
  0xf5   :  { %v1654_v13 = vpop.f32.mrb[0].mxu1  ;;  %v1630_v14 = vpop.f32.mrb[0].mxu0 }
  0xf6   :  { %v1655_v15 = vpop.f32.mrb[1].mxu1  ;;  %v1631_v16 = vpop.f32.mrb[1].mxu0 }
  0xf7   :  { %v2524_v17 = vadd.f32 %v1655_v15, %v1654_v13  ;;  %v1657_v18 = vpop.f32.mrb[2].mxu1  ;;  %v1632_v19 = vadd.f32 %v1631_v16, %v1630_v14  ;;  %v1633_v20 = vpop.f32.mrb[2].mxu0 }
  0xf8   :  { %v1658_v21 = vpop.f32.mrb[3].mxu1  ;;  %v1634_v22 = vpop.f32.mrb[3].mxu0 }
  0xf9   :  { %v2526_v23 = vadd.f32 %v1658_v21, %v1657_v18  ;;  %v1635_v7 = vadd.f32 %v1634_v22, %v1633_v20 }
  0xfd   :  { %v1636_v24 = vpop.f32.mrb[4].mxu0  ;;  %v1660_v25 = vpop.f32.mrb[4].mxu1 }
  0xfe   :  { %v1637_v26 = vpop.f32.mrb[5].mxu0  ;;  %v1661_v27 = vpop.f32.mrb[5].mxu1 }
  0xff   :  { %v1638_v28 = vadd.f32 %v1637_v26, %v1636_v24  ;;  %v1639_v29 = vpop.f32.mrb[6].mxu0  ;;  %v2528_v30 = vadd.f32 %v1661_v27, %v1660_v25  ;;  %v1663_v31 = vpop.f32.mrb[6].mxu1 }
 0x100   :  { %v1640_v32 = vpop.f32.mrb[7].mxu0  ;;  %v1664_v33 = vpop.f32.mrb[7].mxu1 }
 0x101   :  { %v1641_v34 = vadd.f32 %v1640_v32, %v1639_v29  ;;  %v2530_v35 = vadd.f32 %v1664_v33, %v1663_v31 }
 0x105   :  { %v1642_v36 = vpop.f32.mrb[8].mxu0  ;;  %v1666_v37 = vpop.f32.mrb[8].mxu1 }
 0x106   :  { %v1643_v38 = vpop.f32.mrb[9].mxu0  ;;  %v1667_v39 = vpop.f32.mrb[9].mxu1 }
 0x107   :  { %v1644_v40 = vadd.f32 %v1643_v38, %v1642_v36  ;;  %v1645_v41 = vpop.f32.mrb[10].mxu0  ;;  %v2532_v42 = vadd.f32 %v1667_v39, %v1666_v37  ;;  %v1669_v43 = vpop.f32.mrb[10].mxu1 }
 0x108   :  { %v1646_v44 = vpop.f32.mrb[11].mxu0  ;;  %v1670_v45 = vpop.f32.mrb[11].mxu1 }
 0x109   :  { %v1647_v46 = vadd.f32 %v1646_v44, %v1645_v41 }
 0x10d   :  { %v1648_v47 = vpop.f32.mrb[12].mxu0 }
 0x10e   :  { %v1649_v48 = vpop.f32.mrb[13].mxu0 }
 0x10f   :  { %v1650_v49 = vadd.f32 %v1649_v48, %v1648_v47  ;;  %v1651_v50 = vpop.f32.mrb[14].mxu0 }
 0x110   :  { %v1652_v51 = vpop.f32.mrb[15].mxu0 }
 0x111   :  { %v1653_v52 = vadd.f32 %v1652_v51, %v1651_v50 }
 0x115   :  { %v1688_v53 = vpop.f32.mrb[12].mxu1  ;;  %v1746_v54 = vpop.f32.mrb[16].mxu0 }
 0x116   :  { %v1689_v55 = vpop.f32.mrb[13].mxu1  ;;  %v1747_v56 = vpop.f32.mrb[17].mxu0 }
 0x117   :  { %v1690_v57 = vadd.f32 %v1689_v55, %v1688_v53  ;;  %v1691_v58 = vpop.f32.mrb[14].mxu1  ;;  %v1748_v59 = vadd.f32 %v1747_v56, %v1746_v54  ;;  %v1749_v60 = vpop.f32.mrb[18].mxu0 }
 0x118   :  { %v1692_v61 = vpop.f32.mrb[15].mxu1  ;;  %v1750_v62 = vpop.f32.mrb[19].mxu0 }
 0x119   :  { %v1090_v63 = vadd.f32 %v1690_v57, %v1632_v19  ;;  %v1693_v0 = vadd.f32 %v1692_v61, %v1691_v58  ;;  %v1751_v1 = vadd.f32 %v1750_v62, %v1749_v60 }
 0x11b   :  { %v1093_v2 = vadd.f32 %v1693_v0, %v1635_v7  ;;  %v2534_v3 = vadd.f32 %v1748_v59, %v1090_v63 }
 0x11d   :  { %v2536_v4 = vadd.f32 %v1751_v1, %v1093_v2  ;;  %v1694_v5 = vpop.f32.mrb[16].mxu1  ;;  %v1752_v6 = vpop.f32.mrb[20].mxu0 }
 0x11e   :  { %v1695_v8 = vpop.f32.mrb[17].mxu1  ;;  %v1753_v9 = vpop.f32.mrb[21].mxu0 }
 0x11f   :  { %v1696_v10 = vadd.f32 %v1695_v8, %v1694_v5  ;;  %v1697_v11 = vpop.f32.mrb[18].mxu1  ;;  %v1754_v12 = vadd.f32 %v1753_v9, %v1752_v6  ;;  %v1755_v13 = vpop.f32.mrb[22].mxu0 }
 0x120   :  { %v1698_v14 = vpop.f32.mrb[19].mxu1  ;;  %v1756_v15 = vpop.f32.mrb[23].mxu0 }
 0x121   :  { %v1098_v16 = vadd.f32 %v1696_v10, %v1638_v28  ;;  %v1699_v18 = vadd.f32 %v1698_v14, %v1697_v11  ;;  %v1757_v19 = vadd.f32 %v1756_v15, %v1755_v13 }
 0x123   :  { %v1101_v20 = vadd.f32 %v1699_v18, %v1641_v34  ;;  %v2538_v21 = vadd.f32 %v1754_v12, %v1098_v16 }
 0x125   :  { %v2540_v22 = vadd.f32 %v1757_v19, %v1101_v20  ;;  %v1700_v7 = vpop.f32.mrb[20].mxu1  ;;  %v1758_v24 = vpop.f32.mrb[24].mxu0 }
 0x126   :  { %v1701_v25 = vpop.f32.mrb[21].mxu1  ;;  %v1759_v26 = vpop.f32.mrb[25].mxu0 }
 0x127   :  { %v1702_v27 = vadd.f32 %v1701_v25, %v1700_v7  ;;  %v1703_v29 = vpop.f32.mrb[22].mxu1  ;;  %v1760_v31 = vadd.f32 %v1759_v26, %v1758_v24  ;;  %v1761_v32 = vpop.f32.mrb[26].mxu0 }
 0x128   :  { %v1704_v33 = vpop.f32.mrb[23].mxu1  ;;  %v1762_v36 = vpop.f32.mrb[27].mxu0 }
 0x129   :  { %v1106_v37 = vadd.f32 %v1702_v27, %v1644_v40  ;;  %v1705_v38 = vadd.f32 %v1704_v33, %v1703_v29  ;;  %v1763_v28 = vadd.f32 %v1762_v36, %v1761_v32 }
 0x12b   :  { %v1109_v39 = vadd.f32 %v1705_v38, %v1647_v46  ;;  %v2542_v41 = vadd.f32 %v1760_v31, %v1106_v37 }
 0x12d   :  { %v2544_v34 = vadd.f32 %v1763_v28, %v1109_v39  ;;  %v1706_v43 = vpop.f32.mrb[24].mxu1  ;;  %v1764_v44 = vpop.f32.mrb[28].mxu0 }
 0x12e   :  { %v1707_v45 = vpop.f32.mrb[25].mxu1  ;;  %v1765_v47 = vpop.f32.mrb[29].mxu0 }
 0x12f   :  { %v1708_v48 = vadd.f32 %v1707_v45, %v1706_v43  ;;  %v1709_v50 = vpop.f32.mrb[26].mxu1  ;;  %v1766_v51 = vadd.f32 %v1765_v47, %v1764_v44  ;;  %v1767_v53 = vpop.f32.mrb[30].mxu0 }
 0x130   :  { %v1710_v54 = vpop.f32.mrb[27].mxu1  ;;  %v1768_v55 = vpop.f32.mrb[31].mxu0 }
 0x131   :  { %v1114_v56 = vadd.f32 %v1708_v48, %v1650_v49  ;;  %v1711_v57 = vadd.f32 %v1710_v54, %v1709_v50  ;;  %v1769_v40 = vadd.f32 %v1768_v55, %v1767_v53 }
 0x133   :  { %v1117_v58 = vadd.f32 %v1711_v57, %v1653_v52  ;;  %v2546_v59 = vadd.f32 %v1766_v51, %v1114_v56 }
 0x135   :  { %v2548_v46 = vadd.f32 %v1769_v40, %v1117_v58  ;;  %v1712_v60 = vpop.f32.mrb[28].mxu1  ;;  %v1770_v61 = vpop.f32.mrb[32].mxu0 }
 0x136   :  { %v1713_v62 = vpop.f32.mrb[29].mxu1  ;;  %v1771_v63 = vpop.f32.mrb[33].mxu0 }
 0x137   :  { %v1714_v0 = vadd.f32 %v1713_v62, %v1712_v60  ;;  %v1715_v1 = vpop.f32.mrb[30].mxu1  ;;  %v1772_v2 = vadd.f32 %v1771_v63, %v1770_v61  ;;  %v1773_v5 = vpop.f32.mrb[34].mxu0  ;;  %v2569_v60 = vld [vmem:[%s2655_s2] ss:$0 sm:$0xff] }
 0x138   :  { %v1716_v6 = vpop.f32.mrb[31].mxu1  ;;  %v1774_v8 = vpop.f32.mrb[35].mxu0  ;;  %v2575_v62 = vld [vmem:[%s2656_s3] ss:$0 sm:$0xff] }
 0x139   :  { %v1122_v9 = vadd.f32 %v1714_v0, %v2524_v17  ;;  %v1717_v49 = vadd.f32 %v1716_v6, %v1715_v1  ;;  %v1775_v10 = vadd.f32 %v1774_v8, %v1773_v5 }
 0x13b   :  { %v1125_v52 = vadd.f32 %v1717_v49, %v2526_v23  ;;  %v2552_v11 = vadd.f32 %v1772_v2, %v1122_v9 }
 0x13d   :  { %v2554_v12 = vadd.f32 %v1775_v10, %v1125_v52  ;;  %v1718_v13 = vpop.f32.mrb[32].mxu1  ;;  %v1776_v14 = vpop.f32.mrb[36].mxu0 }
 0x13e   :  { %v1719_v15 = vpop.f32.mrb[33].mxu1  ;;  %v1777_v16 = vpop.f32.mrb[37].mxu0 }
 0x13f   :  { %v1720_v18 = vadd.f32 %v1719_v15, %v1718_v13  ;;  %v1721_v19 = vpop.f32.mrb[34].mxu1  ;;  %v1778_v20 = vadd.f32 %v1777_v16, %v1776_v14  ;;  %v1779_v7 = vpop.f32.mrb[38].mxu0 }
 0x140   :  { %v1722_v24 = vpop.f32.mrb[35].mxu1  ;;  %v1780_v25 = vpop.f32.mrb[39].mxu0 }
 0x141   :  { %v1130_v17 = vadd.f32 %v1720_v18, %v2528_v30  ;;  %v1723_v26 = vadd.f32 %v1722_v24, %v1721_v19  ;;  %v1781_v27 = vadd.f32 %v1780_v25, %v1779_v7 }
 0x143   :  { %v1133_v23 = vadd.f32 %v1723_v26, %v2530_v35  ;;  %v2558_v29 = vadd.f32 %v1778_v20, %v1130_v17 }
 0x145   :  { %v2560_v31 = vadd.f32 %v1781_v27, %v1133_v23  ;;  %v1724_v32 = vpop.f32.mrb[36].mxu1  ;;  %v1782_v33 = vpop.f32.mrb[40].mxu0 }
 0x146   :  { %v1725_v36 = vpop.f32.mrb[37].mxu1  ;;  %v1783_v37 = vpop.f32.mrb[41].mxu0 }
 0x147   :  { %v1726_v38 = vadd.f32 %v1725_v36, %v1724_v32  ;;  %v1727_v28 = vpop.f32.mrb[38].mxu1  ;;  %v1784_v39 = vadd.f32 %v1783_v37, %v1782_v33  ;;  %v1785_v43 = vpop.f32.mrb[42].mxu0 }
 0x148   :  { %v1728_v44 = vpop.f32.mrb[39].mxu1  ;;  %v1786_v45 = vpop.f32.mrb[43].mxu0 }
 0x149   :  { %v1138_v30 = vadd.f32 %v1726_v38, %v2532_v42 }
 0x14b   :  { %v2563_v47 = vadd.f32 %v1784_v39, %v1138_v30 }
 0x14d   :  { %v1804_v48 = vpop.f32.mrb[40].mxu1  ;;  %v1353_v35 = vpop.f32.mrb[44].mxu0 }
 0x14e   :  { %v1805_v50 = vpop.f32.mrb[41].mxu1  ;;  %v1879_v51 = vpop.f32.mrb[45].mxu0 }
 0x14f   :  { %v1806_v53 = vadd.f32 %v1805_v50, %v1804_v48  ;;  %v1807_v54 = vpop.f32.mrb[42].mxu1  ;;  %v1356_v55 = vpop.f32.mrb[46].mxu0 }
 0x150   :  { %v1808_v56 = vpop.f32.mrb[43].mxu1  ;;  %v1880_v57 = vpop.f32.mrb[47].mxu0 }
 0x151   :  { %v1809_v40 = vadd.f32 %v1808_v56, %v1807_v54  ;;  %v1266_v58 = vadd.f32 %v1806_v53, %v2534_v3 }
 0x153   :  { %v1354_v42 = vadd.f32 %v1353_v35, %v1266_v58  ;;  %v1269_v61 = vadd.f32 %v1809_v40, %v2536_v4 }
 0x155   :  { %v1414_v63 = vmul.f32 %v2569_v60, %v1354_v42  ;;  %v1357_v0 = vadd.f32 %v1356_v55, %v1269_v61  ;;  %v1810_v1 = vpop.f32.mrb[44].mxu1  ;;  %v1361_v2 = vpop.f32.mrb[48].mxu0 }
 0x156   :  { %v1811_v5 = vpop.f32.mrb[45].mxu1  ;;  %v1883_v3 = vpop.f32.mrb[49].mxu0 }
 0x157   :  { %v1434_v6 = vadd.f32 %v2575_v62, %v1414_v63  ;;  %v1415_v8 = vmul.f32 %v2569_v60, %v1357_v0  ;;  %v1812_v9 = vadd.f32 %v1811_v5, %v1810_v1  ;;  %v1813_v49 = vpop.f32.mrb[46].mxu1  ;;  %v1364_v10 = vpop.f32.mrb[50].mxu0 }
 0x158   :  { %v1814_v4 = vpop.f32.mrb[47].mxu1  ;;  %v1884_v52 = vpop.f32.mrb[51].mxu0 }
 0x159   :  { %v1447_v13 = vmax.f32 %v1434_v6, 0.0  ;;  %v1435_v14 = vadd.f32 %v2575_v62, %v1415_v8  ;;  %v1815_v15 = vadd.f32 %v1814_v4, %v1813_v49  ;;  %v1274_v16 = vadd.f32 %v1812_v9, %v2538_v21 }
 0x15b   :  { %1460 = vst [vmem:[%s2657_s4] sm:$0xff] %v1447_v13  ;;  %v1448_v18 = vmax.f32 %v1435_v14, 0.0  ;;  %v1362_v19 = vadd.f32 %v1361_v2, %v1274_v16  ;;  %v1277_v20 = vadd.f32 %v1815_v15, %v2540_v22 }
 0x15d   :  { %1461 = vst [vmem:[%s2657_s4 + $0x8] sm:$0xff] %v1448_v18  ;;  %v1416_v7 = vmul.f32 %v2569_v60, %v1362_v19  ;;  %v1365_v24 = vadd.f32 %v1364_v10, %v1277_v20  ;;  %v1816_v25 = vpop.f32.mrb[48].mxu1  ;;  %v1369_v17 = vpop.f32.mrb[52].mxu0 }
 0x15e   :  { %v1817_v26 = vpop.f32.mrb[49].mxu1  ;;  %v1887_v27 = vpop.f32.mrb[53].mxu0 }
 0x15f   :  { %v1436_v21 = vadd.f32 %v2575_v62, %v1416_v7  ;;  %v1417_v23 = vmul.f32 %v2569_v60, %v1365_v24  ;;  %v1818_v32 = vadd.f32 %v1817_v26, %v1816_v25  ;;  %v1819_v33 = vpop.f32.mrb[50].mxu1  ;;  %v1372_v36 = vpop.f32.mrb[54].mxu0 }
 0x160   :  { %v1820_v37 = vpop.f32.mrb[51].mxu1  ;;  %v1888_v22 = vpop.f32.mrb[55].mxu0 }
 0x161   :  { %v1449_v38 = vmax.f32 %v1436_v21, 0.0  ;;  %v1437_v28 = vadd.f32 %v2575_v62, %v1417_v23  ;;  %v1821_v39 = vadd.f32 %v1820_v37, %v1819_v33  ;;  %v1282_v43 = vadd.f32 %v1818_v32, %v2542_v41 }
 0x163   :  { %1462 = vst [vmem:[%s2657_s4 + $0x10] sm:$0xff] %v1449_v38  ;;  %v1450_v44 = vmax.f32 %v1437_v28, 0.0  ;;  %v1370_v45 = vadd.f32 %v1369_v17, %v1282_v43  ;;  %v1285_v30 = vadd.f32 %v1821_v39, %v2544_v34 }
 0x165   :  { %1463 = vst [vmem:[%s2657_s4 + $0x18] sm:$0xff] %v1450_v44  ;;  %v1418_v48 = vmul.f32 %v2569_v60, %v1370_v45  ;;  %v1373_v35 = vadd.f32 %v1372_v36, %v1285_v30  ;;  %v1822_v50 = vpop.f32.mrb[52].mxu1  ;;  %v1377_v51 = vpop.f32.mrb[56].mxu0 }
 0x166   :  { %v1823_v53 = vpop.f32.mrb[53].mxu1  ;;  %v1891_v54 = vpop.f32.mrb[57].mxu0 }
 0x167   :  { %v1438_v41 = vadd.f32 %v2575_v62, %v1418_v48  ;;  %v1419_v55 = vmul.f32 %v2569_v60, %v1373_v35  ;;  %v1824_v56 = vadd.f32 %v1823_v53, %v1822_v50  ;;  %v1825_v57 = vpop.f32.mrb[54].mxu1  ;;  %v1380_v40 = vpop.f32.mrb[58].mxu0 }
 0x168   :  { %v1826_v58 = vpop.f32.mrb[55].mxu1  ;;  %v1892_v34 = vpop.f32.mrb[59].mxu0 }
 0x169   :  { %v1451_v42 = vmax.f32 %v1438_v41, 0.0  ;;  %v1439_v61 = vadd.f32 %v2575_v62, %v1419_v55  ;;  %v1827_v63 = vadd.f32 %v1826_v58, %v1825_v57  ;;  %v1290_v0 = vadd.f32 %v1824_v56, %v2546_v59 }
 0x16b   :  { %1464 = vst [vmem:[%s2657_s4 + $0x20] sm:$0xff] %v1451_v42  ;;  %v1452_v1 = vmax.f32 %v1439_v61, 0.0  ;;  %v1378_v2 = vadd.f32 %v1377_v51, %v1290_v0  ;;  %v1293_v5 = vadd.f32 %v1827_v63, %v2548_v46 }
 0x16d   :  { %1465 = vst [vmem:[%s2657_s4 + $0x28] sm:$0xff] %v1452_v1  ;;  %v1420_v3 = vmul.f32 %v2569_v60, %v1378_v2  ;;  %v1381_v6 = vadd.f32 %v1380_v40, %v1293_v5  ;;  %v1828_v8 = vpop.f32.mrb[56].mxu1  ;;  %v1385_v9 = vpop.f32.mrb[60].mxu0 }
 0x16e   :  { %v1829_v49 = vpop.f32.mrb[57].mxu1  ;;  %v1895_v10 = vpop.f32.mrb[61].mxu0 }
 0x16f   :  { %v1440_v59 = vadd.f32 %v2575_v62, %v1420_v3  ;;  %v1421_v4 = vmul.f32 %v2569_v60, %v1381_v6  ;;  %v1830_v52 = vadd.f32 %v1829_v49, %v1828_v8  ;;  %v1831_v13 = vpop.f32.mrb[58].mxu1  ;;  %v1388_v14 = vpop.f32.mrb[62].mxu0 }
 0x170   :  { %v1832_v15 = vpop.f32.mrb[59].mxu1  ;;  %v1896_v46 = vpop.f32.mrb[63].mxu0 }
 0x171   :  { %v1453_v16 = vmax.f32 %v1440_v59, 0.0  ;;  %v1441_v18 = vadd.f32 %v2575_v62, %v1421_v4  ;;  %v1833_v19 = vadd.f32 %v1832_v15, %v1831_v13  ;;  %v1298_v20 = vadd.f32 %v1830_v52, %v2552_v11 }
 0x173   :  { %1466 = vst [vmem:[%s2657_s4 + $0x30] sm:$0xff] %v1453_v16  ;;  %v1454_v7 = vmax.f32 %v1441_v18, 0.0  ;;  %v1386_v24 = vadd.f32 %v1385_v9, %v1298_v20  ;;  %v1301_v25 = vadd.f32 %v1833_v19, %v2554_v12 }
 0x175   :  { %1467 = vst [vmem:[%s2657_s4 + $0x38] sm:$0xff] %v1454_v7  ;;  %v1422_v17 = vmul.f32 %v2569_v60, %v1386_v24  ;;  %v1389_v26 = vadd.f32 %v1388_v14, %v1301_v25  ;;  %v1834_v27 = vpop.f32.mrb[60].mxu1  ;;  %v1393_v21 = vpop.f32.mrb[64].mxu0 }
 0x176   :  { %v1835_v23 = vpop.f32.mrb[61].mxu1  ;;  %v1899_v32 = vpop.f32.mrb[65].mxu0 }
 0x177   :  { %v1442_v11 = vadd.f32 %v2575_v62, %v1422_v17  ;;  %v1423_v33 = vmul.f32 %v2569_v60, %v1389_v26  ;;  %v1836_v36 = vadd.f32 %v1835_v23, %v1834_v27  ;;  %v1837_v37 = vpop.f32.mrb[62].mxu1  ;;  %v1396_v22 = vpop.f32.mrb[66].mxu0 }
 0x178   :  { %v1838_v38 = vpop.f32.mrb[63].mxu1  ;;  %v1900_v12 = vpop.f32.mrb[67].mxu0 }
 0x179   :  { %v1455_v28 = vmax.f32 %v1442_v11, 0.0  ;;  %v1443_v39 = vadd.f32 %v2575_v62, %v1423_v33  ;;  %v1839_v43 = vadd.f32 %v1838_v38, %v1837_v37  ;;  %v1306_v44 = vadd.f32 %v1836_v36, %v2558_v29 }
 0x17b   :  { %1468 = vst [vmem:[%s2657_s4 + $0x40] sm:$0xff] %v1455_v28  ;;  %v1456_v45 = vmax.f32 %v1443_v39, 0.0  ;;  %v1394_v30 = vadd.f32 %v1393_v21, %v1306_v44  ;;  %v1309_v48 = vadd.f32 %v1839_v43, %v2560_v31 }
 0x17d   :  { %1469 = vst [vmem:[%s2657_s4 + $0x48] sm:$0xff] %v1456_v45  ;;  %v1424_v35 = vmul.f32 %v2569_v60, %v1394_v30  ;;  %v1397_v50 = vadd.f32 %v1396_v22, %v1309_v48  ;;  %v1840_v51 = vpop.f32.mrb[64].mxu1  ;;  %v1401_v53 = vpop.f32.mrb[68].mxu0 }
 0x17e   :  { %v1841_v54 = vpop.f32.mrb[65].mxu1  ;;  %v1903_v41 = vpop.f32.mrb[69].mxu0 }
 0x17f   :  { %v1444_v29 = vadd.f32 %v2575_v62, %v1424_v35  ;;  %v1425_v55 = vmul.f32 %v2569_v60, %v1397_v50  ;;  %v1842_v56 = vadd.f32 %v1841_v54, %v1840_v51  ;;  %v1843_v57 = vpop.f32.mrb[66].mxu1  ;;  %v1404_v40 = vpop.f32.mrb[70].mxu0 }
 0x180   :  { %v1844_v58 = vpop.f32.mrb[67].mxu1  ;;  %v1904_v31 = vpop.f32.mrb[71].mxu0 }
 0x181   :  { %v1457_v34 = vmax.f32 %v1444_v29, 0.0  ;;  %v1445_v42 = vadd.f32 %v2575_v62, %v1425_v55  ;;  %v1314_v61 = vadd.f32 %v1842_v56, %v2563_v47 }
 0x183   :  { %1470 = vst [vmem:[%s2657_s4 + $0x50] sm:$0xff] %v1457_v34  ;;  %v1458_v63 = vmax.f32 %v1445_v42, 0.0  ;;  %v1402_v0 = vadd.f32 %v1401_v53, %v1314_v61 }
 0x185   :  { %1471 = vst [vmem:[%s2657_s4 + $0x58] sm:$0xff] %v1458_v63  ;;  %v1426_v1 = vmul.f32 %v2569_v60, %v1402_v0 }
 0x187   :  { %v1446_v2 = vadd.f32 %v2575_v62, %v1426_v1 }
 0x189   :  { %v1459_v5 = vmax.f32 %v1446_v2, 0.0 }
 0x18b   :  { %1472 = vst [vmem:[%s2657_s4 + $0x60] sm:$0x3] %v1459_v5 }

// kernel: _lambda_.6
= control target key start
LH: loop header
LB: loop body
LE: loop exit
PB: predicated region body
PF: predicated region fallthrough
CT: control target
= control target key end

     0   :  { %v3444_v0 = vmov 0   ;;  %s4581_s1 = inlined_call_operand.vmem [shape: bf16[1024,128], index: 1, kind: input, shape index: {}]   ;;  %s4582_s0 = inlined_call_operand.vmem [shape: bf16[392,1024], index: 0, kind: input, shape index: {}]   ;;  %s4583_s2 = inlined_call_operand.vmem [shape: f32[1,128], index: 2, kind: input, shape index: {}]   ;;  %s4584_s3 = inlined_call_operand.vmem [shape: f32[1,128], index: 3, kind: input, shape index: {}]   ;;  %s4585_s4 = inlined_call_operand.vmem [shape: f32[392,128], index: 4, kind: output, shape index: {}]  }
   0x1   :  { %1714 = vmatprep.subr.bf16.mxu1 %v3444_v0  ;;  %2178 = vmatprep.subr.bf16.mxu0 %v3444_v0  ;;  %v3372_v1 = vld [vmem:[%s4581_s1] sm:$0xff]   ;;  %v3374_v3 = vld [vmem:[%s4581_s1 + $0x8] sm:$0xff]   ;;  %v3376_v5 = vld [vmem:[%s4581_s1 + $0x10] sm:$0xff]  }
   0x2   :  { %v3373_v2 = vld [vmem:[%s4581_s1 + $0x100] sm:$0xff]   ;;  %1715 = vmatpush1.bf16.msra.mxu1 %v3372_v1  ;;  %v3375_v4 = vld [vmem:[%s4581_s1 + $0x108] sm:$0xff]   ;;  %v3377_v6 = vld [vmem:[%s4581_s1 + $0x110] sm:$0xff]  }
   0x3   :  { %2179 = vmatpush1.bf16.msra.mxu0 %v3373_v2  ;;  %1716 = vmatprep.subr.bf16.mxu1 %v3444_v0  ;;  %v3378_v7 = vld [vmem:[%s4581_s1 + $0x18] sm:$0xff]   ;;  %v3380_v9 = vld [vmem:[%s4581_s1 + $0x20] sm:$0xff]   ;;  %v3382_v11 = vld [vmem:[%s4581_s1 + $0x28] sm:$0xff]  }
   0x4   :  { %2180 = vmatprep.subr.bf16.mxu0 %v3444_v0  ;;  %v3379_v8 = vld [vmem:[%s4581_s1 + $0x118] sm:$0xff]   ;;  %v3381_v10 = vld [vmem:[%s4581_s1 + $0x120] sm:$0xff]   ;;  %v3383_v12 = vld [vmem:[%s4581_s1 + $0x128] sm:$0xff]  }
   0x5   :  { %v3384_v13 = vld [vmem:[%s4581_s1 + $0x30] sm:$0xff]   ;;  %v3386_v15 = vld [vmem:[%s4581_s1 + $0x38] sm:$0xff]   ;;  %v3388_v17 = vld [vmem:[%s4581_s1 + $0x40] sm:$0xff]  }
   0x6   :  { %1717 = vmatpush1.bf16.msra.mxu1 %v3374_v3  ;;  %v3385_v14 = vld [vmem:[%s4581_s1 + $0x130] sm:$0xff]   ;;  %v3387_v16 = vld [vmem:[%s4581_s1 + $0x138] sm:$0xff]   ;;  %v3389_v18 = vld [vmem:[%s4581_s1 + $0x140] sm:$0xff]  }
   0x7   :  { %2181 = vmatpush1.bf16.msra.mxu0 %v3375_v4  ;;  %1718 = vmatprep.subr.bf16.mxu1 %v3444_v0  ;;  %v3545_v19 = vld [vmem:[%s4582_s0] sm:$0xff]  ;;  %v3555_v21 = vld [vmem:[%s4582_s0 + $0x10] sm:$0xff]  ;;  %v3390_v24 = vld [vmem:[%s4581_s1 + $0x48] sm:$0xff]  }
   0x8   :  { %2182 = vmatprep.subr.bf16.mxu0 %v3444_v0  ;;  %v3550_v20 = vld [vmem:[%s4582_s0 + $0x20] sm:$0xff]  ;;  %v24_v23 = vld [vmem:[%s4582_s0 + $0x30] sm:$0xff]  ;;  %v3391_v26 = vld [vmem:[%s4581_s1 + $0x148] sm:$0xff]  }
   0x9   :  { %v2857_v22 = vcombine.high %v3545_v19, %v3550_v20  ;;  %v2861_v25 = vcombine.high %v3555_v21, %v24_v23  ;;  %v3392_v27 = vld [vmem:[%s4581_s1 + $0x50] sm:$0xff]   ;;  %v3394_v29 = vld [vmem:[%s4581_s1 + $0x58] sm:$0xff]   ;;  %v3396_v31 = vld [vmem:[%s4581_s1 + $0x60] sm:$0xff]   ;;  %v2856_v41 = vcombine.low %v3545_v19, %v3550_v20  ;;  %v2860_v44 = vcombine.low %v3555_v21, %v24_v23 }
   0xa   :  { %1719 = vmatpush1.bf16.msra.mxu1 %v3376_v5  ;;  %v3393_v28 = vld [vmem:[%s4581_s1 + $0x150] sm:$0xff]   ;;  %v3395_v30 = vld [vmem:[%s4581_s1 + $0x158] sm:$0xff]   ;;  %v3397_v32 = vld [vmem:[%s4581_s1 + $0x160] sm:$0xff]  }
   0xb   :  { %2183 = vmatpush1.bf16.msra.mxu0 %v3377_v6  ;;  %1720 = vmatprep.subr.bf16.mxu1 %v3444_v0  ;;  %v3398_v33 = vld [vmem:[%s4581_s1 + $0x68] sm:$0xff]   ;;  %v3400_v35 = vld [vmem:[%s4581_s1 + $0x70] sm:$0xff]   ;;  %v3402_v37 = vld [vmem:[%s4581_s1 + $0x78] sm:$0xff]  }
   0xc   :  { %2184 = vmatprep.subr.bf16.mxu0 %v3444_v0  ;;  %1746 = vmatprep.mubr.bf16.mxu1 %v2857_v22  ;;  %v3399_v34 = vld [vmem:[%s4581_s1 + $0x168] sm:$0xff]   ;;  %v3401_v36 = vld [vmem:[%s4581_s1 + $0x170] sm:$0xff]   ;;  %v3403_v38 = vld [vmem:[%s4581_s1 + $0x178] sm:$0xff]  }
   0xd   :  { %2210 = vmatprep.mubr.bf16.mxu0 %v2861_v25  ;;  %v26_v39 = vld [vmem:[%s4582_s0 + $0x40] sm:$0xff]  ;;  %v28_v42 = vld [vmem:[%s4582_s0 + $0x50] sm:$0xff]  ;;  %v3406_v49 = vld [vmem:[%s4581_s1 + $0x88] sm:$0xff]  }
   0xe   :  { %1721 = vmatpush1.bf16.msra.mxu1 %v3378_v7  ;;  %v30_v40 = vld [vmem:[%s4582_s0 + $0x60] sm:$0xff]  ;;  %v32_v43 = vld [vmem:[%s4582_s0 + $0x70] sm:$0xff]  ;;  %v3407_v50 = vld [vmem:[%s4581_s1 + $0x188] sm:$0xff]  }
   0xf   :  { %2185 = vmatpush1.bf16.msra.mxu0 %v3379_v8  ;;  %1722 = vmatprep.subr.bf16.mxu1 %v3444_v0  ;;  %v3404_v45 = vld [vmem:[%s4581_s1 + $0x80] sm:$0xff]   ;;  %v2865_v47 = vcombine.high %v26_v39, %v30_v40  ;;  %v2869_v48 = vcombine.high %v28_v42, %v32_v43  ;;  %v36_v53 = vld [vmem:[%s4582_s0 + $0x90] sm:$0xff]  ;;  %v2864_v55 = vcombine.low %v26_v39, %v30_v40  ;;  %v3410_v63 = vld [vmem:[%s4581_s1 + $0x98] sm:$0xff]  }
  0x10   :  { %2186 = vmatprep.subr.bf16.mxu0 %v3444_v0  ;;  %v3405_v46 = vld [vmem:[%s4581_s1 + $0x180] sm:$0xff]   ;;  %v40_v54 = vld [vmem:[%s4582_s0 + $0xb0] sm:$0xff]  ;;  %v2868_v56 = vcombine.low %v28_v42, %v32_v43  ;;  %v3411_v3 = vld [vmem:[%s4581_s1 + $0x198] sm:$0xff]  }
  0x11   :  { %v34_v51 = vld [vmem:[%s4582_s0 + $0x80] sm:$0xff]  ;;  %v2877_v58 = vcombine.high %v36_v53, %v40_v54  ;;  %v3408_v59 = vld [vmem:[%s4581_s1 + $0x90] sm:$0xff]   ;;  %v2876_v5 = vcombine.low %v36_v53, %v40_v54  ;;  %v3423_v39 = vld [vmem:[%s4581_s1 + $0x1c8] sm:$0xff]  }
  0x12   :  { %1723 = vmatpush1.bf16.msra.mxu1 %v3380_v9  ;;  %v38_v52 = vld [vmem:[%s4582_s0 + $0xa0] sm:$0xff]  ;;  %v3409_v60 = vld [vmem:[%s4581_s1 + $0x190] sm:$0xff]  }
  0x13   :  { %2187 = vmatpush1.bf16.msra.mxu0 %v3381_v10  ;;  %1724 = vmatprep.subr.bf16.mxu1 %v3444_v0  ;;  %v2873_v57 = vcombine.high %v34_v51, %v38_v52  ;;  %v42_v61 = vld [vmem:[%s4582_s0 + $0xc0] sm:$0xff]  ;;  %v44_v1 = vld [vmem:[%s4582_s0 + $0xd0] sm:$0xff]  ;;  %v2872_v4 = vcombine.low %v34_v51, %v38_v52  ;;  %v3427_v51 = vld [vmem:[%s4581_s1 + $0x1d8] sm:$0xff]  }
  0x14   :  { %2188 = vmatprep.subr.bf16.mxu0 %v3444_v0  ;;  %v46_v62 = vld [vmem:[%s4582_s0 + $0xe0] sm:$0xff]  ;;  %v48_v2 = vld [vmem:[%s4582_s0 + $0xf0] sm:$0xff] }
  0x15   :  { %v2881_v6 = vcombine.high %v42_v61, %v46_v62  ;;  %v2885_v7 = vcombine.high %v44_v1, %v48_v2  ;;  %v3412_v8 = vld [vmem:[%s4581_s1 + $0xa0] sm:$0xff]   ;;  %v3417_v21 = vld [vmem:[%s4581_s1 + $0x1b0] sm:$0xff]  }
  0x16   :  { %1725 = vmatpush1.bf16.msra.mxu1 %v3382_v11  ;;  %v3413_v9 = vld [vmem:[%s4581_s1 + $0x1a0] sm:$0xff]   ;;  %v60_v25 = vld [vmem:[%s4582_s0 + $0x150] sm:$0xff] }
  0x17   :  { %2189 = vmatpush1.bf16.msra.mxu0 %v3383_v12  ;;  %1726 = vmatprep.subr.bf16.mxu1 %v3444_v0  ;;  %v50_v10 = vld [vmem:[%s4582_s0 + $0x100] sm:$0xff]  ;;  %v52_v12 = vld [vmem:[%s4582_s0 + $0x110] sm:$0xff] }
  0x18   :  { %2190 = vmatprep.subr.bf16.mxu0 %v3444_v0  ;;  %v54_v11 = vld [vmem:[%s4582_s0 + $0x120] sm:$0xff] }
  0x19   :  { %v2889_v19 = vcombine.high %v50_v10, %v54_v11  ;;  %v58_v22 = vld [vmem:[%s4582_s0 + $0x140] sm:$0xff] }
  0x1a   :  { %1727 = vmatpush1.bf16.msra.mxu1 %v3384_v13  ;;  %v56_v13 = vld [vmem:[%s4582_s0 + $0x130] sm:$0xff]  ;;  %v62_v23 = vld [vmem:[%s4582_s0 + $0x160] sm:$0xff] }
  0x1b   :  { %2191 = vmatpush1.bf16.msra.mxu0 %v3385_v14  ;;  %1728 = vmatprep.subr.bf16.mxu1 %v3444_v0  ;;  %v3414_v14 = vld [vmem:[%s4581_s1 + $0xa8] sm:$0xff]   ;;  %v2893_v20 = vcombine.high %v52_v12, %v56_v13  ;;  %v2896_v40 = vcombine.low %v58_v22, %v62_v23 }
  0x1c   :  { %2192 = vmatprep.subr.bf16.mxu0 %v3444_v0 }
  0x1e   :  { %1729 = vmatpush1.bf16.msra.mxu1 %v3386_v15  ;;  %v3415_v15 = vld [vmem:[%s4581_s1 + $0x1a8] sm:$0xff]  }
  0x1f   :  { %2193 = vmatpush1.bf16.msra.mxu0 %v3387_v16  ;;  %1730 = vmatprep.subr.bf16.mxu1 %v3444_v0  ;;  %v2880_v16 = vcombine.low %v42_v61, %v46_v62  ;;  %v84_v61 = vld [vmem:[%s4582_s0 + $0x210] sm:$0xff] }
  0x20   :  { %2194 = vmatprep.subr.bf16.mxu0 %v3444_v0  ;;  %v88_v62 = vld [vmem:[%s4582_s0 + $0x230] sm:$0xff] }
  0x22   :  { %1731 = vmatpush1.bf16.msra.mxu1 %v3388_v17  ;;  %v3416_v17 = vld [vmem:[%s4581_s1 + $0xb0] sm:$0xff]  }
  0x23   :  { %2195 = vmatpush1.bf16.msra.mxu0 %v3389_v18  ;;  %1732 = vmatprep.subr.bf16.mxu1 %v3444_v0  ;;  %v2884_v18 = vcombine.low %v44_v1, %v48_v2 }
  0x24   :  { %2196 = vmatprep.subr.bf16.mxu0 %v3444_v0 }
  0x26   :  { %1733 = vmatpush1.bf16.msra.mxu1 %v3390_v24  ;;  %v3418_v24 = vld [vmem:[%s4581_s1 + $0xb8] sm:$0xff]  }
  0x27   :  { %2197 = vmatpush1.bf16.msra.mxu0 %v3391_v26  ;;  %1734 = vmatprep.subr.bf16.mxu1 %v3444_v0  ;;  %v64_v26 = vld [vmem:[%s4582_s0 + $0x170] sm:$0xff] }
  0x28   :  { %2198 = vmatprep.subr.bf16.mxu0 %v3444_v0 }
  0x2a   :  { %1735 = vmatpush1.bf16.msra.mxu1 %v3392_v27  ;;  %v3419_v27 = vld [vmem:[%s4581_s1 + $0x1b8] sm:$0xff]  }
  0x2b   :  { %2199 = vmatpush1.bf16.msra.mxu0 %v3393_v28  ;;  %1736 = vmatprep.subr.bf16.mxu1 %v3444_v0  ;;  %v2888_v28 = vcombine.low %v50_v10, %v54_v11  ;;  %v92_v10 = vld [vmem:[%s4582_s0 + $0x250] sm:$0xff] }
  0x2c   :  { %2200 = vmatprep.subr.bf16.mxu0 %v3444_v0  ;;  %v96_v11 = vld [vmem:[%s4582_s0 + $0x270] sm:$0xff] }
  0x2e   :  { %1737 = vmatpush1.bf16.msra.mxu1 %v3394_v29  ;;  %v2892_v29 = vcombine.low %v52_v12, %v56_v13  ;;  %v3435_v12 = vld [vmem:[%s4581_s1 + $0x1f8] sm:$0xff]  }
  0x2f   :  { %2201 = vmatpush1.bf16.msra.mxu0 %v3395_v30  ;;  %1738 = vmatprep.subr.bf16.mxu1 %v3444_v0  ;;  %v2897_v30 = vcombine.high %v58_v22, %v62_v23 }
  0x30   :  { %2202 = vmatprep.subr.bf16.mxu0 %v3444_v0 }
  0x32   :  { %1739 = vmatpush1.bf16.msra.mxu1 %v3396_v31  ;;  %v2901_v31 = vcombine.high %v60_v25, %v64_v26 }
  0x33   :  { %2203 = vmatpush1.bf16.msra.mxu0 %v3397_v32  ;;  %1740 = vmatprep.subr.bf16.mxu1 %v3444_v0  ;;  %v3420_v32 = vld [vmem:[%s4581_s1 + $0xc0] sm:$0xff]  }
  0x34   :  { %2204 = vmatprep.subr.bf16.mxu0 %v3444_v0 }
  0x36   :  { %1741 = vmatpush1.bf16.msra.mxu1 %v3398_v33  ;;  %v3421_v33 = vld [vmem:[%s4581_s1 + $0x1c0] sm:$0xff]  }
  0x37   :  { %2205 = vmatpush1.bf16.msra.mxu0 %v3399_v34  ;;  %1742 = vmatprep.subr.bf16.mxu1 %v3444_v0  ;;  %v66_v34 = vld [vmem:[%s4582_s0 + $0x180] sm:$0xff] }
  0x38   :  { %2206 = vmatprep.subr.bf16.mxu0 %v3444_v0 }
  0x3a   :  { %1743 = vmatpush1.bf16.msra.mxu1 %v3400_v35  ;;  %v70_v35 = vld [vmem:[%s4582_s0 + $0x1a0] sm:$0xff] }
  0x3b   :  { %2207 = vmatpush1.bf16.msra.mxu0 %v3401_v36  ;;  %1744 = vmatprep.subr.bf16.mxu1 %v3444_v0  ;;  %v3422_v36 = vld [vmem:[%s4581_s1 + $0xc8] sm:$0xff]   ;;  %v2905_v42 = vcombine.high %v66_v34, %v70_v35  ;;  %v2904_v52 = vcombine.low %v66_v34, %v70_v35  ;;  %v116_v34 = vld [vmem:[%s4582_s0 + $0x310] sm:$0xff] }
  0x3c   :  { %2208 = vmatprep.subr.bf16.mxu0 %v3444_v0  ;;  %v120_v35 = vld [vmem:[%s4582_s0 + $0x330] sm:$0xff] }
  0x3e   :  { %1745 = vmatpush1.bf16.msra.mxu1 %v3402_v37  ;;  %v68_v37 = vld [vmem:[%s4582_s0 + $0x190] sm:$0xff] }
  0x3f   :  { %2209 = vmatpush1.bf16.msra.mxu0 %v3403_v38  ;;  %1946 = vmatprep.subr.bf16.mxu1 %v3444_v0  ;;  %v72_v38 = vld [vmem:[%s4582_s0 + $0x1b0] sm:$0xff] }
  0x40   :  { %2410 = vmatprep.subr.bf16.mxu0 %v3444_v0  ;;  %v2909_v43 = vcombine.high %v68_v37, %v72_v38  ;;  %v2908_v53 = vcombine.low %v68_v37, %v72_v38 }
  0x41   :  { %1747 = vmatmul.mubr.bf16.vlgmr.msra.gmra.mrb[0].mxu1 %v2856_v41  ;;  %v2900_v41 = vcombine.low %v60_v25, %v64_v26  ;;  %v110_v25 = vld [vmem:[%s4582_s0 + $0x2e0] sm:$0xff]  ;;  %v108_v26 = vld [vmem:[%s4582_s0 + $0x2d0] sm:$0xff] }
  0x42   :  { %2211 = vmatmul.mubr.bf16.vlgmr.msra.gmra.mrb[0].mxu0 %v2860_v44  ;;  %1947 = vmatpush1.bf16.msra.mxu1 %v3404_v45  ;;  %v3424_v44 = vld [vmem:[%s4581_s1 + $0xd0] sm:$0xff]  }
  0x43   :  { %2411 = vmatpush1.bf16.msra.mxu0 %v3405_v46  ;;  %1754 = vmatprep.mubr.bf16.mxu1 %v2865_v47  ;;  %v3425_v45 = vld [vmem:[%s4581_s1 + $0x1d0] sm:$0xff]   ;;  %v74_v46 = vld [vmem:[%s4582_s0 + $0x1c0] sm:$0xff] }
  0x44   :  { %2218 = vmatprep.mubr.bf16.mxu0 %v2869_v48  ;;  %1948 = vmatprep.subr.bf16.mxu1 %v3444_v0  ;;  %v78_v47 = vld [vmem:[%s4582_s0 + $0x1e0] sm:$0xff]  ;;  %v3426_v48 = vld [vmem:[%s4581_s1 + $0xd8] sm:$0xff]  }
  0x45   :  { %2412 = vmatprep.subr.bf16.mxu0 %v3444_v0  ;;  %v2913_v54 = vcombine.high %v74_v46, %v78_v47  ;;  %v2912_v1 = vcombine.low %v74_v46, %v78_v47 }
  0x46   :  { %1949 = vmatpush1.bf16.msra.mxu1 %v3406_v49  ;;  %v76_v49 = vld [vmem:[%s4582_s0 + $0x1d0] sm:$0xff] }
  0x47   :  { %2413 = vmatpush1.bf16.msra.mxu0 %v3407_v50  ;;  %1950 = vmatprep.subr.bf16.mxu1 %v3444_v0  ;;  %v80_v50 = vld [vmem:[%s4582_s0 + $0x1f0] sm:$0xff] }
  0x48   :  { %2414 = vmatprep.subr.bf16.mxu0 %v3444_v0  ;;  %v2916_v2 = vcombine.low %v76_v49, %v80_v50 }
  0x49   :  { %1755 = vmatmul.mubr.bf16.gmra.mrb[4].mxu1 %v2864_v55  ;;  %v2917_v55 = vcombine.high %v76_v49, %v80_v50  ;;  %v134_v49 = vld [vmem:[%s4582_s0 + $0x3a0] sm:$0xff]  ;;  %v132_v50 = vld [vmem:[%s4582_s0 + $0x390] sm:$0xff] }
  0x4a   :  { %2219 = vmatmul.mubr.bf16.gmra.mrb[4].mxu0 %v2868_v56  ;;  %1762 = vmatprep.mubr.bf16.mxu1 %v2873_v57  ;;  %v3428_v56 = vld [vmem:[%s4581_s1 + $0xe0] sm:$0xff]  }
  0x4b   :  { %2226 = vmatprep.mubr.bf16.mxu0 %v2877_v58  ;;  %1951 = vmatpush1.bf16.msra.mxu1 %v3408_v59  ;;  %v3429_v57 = vld [vmem:[%s4581_s1 + $0x1e0] sm:$0xff]  }
  0x4c   :  { %2415 = vmatpush1.bf16.msra.mxu0 %v3409_v60  ;;  %1952 = vmatprep.subr.bf16.mxu1 %v3444_v0  ;;  %v82_v58 = vld [vmem:[%s4582_s0 + $0x200] sm:$0xff]  ;;  %v3430_v60 = vld [vmem:[%s4581_s1 + $0xe8] sm:$0xff]  }
  0x4d   :  { %2416 = vmatprep.subr.bf16.mxu0 %v3444_v0  ;;  %v86_v59 = vld [vmem:[%s4582_s0 + $0x220] sm:$0xff] }
  0x4e   :  { %v2920_v13 = vcombine.low %v82_v58, %v86_v59 }
  0x4f   :  { %1953 = vmatpush1.bf16.msra.mxu1 %v3410_v63  ;;  %v3431_v63 = vld [vmem:[%s4581_s1 + $0x1e8] sm:$0xff]  }
  0x50   :  { %2417 = vmatpush1.bf16.msra.mxu0 %v3411_v3  ;;  %1954 = vmatprep.subr.bf16.mxu1 %v3444_v0  ;;  %v2921_v3 = vcombine.high %v82_v58, %v86_v59  ;;  %v140_v58 = vld [vmem:[%s4582_s0 + $0x3d0] sm:$0xff] }
  0x51   :  { %1763 = vmatmul.mubr.bf16.gmra.mrb[8].mxu1 %v2872_v4  ;;  %2418 = vmatprep.subr.bf16.mxu0 %v3444_v0  ;;  %v2925_v4 = vcombine.high %v84_v61, %v88_v62  ;;  %v144_v59 = vld [vmem:[%s4582_s0 + $0x3f0] sm:$0xff] }
  0x52   :  { %2227 = vmatmul.mubr.bf16.gmra.mrb[8].mxu0 %v2876_v5  ;;  %1770 = vmatprep.mubr.bf16.mxu1 %v2881_v6  ;;  %v3432_v5 = vld [vmem:[%s4581_s1 + $0xf0] sm:$0xff]  }
  0x53   :  { %2234 = vmatprep.mubr.bf16.mxu0 %v2885_v7  ;;  %1955 = vmatpush1.bf16.msra.mxu1 %v3412_v8  ;;  %v3433_v6 = vld [vmem:[%s4581_s1 + $0x1f0] sm:$0xff]   ;;  %v90_v7 = vld [vmem:[%s4582_s0 + $0x240] sm:$0xff] }
  0x54   :  { %2419 = vmatpush1.bf16.msra.mxu0 %v3413_v9  ;;  %1956 = vmatprep.subr.bf16.mxu1 %v3444_v0  ;;  %v94_v8 = vld [vmem:[%s4582_s0 + $0x260] sm:$0xff]  ;;  %v3434_v9 = vld [vmem:[%s4581_s1 + $0xf8] sm:$0xff]  }
  0x55   :  { %2420 = vmatprep.subr.bf16.mxu0 %v3444_v0 }
  0x57   :  { %1957 = vmatpush1.bf16.msra.mxu1 %v3414_v14  ;;  %v2924_v14 = vcombine.low %v84_v61, %v88_v62 }
  0x58   :  { %2421 = vmatpush1.bf16.msra.mxu0 %v3415_v15  ;;  %1958 = vmatprep.subr.bf16.mxu1 %v3444_v0  ;;  %v2929_v15 = vcombine.high %v90_v7, %v94_v8 }
  0x59   :  { %1771 = vmatmul.mubr.bf16.gmra.mrb[12].mxu1 %v2880_v16  ;;  %2422 = vmatprep.subr.bf16.mxu0 %v3444_v0  ;;  %v2933_v16 = vcombine.high %v92_v10, %v96_v11 }
  0x5a   :  { %2235 = vmatmul.mubr.bf16.gmra.mrb[12].mxu0 %v2884_v18  ;;  %1778 = vmatprep.mubr.bf16.mxu1 %v2889_v19  ;;  %v102_v18 = vld [vmem:[%s4582_s0 + $0x2a0] sm:$0xff]  ;;  %v104_v19 = vld [vmem:[%s4582_s0 + $0x2b0] sm:$0xff] }
  0x5b   :  { %2242 = vmatprep.mubr.bf16.mxu0 %v2893_v20  ;;  %1959 = vmatpush1.bf16.msra.mxu1 %v3416_v17  ;;  %v98_v17 = vld [vmem:[%s4582_s0 + $0x280] sm:$0xff]  ;;  %v2928_v20 = vcombine.low %v90_v7, %v94_v8 }
  0x5c   :  { %2423 = vmatpush1.bf16.msra.mxu0 %v3417_v21  ;;  %1960 = vmatprep.subr.bf16.mxu1 %v3444_v0  ;;  %v2932_v21 = vcombine.low %v92_v10, %v96_v11  ;;  %v2937_v22 = vcombine.high %v98_v17, %v102_v18  ;;  %v158_v10 = vld [vmem:[%s4582_s0 + $0x460] sm:$0xff]  ;;  %v156_v11 = vld [vmem:[%s4582_s0 + $0x450] sm:$0xff] }
  0x5d   :  { %2424 = vmatprep.subr.bf16.mxu0 %v3444_v0 }
  0x5f   :  { %1961 = vmatpush1.bf16.msra.mxu1 %v3418_v24  ;;  %v106_v24 = vld [vmem:[%s4582_s0 + $0x2c0] sm:$0xff] }
  0x60   :  { %2425 = vmatpush1.bf16.msra.mxu0 %v3419_v27  ;;  %1962 = vmatprep.subr.bf16.mxu1 %v3444_v0  ;;  %v112_v27 = vld [vmem:[%s4582_s0 + $0x2f0] sm:$0xff] }
  0x61   :  { %1779 = vmatmul.mubr.bf16.gmra.mrb[16].mxu1 %v2888_v28  ;;  %2426 = vmatprep.subr.bf16.mxu0 %v3444_v0  ;;  %v2936_v28 = vcombine.low %v98_v17, %v102_v18  ;;  %v2948_v37 = vcombine.low %v108_v26, %v112_v27  ;;  %v162_v17 = vld [vmem:[%s4582_s0 + $0x480] sm:$0xff] }
  0x62   :  { %2243 = vmatmul.mubr.bf16.gmra.mrb[16].mxu0 %v2892_v29  ;;  %1786 = vmatprep.mubr.bf16.mxu1 %v2897_v30  ;;  %v2945_v30 = vcombine.high %v106_v24, %v110_v25  ;;  %v166_v18 = vld [vmem:[%s4582_s0 + $0x4a0] sm:$0xff] }
  0x63   :  { %2250 = vmatprep.mubr.bf16.mxu0 %v2901_v31  ;;  %1963 = vmatpush1.bf16.msra.mxu1 %v3420_v32  ;;  %v2949_v31 = vcombine.high %v108_v26, %v112_v27  ;;  %v114_v32 = vld [vmem:[%s4582_s0 + $0x300] sm:$0xff]  ;;  %v172_v26 = vld [vmem:[%s4582_s0 + $0x4d0] sm:$0xff] }
  0x64   :  { %2427 = vmatpush1.bf16.msra.mxu0 %v3421_v33  ;;  %1964 = vmatprep.subr.bf16.mxu1 %v3444_v0  ;;  %v118_v33 = vld [vmem:[%s4582_s0 + $0x320] sm:$0xff]  ;;  %v176_v27 = vld [vmem:[%s4582_s0 + $0x4f0] sm:$0xff] }
  0x65   :  { %2428 = vmatprep.subr.bf16.mxu0 %v3444_v0  ;;  %v2953_v38 = vcombine.high %v114_v32, %v118_v33 }
  0x67   :  { %1965 = vmatpush1.bf16.msra.mxu1 %v3422_v36  ;;  %v2944_v36 = vcombine.low %v106_v24, %v110_v25  ;;  %v170_v24 = vld [vmem:[%s4582_s0 + $0x4c0] sm:$0xff] }
  0x68   :  { %2429 = vmatpush1.bf16.msra.mxu0 %v3423_v39  ;;  %1966 = vmatprep.subr.bf16.mxu1 %v3444_v0  ;;  %v2957_v39 = vcombine.high %v116_v34, %v120_v35  ;;  %v174_v25 = vld [vmem:[%s4582_s0 + $0x4e0] sm:$0xff] }
  0x69   :  { %1787 = vmatmul.mubr.bf16.gmra.mrb[20].mxu1 %v2896_v40  ;;  %2430 = vmatprep.subr.bf16.mxu0 %v3444_v0  ;;  %v122_v40 = vld [vmem:[%s4582_s0 + $0x340] sm:$0xff] }
  0x6a   :  { %2251 = vmatmul.mubr.bf16.gmra.mrb[20].mxu0 %v2900_v41  ;;  %1794 = vmatprep.mubr.bf16.mxu1 %v2905_v42  ;;  %v126_v41 = vld [vmem:[%s4582_s0 + $0x360] sm:$0xff]  ;;  %v124_v42 = vld [vmem:[%s4582_s0 + $0x350] sm:$0xff] }
  0x6b   :  { %2258 = vmatprep.mubr.bf16.mxu0 %v2909_v43  ;;  %1967 = vmatpush1.bf16.msra.mxu1 %v3424_v44  ;;  %v128_v43 = vld [vmem:[%s4582_s0 + $0x370] sm:$0xff]  ;;  %v2952_v44 = vcombine.low %v114_v32, %v118_v33  ;;  %v2961_v46 = vcombine.high %v122_v40, %v126_v41  ;;  %v178_v32 = vld [vmem:[%s4582_s0 + $0x500] sm:$0xff] }
  0x6c   :  { %2431 = vmatpush1.bf16.msra.mxu0 %v3425_v45  ;;  %1968 = vmatprep.subr.bf16.mxu1 %v3444_v0  ;;  %v2956_v45 = vcombine.low %v116_v34, %v120_v35  ;;  %v2965_v47 = vcombine.high %v124_v42, %v128_v43  ;;  %v182_v33 = vld [vmem:[%s4582_s0 + $0x520] sm:$0xff]  ;;  %v180_v34 = vld [vmem:[%s4582_s0 + $0x510] sm:$0xff] }
  0x6d   :  { %2432 = vmatprep.subr.bf16.mxu0 %v3444_v0  ;;  %v184_v35 = vld [vmem:[%s4582_s0 + $0x530] sm:$0xff] }
  0x6f   :  { %1969 = vmatpush1.bf16.msra.mxu1 %v3426_v48  ;;  %v130_v48 = vld [vmem:[%s4582_s0 + $0x380] sm:$0xff] }
  0x70   :  { %2433 = vmatpush1.bf16.msra.mxu0 %v3427_v51  ;;  %1970 = vmatprep.subr.bf16.mxu1 %v3444_v0  ;;  %v136_v51 = vld [vmem:[%s4582_s0 + $0x3b0] sm:$0xff] }
  0x71   :  { %1795 = vmatmul.mubr.bf16.gmra.mrb[24].mxu1 %v2904_v52  ;;  %2434 = vmatprep.subr.bf16.mxu0 %v3444_v0  ;;  %v2960_v52 = vcombine.low %v122_v40, %v126_v41  ;;  %v2972_v61 = vcombine.low %v132_v50, %v136_v51  ;;  %v186_v40 = vld [vmem:[%s4582_s0 + $0x540] sm:$0xff] }
  0x72   :  { %2259 = vmatmul.mubr.bf16.gmra.mrb[24].mxu0 %v2908_v53  ;;  %1802 = vmatprep.mubr.bf16.mxu1 %v2913_v54  ;;  %v2964_v53 = vcombine.low %v124_v42, %v128_v43  ;;  %v2969_v54 = vcombine.high %v130_v48, %v134_v49  ;;  %v190_v41 = vld [vmem:[%s4582_s0 + $0x560] sm:$0xff]  ;;  %v188_v42 = vld [vmem:[%s4582_s0 + $0x550] sm:$0xff] }
  0x73   :  { %2266 = vmatprep.mubr.bf16.mxu0 %v2917_v55  ;;  %1971 = vmatpush1.bf16.msra.mxu1 %v3428_v56  ;;  %v2973_v55 = vcombine.high %v132_v50, %v136_v51  ;;  %v138_v56 = vld [vmem:[%s4582_s0 + $0x3c0] sm:$0xff]  ;;  %v192_v43 = vld [vmem:[%s4582_s0 + $0x570] sm:$0xff] }
  0x74   :  { %2435 = vmatpush1.bf16.msra.mxu0 %v3429_v57  ;;  %1972 = vmatprep.subr.bf16.mxu1 %v3444_v0  ;;  %v142_v57 = vld [vmem:[%s4582_s0 + $0x3e0] sm:$0xff]  ;;  %v196_v50 = vld [vmem:[%s4582_s0 + $0x590] sm:$0xff] }
  0x75   :  { %2436 = vmatprep.subr.bf16.mxu0 %v3444_v0  ;;  %v2977_v62 = vcombine.high %v138_v56, %v142_v57  ;;  %v200_v51 = vld [vmem:[%s4582_s0 + $0x5b0] sm:$0xff] }
  0x77   :  { %1973 = vmatpush1.bf16.msra.mxu1 %v3430_v60  ;;  %v2968_v60 = vcombine.low %v130_v48, %v134_v49  ;;  %v194_v48 = vld [vmem:[%s4582_s0 + $0x580] sm:$0xff] }
  0x78   :  { %2437 = vmatpush1.bf16.msra.mxu0 %v3431_v63  ;;  %1974 = vmatprep.subr.bf16.mxu1 %v3444_v0  ;;  %v2981_v63 = vcombine.high %v140_v58, %v144_v59  ;;  %v198_v49 = vld [vmem:[%s4582_s0 + $0x5a0] sm:$0xff] }
  0x79   :  { %1803 = vmatmul.mubr.bf16.gmra.mrb[28].mxu1 %v2912_v1  ;;  %2438 = vmatprep.subr.bf16.mxu0 %v3444_v0  ;;  %v146_v1 = vld [vmem:[%s4582_s0 + $0x400] sm:$0xff] }
  0x7a   :  { %2267 = vmatmul.mubr.bf16.gmra.mrb[28].mxu0 %v2916_v2  ;;  %1810 = vmatprep.mubr.bf16.mxu1 %v2921_v3  ;;  %v150_v2 = vld [vmem:[%s4582_s0 + $0x420] sm:$0xff]  ;;  %v148_v3 = vld [vmem:[%s4582_s0 + $0x410] sm:$0xff] }
  0x7b   :  { %2274 = vmatprep.mubr.bf16.mxu0 %v2925_v4  ;;  %1975 = vmatpush1.bf16.msra.mxu1 %v3432_v5  ;;  %v152_v4 = vld [vmem:[%s4582_s0 + $0x430] sm:$0xff]  ;;  %v2976_v5 = vcombine.low %v138_v56, %v142_v57  ;;  %v2985_v7 = vcombine.high %v146_v1, %v150_v2  ;;  %v202_v56 = vld [vmem:[%s4582_s0 + $0x5c0] sm:$0xff] }
  0x7c   :  { %2439 = vmatpush1.bf16.msra.mxu0 %v3433_v6  ;;  %1976 = vmatprep.subr.bf16.mxu1 %v3444_v0  ;;  %v2980_v6 = vcombine.low %v140_v58, %v144_v59  ;;  %v2989_v8 = vcombine.high %v148_v3, %v152_v4  ;;  %v206_v57 = vld [vmem:[%s4582_s0 + $0x5e0] sm:$0xff]  ;;  %v204_v58 = vld [vmem:[%s4582_s0 + $0x5d0] sm:$0xff] }
  0x7d   :  { %2440 = vmatprep.subr.bf16.mxu0 %v3444_v0  ;;  %v100_v0 = vld [vmem:[%s4582_s0 + $0x290] sm:$0xff] }
  0x7e   :  { %v2941_v23 = vcombine.high %v100_v0, %v104_v19  ;;  %v2940_v29 = vcombine.low %v100_v0, %v104_v19  ;;  %v164_v0 = vld [vmem:[%s4582_s0 + $0x490] sm:$0xff] }
  0x7f   :  { %1977 = vmatpush1.bf16.msra.mxu1 %v3434_v9  ;;  %v154_v9 = vld [vmem:[%s4582_s0 + $0x440] sm:$0xff]  ;;  %v168_v19 = vld [vmem:[%s4582_s0 + $0x4b0] sm:$0xff] }
  0x80   :  { %2441 = vmatpush1.bf16.msra.mxu0 %v3435_v12  ;;  %v160_v12 = vld [vmem:[%s4582_s0 + $0x470] sm:$0xff] }
  0x81   :  { %1811 = vmatmul.mubr.bf16.gmra.mrb[32].mxu1 %v2920_v13  ;;  %v2984_v13 = vcombine.low %v146_v1, %v150_v2  ;;  %v208_v59 = vld [vmem:[%s4582_s0 + $0x5f0] sm:$0xff]  ;;  %v210_v1 = vld [vmem:[%s4582_s0 + $0x600] sm:$0xff] }
  0x82   :  { %2275 = vmatmul.mubr.bf16.gmra.mrb[32].mxu0 %v2924_v14  ;;  %1818 = vmatprep.mubr.bf16.mxu1 %v2929_v15  ;;  %v2988_v14 = vcombine.low %v148_v3, %v152_v4  ;;  %v2993_v15 = vcombine.high %v154_v9, %v158_v10  ;;  %v212_v2 = vld [vmem:[%s4582_s0 + $0x610] sm:$0xff]  ;;  %v3040_v3 = vcombine.low %v202_v56, %v206_v57 }
  0x83   :  { %2282 = vmatprep.mubr.bf16.mxu0 %v2933_v16  ;;  %v2997_v16 = vcombine.high %v156_v11, %v160_v12  ;;  %v3044_v4 = vcombine.low %v204_v58, %v208_v59 }
  0x89   :  { %1819 = vmatmul.mubr.bf16.gmra.mrb[36].mxu1 %v2928_v20  ;;  %v2992_v20 = vcombine.low %v154_v9, %v158_v10  ;;  %v21_v9 = vld [vmem:[%s4582_s0 + $0x18] sm:$0xff] }
  0x8a   :  { %2283 = vmatmul.mubr.bf16.gmra.mrb[36].mxu0 %v2932_v21  ;;  %1826 = vmatprep.mubr.bf16.mxu1 %v2937_v22  ;;  %v2996_v21 = vcombine.low %v156_v11, %v160_v12  ;;  %v3001_v22 = vcombine.high %v162_v17, %v166_v18  ;;  %v25_v10 = vld [vmem:[%s4582_s0 + $0x38] sm:$0xff]  ;;  %v3048_v11 = vcombine.low %v210_v1, %v210_v1 }
  0x8b   :  { %2290 = vmatprep.mubr.bf16.mxu0 %v2941_v23  ;;  %v3005_v23 = vcombine.high %v164_v0, %v168_v19  ;;  %v3052_v12 = vcombine.low %v212_v2, %v212_v2 }
  0x91   :  { %1827 = vmatmul.mubr.bf16.gmra.mrb[40].mxu1 %v2936_v28  ;;  %v3000_v28 = vcombine.low %v162_v17, %v166_v18  ;;  %v29_v17 = vld [vmem:[%s4582_s0 + $0x58] sm:$0xff] }
  0x92   :  { %2291 = vmatmul.mubr.bf16.gmra.mrb[40].mxu0 %v2940_v29  ;;  %1834 = vmatprep.mubr.bf16.mxu1 %v2945_v30  ;;  %v3004_v29 = vcombine.low %v164_v0, %v168_v19  ;;  %v3009_v30 = vcombine.high %v170_v24, %v174_v25  ;;  %v33_v18 = vld [vmem:[%s4582_s0 + $0x78] sm:$0xff]  ;;  %v2862_v19 = vcombine.low %v21_v9, %v25_v10 }
  0x93   :  { %2298 = vmatprep.mubr.bf16.mxu0 %v2949_v31  ;;  %v3013_v31 = vcombine.high %v172_v26, %v176_v27 }
  0x99   :  { %1835 = vmatmul.mubr.bf16.gmra.mrb[44].mxu1 %v2944_v36  ;;  %v3008_v36 = vcombine.low %v170_v24, %v174_v25  ;;  %v37_v24 = vld [vmem:[%s4582_s0 + $0x98] sm:$0xff] }
  0x9a   :  { %2299 = vmatmul.mubr.bf16.gmra.mrb[44].mxu0 %v2948_v37  ;;  %1842 = vmatprep.mubr.bf16.mxu1 %v2953_v38  ;;  %v3012_v37 = vcombine.low %v172_v26, %v176_v27  ;;  %v3017_v38 = vcombine.high %v178_v32, %v182_v33  ;;  %v41_v25 = vld [vmem:[%s4582_s0 + $0xb8] sm:$0xff]  ;;  %v2870_v27 = vcombine.low %v29_v17, %v33_v18 }
  0x9b   :  { %2306 = vmatprep.mubr.bf16.mxu0 %v2957_v39  ;;  %v3021_v39 = vcombine.high %v180_v34, %v184_v35 }
  0xa1   :  { %1843 = vmatmul.mubr.bf16.gmra.mrb[48].mxu1 %v2952_v44  ;;  %v3016_v44 = vcombine.low %v178_v32, %v182_v33  ;;  %v45_v32 = vld [vmem:[%s4582_s0 + $0xd8] sm:$0xff] }
  0xa2   :  { %2307 = vmatmul.mubr.bf16.gmra.mrb[48].mxu0 %v2956_v45  ;;  %1850 = vmatprep.mubr.bf16.mxu1 %v2961_v46  ;;  %v3020_v45 = vcombine.low %v180_v34, %v184_v35  ;;  %v3025_v46 = vcombine.high %v186_v40, %v190_v41  ;;  %v49_v33 = vld [vmem:[%s4582_s0 + $0xf8] sm:$0xff]  ;;  %v2878_v35 = vcombine.low %v37_v24, %v41_v25 }
  0xa3   :  { %2314 = vmatprep.mubr.bf16.mxu0 %v2965_v47  ;;  %v3029_v47 = vcombine.high %v188_v42, %v192_v43 }
  0xa9   :  { %1851 = vmatmul.mubr.bf16.gmra.mrb[52].mxu1 %v2960_v52  ;;  %v3024_v52 = vcombine.low %v186_v40, %v190_v41  ;;  %v53_v40 = vld [vmem:[%s4582_s0 + $0x118] sm:$0xff] }
  0xaa   :  { %2315 = vmatmul.mubr.bf16.gmra.mrb[52].mxu0 %v2964_v53  ;;  %1858 = vmatprep.mubr.bf16.mxu1 %v2969_v54  ;;  %v3028_v53 = vcombine.low %v188_v42, %v192_v43  ;;  %v3033_v54 = vcombine.high %v194_v48, %v198_v49  ;;  %v57_v41 = vld [vmem:[%s4582_s0 + $0x138] sm:$0xff]  ;;  %v2886_v43 = vcombine.low %v45_v32, %v49_v33 }
  0xab   :  { %2322 = vmatprep.mubr.bf16.mxu0 %v2973_v55  ;;  %v3037_v55 = vcombine.high %v196_v50, %v200_v51 }
  0xb1   :  { %1859 = vmatmul.mubr.bf16.gmra.mrb[56].mxu1 %v2968_v60  ;;  %v3032_v60 = vcombine.low %v194_v48, %v198_v49  ;;  %v61_v48 = vld [vmem:[%s4582_s0 + $0x158] sm:$0xff] }
  0xb2   :  { %2323 = vmatmul.mubr.bf16.gmra.mrb[56].mxu0 %v2972_v61  ;;  %1866 = vmatprep.mubr.bf16.mxu1 %v2977_v62  ;;  %v3036_v61 = vcombine.low %v196_v50, %v200_v51  ;;  %v3041_v62 = vcombine.high %v202_v56, %v206_v57  ;;  %v65_v49 = vld [vmem:[%s4582_s0 + $0x178] sm:$0xff]  ;;  %v2894_v51 = vcombine.low %v53_v40, %v57_v41 }
  0xb3   :  { %2330 = vmatprep.mubr.bf16.mxu0 %v2981_v63  ;;  %v3045_v63 = vcombine.high %v204_v58, %v208_v59  ;;  %v69_v56 = vld [vmem:[%s4582_s0 + $0x198] sm:$0xff]  ;;  %v2902_v59 = vcombine.low %v61_v48, %v65_v49 }
  0xb4   :  { %v73_v57 = vld [vmem:[%s4582_s0 + $0x1b8] sm:$0xff] }
  0xb9   :  { %1867 = vmatmul.mubr.bf16.gmra.mrb[60].mxu1 %v2976_v5  ;;  %v3049_v5 = vcombine.high %v210_v1, %v210_v1  ;;  %v77_v1 = vld [vmem:[%s4582_s0 + $0x1d8] sm:$0xff] }
  0xba   :  { %2331 = vmatmul.mubr.bf16.gmra.mrb[60].mxu0 %v2980_v6  ;;  %1874 = vmatprep.mubr.bf16.mxu1 %v2985_v7  ;;  %v3053_v6 = vcombine.high %v212_v2, %v212_v2  ;;  %v19_v7 = vld [vmem:[%s4582_s0 + $0x8] sm:$0xff]  ;;  %v81_v2 = vld [vmem:[%s4582_s0 + $0x1f8] sm:$0xff] }
  0xbb   :  { %2338 = vmatprep.mubr.bf16.mxu0 %v2989_v8  ;;  %v23_v8 = vld [vmem:[%s4582_s0 + $0x28] sm:$0xff] }
  0xbc   :  { %v2858_v0 = vcombine.low %v19_v7, %v23_v8 }
  0xc1   :  { %1875 = vmatmul.mubr.bf16.gmra.mrb[64].mxu1 %v2984_v13  ;;  %v2859_v13 = vcombine.high %v19_v7, %v23_v8  ;;  %v83_v7 = vld [vmem:[%s4582_s0 + $0x208] sm:$0xff] }
  0xc2   :  { %2339 = vmatmul.mubr.bf16.gmra.mrb[64].mxu0 %v2988_v14  ;;  %1882 = vmatprep.mubr.bf16.mxu1 %v2993_v15  ;;  %v2863_v14 = vcombine.high %v21_v9, %v25_v10  ;;  %v27_v15 = vld [vmem:[%s4582_s0 + $0x48] sm:$0xff]  ;;  %v85_v9 = vld [vmem:[%s4582_s0 + $0x218] sm:$0xff] }
  0xc3   :  { %2346 = vmatprep.mubr.bf16.mxu0 %v2997_v16  ;;  %v31_v16 = vld [vmem:[%s4582_s0 + $0x68] sm:$0xff]  ;;  %v89_v10 = vld [vmem:[%s4582_s0 + $0x238] sm:$0xff] }
  0xc4   :  { %v2866_v26 = vcombine.low %v27_v15, %v31_v16  ;;  %v87_v8 = vld [vmem:[%s4582_s0 + $0x228] sm:$0xff] }
  0xc9   :  { %1883 = vmatmul.mubr.bf16.gmra.mrb[68].mxu1 %v2992_v20  ;;  %v2867_v20 = vcombine.high %v27_v15, %v31_v16  ;;  %v91_v15 = vld [vmem:[%s4582_s0 + $0x248] sm:$0xff] }
  0xca   :  { %2347 = vmatmul.mubr.bf16.gmra.mrb[68].mxu0 %v2996_v21  ;;  %1890 = vmatprep.mubr.bf16.mxu1 %v3001_v22  ;;  %v2871_v21 = vcombine.high %v29_v17, %v33_v18  ;;  %v35_v22 = vld [vmem:[%s4582_s0 + $0x88] sm:$0xff]  ;;  %v93_v17 = vld [vmem:[%s4582_s0 + $0x258] sm:$0xff] }
  0xcb   :  { %2354 = vmatprep.mubr.bf16.mxu0 %v3005_v23  ;;  %v39_v23 = vld [vmem:[%s4582_s0 + $0xa8] sm:$0xff]  ;;  %v97_v18 = vld [vmem:[%s4582_s0 + $0x278] sm:$0xff] }
  0xcc   :  { %v2874_v34 = vcombine.low %v35_v22, %v39_v23  ;;  %v95_v16 = vld [vmem:[%s4582_s0 + $0x268] sm:$0xff] }
  0xd1   :  { %1891 = vmatmul.mubr.bf16.gmra.mrb[72].mxu1 %v3000_v28  ;;  %v2875_v28 = vcombine.high %v35_v22, %v39_v23  ;;  %v99_v22 = vld [vmem:[%s4582_s0 + $0x288] sm:$0xff] }
  0xd2   :  { %2355 = vmatmul.mubr.bf16.gmra.mrb[72].mxu0 %v3004_v29  ;;  %1898 = vmatprep.mubr.bf16.mxu1 %v3009_v30  ;;  %v2879_v29 = vcombine.high %v37_v24, %v41_v25  ;;  %v43_v30 = vld [vmem:[%s4582_s0 + $0xc8] sm:$0xff]  ;;  %v101_v24 = vld [vmem:[%s4582_s0 + $0x298] sm:$0xff] }
  0xd3   :  { %2362 = vmatprep.mubr.bf16.mxu0 %v3013_v31  ;;  %v47_v31 = vld [vmem:[%s4582_s0 + $0xe8] sm:$0xff]  ;;  %v105_v25 = vld [vmem:[%s4582_s0 + $0x2b8] sm:$0xff] }
  0xd4   :  { %v2882_v42 = vcombine.low %v43_v30, %v47_v31  ;;  %v103_v23 = vld [vmem:[%s4582_s0 + $0x2a8] sm:$0xff] }
  0xd9   :  { %1899 = vmatmul.mubr.bf16.gmra.mrb[76].mxu1 %v3008_v36  ;;  %v2883_v36 = vcombine.high %v43_v30, %v47_v31  ;;  %v107_v30 = vld [vmem:[%s4582_s0 + $0x2c8] sm:$0xff] }
  0xda   :  { %2363 = vmatmul.mubr.bf16.gmra.mrb[76].mxu0 %v3012_v37  ;;  %1906 = vmatprep.mubr.bf16.mxu1 %v3017_v38  ;;  %v2887_v37 = vcombine.high %v45_v32, %v49_v33  ;;  %v51_v38 = vld [vmem:[%s4582_s0 + $0x108] sm:$0xff]  ;;  %v109_v32 = vld [vmem:[%s4582_s0 + $0x2d8] sm:$0xff] }
  0xdb   :  { %2370 = vmatprep.mubr.bf16.mxu0 %v3021_v39  ;;  %v55_v39 = vld [vmem:[%s4582_s0 + $0x128] sm:$0xff]  ;;  %v113_v33 = vld [vmem:[%s4582_s0 + $0x2f8] sm:$0xff] }
  0xdc   :  { %v2890_v50 = vcombine.low %v51_v38, %v55_v39  ;;  %v111_v31 = vld [vmem:[%s4582_s0 + $0x2e8] sm:$0xff] }
  0xe1   :  { %1907 = vmatmul.mubr.bf16.gmra.mrb[80].mxu1 %v3016_v44  ;;  %v2891_v44 = vcombine.high %v51_v38, %v55_v39  ;;  %v115_v38 = vld [vmem:[%s4582_s0 + $0x308] sm:$0xff] }
  0xe2   :  { %2371 = vmatmul.mubr.bf16.gmra.mrb[80].mxu0 %v3020_v45  ;;  %1914 = vmatprep.mubr.bf16.mxu1 %v3025_v46  ;;  %v2895_v45 = vcombine.high %v53_v40, %v57_v41  ;;  %v59_v46 = vld [vmem:[%s4582_s0 + $0x148] sm:$0xff]  ;;  %v117_v40 = vld [vmem:[%s4582_s0 + $0x318] sm:$0xff] }
  0xe3   :  { %2378 = vmatprep.mubr.bf16.mxu0 %v3029_v47  ;;  %v63_v47 = vld [vmem:[%s4582_s0 + $0x168] sm:$0xff]  ;;  %v121_v41 = vld [vmem:[%s4582_s0 + $0x338] sm:$0xff] }
  0xe4   :  { %v2898_v58 = vcombine.low %v59_v46, %v63_v47  ;;  %v119_v39 = vld [vmem:[%s4582_s0 + $0x328] sm:$0xff] }
  0xe9   :  { %1915 = vmatmul.mubr.bf16.gmra.mrb[84].mxu1 %v3024_v52  ;;  %v2899_v52 = vcombine.high %v59_v46, %v63_v47  ;;  %v123_v46 = vld [vmem:[%s4582_s0 + $0x348] sm:$0xff] }
  0xea   :  { %2379 = vmatmul.mubr.bf16.gmra.mrb[84].mxu0 %v3028_v53  ;;  %1922 = vmatprep.mubr.bf16.mxu1 %v3033_v54  ;;  %v2903_v53 = vcombine.high %v61_v48, %v65_v49  ;;  %v67_v54 = vld [vmem:[%s4582_s0 + $0x188] sm:$0xff]  ;;  %v125_v48 = vld [vmem:[%s4582_s0 + $0x358] sm:$0xff] }
  0xeb   :  { %2386 = vmatprep.mubr.bf16.mxu0 %v3037_v55  ;;  %v71_v55 = vld [vmem:[%s4582_s0 + $0x1a8] sm:$0xff]  ;;  %v129_v49 = vld [vmem:[%s4582_s0 + $0x378] sm:$0xff] }
  0xec   :  { %v127_v47 = vld [vmem:[%s4582_s0 + $0x368] sm:$0xff] }
  0xf1   :  { %1923 = vmatmul.mubr.bf16.gmra.mrb[88].mxu1 %v3032_v60  ;;  %v2907_v60 = vcombine.high %v67_v54, %v71_v55 }
  0xf2   :  { %2387 = vmatmul.mubr.bf16.gmra.mrb[88].mxu0 %v3036_v61  ;;  %1930 = vmatprep.mubr.bf16.mxu1 %v3041_v62  ;;  %v2911_v61 = vcombine.high %v69_v56, %v73_v57  ;;  %v75_v62 = vld [vmem:[%s4582_s0 + $0x1c8] sm:$0xff] }
  0xf3   :  { %2394 = vmatprep.mubr.bf16.mxu0 %v3045_v63  ;;  %v79_v63 = vld [vmem:[%s4582_s0 + $0x1e8] sm:$0xff] }
  0xf9   :  { %1931 = vmatmul.mubr.bf16.gmra.mrb[92].mxu1 %v3040_v3  ;;  %v2906_v3 = vcombine.low %v67_v54, %v71_v55  ;;  %v131_v54 = vld [vmem:[%s4582_s0 + $0x388] sm:$0xff] }
  0xfa   :  { %2395 = vmatmul.mubr.bf16.gmra.mrb[92].mxu0 %v3044_v4  ;;  %1938 = vmatprep.mubr.bf16.mxu1 %v3049_v5  ;;  %v2910_v4 = vcombine.low %v69_v56, %v73_v57  ;;  %v2915_v5 = vcombine.high %v75_v62, %v79_v63  ;;  %v135_v55 = vld [vmem:[%s4582_s0 + $0x3a8] sm:$0xff]  ;;  %v133_v56 = vld [vmem:[%s4582_s0 + $0x398] sm:$0xff] }
  0xfb   :  { %2402 = vmatprep.mubr.bf16.mxu0 %v3053_v6  ;;  %v2919_v6 = vcombine.high %v77_v1, %v81_v2  ;;  %v137_v57 = vld [vmem:[%s4582_s0 + $0x3b8] sm:$0xff] }
 0x101   :  { %1939 = vmatmul.mubr.bf16.gmra.mrb[96].mxu1 %v3048_v11  ;;  %v2914_v11 = vcombine.low %v75_v62, %v79_v63  ;;  %v139_v62 = vld [vmem:[%s4582_s0 + $0x3c8] sm:$0xff] }
 0x102   :  { %2403 = vmatmul.mubr.bf16.gmra.mrb[96].mxu0 %v3052_v12  ;;  %1978 = vmatprep.mubr.bf16.mxu1 %v2859_v13  ;;  %v2918_v12 = vcombine.low %v77_v1, %v81_v2  ;;  %v2923_v13 = vcombine.high %v83_v7, %v87_v8  ;;  %v143_v63 = vld [vmem:[%s4582_s0 + $0x3e8] sm:$0xff]  ;;  %v141_v1 = vld [vmem:[%s4582_s0 + $0x3d8] sm:$0xff] }
 0x103   :  { %2442 = vmatprep.mubr.bf16.mxu0 %v2863_v14  ;;  %v2927_v14 = vcombine.high %v85_v9, %v89_v10  ;;  %v145_v2 = vld [vmem:[%s4582_s0 + $0x3f8] sm:$0xff] }
 0x109   :  { %1979 = vmatmul.mubr.bf16.vlgmr.msra.gmra.mrb[0].mxu1 %v2858_v0  ;;  %v2922_v0 = vcombine.low %v83_v7, %v87_v8  ;;  %v147_v7 = vld [vmem:[%s4582_s0 + $0x408] sm:$0xff] }
 0x10a   :  { %2443 = vmatmul.mubr.bf16.vlgmr.msra.gmra.mrb[0].mxu0 %v2862_v19  ;;  %1986 = vmatprep.mubr.bf16.mxu1 %v2867_v20  ;;  %v2926_v19 = vcombine.low %v85_v9, %v89_v10  ;;  %v2931_v20 = vcombine.high %v91_v15, %v95_v16  ;;  %v151_v8 = vld [vmem:[%s4582_s0 + $0x428] sm:$0xff]  ;;  %v149_v9 = vld [vmem:[%s4582_s0 + $0x418] sm:$0xff] }
 0x10b   :  { %2450 = vmatprep.mubr.bf16.mxu0 %v2871_v21  ;;  %v2935_v21 = vcombine.high %v93_v17, %v97_v18  ;;  %v153_v10 = vld [vmem:[%s4582_s0 + $0x438] sm:$0xff] }
 0x111   :  { %1987 = vmatmul.mubr.bf16.gmra.mrb[4].mxu1 %v2866_v26  ;;  %v2930_v26 = vcombine.low %v91_v15, %v95_v16  ;;  %v155_v15 = vld [vmem:[%s4582_s0 + $0x448] sm:$0xff] }
 0x112   :  { %2451 = vmatmul.mubr.bf16.gmra.mrb[4].mxu0 %v2870_v27  ;;  %1994 = vmatprep.mubr.bf16.mxu1 %v2875_v28  ;;  %v2934_v27 = vcombine.low %v93_v17, %v97_v18  ;;  %v2939_v28 = vcombine.high %v99_v22, %v103_v23  ;;  %v159_v16 = vld [vmem:[%s4582_s0 + $0x468] sm:$0xff]  ;;  %v157_v17 = vld [vmem:[%s4582_s0 + $0x458] sm:$0xff] }
 0x113   :  { %2458 = vmatprep.mubr.bf16.mxu0 %v2879_v29  ;;  %v2943_v29 = vcombine.high %v101_v24, %v105_v25  ;;  %v161_v18 = vld [vmem:[%s4582_s0 + $0x478] sm:$0xff] }
 0x119   :  { %1995 = vmatmul.mubr.bf16.gmra.mrb[8].mxu1 %v2874_v34  ;;  %v2938_v34 = vcombine.low %v99_v22, %v103_v23  ;;  %v163_v22 = vld [vmem:[%s4582_s0 + $0x488] sm:$0xff] }
 0x11a   :  { %2459 = vmatmul.mubr.bf16.gmra.mrb[8].mxu0 %v2878_v35  ;;  %2002 = vmatprep.mubr.bf16.mxu1 %v2883_v36  ;;  %v2942_v35 = vcombine.low %v101_v24, %v105_v25  ;;  %v2947_v36 = vcombine.high %v107_v30, %v111_v31  ;;  %v167_v23 = vld [vmem:[%s4582_s0 + $0x4a8] sm:$0xff]  ;;  %v165_v24 = vld [vmem:[%s4582_s0 + $0x498] sm:$0xff] }
 0x11b   :  { %2466 = vmatprep.mubr.bf16.mxu0 %v2887_v37  ;;  %v2951_v37 = vcombine.high %v109_v32, %v113_v33  ;;  %v169_v25 = vld [vmem:[%s4582_s0 + $0x4b8] sm:$0xff] }
 0x121   :  { %2003 = vmatmul.mubr.bf16.gmra.mrb[12].mxu1 %v2882_v42  ;;  %v2946_v42 = vcombine.low %v107_v30, %v111_v31  ;;  %v171_v30 = vld [vmem:[%s4582_s0 + $0x4c8] sm:$0xff] }
 0x122   :  { %2467 = vmatmul.mubr.bf16.gmra.mrb[12].mxu0 %v2886_v43  ;;  %2010 = vmatprep.mubr.bf16.mxu1 %v2891_v44  ;;  %v2950_v43 = vcombine.low %v109_v32, %v113_v33  ;;  %v2955_v44 = vcombine.high %v115_v38, %v119_v39  ;;  %v175_v31 = vld [vmem:[%s4582_s0 + $0x4e8] sm:$0xff]  ;;  %v173_v32 = vld [vmem:[%s4582_s0 + $0x4d8] sm:$0xff] }
 0x123   :  { %2474 = vmatprep.mubr.bf16.mxu0 %v2895_v45  ;;  %v2959_v45 = vcombine.high %v117_v40, %v121_v41  ;;  %v177_v33 = vld [vmem:[%s4582_s0 + $0x4f8] sm:$0xff] }
 0x129   :  { %2011 = vmatmul.mubr.bf16.gmra.mrb[16].mxu1 %v2890_v50  ;;  %v2954_v50 = vcombine.low %v115_v38, %v119_v39  ;;  %v179_v38 = vld [vmem:[%s4582_s0 + $0x508] sm:$0xff] }
 0x12a   :  { %2475 = vmatmul.mubr.bf16.gmra.mrb[16].mxu0 %v2894_v51  ;;  %2018 = vmatprep.mubr.bf16.mxu1 %v2899_v52  ;;  %v2958_v51 = vcombine.low %v117_v40, %v121_v41  ;;  %v2963_v52 = vcombine.high %v123_v46, %v127_v47  ;;  %v183_v39 = vld [vmem:[%s4582_s0 + $0x528] sm:$0xff]  ;;  %v181_v40 = vld [vmem:[%s4582_s0 + $0x518] sm:$0xff] }
 0x12b   :  { %2482 = vmatprep.mubr.bf16.mxu0 %v2903_v53  ;;  %v2967_v53 = vcombine.high %v125_v48, %v129_v49  ;;  %v185_v41 = vld [vmem:[%s4582_s0 + $0x538] sm:$0xff] }
 0x131   :  { %2019 = vmatmul.mubr.bf16.gmra.mrb[20].mxu1 %v2898_v58  ;;  %v2962_v58 = vcombine.low %v123_v46, %v127_v47  ;;  %v187_v46 = vld [vmem:[%s4582_s0 + $0x548] sm:$0xff] }
 0x132   :  { %2483 = vmatmul.mubr.bf16.gmra.mrb[20].mxu0 %v2902_v59  ;;  %2026 = vmatprep.mubr.bf16.mxu1 %v2907_v60  ;;  %v2966_v59 = vcombine.low %v125_v48, %v129_v49  ;;  %v2971_v60 = vcombine.high %v131_v54, %v135_v55  ;;  %v191_v47 = vld [vmem:[%s4582_s0 + $0x568] sm:$0xff]  ;;  %v189_v48 = vld [vmem:[%s4582_s0 + $0x558] sm:$0xff] }
 0x133   :  { %2490 = vmatprep.mubr.bf16.mxu0 %v2911_v61  ;;  %v2975_v61 = vcombine.high %v133_v56, %v137_v57  ;;  %v193_v49 = vld [vmem:[%s4582_s0 + $0x578] sm:$0xff] }
 0x139   :  { %2027 = vmatmul.mubr.bf16.gmra.mrb[24].mxu1 %v2906_v3  ;;  %v2970_v3 = vcombine.low %v131_v54, %v135_v55  ;;  %v195_v54 = vld [vmem:[%s4582_s0 + $0x588] sm:$0xff] }
 0x13a   :  { %2491 = vmatmul.mubr.bf16.gmra.mrb[24].mxu0 %v2910_v4  ;;  %2034 = vmatprep.mubr.bf16.mxu1 %v2915_v5  ;;  %v2974_v4 = vcombine.low %v133_v56, %v137_v57  ;;  %v2979_v5 = vcombine.high %v139_v62, %v143_v63  ;;  %v199_v55 = vld [vmem:[%s4582_s0 + $0x5a8] sm:$0xff]  ;;  %v197_v56 = vld [vmem:[%s4582_s0 + $0x598] sm:$0xff] }
 0x13b   :  { %2498 = vmatprep.mubr.bf16.mxu0 %v2919_v6  ;;  %v2983_v6 = vcombine.high %v141_v1, %v145_v2  ;;  %v201_v57 = vld [vmem:[%s4582_s0 + $0x5b8] sm:$0xff] }
 0x141   :  { %2035 = vmatmul.mubr.bf16.gmra.mrb[28].mxu1 %v2914_v11  ;;  %v2978_v11 = vcombine.low %v139_v62, %v143_v63  ;;  %v203_v62 = vld [vmem:[%s4582_s0 + $0x5c8] sm:$0xff] }
 0x142   :  { %2499 = vmatmul.mubr.bf16.gmra.mrb[28].mxu0 %v2918_v12  ;;  %2042 = vmatprep.mubr.bf16.mxu1 %v2923_v13  ;;  %v2982_v12 = vcombine.low %v141_v1, %v145_v2  ;;  %v2987_v13 = vcombine.high %v147_v7, %v151_v8  ;;  %v207_v63 = vld [vmem:[%s4582_s0 + $0x5e8] sm:$0xff]  ;;  %v205_v1 = vld [vmem:[%s4582_s0 + $0x5d8] sm:$0xff] }
 0x143   :  { %2506 = vmatprep.mubr.bf16.mxu0 %v2927_v14  ;;  %v2991_v14 = vcombine.high %v149_v9, %v153_v10  ;;  %v209_v2 = vld [vmem:[%s4582_s0 + $0x5f8] sm:$0xff] }
 0x149   :  { %2043 = vmatmul.mubr.bf16.gmra.mrb[32].mxu1 %v2922_v0  ;;  %v2986_v0 = vcombine.low %v147_v7, %v151_v8  ;;  %v211_v7 = vld [vmem:[%s4582_s0 + $0x608] sm:$0xff]  ;;  %v213_v8 = vld [vmem:[%s4582_s0 + $0x618] sm:$0xff] }
 0x14a   :  { %2507 = vmatmul.mubr.bf16.gmra.mrb[32].mxu0 %v2926_v19  ;;  %2050 = vmatprep.mubr.bf16.mxu1 %v2931_v20  ;;  %v2990_v19 = vcombine.low %v149_v9, %v153_v10  ;;  %v2995_v20 = vcombine.high %v155_v15, %v159_v16  ;;  %v3042_v9 = vcombine.low %v203_v62, %v207_v63 }
 0x14b   :  { %2514 = vmatprep.mubr.bf16.mxu0 %v2935_v21  ;;  %v2999_v21 = vcombine.high %v157_v17, %v161_v18  ;;  %v3046_v10 = vcombine.low %v205_v1, %v209_v2 }
 0x151   :  { %2051 = vmatmul.mubr.bf16.gmra.mrb[36].mxu1 %v2930_v26  ;;  %v2994_v26 = vcombine.low %v155_v15, %v159_v16 }
 0x152   :  { %2515 = vmatmul.mubr.bf16.gmra.mrb[36].mxu0 %v2934_v27  ;;  %2058 = vmatprep.mubr.bf16.mxu1 %v2939_v28  ;;  %v2998_v27 = vcombine.low %v157_v17, %v161_v18  ;;  %v3003_v28 = vcombine.high %v163_v22, %v167_v23  ;;  %v4329_v17 = vld [vmem:[%s4583_s2] ss:$0 sm:$0xff] }
 0x153   :  { %2522 = vmatprep.mubr.bf16.mxu0 %v2943_v29  ;;  %v3007_v29 = vcombine.high %v165_v24, %v169_v25 }
 0x159   :  { %2059 = vmatmul.mubr.bf16.gmra.mrb[40].mxu1 %v2938_v34  ;;  %v3002_v34 = vcombine.low %v163_v22, %v167_v23 }
 0x15a   :  { %2523 = vmatmul.mubr.bf16.gmra.mrb[40].mxu0 %v2942_v35  ;;  %2066 = vmatprep.mubr.bf16.mxu1 %v2947_v36  ;;  %v3006_v35 = vcombine.low %v165_v24, %v169_v25  ;;  %v3011_v36 = vcombine.high %v171_v30, %v175_v31 }
 0x15b   :  { %2530 = vmatprep.mubr.bf16.mxu0 %v2951_v37  ;;  %v3015_v37 = vcombine.high %v173_v32, %v177_v33 }
 0x161   :  { %2067 = vmatmul.mubr.bf16.gmra.mrb[44].mxu1 %v2946_v42  ;;  %v3010_v42 = vcombine.low %v171_v30, %v175_v31 }
 0x162   :  { %2531 = vmatmul.mubr.bf16.gmra.mrb[44].mxu0 %v2950_v43  ;;  %2074 = vmatprep.mubr.bf16.mxu1 %v2955_v44  ;;  %v3014_v43 = vcombine.low %v173_v32, %v177_v33  ;;  %v3019_v44 = vcombine.high %v179_v38, %v183_v39 }
 0x163   :  { %2538 = vmatprep.mubr.bf16.mxu0 %v2959_v45  ;;  %v3023_v45 = vcombine.high %v181_v40, %v185_v41 }
 0x169   :  { %2075 = vmatmul.mubr.bf16.gmra.mrb[48].mxu1 %v2954_v50  ;;  %v3018_v50 = vcombine.low %v179_v38, %v183_v39 }
 0x16a   :  { %2539 = vmatmul.mubr.bf16.gmra.mrb[48].mxu0 %v2958_v51  ;;  %2082 = vmatprep.mubr.bf16.mxu1 %v2963_v52  ;;  %v3022_v51 = vcombine.low %v181_v40, %v185_v41  ;;  %v3027_v52 = vcombine.high %v187_v46, %v191_v47 }
 0x16b   :  { %2546 = vmatprep.mubr.bf16.mxu0 %v2967_v53  ;;  %v3031_v53 = vcombine.high %v189_v48, %v193_v49 }
 0x171   :  { %2083 = vmatmul.mubr.bf16.gmra.mrb[52].mxu1 %v2962_v58  ;;  %v3026_v58 = vcombine.low %v187_v46, %v191_v47 }
 0x172   :  { %2547 = vmatmul.mubr.bf16.gmra.mrb[52].mxu0 %v2966_v59  ;;  %2090 = vmatprep.mubr.bf16.mxu1 %v2971_v60  ;;  %v3030_v59 = vcombine.low %v189_v48, %v193_v49  ;;  %v3035_v60 = vcombine.high %v195_v54, %v199_v55 }
 0x173   :  { %2554 = vmatprep.mubr.bf16.mxu0 %v2975_v61  ;;  %v3039_v61 = vcombine.high %v197_v56, %v201_v57 }
 0x179   :  { %2091 = vmatmul.mubr.bf16.gmra.mrb[56].mxu1 %v2970_v3  ;;  %v3034_v3 = vcombine.low %v195_v54, %v199_v55 }
 0x17a   :  { %2555 = vmatmul.mubr.bf16.gmra.mrb[56].mxu0 %v2974_v4  ;;  %2098 = vmatprep.mubr.bf16.mxu1 %v2979_v5  ;;  %v3038_v4 = vcombine.low %v197_v56, %v201_v57  ;;  %v3043_v5 = vcombine.high %v203_v62, %v207_v63 }
 0x17b   :  { %2562 = vmatprep.mubr.bf16.mxu0 %v2983_v6  ;;  %v3047_v6 = vcombine.high %v205_v1, %v209_v2 }
 0x181   :  { %2099 = vmatmul.mubr.bf16.gmra.mrb[60].mxu1 %v2978_v11  ;;  %v3051_v11 = vcombine.high %v211_v7, %v211_v7 }
 0x182   :  { %2563 = vmatmul.mubr.bf16.gmra.mrb[60].mxu0 %v2982_v12  ;;  %2106 = vmatprep.mubr.bf16.mxu1 %v2987_v13  ;;  %v3055_v12 = vcombine.high %v213_v8, %v213_v8  ;;  %v3050_v13 = vcombine.low %v211_v7, %v211_v7 }
 0x183   :  { %2570 = vmatprep.mubr.bf16.mxu0 %v2991_v14  ;;  %v3054_v14 = vcombine.low %v213_v8, %v213_v8 }
 0x189   :  { %2107 = vmatmul.mubr.bf16.gmra.mrb[64].mxu1 %v2986_v0 }
 0x18a   :  { %2571 = vmatmul.mubr.bf16.gmra.mrb[64].mxu0 %v2990_v19  ;;  %2114 = vmatprep.mubr.bf16.mxu1 %v2995_v20 }
 0x18b   :  { %2578 = vmatprep.mubr.bf16.mxu0 %v2999_v21  ;;  %v4334_v21 = vld [vmem:[%s4584_s3] ss:$0 sm:$0xff] }
 0x191   :  { %2115 = vmatmul.mubr.bf16.gmra.mrb[68].mxu1 %v2994_v26 }
 0x192   :  { %2579 = vmatmul.mubr.bf16.gmra.mrb[68].mxu0 %v2998_v27  ;;  %2122 = vmatprep.mubr.bf16.mxu1 %v3003_v28 }
 0x193   :  { %2586 = vmatprep.mubr.bf16.mxu0 %v3007_v29 }
 0x199   :  { %2123 = vmatmul.mubr.bf16.gmra.mrb[72].mxu1 %v3002_v34 }
 0x19a   :  { %2587 = vmatmul.mubr.bf16.gmra.mrb[72].mxu0 %v3006_v35  ;;  %2130 = vmatprep.mubr.bf16.mxu1 %v3011_v36 }
 0x19b   :  { %2594 = vmatprep.mubr.bf16.mxu0 %v3015_v37 }
 0x1a1   :  { %2131 = vmatmul.mubr.bf16.gmra.mrb[76].mxu1 %v3010_v42 }
 0x1a2   :  { %2595 = vmatmul.mubr.bf16.gmra.mrb[76].mxu0 %v3014_v43  ;;  %2138 = vmatprep.mubr.bf16.mxu1 %v3019_v44 }
 0x1a3   :  { %2602 = vmatprep.mubr.bf16.mxu0 %v3023_v45 }
 0x1a9   :  { %2139 = vmatmul.mubr.bf16.gmra.mrb[80].mxu1 %v3018_v50 }
 0x1aa   :  { %2603 = vmatmul.mubr.bf16.gmra.mrb[80].mxu0 %v3022_v51  ;;  %2146 = vmatprep.mubr.bf16.mxu1 %v3027_v52 }
 0x1ab   :  { %2610 = vmatprep.mubr.bf16.mxu0 %v3031_v53 }
 0x1b1   :  { %2147 = vmatmul.mubr.bf16.gmra.mrb[84].mxu1 %v3026_v58 }
 0x1b2   :  { %2611 = vmatmul.mubr.bf16.gmra.mrb[84].mxu0 %v3030_v59  ;;  %2154 = vmatprep.mubr.bf16.mxu1 %v3035_v60 }
 0x1b3   :  { %2618 = vmatprep.mubr.bf16.mxu0 %v3039_v61 }
 0x1b9   :  { %2155 = vmatmul.mubr.bf16.gmra.mrb[88].mxu1 %v3034_v3 }
 0x1ba   :  { %2619 = vmatmul.mubr.bf16.gmra.mrb[88].mxu0 %v3038_v4  ;;  %2162 = vmatprep.mubr.bf16.mxu1 %v3043_v5 }
 0x1bb   :  { %2626 = vmatprep.mubr.bf16.mxu0 %v3047_v6 }
 0x1c1   :  { %2163 = vmatmul.mubr.bf16.gmra.mrb[92].mxu1 %v3042_v9 }
 0x1c2   :  { %2627 = vmatmul.mubr.bf16.gmra.mrb[92].mxu0 %v3046_v10  ;;  %2170 = vmatprep.mubr.bf16.mxu1 %v3051_v11 }
 0x1c3   :  { %2634 = vmatprep.mubr.bf16.mxu0 %v3055_v12 }
 0x1c9   :  { %2171 = vmatmul.mubr.bf16.gmra.mrb[96].mxu1 %v3050_v13 }
 0x1ca   :  { %2635 = vmatmul.mubr.bf16.gmra.mrb[96].mxu0 %v3054_v14 }
 0x1dc   :  { %v1980_v15 = vpop.f32.mrb[0].mxu1 }
 0x1dd   :  { %v2444_v16 = vpop.f32.mrb[0].mxu0  ;;  %v1982_v18 = vpop.f32.mrb[1].mxu1 }
 0x1de   :  { %v3122_v0 = vadd.f32 %v2444_v16, %v1980_v15  ;;  %v2446_v19 = vpop.f32.mrb[1].mxu0  ;;  %v1983_v20 = vpop.f32.mrb[2].mxu1 }
 0x1df   :  { %v2447_v22 = vpop.f32.mrb[2].mxu0  ;;  %v1985_v23 = vpop.f32.mrb[3].mxu1 }
 0x1e0   :  { %v2649_v24 = vmul.f32 %v3122_v0, %v4329_v17  ;;  %v3123_v25 = vadd.f32 %v2447_v22, %v1983_v20  ;;  %v2449_v26 = vpop.f32.mrb[3].mxu0 }
 0x1e2   :  { %v2705_v27 = vadd.f32 %v4334_v21, %v2649_v24  ;;  %v2650_v28 = vmul.f32 %v3123_v25, %v4329_v17 }
 0x1e4   :  { %v2754_v29 = vmax.f32 %v2705_v27, 0.0  ;;  %v2706_v30 = vadd.f32 %v4334_v21, %v2650_v28  ;;  %v1988_v31 = vpop.f32.mrb[4].mxu1 }
 0x1e5   :  { %v2452_v32 = vpop.f32.mrb[4].mxu0  ;;  %v1990_v33 = vpop.f32.mrb[5].mxu1 }
 0x1e6   :  { %2803 = vst [vmem:[%s4585_s4] sm:$0xff] %v2754_v29  ;;  %v2755_v34 = vmax.f32 %v2706_v30, 0.0  ;;  %v3124_v35 = vadd.f32 %v2452_v32, %v1988_v31  ;;  %v2454_v36 = vpop.f32.mrb[5].mxu0  ;;  %v1991_v37 = vpop.f32.mrb[6].mxu1 }
 0x1e7   :  { %v2455_v38 = vpop.f32.mrb[6].mxu0  ;;  %v1993_v39 = vpop.f32.mrb[7].mxu1 }
 0x1e8   :  { %2804 = vst [vmem:[%s4585_s4 + $0x8] sm:$0xff] %v2755_v34  ;;  %v2651_v40 = vmul.f32 %v3124_v35, %v4329_v17  ;;  %v3125_v41 = vadd.f32 %v2455_v38, %v1991_v37  ;;  %v2457_v42 = vpop.f32.mrb[7].mxu0 }
 0x1ea   :  { %v2707_v43 = vadd.f32 %v4334_v21, %v2651_v40  ;;  %v2652_v44 = vmul.f32 %v3125_v41, %v4329_v17 }
 0x1ec   :  { %v2756_v45 = vmax.f32 %v2707_v43, 0.0  ;;  %v2708_v46 = vadd.f32 %v4334_v21, %v2652_v44  ;;  %v1996_v47 = vpop.f32.mrb[8].mxu1 }
 0x1ed   :  { %v2460_v48 = vpop.f32.mrb[8].mxu0  ;;  %v1998_v49 = vpop.f32.mrb[9].mxu1 }
 0x1ee   :  { %2805 = vst [vmem:[%s4585_s4 + $0x10] sm:$0xff] %v2756_v45  ;;  %v2757_v50 = vmax.f32 %v2708_v46, 0.0  ;;  %v3126_v51 = vadd.f32 %v2460_v48, %v1996_v47  ;;  %v2462_v52 = vpop.f32.mrb[9].mxu0  ;;  %v1999_v53 = vpop.f32.mrb[10].mxu1 }
 0x1ef   :  { %v2463_v54 = vpop.f32.mrb[10].mxu0  ;;  %v2001_v55 = vpop.f32.mrb[11].mxu1 }
 0x1f0   :  { %2806 = vst [vmem:[%s4585_s4 + $0x18] sm:$0xff] %v2757_v50  ;;  %v2653_v56 = vmul.f32 %v3126_v51, %v4329_v17  ;;  %v3127_v57 = vadd.f32 %v2463_v54, %v1999_v53  ;;  %v2465_v58 = vpop.f32.mrb[11].mxu0 }
 0x1f2   :  { %v2709_v59 = vadd.f32 %v4334_v21, %v2653_v56  ;;  %v2654_v60 = vmul.f32 %v3127_v57, %v4329_v17 }
 0x1f4   :  { %v2758_v61 = vmax.f32 %v2709_v59, 0.0  ;;  %v2710_v62 = vadd.f32 %v4334_v21, %v2654_v60  ;;  %v2004_v63 = vpop.f32.mrb[12].mxu1 }
 0x1f5   :  { %v2468_v1 = vpop.f32.mrb[12].mxu0  ;;  %v2006_v2 = vpop.f32.mrb[13].mxu1 }
 0x1f6   :  { %2807 = vst [vmem:[%s4585_s4 + $0x20] sm:$0xff] %v2758_v61  ;;  %v2759_v3 = vmax.f32 %v2710_v62, 0.0  ;;  %v3128_v4 = vadd.f32 %v2468_v1, %v2004_v63  ;;  %v2470_v5 = vpop.f32.mrb[13].mxu0  ;;  %v2007_v6 = vpop.f32.mrb[14].mxu1 }
 0x1f7   :  { %v2471_v7 = vpop.f32.mrb[14].mxu0  ;;  %v2009_v8 = vpop.f32.mrb[15].mxu1 }
 0x1f8   :  { %2808 = vst [vmem:[%s4585_s4 + $0x28] sm:$0xff] %v2759_v3  ;;  %v2655_v9 = vmul.f32 %v3128_v4, %v4329_v17  ;;  %v3129_v10 = vadd.f32 %v2471_v7, %v2007_v6  ;;  %v2473_v11 = vpop.f32.mrb[15].mxu0 }
 0x1fa   :  { %v2711_v12 = vadd.f32 %v4334_v21, %v2655_v9  ;;  %v2656_v13 = vmul.f32 %v3129_v10, %v4329_v17 }
 0x1fc   :  { %v2760_v14 = vmax.f32 %v2711_v12, 0.0  ;;  %v2712_v15 = vadd.f32 %v4334_v21, %v2656_v13  ;;  %v2012_v16 = vpop.f32.mrb[16].mxu1 }
 0x1fd   :  { %v2476_v18 = vpop.f32.mrb[16].mxu0  ;;  %v2014_v0 = vpop.f32.mrb[17].mxu1 }
 0x1fe   :  { %2809 = vst [vmem:[%s4585_s4 + $0x30] sm:$0xff] %v2760_v14  ;;  %v2761_v19 = vmax.f32 %v2712_v15, 0.0  ;;  %v3130_v20 = vadd.f32 %v2476_v18, %v2012_v16  ;;  %v2478_v22 = vpop.f32.mrb[17].mxu0  ;;  %v2015_v23 = vpop.f32.mrb[18].mxu1 }
 0x1ff   :  { %v2479_v24 = vpop.f32.mrb[18].mxu0  ;;  %v2017_v25 = vpop.f32.mrb[19].mxu1 }
 0x200   :  { %2810 = vst [vmem:[%s4585_s4 + $0x38] sm:$0xff] %v2761_v19  ;;  %v2657_v26 = vmul.f32 %v3130_v20, %v4329_v17  ;;  %v3131_v27 = vadd.f32 %v2479_v24, %v2015_v23  ;;  %v2481_v28 = vpop.f32.mrb[19].mxu0 }
 0x202   :  { %v2713_v29 = vadd.f32 %v4334_v21, %v2657_v26  ;;  %v2658_v30 = vmul.f32 %v3131_v27, %v4329_v17 }
 0x204   :  { %v2762_v31 = vmax.f32 %v2713_v29, 0.0  ;;  %v2714_v32 = vadd.f32 %v4334_v21, %v2658_v30  ;;  %v2020_v33 = vpop.f32.mrb[20].mxu1 }
 0x205   :  { %v2484_v34 = vpop.f32.mrb[20].mxu0  ;;  %v2022_v35 = vpop.f32.mrb[21].mxu1 }
 0x206   :  { %2811 = vst [vmem:[%s4585_s4 + $0x40] sm:$0xff] %v2762_v31  ;;  %v2763_v36 = vmax.f32 %v2714_v32, 0.0  ;;  %v3132_v37 = vadd.f32 %v2484_v34, %v2020_v33  ;;  %v2486_v38 = vpop.f32.mrb[21].mxu0  ;;  %v2023_v39 = vpop.f32.mrb[22].mxu1 }
 0x207   :  { %v2487_v40 = vpop.f32.mrb[22].mxu0  ;;  %v2025_v41 = vpop.f32.mrb[23].mxu1 }
 0x208   :  { %2812 = vst [vmem:[%s4585_s4 + $0x48] sm:$0xff] %v2763_v36  ;;  %v2659_v42 = vmul.f32 %v3132_v37, %v4329_v17  ;;  %v3133_v43 = vadd.f32 %v2487_v40, %v2023_v39  ;;  %v2489_v44 = vpop.f32.mrb[23].mxu0 }
 0x20a   :  { %v2715_v45 = vadd.f32 %v4334_v21, %v2659_v42  ;;  %v2660_v46 = vmul.f32 %v3133_v43, %v4329_v17 }
 0x20c   :  { %v2764_v47 = vmax.f32 %v2715_v45, 0.0  ;;  %v2716_v48 = vadd.f32 %v4334_v21, %v2660_v46  ;;  %v2028_v49 = vpop.f32.mrb[24].mxu1 }
 0x20d   :  { %v2492_v50 = vpop.f32.mrb[24].mxu0  ;;  %v2030_v51 = vpop.f32.mrb[25].mxu1 }
 0x20e   :  { %2813 = vst [vmem:[%s4585_s4 + $0x50] sm:$0xff] %v2764_v47  ;;  %v2765_v52 = vmax.f32 %v2716_v48, 0.0  ;;  %v3134_v53 = vadd.f32 %v2492_v50, %v2028_v49  ;;  %v2494_v54 = vpop.f32.mrb[25].mxu0  ;;  %v2031_v55 = vpop.f32.mrb[26].mxu1 }
 0x20f   :  { %v2495_v56 = vpop.f32.mrb[26].mxu0  ;;  %v2033_v57 = vpop.f32.mrb[27].mxu1 }
 0x210   :  { %2814 = vst [vmem:[%s4585_s4 + $0x58] sm:$0xff] %v2765_v52  ;;  %v2661_v58 = vmul.f32 %v3134_v53, %v4329_v17  ;;  %v3135_v59 = vadd.f32 %v2495_v56, %v2031_v55  ;;  %v2497_v60 = vpop.f32.mrb[27].mxu0 }
 0x212   :  { %v2717_v61 = vadd.f32 %v4334_v21, %v2661_v58  ;;  %v2662_v62 = vmul.f32 %v3135_v59, %v4329_v17 }
 0x214   :  { %v2766_v63 = vmax.f32 %v2717_v61, 0.0  ;;  %v2718_v1 = vadd.f32 %v4334_v21, %v2662_v62  ;;  %v2036_v2 = vpop.f32.mrb[28].mxu1 }
 0x215   :  { %v2500_v3 = vpop.f32.mrb[28].mxu0  ;;  %v2038_v4 = vpop.f32.mrb[29].mxu1 }
 0x216   :  { %2815 = vst [vmem:[%s4585_s4 + $0x60] sm:$0xff] %v2766_v63  ;;  %v2767_v5 = vmax.f32 %v2718_v1, 0.0  ;;  %v3136_v6 = vadd.f32 %v2500_v3, %v2036_v2  ;;  %v2502_v7 = vpop.f32.mrb[29].mxu0  ;;  %v2039_v8 = vpop.f32.mrb[30].mxu1 }
 0x217   :  { %v2503_v9 = vpop.f32.mrb[30].mxu0  ;;  %v2041_v10 = vpop.f32.mrb[31].mxu1 }
 0x218   :  { %2816 = vst [vmem:[%s4585_s4 + $0x68] sm:$0xff] %v2767_v5  ;;  %v2663_v11 = vmul.f32 %v3136_v6, %v4329_v17  ;;  %v3137_v12 = vadd.f32 %v2503_v9, %v2039_v8  ;;  %v2505_v13 = vpop.f32.mrb[31].mxu0 }
 0x21a   :  { %v2719_v14 = vadd.f32 %v4334_v21, %v2663_v11  ;;  %v2664_v15 = vmul.f32 %v3137_v12, %v4329_v17 }
 0x21c   :  { %v2768_v16 = vmax.f32 %v2719_v14, 0.0  ;;  %v2720_v18 = vadd.f32 %v4334_v21, %v2664_v15  ;;  %v2044_v0 = vpop.f32.mrb[32].mxu1 }
 0x21d   :  { %v2508_v19 = vpop.f32.mrb[32].mxu0  ;;  %v2046_v20 = vpop.f32.mrb[33].mxu1 }
 0x21e   :  { %2817 = vst [vmem:[%s4585_s4 + $0x70] sm:$0xff] %v2768_v16  ;;  %v2769_v22 = vmax.f32 %v2720_v18, 0.0  ;;  %v3138_v23 = vadd.f32 %v2508_v19, %v2044_v0  ;;  %v2510_v24 = vpop.f32.mrb[33].mxu0  ;;  %v2047_v25 = vpop.f32.mrb[34].mxu1 }
 0x21f   :  { %v2511_v26 = vpop.f32.mrb[34].mxu0  ;;  %v2049_v27 = vpop.f32.mrb[35].mxu1 }
 0x220   :  { %2818 = vst [vmem:[%s4585_s4 + $0x78] sm:$0xff] %v2769_v22  ;;  %v2665_v28 = vmul.f32 %v3138_v23, %v4329_v17  ;;  %v3139_v29 = vadd.f32 %v2511_v26, %v2047_v25  ;;  %v2513_v30 = vpop.f32.mrb[35].mxu0 }
 0x222   :  { %v2721_v31 = vadd.f32 %v4334_v21, %v2665_v28  ;;  %v2666_v32 = vmul.f32 %v3139_v29, %v4329_v17 }
 0x224   :  { %v2770_v33 = vmax.f32 %v2721_v31, 0.0  ;;  %v2722_v34 = vadd.f32 %v4334_v21, %v2666_v32  ;;  %v2052_v35 = vpop.f32.mrb[36].mxu1 }
 0x225   :  { %v2516_v36 = vpop.f32.mrb[36].mxu0  ;;  %v2054_v37 = vpop.f32.mrb[37].mxu1 }
 0x226   :  { %2819 = vst [vmem:[%s4585_s4 + $0x80] sm:$0xff] %v2770_v33  ;;  %v2771_v38 = vmax.f32 %v2722_v34, 0.0  ;;  %v3140_v39 = vadd.f32 %v2516_v36, %v2052_v35  ;;  %v2518_v40 = vpop.f32.mrb[37].mxu0  ;;  %v2055_v41 = vpop.f32.mrb[38].mxu1 }
 0x227   :  { %v2519_v42 = vpop.f32.mrb[38].mxu0  ;;  %v2057_v43 = vpop.f32.mrb[39].mxu1 }
 0x228   :  { %2820 = vst [vmem:[%s4585_s4 + $0x88] sm:$0xff] %v2771_v38  ;;  %v2667_v44 = vmul.f32 %v3140_v39, %v4329_v17  ;;  %v3141_v45 = vadd.f32 %v2519_v42, %v2055_v41  ;;  %v2521_v46 = vpop.f32.mrb[39].mxu0 }
 0x22a   :  { %v2723_v47 = vadd.f32 %v4334_v21, %v2667_v44  ;;  %v2668_v48 = vmul.f32 %v3141_v45, %v4329_v17 }
 0x22c   :  { %v2772_v49 = vmax.f32 %v2723_v47, 0.0  ;;  %v2724_v50 = vadd.f32 %v4334_v21, %v2668_v48  ;;  %v2060_v51 = vpop.f32.mrb[40].mxu1 }
 0x22d   :  { %v2524_v52 = vpop.f32.mrb[40].mxu0  ;;  %v2062_v53 = vpop.f32.mrb[41].mxu1 }
 0x22e   :  { %2821 = vst [vmem:[%s4585_s4 + $0x90] sm:$0xff] %v2772_v49  ;;  %v2773_v54 = vmax.f32 %v2724_v50, 0.0  ;;  %v3142_v55 = vadd.f32 %v2524_v52, %v2060_v51  ;;  %v2526_v56 = vpop.f32.mrb[41].mxu0  ;;  %v2063_v57 = vpop.f32.mrb[42].mxu1 }
 0x22f   :  { %v2527_v58 = vpop.f32.mrb[42].mxu0  ;;  %v2065_v59 = vpop.f32.mrb[43].mxu1 }
 0x230   :  { %2822 = vst [vmem:[%s4585_s4 + $0x98] sm:$0xff] %v2773_v54  ;;  %v2669_v60 = vmul.f32 %v3142_v55, %v4329_v17  ;;  %v3143_v61 = vadd.f32 %v2527_v58, %v2063_v57  ;;  %v2529_v62 = vpop.f32.mrb[43].mxu0 }
 0x232   :  { %v2725_v63 = vadd.f32 %v4334_v21, %v2669_v60  ;;  %v2670_v1 = vmul.f32 %v3143_v61, %v4329_v17 }
 0x234   :  { %v2774_v2 = vmax.f32 %v2725_v63, 0.0  ;;  %v2726_v3 = vadd.f32 %v4334_v21, %v2670_v1  ;;  %v2068_v4 = vpop.f32.mrb[44].mxu1 }
 0x235   :  { %v2532_v5 = vpop.f32.mrb[44].mxu0  ;;  %v2070_v6 = vpop.f32.mrb[45].mxu1 }
 0x236   :  { %2823 = vst [vmem:[%s4585_s4 + $0xa0] sm:$0xff] %v2774_v2  ;;  %v2775_v7 = vmax.f32 %v2726_v3, 0.0  ;;  %v3144_v8 = vadd.f32 %v2532_v5, %v2068_v4  ;;  %v2534_v9 = vpop.f32.mrb[45].mxu0  ;;  %v2071_v10 = vpop.f32.mrb[46].mxu1 }
 0x237   :  { %v2535_v11 = vpop.f32.mrb[46].mxu0  ;;  %v2073_v12 = vpop.f32.mrb[47].mxu1 }
 0x238   :  { %2824 = vst [vmem:[%s4585_s4 + $0xa8] sm:$0xff] %v2775_v7  ;;  %v2671_v13 = vmul.f32 %v3144_v8, %v4329_v17  ;;  %v3145_v14 = vadd.f32 %v2535_v11, %v2071_v10  ;;  %v2537_v15 = vpop.f32.mrb[47].mxu0 }
 0x23a   :  { %v2727_v16 = vadd.f32 %v4334_v21, %v2671_v13  ;;  %v2672_v18 = vmul.f32 %v3145_v14, %v4329_v17 }
 0x23c   :  { %v2776_v0 = vmax.f32 %v2727_v16, 0.0  ;;  %v2728_v19 = vadd.f32 %v4334_v21, %v2672_v18  ;;  %v2076_v20 = vpop.f32.mrb[48].mxu1 }
 0x23d   :  { %v2540_v22 = vpop.f32.mrb[48].mxu0  ;;  %v2078_v23 = vpop.f32.mrb[49].mxu1 }
 0x23e   :  { %2825 = vst [vmem:[%s4585_s4 + $0xb0] sm:$0xff] %v2776_v0  ;;  %v2777_v24 = vmax.f32 %v2728_v19, 0.0  ;;  %v3146_v25 = vadd.f32 %v2540_v22, %v2076_v20  ;;  %v2542_v26 = vpop.f32.mrb[49].mxu0  ;;  %v2079_v27 = vpop.f32.mrb[50].mxu1 }
 0x23f   :  { %v2543_v28 = vpop.f32.mrb[50].mxu0  ;;  %v2081_v29 = vpop.f32.mrb[51].mxu1 }
 0x240   :  { %2826 = vst [vmem:[%s4585_s4 + $0xb8] sm:$0xff] %v2777_v24  ;;  %v2673_v30 = vmul.f32 %v3146_v25, %v4329_v17  ;;  %v3147_v31 = vadd.f32 %v2543_v28, %v2079_v27  ;;  %v2545_v32 = vpop.f32.mrb[51].mxu0 }
 0x242   :  { %v2729_v33 = vadd.f32 %v4334_v21, %v2673_v30  ;;  %v2674_v34 = vmul.f32 %v3147_v31, %v4329_v17 }
 0x244   :  { %v2778_v35 = vmax.f32 %v2729_v33, 0.0  ;;  %v2730_v36 = vadd.f32 %v4334_v21, %v2674_v34  ;;  %v2084_v37 = vpop.f32.mrb[52].mxu1 }
 0x245   :  { %v2548_v38 = vpop.f32.mrb[52].mxu0  ;;  %v2086_v39 = vpop.f32.mrb[53].mxu1 }
 0x246   :  { %2827 = vst [vmem:[%s4585_s4 + $0xc0] sm:$0xff] %v2778_v35  ;;  %v2779_v40 = vmax.f32 %v2730_v36, 0.0  ;;  %v3148_v41 = vadd.f32 %v2548_v38, %v2084_v37  ;;  %v2550_v42 = vpop.f32.mrb[53].mxu0  ;;  %v2087_v43 = vpop.f32.mrb[54].mxu1 }
 0x247   :  { %v2551_v44 = vpop.f32.mrb[54].mxu0  ;;  %v2089_v45 = vpop.f32.mrb[55].mxu1 }
 0x248   :  { %2828 = vst [vmem:[%s4585_s4 + $0xc8] sm:$0xff] %v2779_v40  ;;  %v2675_v46 = vmul.f32 %v3148_v41, %v4329_v17  ;;  %v3149_v47 = vadd.f32 %v2551_v44, %v2087_v43  ;;  %v2553_v48 = vpop.f32.mrb[55].mxu0 }
 0x24a   :  { %v2731_v49 = vadd.f32 %v4334_v21, %v2675_v46  ;;  %v2676_v50 = vmul.f32 %v3149_v47, %v4329_v17 }
 0x24c   :  { %v2780_v51 = vmax.f32 %v2731_v49, 0.0  ;;  %v2732_v52 = vadd.f32 %v4334_v21, %v2676_v50  ;;  %v2092_v53 = vpop.f32.mrb[56].mxu1 }
 0x24d   :  { %v2556_v54 = vpop.f32.mrb[56].mxu0  ;;  %v2094_v55 = vpop.f32.mrb[57].mxu1 }
 0x24e   :  { %2829 = vst [vmem:[%s4585_s4 + $0xd0] sm:$0xff] %v2780_v51  ;;  %v2781_v56 = vmax.f32 %v2732_v52, 0.0  ;;  %v3150_v57 = vadd.f32 %v2556_v54, %v2092_v53  ;;  %v2558_v58 = vpop.f32.mrb[57].mxu0  ;;  %v2095_v59 = vpop.f32.mrb[58].mxu1 }
 0x24f   :  { %v2559_v60 = vpop.f32.mrb[58].mxu0  ;;  %v2097_v61 = vpop.f32.mrb[59].mxu1 }
 0x250   :  { %2830 = vst [vmem:[%s4585_s4 + $0xd8] sm:$0xff] %v2781_v56  ;;  %v2677_v62 = vmul.f32 %v3150_v57, %v4329_v17  ;;  %v3151_v63 = vadd.f32 %v2559_v60, %v2095_v59  ;;  %v2561_v1 = vpop.f32.mrb[59].mxu0 }
 0x252   :  { %v2733_v2 = vadd.f32 %v4334_v21, %v2677_v62  ;;  %v2678_v3 = vmul.f32 %v3151_v63, %v4329_v17 }
 0x254   :  { %v2782_v4 = vmax.f32 %v2733_v2, 0.0  ;;  %v2734_v5 = vadd.f32 %v4334_v21, %v2678_v3  ;;  %v2100_v6 = vpop.f32.mrb[60].mxu1 }
 0x255   :  { %v2564_v7 = vpop.f32.mrb[60].mxu0  ;;  %v2102_v8 = vpop.f32.mrb[61].mxu1 }
 0x256   :  { %2831 = vst [vmem:[%s4585_s4 + $0xe0] sm:$0xff] %v2782_v4  ;;  %v2783_v9 = vmax.f32 %v2734_v5, 0.0  ;;  %v3152_v10 = vadd.f32 %v2564_v7, %v2100_v6  ;;  %v2566_v11 = vpop.f32.mrb[61].mxu0  ;;  %v2103_v12 = vpop.f32.mrb[62].mxu1 }
 0x257   :  { %v2567_v13 = vpop.f32.mrb[62].mxu0  ;;  %v2105_v14 = vpop.f32.mrb[63].mxu1 }
 0x258   :  { %2832 = vst [vmem:[%s4585_s4 + $0xe8] sm:$0xff] %v2783_v9  ;;  %v2679_v15 = vmul.f32 %v3152_v10, %v4329_v17  ;;  %v3153_v16 = vadd.f32 %v2567_v13, %v2103_v12  ;;  %v2569_v18 = vpop.f32.mrb[63].mxu0 }
 0x25a   :  { %v2735_v0 = vadd.f32 %v4334_v21, %v2679_v15  ;;  %v2680_v19 = vmul.f32 %v3153_v16, %v4329_v17 }
 0x25c   :  { %v2784_v20 = vmax.f32 %v2735_v0, 0.0  ;;  %v2736_v22 = vadd.f32 %v4334_v21, %v2680_v19  ;;  %v2108_v23 = vpop.f32.mrb[64].mxu1 }
 0x25d   :  { %v2572_v24 = vpop.f32.mrb[64].mxu0  ;;  %v2110_v25 = vpop.f32.mrb[65].mxu1 }
 0x25e   :  { %2833 = vst [vmem:[%s4585_s4 + $0xf0] sm:$0xff] %v2784_v20  ;;  %v2785_v26 = vmax.f32 %v2736_v22, 0.0  ;;  %v3154_v27 = vadd.f32 %v2572_v24, %v2108_v23  ;;  %v2574_v28 = vpop.f32.mrb[65].mxu0  ;;  %v2111_v29 = vpop.f32.mrb[66].mxu1 }
 0x25f   :  { %v2575_v30 = vpop.f32.mrb[66].mxu0  ;;  %v2113_v31 = vpop.f32.mrb[67].mxu1 }
 0x260   :  { %2834 = vst [vmem:[%s4585_s4 + $0xf8] sm:$0xff] %v2785_v26  ;;  %v2681_v32 = vmul.f32 %v3154_v27, %v4329_v17  ;;  %v3155_v33 = vadd.f32 %v2575_v30, %v2111_v29  ;;  %v2577_v34 = vpop.f32.mrb[67].mxu0 }
 0x262   :  { %v2737_v35 = vadd.f32 %v4334_v21, %v2681_v32  ;;  %v2682_v36 = vmul.f32 %v3155_v33, %v4329_v17 }
 0x264   :  { %v2786_v37 = vmax.f32 %v2737_v35, 0.0  ;;  %v2738_v38 = vadd.f32 %v4334_v21, %v2682_v36  ;;  %v2116_v39 = vpop.f32.mrb[68].mxu1 }
 0x265   :  { %v2580_v40 = vpop.f32.mrb[68].mxu0  ;;  %v2118_v41 = vpop.f32.mrb[69].mxu1 }
 0x266   :  { %2835 = vst [vmem:[%s4585_s4 + $0x100] sm:$0xff] %v2786_v37  ;;  %v2787_v42 = vmax.f32 %v2738_v38, 0.0  ;;  %v3156_v43 = vadd.f32 %v2580_v40, %v2116_v39  ;;  %v2582_v44 = vpop.f32.mrb[69].mxu0  ;;  %v2119_v45 = vpop.f32.mrb[70].mxu1 }
 0x267   :  { %v2583_v46 = vpop.f32.mrb[70].mxu0  ;;  %v2121_v47 = vpop.f32.mrb[71].mxu1 }
 0x268   :  { %2836 = vst [vmem:[%s4585_s4 + $0x108] sm:$0xff] %v2787_v42  ;;  %v2683_v48 = vmul.f32 %v3156_v43, %v4329_v17  ;;  %v3157_v49 = vadd.f32 %v2583_v46, %v2119_v45  ;;  %v2585_v50 = vpop.f32.mrb[71].mxu0 }
 0x26a   :  { %v2739_v51 = vadd.f32 %v4334_v21, %v2683_v48  ;;  %v2684_v52 = vmul.f32 %v3157_v49, %v4329_v17 }
 0x26c   :  { %v2788_v53 = vmax.f32 %v2739_v51, 0.0  ;;  %v2740_v54 = vadd.f32 %v4334_v21, %v2684_v52  ;;  %v2124_v55 = vpop.f32.mrb[72].mxu1 }
 0x26d   :  { %v2588_v56 = vpop.f32.mrb[72].mxu0  ;;  %v2126_v57 = vpop.f32.mrb[73].mxu1 }
 0x26e   :  { %2837 = vst [vmem:[%s4585_s4 + $0x110] sm:$0xff] %v2788_v53  ;;  %v2789_v58 = vmax.f32 %v2740_v54, 0.0  ;;  %v3158_v59 = vadd.f32 %v2588_v56, %v2124_v55  ;;  %v2590_v60 = vpop.f32.mrb[73].mxu0  ;;  %v2127_v61 = vpop.f32.mrb[74].mxu1 }
 0x26f   :  { %v2591_v62 = vpop.f32.mrb[74].mxu0  ;;  %v2129_v63 = vpop.f32.mrb[75].mxu1 }
 0x270   :  { %2838 = vst [vmem:[%s4585_s4 + $0x118] sm:$0xff] %v2789_v58  ;;  %v2685_v1 = vmul.f32 %v3158_v59, %v4329_v17  ;;  %v3159_v2 = vadd.f32 %v2591_v62, %v2127_v61  ;;  %v2593_v3 = vpop.f32.mrb[75].mxu0 }
 0x272   :  { %v2741_v4 = vadd.f32 %v4334_v21, %v2685_v1  ;;  %v2686_v5 = vmul.f32 %v3159_v2, %v4329_v17 }
 0x274   :  { %v2790_v6 = vmax.f32 %v2741_v4, 0.0  ;;  %v2742_v7 = vadd.f32 %v4334_v21, %v2686_v5  ;;  %v2132_v8 = vpop.f32.mrb[76].mxu1 }
 0x275   :  { %v2596_v9 = vpop.f32.mrb[76].mxu0  ;;  %v2134_v10 = vpop.f32.mrb[77].mxu1 }
 0x276   :  { %2839 = vst [vmem:[%s4585_s4 + $0x120] sm:$0xff] %v2790_v6  ;;  %v2791_v11 = vmax.f32 %v2742_v7, 0.0  ;;  %v3160_v12 = vadd.f32 %v2596_v9, %v2132_v8  ;;  %v2598_v13 = vpop.f32.mrb[77].mxu0  ;;  %v2135_v14 = vpop.f32.mrb[78].mxu1 }
 0x277   :  { %v2599_v15 = vpop.f32.mrb[78].mxu0  ;;  %v2137_v16 = vpop.f32.mrb[79].mxu1 }
 0x278   :  { %2840 = vst [vmem:[%s4585_s4 + $0x128] sm:$0xff] %v2791_v11  ;;  %v2687_v18 = vmul.f32 %v3160_v12, %v4329_v17  ;;  %v3161_v0 = vadd.f32 %v2599_v15, %v2135_v14  ;;  %v2601_v19 = vpop.f32.mrb[79].mxu0 }
 0x27a   :  { %v2743_v20 = vadd.f32 %v4334_v21, %v2687_v18  ;;  %v2688_v22 = vmul.f32 %v3161_v0, %v4329_v17 }
 0x27c   :  { %v2792_v23 = vmax.f32 %v2743_v20, 0.0  ;;  %v2744_v24 = vadd.f32 %v4334_v21, %v2688_v22  ;;  %v2140_v25 = vpop.f32.mrb[80].mxu1 }
 0x27d   :  { %v2604_v26 = vpop.f32.mrb[80].mxu0  ;;  %v2142_v27 = vpop.f32.mrb[81].mxu1 }
 0x27e   :  { %2841 = vst [vmem:[%s4585_s4 + $0x130] sm:$0xff] %v2792_v23  ;;  %v2793_v28 = vmax.f32 %v2744_v24, 0.0  ;;  %v3162_v29 = vadd.f32 %v2604_v26, %v2140_v25  ;;  %v2606_v30 = vpop.f32.mrb[81].mxu0  ;;  %v2143_v31 = vpop.f32.mrb[82].mxu1 }
 0x27f   :  { %v2607_v32 = vpop.f32.mrb[82].mxu0  ;;  %v2145_v33 = vpop.f32.mrb[83].mxu1 }
 0x280   :  { %2842 = vst [vmem:[%s4585_s4 + $0x138] sm:$0xff] %v2793_v28  ;;  %v2689_v34 = vmul.f32 %v3162_v29, %v4329_v17  ;;  %v3163_v35 = vadd.f32 %v2607_v32, %v2143_v31  ;;  %v2609_v36 = vpop.f32.mrb[83].mxu0 }
 0x282   :  { %v2745_v37 = vadd.f32 %v4334_v21, %v2689_v34  ;;  %v2690_v38 = vmul.f32 %v3163_v35, %v4329_v17 }
 0x284   :  { %v2794_v39 = vmax.f32 %v2745_v37, 0.0  ;;  %v2746_v40 = vadd.f32 %v4334_v21, %v2690_v38  ;;  %v2148_v41 = vpop.f32.mrb[84].mxu1 }
 0x285   :  { %v2612_v42 = vpop.f32.mrb[84].mxu0  ;;  %v2150_v43 = vpop.f32.mrb[85].mxu1 }
 0x286   :  { %2843 = vst [vmem:[%s4585_s4 + $0x140] sm:$0xff] %v2794_v39  ;;  %v2795_v44 = vmax.f32 %v2746_v40, 0.0  ;;  %v3164_v45 = vadd.f32 %v2612_v42, %v2148_v41  ;;  %v2614_v46 = vpop.f32.mrb[85].mxu0  ;;  %v2151_v47 = vpop.f32.mrb[86].mxu1 }
 0x287   :  { %v2615_v48 = vpop.f32.mrb[86].mxu0  ;;  %v2153_v49 = vpop.f32.mrb[87].mxu1 }
 0x288   :  { %2844 = vst [vmem:[%s4585_s4 + $0x148] sm:$0xff] %v2795_v44  ;;  %v2691_v50 = vmul.f32 %v3164_v45, %v4329_v17  ;;  %v3165_v51 = vadd.f32 %v2615_v48, %v2151_v47  ;;  %v2617_v52 = vpop.f32.mrb[87].mxu0 }
 0x28a   :  { %v2747_v53 = vadd.f32 %v4334_v21, %v2691_v50  ;;  %v2692_v54 = vmul.f32 %v3165_v51, %v4329_v17 }
 0x28c   :  { %v2796_v55 = vmax.f32 %v2747_v53, 0.0  ;;  %v2748_v56 = vadd.f32 %v4334_v21, %v2692_v54  ;;  %v2156_v57 = vpop.f32.mrb[88].mxu1 }
 0x28d   :  { %v2620_v58 = vpop.f32.mrb[88].mxu0  ;;  %v2158_v59 = vpop.f32.mrb[89].mxu1 }
 0x28e   :  { %2845 = vst [vmem:[%s4585_s4 + $0x150] sm:$0xff] %v2796_v55  ;;  %v2797_v60 = vmax.f32 %v2748_v56, 0.0  ;;  %v3166_v61 = vadd.f32 %v2620_v58, %v2156_v57  ;;  %v2622_v62 = vpop.f32.mrb[89].mxu0  ;;  %v2159_v63 = vpop.f32.mrb[90].mxu1 }
 0x28f   :  { %v2623_v1 = vpop.f32.mrb[90].mxu0  ;;  %v2161_v2 = vpop.f32.mrb[91].mxu1 }
 0x290   :  { %2846 = vst [vmem:[%s4585_s4 + $0x158] sm:$0xff] %v2797_v60  ;;  %v2693_v3 = vmul.f32 %v3166_v61, %v4329_v17  ;;  %v3167_v4 = vadd.f32 %v2623_v1, %v2159_v63  ;;  %v2625_v5 = vpop.f32.mrb[91].mxu0 }
 0x292   :  { %v2749_v6 = vadd.f32 %v4334_v21, %v2693_v3  ;;  %v2694_v7 = vmul.f32 %v3167_v4, %v4329_v17 }
 0x294   :  { %v2798_v8 = vmax.f32 %v2749_v6, 0.0  ;;  %v2750_v9 = vadd.f32 %v4334_v21, %v2694_v7  ;;  %v2164_v10 = vpop.f32.mrb[92].mxu1 }
 0x295   :  { %v2628_v11 = vpop.f32.mrb[92].mxu0  ;;  %v2166_v12 = vpop.f32.mrb[93].mxu1 }
 0x296   :  { %2847 = vst [vmem:[%s4585_s4 + $0x160] sm:$0xff] %v2798_v8  ;;  %v2799_v13 = vmax.f32 %v2750_v9, 0.0  ;;  %v3168_v14 = vadd.f32 %v2628_v11, %v2164_v10  ;;  %v2630_v15 = vpop.f32.mrb[93].mxu0  ;;  %v2167_v16 = vpop.f32.mrb[94].mxu1 }
 0x297   :  { %v2631_v18 = vpop.f32.mrb[94].mxu0  ;;  %v2169_v0 = vpop.f32.mrb[95].mxu1 }
 0x298   :  { %2848 = vst [vmem:[%s4585_s4 + $0x168] sm:$0xff] %v2799_v13  ;;  %v2695_v19 = vmul.f32 %v3168_v14, %v4329_v17  ;;  %v3169_v20 = vadd.f32 %v2631_v18, %v2167_v16  ;;  %v2633_v22 = vpop.f32.mrb[95].mxu0 }
 0x29a   :  { %v2751_v23 = vadd.f32 %v4334_v21, %v2695_v19  ;;  %v2696_v24 = vmul.f32 %v3169_v20, %v4329_v17 }
 0x29c   :  { %v2800_v25 = vmax.f32 %v2751_v23, 0.0  ;;  %v2752_v26 = vadd.f32 %v4334_v21, %v2696_v24  ;;  %v2172_v27 = vpop.f32.mrb[96].mxu1 }
 0x29d   :  { %v2636_v28 = vpop.f32.mrb[96].mxu0  ;;  %v2174_v29 = vpop.f32.mrb[97].mxu1 }
 0x29e   :  { %2849 = vst [vmem:[%s4585_s4 + $0x170] sm:$0xff] %v2800_v25  ;;  %v2801_v30 = vmax.f32 %v2752_v26, 0.0  ;;  %v3170_v31 = vadd.f32 %v2636_v28, %v2172_v27  ;;  %v2638_v32 = vpop.f32.mrb[97].mxu0  ;;  %v2175_v33 = vpop.f32.mrb[98].mxu1 }
 0x29f   :  { %v2639_v34 = vpop.f32.mrb[98].mxu0  ;;  %v2176_v35 = vpop.f32.mrb[99].mxu1 }
 0x2a0   :  { %2850 = vst [vmem:[%s4585_s4 + $0x178] sm:$0xff] %v2801_v30  ;;  %v2697_v36 = vmul.f32 %v3170_v31, %v4329_v17  ;;  %v2640_v37 = vpop.f32.mrb[99].mxu0 }
 0x2a2   :  { %v2753_v38 = vadd.f32 %v4334_v21, %v2697_v36 }
 0x2a4   :  { %v2802_v39 = vmax.f32 %v2753_v38, 0.0 }
 0x2a6   :  { %2851 = vst [vmem:[%s4585_s4 + $0x180] sm:$0xff] %v2802_v39 }

// kernel: _lambda_.7
= control target key start
LH: loop header
LB: loop body
LE: loop exit
PB: predicated region body
PF: predicated region fallthrough
CT: control target
= control target key end

     0   :  { %v6705_v0 = vmov 0   ;;  %s9065_s1 = inlined_call_operand.vmem [shape: bf16[512,128], index: 1, kind: input, shape index: {}]   ;;  %s9066_s0 = inlined_call_operand.vmem [shape: bf16[1568,512], index: 0, kind: input, shape index: {}]   ;;  %s9067_s2 = inlined_call_operand.vmem [shape: f32[1,128], index: 2, kind: input, shape index: {}]   ;;  %s9068_s3 = inlined_call_operand.vmem [shape: f32[1,128], index: 3, kind: input, shape index: {}]   ;;  %s9069_s4 = inlined_call_operand.vmem [shape: f32[1568,128], index: 4, kind: output, shape index: {}]  }
   0x1   :  { %2626 = vmatprep.subr.bf16.mxu1 %v6705_v0  ;;  %3443 = vmatprep.subr.bf16.mxu0 %v6705_v0  ;;  %v5685_v1 = vld [vmem:[%s9065_s1] sm:$0xff]   ;;  %v5687_v3 = vld [vmem:[%s9065_s1 + $0x8] sm:$0xff]   ;;  %v5689_v5 = vld [vmem:[%s9065_s1 + $0x10] sm:$0xff]  }
   0x2   :  { %v5686_v2 = vld [vmem:[%s9065_s1 + $0x80] sm:$0xff]   ;;  %2627 = vmatpush1.bf16.msra.mxu1 %v5685_v1  ;;  %v5688_v4 = vld [vmem:[%s9065_s1 + $0x88] sm:$0xff]   ;;  %v5690_v6 = vld [vmem:[%s9065_s1 + $0x90] sm:$0xff]  }
   0x3   :  { %3444 = vmatpush1.bf16.msra.mxu0 %v5686_v2  ;;  %2628 = vmatprep.subr.bf16.mxu1 %v6705_v0  ;;  %v5691_v7 = vld [vmem:[%s9065_s1 + $0x18] sm:$0xff]   ;;  %v5693_v9 = vld [vmem:[%s9065_s1 + $0x20] sm:$0xff]   ;;  %v5695_v11 = vld [vmem:[%s9065_s1 + $0x28] sm:$0xff]  }
   0x4   :  { %3445 = vmatprep.subr.bf16.mxu0 %v6705_v0  ;;  %v5692_v8 = vld [vmem:[%s9065_s1 + $0x98] sm:$0xff]   ;;  %v5694_v10 = vld [vmem:[%s9065_s1 + $0xa0] sm:$0xff]   ;;  %v5696_v12 = vld [vmem:[%s9065_s1 + $0xa8] sm:$0xff]  }
   0x5   :  { %v5697_v13 = vld [vmem:[%s9065_s1 + $0x30] sm:$0xff]   ;;  %v5699_v15 = vld [vmem:[%s9065_s1 + $0x38] sm:$0xff]   ;;  %v5701_v17 = vld [vmem:[%s9065_s1 + $0x40] sm:$0xff]  }
   0x6   :  { %2629 = vmatpush1.bf16.msra.mxu1 %v5687_v3  ;;  %v5698_v14 = vld [vmem:[%s9065_s1 + $0xb0] sm:$0xff]   ;;  %v5700_v16 = vld [vmem:[%s9065_s1 + $0xb8] sm:$0xff]   ;;  %v5702_v18 = vld [vmem:[%s9065_s1 + $0xc0] sm:$0xff]  }
   0x7   :  { %3446 = vmatpush1.bf16.msra.mxu0 %v5688_v4  ;;  %2630 = vmatprep.subr.bf16.mxu1 %v6705_v0  ;;  %v5719_v19 = vld [vmem:[%s9066_s0 + $0x4] ss:$16 sps:$4 sm:$0xff]   ;;  %v5703_v20 = vld [vmem:[%s9065_s1 + $0x48] sm:$0xff]   ;;  %v5707_v25 = vld [vmem:[%s9065_s1 + $0x58] sm:$0xff]  }
   0x8   :  { %3447 = vmatprep.subr.bf16.mxu0 %v6705_v0  ;;  %v5722_v21 = vld [vmem:[%s9066_s0 + $0xc] ss:$16 sps:$4 sm:$0xff]   ;;  %2658 = vmatprep.mubr.bf16.mxu1 %v5719_v19  ;;  %v5705_v23 = vld [vmem:[%s9065_s1 + $0x50] sm:$0xff]   ;;  %v5709_v27 = vld [vmem:[%s9065_s1 + $0x60] sm:$0xff]  }
   0x9   :  { %v5704_v22 = vld [vmem:[%s9065_s1 + $0xc8] sm:$0xff]   ;;  %3475 = vmatprep.mubr.bf16.mxu0 %v5722_v21  ;;  %v5706_v24 = vld [vmem:[%s9065_s1 + $0xd0] sm:$0xff]   ;;  %v5708_v26 = vld [vmem:[%s9065_s1 + $0xd8] sm:$0xff]  }
   0xa   :  { %2631 = vmatpush1.bf16.msra.mxu1 %v5689_v5  ;;  %v5710_v28 = vld [vmem:[%s9065_s1 + $0xe0] sm:$0xff]   ;;  %v5711_v29 = vld [vmem:[%s9065_s1 + $0x68] sm:$0xff]   ;;  %v5713_v31 = vld [vmem:[%s9065_s1 + $0x70] sm:$0xff]  }
   0xb   :  { %3448 = vmatpush1.bf16.msra.mxu0 %v5690_v6  ;;  %2632 = vmatprep.subr.bf16.mxu1 %v6705_v0  ;;  %v5712_v30 = vld [vmem:[%s9065_s1 + $0xe8] sm:$0xff]   ;;  %v5714_v32 = vld [vmem:[%s9065_s1 + $0xf0] sm:$0xff]   ;;  %v5715_v33 = vld [vmem:[%s9065_s1 + $0x78] sm:$0xff]  }
   0xc   :  { %3449 = vmatprep.subr.bf16.mxu0 %v6705_v0  ;;  %v5716_v34 = vld [vmem:[%s9065_s1 + $0xf8] sm:$0xff]   ;;  %v5717_v35 = vld [vmem:[%s9066_s0] ss:$16 sps:$4 sm:$0xff]   ;;  %v5723_v37 = vld [vmem:[%s9066_s0 + $0x24] ss:$16 sps:$4 sm:$0xff]  }
   0xd   :  { %v5720_v36 = vld [vmem:[%s9066_s0 + $0x8] ss:$16 sps:$4 sm:$0xff]   ;;  %v5725_v38 = vld [vmem:[%s9066_s0 + $0x2c] ss:$16 sps:$4 sm:$0xff]   ;;  %v5727_v39 = vld [vmem:[%s9066_s0 + $0x20] ss:$16 sps:$4 sm:$0xff]  }
   0xe   :  { %2633 = vmatpush1.bf16.msra.mxu1 %v5691_v7  ;;  %v5728_v40 = vld [vmem:[%s9066_s0 + $0x28] ss:$16 sps:$4 sm:$0xff]   ;;  %v5729_v41 = vld [vmem:[%s9066_s0 + $0x44] ss:$16 sps:$4 sm:$0xff]   ;;  %v5731_v42 = vld [vmem:[%s9066_s0 + $0x4c] ss:$16 sps:$4 sm:$0xff]  }
   0xf   :  { %3450 = vmatpush1.bf16.msra.mxu0 %v5692_v8  ;;  %2634 = vmatprep.subr.bf16.mxu1 %v6705_v0  ;;  %v5733_v43 = vld [vmem:[%s9066_s0 + $0x40] ss:$16 sps:$4 sm:$0xff]   ;;  %v5734_v44 = vld [vmem:[%s9066_s0 + $0x48] ss:$16 sps:$4 sm:$0xff]   ;;  %v5735_v45 = vld [vmem:[%s9066_s0 + $0x64] ss:$16 sps:$4 sm:$0xff]  }
  0x10   :  { %3451 = vmatprep.subr.bf16.mxu0 %v6705_v0  ;;  %v5737_v46 = vld [vmem:[%s9066_s0 + $0x6c] ss:$16 sps:$4 sm:$0xff]   ;;  %v5739_v47 = vld [vmem:[%s9066_s0 + $0x60] ss:$16 sps:$4 sm:$0xff]   ;;  %v5740_v48 = vld [vmem:[%s9066_s0 + $0x68] ss:$16 sps:$4 sm:$0xff]  }
  0x11   :  { %v5741_v49 = vld [vmem:[%s9066_s0 + $0x84] ss:$16 sps:$4 sm:$0xff]   ;;  %v5743_v50 = vld [vmem:[%s9066_s0 + $0x8c] ss:$16 sps:$4 sm:$0xff]   ;;  %v5745_v51 = vld [vmem:[%s9066_s0 + $0x80] ss:$16 sps:$4 sm:$0xff]  }
  0x12   :  { %2635 = vmatpush1.bf16.msra.mxu1 %v5693_v9  ;;  %v5746_v52 = vld [vmem:[%s9066_s0 + $0x88] ss:$16 sps:$4 sm:$0xff]   ;;  %v5747_v53 = vld [vmem:[%s9066_s0 + $0xa4] ss:$16 sps:$4 sm:$0xff]   ;;  %v5749_v54 = vld [vmem:[%s9066_s0 + $0xac] ss:$16 sps:$4 sm:$0xff]  }
  0x13   :  { %3452 = vmatpush1.bf16.msra.mxu0 %v5694_v10  ;;  %2636 = vmatprep.subr.bf16.mxu1 %v6705_v0  ;;  %v5751_v55 = vld [vmem:[%s9066_s0 + $0xa0] ss:$16 sps:$4 sm:$0xff]   ;;  %v5752_v56 = vld [vmem:[%s9066_s0 + $0xa8] ss:$16 sps:$4 sm:$0xff]   ;;  %v5753_v57 = vld [vmem:[%s9066_s0 + $0xc4] ss:$16 sps:$4 sm:$0xff]  }
  0x14   :  { %3453 = vmatprep.subr.bf16.mxu0 %v6705_v0  ;;  %v5755_v58 = vld [vmem:[%s9066_s0 + $0xcc] ss:$16 sps:$4 sm:$0xff]   ;;  %v5757_v59 = vld [vmem:[%s9066_s0 + $0xc0] ss:$16 sps:$4 sm:$0xff]   ;;  %v5758_v60 = vld [vmem:[%s9066_s0 + $0xc8] ss:$16 sps:$4 sm:$0xff]  }
  0x15   :  { %v5759_v61 = vld [vmem:[%s9066_s0 + $0xe4] ss:$16 sps:$4 sm:$0xff]   ;;  %v5761_v62 = vld [vmem:[%s9066_s0 + $0xec] ss:$16 sps:$4 sm:$0xff]   ;;  %v5763_v63 = vld [vmem:[%s9066_s0 + $0xe0] ss:$16 sps:$4 sm:$0xff]  }
  0x16   :  { %2637 = vmatpush1.bf16.msra.mxu1 %v5695_v11  ;;  %v5765_v1 = vld [vmem:[%s9066_s0 + $0x104] ss:$16 sps:$4 sm:$0xff]   ;;  %v5767_v2 = vld [vmem:[%s9066_s0 + $0x10c] ss:$16 sps:$4 sm:$0xff]   ;;  %v5769_v3 = vld [vmem:[%s9066_s0 + $0x100] ss:$16 sps:$4 sm:$0xff]  }
  0x17   :  { %3454 = vmatpush1.bf16.msra.mxu0 %v5696_v12  ;;  %2638 = vmatprep.subr.bf16.mxu1 %v6705_v0  ;;  %v5770_v4 = vld [vmem:[%s9066_s0 + $0x108] ss:$16 sps:$4 sm:$0xff]   ;;  %v5771_v5 = vld [vmem:[%s9066_s0 + $0x124] ss:$16 sps:$4 sm:$0xff]   ;;  %v5773_v6 = vld [vmem:[%s9066_s0 + $0x12c] ss:$16 sps:$4 sm:$0xff]  }
  0x18   :  { %3455 = vmatprep.subr.bf16.mxu0 %v6705_v0  ;;  %v5775_v7 = vld [vmem:[%s9066_s0 + $0x120] ss:$16 sps:$4 sm:$0xff]   ;;  %v5776_v8 = vld [vmem:[%s9066_s0 + $0x128] ss:$16 sps:$4 sm:$0xff]   ;;  %v5777_v9 = vld [vmem:[%s9066_s0 + $0x144] ss:$16 sps:$4 sm:$0xff]  }
  0x19   :  { %v5779_v10 = vld [vmem:[%s9066_s0 + $0x14c] ss:$16 sps:$4 sm:$0xff]   ;;  %v5781_v11 = vld [vmem:[%s9066_s0 + $0x140] ss:$16 sps:$4 sm:$0xff]   ;;  %v5782_v12 = vld [vmem:[%s9066_s0 + $0x148] ss:$16 sps:$4 sm:$0xff]  }
  0x1a   :  { %2639 = vmatpush1.bf16.msra.mxu1 %v5697_v13  ;;  %v5783_v13 = vld [vmem:[%s9066_s0 + $0x164] ss:$16 sps:$4 sm:$0xff]   ;;  %v5793_v19 = vld [vmem:[%s9066_s0 + $0x180] ss:$16 sps:$4 sm:$0xff]  }
  0x1b   :  { %3456 = vmatpush1.bf16.msra.mxu0 %v5698_v14  ;;  %2640 = vmatprep.subr.bf16.mxu1 %v6705_v0  ;;  %v5785_v14 = vld [vmem:[%s9066_s0 + $0x16c] ss:$16 sps:$4 sm:$0xff]   ;;  %v5795_v21 = vld [vmem:[%s9066_s0 + $0x1a4] ss:$16 sps:$4 sm:$0xff]  }
  0x1c   :  { %3457 = vmatprep.subr.bf16.mxu0 %v6705_v0 }
  0x1e   :  { %2641 = vmatpush1.bf16.msra.mxu1 %v5699_v15  ;;  %v5787_v15 = vld [vmem:[%s9066_s0 + $0x160] ss:$16 sps:$4 sm:$0xff]  }
  0x1f   :  { %3458 = vmatpush1.bf16.msra.mxu0 %v5700_v16  ;;  %2642 = vmatprep.subr.bf16.mxu1 %v6705_v0  ;;  %v5788_v16 = vld [vmem:[%s9066_s0 + $0x168] ss:$16 sps:$4 sm:$0xff]  }
  0x20   :  { %3459 = vmatprep.subr.bf16.mxu0 %v6705_v0 }
  0x22   :  { %2643 = vmatpush1.bf16.msra.mxu1 %v5701_v17  ;;  %v5789_v17 = vld [vmem:[%s9066_s0 + $0x184] ss:$16 sps:$4 sm:$0xff]  }
  0x23   :  { %3460 = vmatpush1.bf16.msra.mxu0 %v5702_v18  ;;  %2644 = vmatprep.subr.bf16.mxu1 %v6705_v0  ;;  %v5791_v18 = vld [vmem:[%s9066_s0 + $0x18c] ss:$16 sps:$4 sm:$0xff]  }
  0x24   :  { %3461 = vmatprep.subr.bf16.mxu0 %v6705_v0 }
  0x26   :  { %2645 = vmatpush1.bf16.msra.mxu1 %v5703_v20  ;;  %v5794_v20 = vld [vmem:[%s9066_s0 + $0x188] ss:$16 sps:$4 sm:$0xff]  }
  0x27   :  { %3462 = vmatpush1.bf16.msra.mxu0 %v5704_v22  ;;  %2646 = vmatprep.subr.bf16.mxu1 %v6705_v0  ;;  %v5797_v22 = vld [vmem:[%s9066_s0 + $0x1ac] ss:$16 sps:$4 sm:$0xff]  }
  0x28   :  { %3463 = vmatprep.subr.bf16.mxu0 %v6705_v0 }
  0x2a   :  { %2647 = vmatpush1.bf16.msra.mxu1 %v5705_v23  ;;  %v5799_v23 = vld [vmem:[%s9066_s0 + $0x1a0] ss:$16 sps:$4 sm:$0xff]  }
  0x2b   :  { %3464 = vmatpush1.bf16.msra.mxu0 %v5706_v24  ;;  %2648 = vmatprep.subr.bf16.mxu1 %v6705_v0  ;;  %v5800_v24 = vld [vmem:[%s9066_s0 + $0x1a8] ss:$16 sps:$4 sm:$0xff]  }
  0x2c   :  { %3465 = vmatprep.subr.bf16.mxu0 %v6705_v0 }
  0x2e   :  { %2649 = vmatpush1.bf16.msra.mxu1 %v5707_v25  ;;  %v5801_v25 = vld [vmem:[%s9066_s0 + $0x1c4] ss:$16 sps:$4 sm:$0xff]  }
  0x2f   :  { %3466 = vmatpush1.bf16.msra.mxu0 %v5708_v26  ;;  %2650 = vmatprep.subr.bf16.mxu1 %v6705_v0  ;;  %v5803_v26 = vld [vmem:[%s9066_s0 + $0x1cc] ss:$16 sps:$4 sm:$0xff]  }
  0x30   :  { %3467 = vmatprep.subr.bf16.mxu0 %v6705_v0 }
  0x32   :  { %2651 = vmatpush1.bf16.msra.mxu1 %v5709_v27  ;;  %v5805_v27 = vld [vmem:[%s9066_s0 + $0x1c0] ss:$16 sps:$4 sm:$0xff]  }
  0x33   :  { %3468 = vmatpush1.bf16.msra.mxu0 %v5710_v28  ;;  %2652 = vmatprep.subr.bf16.mxu1 %v6705_v0  ;;  %v5806_v28 = vld [vmem:[%s9066_s0 + $0x1c8] ss:$16 sps:$4 sm:$0xff]  }
  0x34   :  { %3469 = vmatprep.subr.bf16.mxu0 %v6705_v0 }
  0x36   :  { %2653 = vmatpush1.bf16.msra.mxu1 %v5711_v29  ;;  %v5807_v29 = vld [vmem:[%s9066_s0 + $0x1e4] ss:$16 sps:$4 sm:$0xff]  }
  0x37   :  { %3470 = vmatpush1.bf16.msra.mxu0 %v5712_v30  ;;  %2654 = vmatprep.subr.bf16.mxu1 %v6705_v0  ;;  %v5809_v30 = vld [vmem:[%s9066_s0 + $0x1ec] ss:$16 sps:$4 sm:$0xff]  }
  0x38   :  { %3471 = vmatprep.subr.bf16.mxu0 %v6705_v0 }
  0x3a   :  { %2655 = vmatpush1.bf16.msra.mxu1 %v5713_v31  ;;  %v5811_v31 = vld [vmem:[%s9066_s0 + $0x1e0] ss:$16 sps:$4 sm:$0xff]  }
  0x3b   :  { %3472 = vmatpush1.bf16.msra.mxu0 %v5714_v32  ;;  %2656 = vmatprep.subr.bf16.mxu1 %v6705_v0  ;;  %v5812_v32 = vld [vmem:[%s9066_s0 + $0x1e8] ss:$16 sps:$4 sm:$0xff]  }
  0x3c   :  { %3473 = vmatprep.subr.bf16.mxu0 %v6705_v0  ;;  %v5764_v0 = vld [vmem:[%s9066_s0 + $0xe8] ss:$16 sps:$4 sm:$0xff]  }
  0x3e   :  { %2657 = vmatpush1.bf16.msra.mxu1 %v5715_v33  ;;  %v5813_v33 = vld [vmem:[%s9066_s0 + $0x204] ss:$16 sps:$4 sm:$0xff]  }
  0x3f   :  { %3474 = vmatpush1.bf16.msra.mxu0 %v5716_v34  ;;  %v5815_v34 = vld [vmem:[%s9066_s0 + $0x20c] ss:$16 sps:$4 sm:$0xff]  }
  0x41   :  { %2659 = vmatmul.mubr.bf16.vlgmr.msra.gmra.mrb[0].mxu1 %v5717_v35  ;;  %v5817_v35 = vld [vmem:[%s9066_s0 + $0x200] ss:$16 sps:$4 sm:$0xff]  }
  0x42   :  { %3476 = vmatmul.mubr.bf16.vlgmr.msra.gmra.mrb[0].mxu0 %v5720_v36  ;;  %2666 = vmatprep.mubr.bf16.mxu1 %v5723_v37  ;;  %v5818_v36 = vld [vmem:[%s9066_s0 + $0x208] ss:$16 sps:$4 sm:$0xff]   ;;  %v5819_v37 = vld [vmem:[%s9066_s0 + $0x224] ss:$16 sps:$4 sm:$0xff]  }
  0x43   :  { %3483 = vmatprep.mubr.bf16.mxu0 %v5725_v38  ;;  %v5821_v38 = vld [vmem:[%s9066_s0 + $0x22c] ss:$16 sps:$4 sm:$0xff]  }
  0x49   :  { %2667 = vmatmul.mubr.bf16.gmra.mrb[4].mxu1 %v5727_v39  ;;  %v5823_v39 = vld [vmem:[%s9066_s0 + $0x220] ss:$16 sps:$4 sm:$0xff]  }
  0x4a   :  { %3484 = vmatmul.mubr.bf16.gmra.mrb[4].mxu0 %v5728_v40  ;;  %2674 = vmatprep.mubr.bf16.mxu1 %v5729_v41  ;;  %v5824_v40 = vld [vmem:[%s9066_s0 + $0x228] ss:$16 sps:$4 sm:$0xff]   ;;  %v5825_v41 = vld [vmem:[%s9066_s0 + $0x244] ss:$16 sps:$4 sm:$0xff]  }
  0x4b   :  { %3491 = vmatprep.mubr.bf16.mxu0 %v5731_v42  ;;  %v5827_v42 = vld [vmem:[%s9066_s0 + $0x24c] ss:$16 sps:$4 sm:$0xff]  }
  0x51   :  { %2675 = vmatmul.mubr.bf16.gmra.mrb[8].mxu1 %v5733_v43  ;;  %v5829_v43 = vld [vmem:[%s9066_s0 + $0x240] ss:$16 sps:$4 sm:$0xff]  }
  0x52   :  { %3492 = vmatmul.mubr.bf16.gmra.mrb[8].mxu0 %v5734_v44  ;;  %2682 = vmatprep.mubr.bf16.mxu1 %v5735_v45  ;;  %v5830_v44 = vld [vmem:[%s9066_s0 + $0x248] ss:$16 sps:$4 sm:$0xff]   ;;  %v5831_v45 = vld [vmem:[%s9066_s0 + $0x264] ss:$16 sps:$4 sm:$0xff]  }
  0x53   :  { %3499 = vmatprep.mubr.bf16.mxu0 %v5737_v46  ;;  %v5833_v46 = vld [vmem:[%s9066_s0 + $0x26c] ss:$16 sps:$4 sm:$0xff]  }
  0x59   :  { %2683 = vmatmul.mubr.bf16.gmra.mrb[12].mxu1 %v5739_v47  ;;  %v5835_v47 = vld [vmem:[%s9066_s0 + $0x260] ss:$16 sps:$4 sm:$0xff]  }
  0x5a   :  { %3500 = vmatmul.mubr.bf16.gmra.mrb[12].mxu0 %v5740_v48  ;;  %2690 = vmatprep.mubr.bf16.mxu1 %v5741_v49  ;;  %v5836_v48 = vld [vmem:[%s9066_s0 + $0x268] ss:$16 sps:$4 sm:$0xff]   ;;  %v5837_v49 = vld [vmem:[%s9066_s0 + $0x284] ss:$16 sps:$4 sm:$0xff]  }
  0x5b   :  { %3507 = vmatprep.mubr.bf16.mxu0 %v5743_v50  ;;  %v5839_v50 = vld [vmem:[%s9066_s0 + $0x28c] ss:$16 sps:$4 sm:$0xff]  }
  0x61   :  { %2691 = vmatmul.mubr.bf16.gmra.mrb[16].mxu1 %v5745_v51  ;;  %v5841_v51 = vld [vmem:[%s9066_s0 + $0x280] ss:$16 sps:$4 sm:$0xff]  }
  0x62   :  { %3508 = vmatmul.mubr.bf16.gmra.mrb[16].mxu0 %v5746_v52  ;;  %2698 = vmatprep.mubr.bf16.mxu1 %v5747_v53  ;;  %v5842_v52 = vld [vmem:[%s9066_s0 + $0x288] ss:$16 sps:$4 sm:$0xff]   ;;  %v5843_v53 = vld [vmem:[%s9066_s0 + $0x2a4] ss:$16 sps:$4 sm:$0xff]  }
  0x63   :  { %3515 = vmatprep.mubr.bf16.mxu0 %v5749_v54  ;;  %v5845_v54 = vld [vmem:[%s9066_s0 + $0x2ac] ss:$16 sps:$4 sm:$0xff]  }
  0x69   :  { %2699 = vmatmul.mubr.bf16.gmra.mrb[20].mxu1 %v5751_v55  ;;  %v5847_v55 = vld [vmem:[%s9066_s0 + $0x2a0] ss:$16 sps:$4 sm:$0xff]  }
  0x6a   :  { %3516 = vmatmul.mubr.bf16.gmra.mrb[20].mxu0 %v5752_v56  ;;  %2706 = vmatprep.mubr.bf16.mxu1 %v5753_v57  ;;  %v5848_v56 = vld [vmem:[%s9066_s0 + $0x2a8] ss:$16 sps:$4 sm:$0xff]   ;;  %v5849_v57 = vld [vmem:[%s9066_s0 + $0x2c4] ss:$16 sps:$4 sm:$0xff]  }
  0x6b   :  { %3523 = vmatprep.mubr.bf16.mxu0 %v5755_v58  ;;  %v5851_v58 = vld [vmem:[%s9066_s0 + $0x2cc] ss:$16 sps:$4 sm:$0xff]  }
  0x71   :  { %2707 = vmatmul.mubr.bf16.gmra.mrb[24].mxu1 %v5757_v59  ;;  %v5853_v59 = vld [vmem:[%s9066_s0 + $0x2c0] ss:$16 sps:$4 sm:$0xff]  }
  0x72   :  { %3524 = vmatmul.mubr.bf16.gmra.mrb[24].mxu0 %v5758_v60  ;;  %2714 = vmatprep.mubr.bf16.mxu1 %v5759_v61  ;;  %v5854_v60 = vld [vmem:[%s9066_s0 + $0x2c8] ss:$16 sps:$4 sm:$0xff]   ;;  %v5855_v61 = vld [vmem:[%s9066_s0 + $0x2e4] ss:$16 sps:$4 sm:$0xff]  }
  0x73   :  { %3531 = vmatprep.mubr.bf16.mxu0 %v5761_v62  ;;  %v5857_v62 = vld [vmem:[%s9066_s0 + $0x2ec] ss:$16 sps:$4 sm:$0xff]  }
  0x79   :  { %2715 = vmatmul.mubr.bf16.gmra.mrb[28].mxu1 %v5763_v63  ;;  %v5859_v63 = vld [vmem:[%s9066_s0 + $0x2e0] ss:$16 sps:$4 sm:$0xff]  }
  0x7a   :  { %3532 = vmatmul.mubr.bf16.gmra.mrb[28].mxu0 %v5764_v0  ;;  %2722 = vmatprep.mubr.bf16.mxu1 %v5765_v1  ;;  %v5860_v0 = vld [vmem:[%s9066_s0 + $0x2e8] ss:$16 sps:$4 sm:$0xff]   ;;  %v5861_v1 = vld [vmem:[%s9066_s0 + $0x304] ss:$16 sps:$4 sm:$0xff]  }
  0x7b   :  { %3539 = vmatprep.mubr.bf16.mxu0 %v5767_v2  ;;  %v5863_v2 = vld [vmem:[%s9066_s0 + $0x30c] ss:$16 sps:$4 sm:$0xff]  }
  0x81   :  { %2723 = vmatmul.mubr.bf16.gmra.mrb[32].mxu1 %v5769_v3  ;;  %v5865_v3 = vld [vmem:[%s9066_s0 + $0x300] ss:$16 sps:$4 sm:$0xff]  }
  0x82   :  { %3540 = vmatmul.mubr.bf16.gmra.mrb[32].mxu0 %v5770_v4  ;;  %2730 = vmatprep.mubr.bf16.mxu1 %v5771_v5  ;;  %v5866_v4 = vld [vmem:[%s9066_s0 + $0x308] ss:$16 sps:$4 sm:$0xff]   ;;  %v5867_v5 = vld [vmem:[%s9066_s0 + $0x324] ss:$16 sps:$4 sm:$0xff]  }
  0x83   :  { %3547 = vmatprep.mubr.bf16.mxu0 %v5773_v6  ;;  %v5869_v6 = vld [vmem:[%s9066_s0 + $0x32c] ss:$16 sps:$4 sm:$0xff]  }
  0x89   :  { %2731 = vmatmul.mubr.bf16.gmra.mrb[36].mxu1 %v5775_v7  ;;  %v5871_v7 = vld [vmem:[%s9066_s0 + $0x320] ss:$16 sps:$4 sm:$0xff]  }
  0x8a   :  { %3548 = vmatmul.mubr.bf16.gmra.mrb[36].mxu0 %v5776_v8  ;;  %2738 = vmatprep.mubr.bf16.mxu1 %v5777_v9  ;;  %v5872_v8 = vld [vmem:[%s9066_s0 + $0x328] ss:$16 sps:$4 sm:$0xff]   ;;  %v5873_v9 = vld [vmem:[%s9066_s0 + $0x344] ss:$16 sps:$4 sm:$0xff]  }
  0x8b   :  { %3555 = vmatprep.mubr.bf16.mxu0 %v5779_v10  ;;  %v5875_v10 = vld [vmem:[%s9066_s0 + $0x34c] ss:$16 sps:$4 sm:$0xff]  }
  0x91   :  { %2739 = vmatmul.mubr.bf16.gmra.mrb[40].mxu1 %v5781_v11  ;;  %v5877_v11 = vld [vmem:[%s9066_s0 + $0x340] ss:$16 sps:$4 sm:$0xff]  }
  0x92   :  { %3556 = vmatmul.mubr.bf16.gmra.mrb[40].mxu0 %v5782_v12  ;;  %2746 = vmatprep.mubr.bf16.mxu1 %v5783_v13  ;;  %v5878_v12 = vld [vmem:[%s9066_s0 + $0x348] ss:$16 sps:$4 sm:$0xff]   ;;  %v5879_v13 = vld [vmem:[%s9066_s0 + $0x364] ss:$16 sps:$4 sm:$0xff]  }
  0x93   :  { %3563 = vmatprep.mubr.bf16.mxu0 %v5785_v14  ;;  %v5881_v14 = vld [vmem:[%s9066_s0 + $0x36c] ss:$16 sps:$4 sm:$0xff]  }
  0x99   :  { %2747 = vmatmul.mubr.bf16.gmra.mrb[44].mxu1 %v5787_v15 }
  0x9a   :  { %3564 = vmatmul.mubr.bf16.gmra.mrb[44].mxu0 %v5788_v16  ;;  %2754 = vmatprep.mubr.bf16.mxu1 %v5789_v17  ;;  %v7192_v17 = vld [vmem:[%s9067_s2] ss:$0 sm:$0xff] }
  0x9b   :  { %3571 = vmatprep.mubr.bf16.mxu0 %v5791_v18 }
  0xa1   :  { %2755 = vmatmul.mubr.bf16.gmra.mrb[48].mxu1 %v5793_v19  ;;  %v5883_v19 = vld [vmem:[%s9066_s0 + $0x360] ss:$16 sps:$4 sm:$0xff]  }
  0xa2   :  { %3572 = vmatmul.mubr.bf16.gmra.mrb[48].mxu0 %v5794_v20  ;;  %2762 = vmatprep.mubr.bf16.mxu1 %v5795_v21 }
  0xa3   :  { %3579 = vmatprep.mubr.bf16.mxu0 %v5797_v22 }
  0xa9   :  { %2763 = vmatmul.mubr.bf16.gmra.mrb[52].mxu1 %v5799_v23  ;;  %v5884_v23 = vld [vmem:[%s9066_s0 + $0x368] ss:$16 sps:$4 sm:$0xff]  }
  0xaa   :  { %3580 = vmatmul.mubr.bf16.gmra.mrb[52].mxu0 %v5800_v24  ;;  %2770 = vmatprep.mubr.bf16.mxu1 %v5801_v25  ;;  %v5885_v24 = vld [vmem:[%s9066_s0 + $0x384] ss:$16 sps:$4 sm:$0xff]   ;;  %v7206_v25 = vld [vmem:[%s9068_s3] ss:$0 sm:$0xff] }
  0xab   :  { %3587 = vmatprep.mubr.bf16.mxu0 %v5803_v26 }
  0xb1   :  { %2771 = vmatmul.mubr.bf16.gmra.mrb[56].mxu1 %v5805_v27 }
  0xb2   :  { %3588 = vmatmul.mubr.bf16.gmra.mrb[56].mxu0 %v5806_v28  ;;  %2778 = vmatprep.mubr.bf16.mxu1 %v5807_v29  ;;  %v5887_v28 = vld [vmem:[%s9066_s0 + $0x38c] ss:$16 sps:$4 sm:$0xff]  }
  0xb3   :  { %3595 = vmatprep.mubr.bf16.mxu0 %v5809_v30 }
  0xb9   :  { %2779 = vmatmul.mubr.bf16.gmra.mrb[60].mxu1 %v5811_v31 }
  0xba   :  { %3596 = vmatmul.mubr.bf16.gmra.mrb[60].mxu0 %v5812_v32  ;;  %2786 = vmatprep.mubr.bf16.mxu1 %v5813_v33 }
  0xbb   :  { %3603 = vmatprep.mubr.bf16.mxu0 %v5815_v34 }
  0xc1   :  { %2787 = vmatmul.mubr.bf16.gmra.mrb[64].mxu1 %v5817_v35 }
  0xc2   :  { %3604 = vmatmul.mubr.bf16.gmra.mrb[64].mxu0 %v5818_v36  ;;  %2794 = vmatprep.mubr.bf16.mxu1 %v5819_v37 }
  0xc3   :  { %3611 = vmatprep.mubr.bf16.mxu0 %v5821_v38  ;;  %v5889_v38 = vld [vmem:[%s9066_s0 + $0x380] ss:$16 sps:$4 sm:$0xff]  }
  0xc9   :  { %2795 = vmatmul.mubr.bf16.gmra.mrb[68].mxu1 %v5823_v39 }
  0xca   :  { %3612 = vmatmul.mubr.bf16.gmra.mrb[68].mxu0 %v5824_v40  ;;  %2802 = vmatprep.mubr.bf16.mxu1 %v5825_v41 }
  0xcb   :  { %3619 = vmatprep.mubr.bf16.mxu0 %v5827_v42  ;;  %v5890_v42 = vld [vmem:[%s9066_s0 + $0x388] ss:$16 sps:$4 sm:$0xff]  }
  0xd1   :  { %2803 = vmatmul.mubr.bf16.gmra.mrb[72].mxu1 %v5829_v43  ;;  %v5891_v43 = vld [vmem:[%s9066_s0 + $0x3a4] ss:$16 sps:$4 sm:$0xff]  }
  0xd2   :  { %3620 = vmatmul.mubr.bf16.gmra.mrb[72].mxu0 %v5830_v44  ;;  %2810 = vmatprep.mubr.bf16.mxu1 %v5831_v45 }
  0xd3   :  { %3627 = vmatprep.mubr.bf16.mxu0 %v5833_v46  ;;  %v5893_v46 = vld [vmem:[%s9066_s0 + $0x3ac] ss:$16 sps:$4 sm:$0xff]  }
  0xd9   :  { %2811 = vmatmul.mubr.bf16.gmra.mrb[76].mxu1 %v5835_v47 }
  0xda   :  { %3628 = vmatmul.mubr.bf16.gmra.mrb[76].mxu0 %v5836_v48  ;;  %2818 = vmatprep.mubr.bf16.mxu1 %v5837_v49 }
  0xdb   :  { %3635 = vmatprep.mubr.bf16.mxu0 %v5839_v50 }
  0xe1   :  { %2819 = vmatmul.mubr.bf16.gmra.mrb[80].mxu1 %v5841_v51 }
  0xe2   :  { %3636 = vmatmul.mubr.bf16.gmra.mrb[80].mxu0 %v5842_v52  ;;  %2826 = vmatprep.mubr.bf16.mxu1 %v5843_v53 }
  0xe3   :  { %3643 = vmatprep.mubr.bf16.mxu0 %v5845_v54 }
  0xe9   :  { %2827 = vmatmul.mubr.bf16.gmra.mrb[84].mxu1 %v5847_v55 }
  0xea   :  { %3644 = vmatmul.mubr.bf16.gmra.mrb[84].mxu0 %v5848_v56  ;;  %2834 = vmatprep.mubr.bf16.mxu1 %v5849_v57  ;;  %v5895_v56 = vld [vmem:[%s9066_s0 + $0x3a0] ss:$16 sps:$4 sm:$0xff]  }
  0xeb   :  { %3651 = vmatprep.mubr.bf16.mxu0 %v5851_v58 }
  0xf1   :  { %2835 = vmatmul.mubr.bf16.gmra.mrb[88].mxu1 %v5853_v59 }
  0xf2   :  { %3652 = vmatmul.mubr.bf16.gmra.mrb[88].mxu0 %v5854_v60  ;;  %2842 = vmatprep.mubr.bf16.mxu1 %v5855_v61  ;;  %v5896_v61 = vld [vmem:[%s9066_s0 + $0x3a8] ss:$16 sps:$4 sm:$0xff]  }
  0xf3   :  { %3659 = vmatprep.mubr.bf16.mxu0 %v5857_v62  ;;  %v5897_v62 = vld [vmem:[%s9066_s0 + $0x3c4] ss:$16 sps:$4 sm:$0xff]  }
  0xf9   :  { %2843 = vmatmul.mubr.bf16.gmra.mrb[92].mxu1 %v5859_v63 }
  0xfa   :  { %3660 = vmatmul.mubr.bf16.gmra.mrb[92].mxu0 %v5860_v0  ;;  %2850 = vmatprep.mubr.bf16.mxu1 %v5861_v1  ;;  %v5899_v1 = vld [vmem:[%s9066_s0 + $0x3cc] ss:$16 sps:$4 sm:$0xff]  }
  0xfb   :  { %3667 = vmatprep.mubr.bf16.mxu0 %v5863_v2 }
 0x101   :  { %2851 = vmatmul.mubr.bf16.gmra.mrb[96].mxu1 %v5865_v3 }
 0x102   :  { %3668 = vmatmul.mubr.bf16.gmra.mrb[96].mxu0 %v5866_v4  ;;  %2858 = vmatprep.mubr.bf16.mxu1 %v5867_v5 }
 0x103   :  { %3675 = vmatprep.mubr.bf16.mxu0 %v5869_v6 }
 0x109   :  { %2859 = vmatmul.mubr.bf16.gmra.mrb[100].mxu1 %v5871_v7 }
 0x10a   :  { %3676 = vmatmul.mubr.bf16.gmra.mrb[100].mxu0 %v5872_v8  ;;  %2866 = vmatprep.mubr.bf16.mxu1 %v5873_v9 }
 0x10b   :  { %3683 = vmatprep.mubr.bf16.mxu0 %v5875_v10 }
 0x111   :  { %2867 = vmatmul.mubr.bf16.gmra.mrb[104].mxu1 %v5877_v11 }
 0x112   :  { %3684 = vmatmul.mubr.bf16.gmra.mrb[104].mxu0 %v5878_v12  ;;  %2874 = vmatprep.mubr.bf16.mxu1 %v5879_v13  ;;  %v5901_v12 = vld [vmem:[%s9066_s0 + $0x3c0] ss:$16 sps:$4 sm:$0xff]  }
 0x113   :  { %3691 = vmatprep.mubr.bf16.mxu0 %v5881_v14 }
 0x114   :  { %v2660_v15 = vpop.f32.mrb[0].mxu1 }
 0x115   :  { %v3477_v16 = vpop.f32.mrb[0].mxu0  ;;  %v2662_v18 = vpop.f32.mrb[1].mxu1 }
 0x116   :  { %v3478_v20 = vadd.f32 %v3477_v16, %v2660_v15  ;;  %v3479_v21 = vpop.f32.mrb[1].mxu0  ;;  %v2663_v22 = vpop.f32.mrb[2].mxu1  ;;  %v5902_v18 = vld [vmem:[%s9066_s0 + $0x3c8] ss:$16 sps:$4 sm:$0xff]  }
 0x117   :  { %v3480_v26 = vpop.f32.mrb[2].mxu0  ;;  %v2665_v27 = vpop.f32.mrb[3].mxu1 }
 0x118   :  { %v4267_v29 = vmul.f32 %v7192_v17, %v3478_v20  ;;  %v3481_v30 = vadd.f32 %v3480_v26, %v2663_v22  ;;  %v3482_v31 = vpop.f32.mrb[3].mxu0  ;;  %v5905_v22 = vld [vmem:[%s9066_s0 + $0x3ec] ss:$16 sps:$4 sm:$0xff]  }
 0x119   :  { %2875 = vmatmul.mubr.bf16.gmra.mrb[108].mxu1 %v5883_v19  ;;  %v5903_v19 = vld [vmem:[%s9066_s0 + $0x3e4] ss:$16 sps:$4 sm:$0xff]  }
 0x11a   :  { %v4470_v32 = vadd.f32 %v7206_v25, %v4267_v29  ;;  %v4268_v33 = vmul.f32 %v7192_v17, %v3481_v30  ;;  %3692 = vmatmul.mubr.bf16.gmra.mrb[108].mxu0 %v5884_v23  ;;  %2882 = vmatprep.mubr.bf16.mxu1 %v5885_v24 }
 0x11b   :  { %3699 = vmatprep.mubr.bf16.mxu0 %v5887_v28 }
 0x11c   :  { %6305 = vtanh.f32 %v4470_v32  ;;  %v4471_v34 = vadd.f32 %v7206_v25, %v4268_v33  ;;  %v2668_v35 = vpop.f32.mrb[4].mxu1 }
 0x11d   :  { %v3485_v36 = vpop.f32.mrb[4].mxu0  ;;  %v2670_v37 = vpop.f32.mrb[5].mxu1 }
 0x11e   :  { %6307 = vtanh.f32 %v4471_v34  ;;  %v3486_v39 = vadd.f32 %v3485_v36, %v2668_v35  ;;  %v3487_v40 = vpop.f32.mrb[5].mxu0  ;;  %v2671_v41 = vpop.f32.mrb[6].mxu1  ;;  %v5907_v34 = vld [vmem:[%s9066_s0 + $0x3e0] ss:$16 sps:$4 sm:$0xff]  }
 0x11f   :  { %v3488_v44 = vpop.f32.mrb[6].mxu0  ;;  %v2673_v45 = vpop.f32.mrb[7].mxu1  ;;  %v5909_v40 = vld [vmem:[%s9066_s0 + $0x404] ss:$16 sps:$4 sm:$0xff]  }
 0x120   :  { %v4269_v47 = vmul.f32 %v7192_v17, %v3486_v39  ;;  %v3489_v48 = vadd.f32 %v3488_v44, %v2671_v41  ;;  %v3490_v49 = vpop.f32.mrb[7].mxu0  ;;  %v5908_v39 = vld [vmem:[%s9066_s0 + $0x3e8] ss:$16 sps:$4 sm:$0xff]  }
 0x121   :  { %2883 = vmatmul.mubr.bf16.gmra.mrb[112].mxu1 %v5889_v38 }
 0x122   :  { %v4472_v50 = vadd.f32 %v7206_v25, %v4269_v47  ;;  %v4270_v51 = vmul.f32 %v7192_v17, %v3489_v48  ;;  %3700 = vmatmul.mubr.bf16.gmra.mrb[112].mxu0 %v5890_v42  ;;  %2890 = vmatprep.mubr.bf16.mxu1 %v5891_v43  ;;  %v5911_v43 = vld [vmem:[%s9066_s0 + $0x40c] ss:$16 sps:$4 sm:$0xff]  }
 0x123   :  { %3707 = vmatprep.mubr.bf16.mxu0 %v5893_v46 }
 0x124   :  { %6309 = vtanh.f32 %v4472_v50  ;;  %v4473_v52 = vadd.f32 %v7206_v25, %v4270_v51  ;;  %v2676_v53 = vpop.f32.mrb[8].mxu1 }
 0x125   :  { %v3493_v54 = vpop.f32.mrb[8].mxu0  ;;  %v2678_v55 = vpop.f32.mrb[9].mxu1 }
 0x126   :  { %v6306_v57 = vpop.eup %6305  ;;  %6311 = vtanh.f32 %v4473_v52  ;;  %v3494_v58 = vadd.f32 %v3493_v54, %v2676_v53  ;;  %v3495_v59 = vpop.f32.mrb[9].mxu0  ;;  %v5913_v54 = vld [vmem:[%s9066_s0 + $0x400] ss:$16 sps:$4 sm:$0xff]  }
 0x127   :  { %v2679_v60 = vpop.f32.mrb[10].mxu1  ;;  %4862 = vst [vmem:[%s9069_s4] sm:$0xff] %v6306_v57  ;;  %v3496_v63 = vpop.f32.mrb[10].mxu0  ;;  %v5914_v59 = vld [vmem:[%s9066_s0 + $0x408] ss:$16 sps:$4 sm:$0xff]  }
 0x128   :  { %v2681_v0 = vpop.f32.mrb[11].mxu1  ;;  %v6308_v2 = vpop.eup %6307  ;;  %v4271_v3 = vmul.f32 %v7192_v17, %v3494_v58  ;;  %v3497_v4 = vadd.f32 %v3496_v63, %v2679_v60  ;;  %v5915_v60 = vld [vmem:[%s9066_s0 + $0x424] ss:$16 sps:$4 sm:$0xff]   ;;  %v5917_v63 = vld [vmem:[%s9066_s0 + $0x42c] ss:$16 sps:$4 sm:$0xff]  }
 0x129   :  { %v3498_v5 = vpop.f32.mrb[11].mxu0  ;;  %4863 = vst [vmem:[%s9069_s4 + $0x8] sm:$0xff] %v6308_v2  ;;  %2891 = vmatmul.mubr.bf16.gmra.mrb[116].mxu1 %v5895_v56 }
 0x12a   :  { %v4474_v6 = vadd.f32 %v7206_v25, %v4271_v3  ;;  %v4272_v7 = vmul.f32 %v7192_v17, %v3497_v4  ;;  %3708 = vmatmul.mubr.bf16.gmra.mrb[116].mxu0 %v5896_v61  ;;  %2898 = vmatprep.mubr.bf16.mxu1 %v5897_v62 }
 0x12b   :  { %3715 = vmatprep.mubr.bf16.mxu0 %v5899_v1 }
 0x12c   :  { %6313 = vtanh.f32 %v4474_v6  ;;  %v4475_v8 = vadd.f32 %v7206_v25, %v4272_v7  ;;  %v2684_v9 = vpop.f32.mrb[12].mxu1 }
 0x12d   :  { %v3501_v10 = vpop.f32.mrb[12].mxu0  ;;  %v2686_v11 = vpop.f32.mrb[13].mxu1 }
 0x12e   :  { %v6310_v13 = vpop.eup %6309  ;;  %6315 = vtanh.f32 %v4475_v8  ;;  %v3502_v14 = vadd.f32 %v3501_v10, %v2684_v9  ;;  %v3503_v15 = vpop.f32.mrb[13].mxu0  ;;  %v5919_v10 = vld [vmem:[%s9066_s0 + $0x420] ss:$16 sps:$4 sm:$0xff]  }
 0x12f   :  { %v2687_v16 = vpop.f32.mrb[14].mxu1  ;;  %4864 = vst [vmem:[%s9069_s4 + $0x10] sm:$0xff] %v6310_v13  ;;  %v3504_v20 = vpop.f32.mrb[14].mxu0  ;;  %v5920_v15 = vld [vmem:[%s9066_s0 + $0x428] ss:$16 sps:$4 sm:$0xff]  }
 0x130   :  { %v2689_v21 = vpop.f32.mrb[15].mxu1  ;;  %v6312_v23 = vpop.eup %6311  ;;  %v4273_v24 = vmul.f32 %v7192_v17, %v3502_v14  ;;  %v3505_v26 = vadd.f32 %v3504_v20, %v2687_v16  ;;  %v5921_v16 = vld [vmem:[%s9066_s0 + $0x444] ss:$16 sps:$4 sm:$0xff]   ;;  %v5923_v20 = vld [vmem:[%s9066_s0 + $0x44c] ss:$16 sps:$4 sm:$0xff]  }
 0x131   :  { %v3506_v27 = vpop.f32.mrb[15].mxu0  ;;  %4865 = vst [vmem:[%s9069_s4 + $0x18] sm:$0xff] %v6312_v23  ;;  %2899 = vmatmul.mubr.bf16.gmra.mrb[120].mxu1 %v5901_v12 }
 0x132   :  { %v4476_v28 = vadd.f32 %v7206_v25, %v4273_v24  ;;  %v4274_v29 = vmul.f32 %v7192_v17, %v3505_v26  ;;  %3716 = vmatmul.mubr.bf16.gmra.mrb[120].mxu0 %v5902_v18  ;;  %2906 = vmatprep.mubr.bf16.mxu1 %v5903_v19 }
 0x133   :  { %3723 = vmatprep.mubr.bf16.mxu0 %v5905_v22 }
 0x134   :  { %6317 = vtanh.f32 %v4476_v28  ;;  %v4477_v30 = vadd.f32 %v7206_v25, %v4274_v29  ;;  %v2692_v31 = vpop.f32.mrb[16].mxu1 }
 0x135   :  { %v3509_v32 = vpop.f32.mrb[16].mxu0  ;;  %v2694_v33 = vpop.f32.mrb[17].mxu1 }
 0x136   :  { %v6314_v35 = vpop.eup %6313  ;;  %6319 = vtanh.f32 %v4477_v30  ;;  %v3510_v36 = vadd.f32 %v3509_v32, %v2692_v31  ;;  %v3511_v37 = vpop.f32.mrb[17].mxu0  ;;  %v5925_v32 = vld [vmem:[%s9066_s0 + $0x440] ss:$16 sps:$4 sm:$0xff]  }
 0x137   :  { %v2695_v38 = vpop.f32.mrb[18].mxu1  ;;  %4866 = vst [vmem:[%s9069_s4 + $0x20] sm:$0xff] %v6314_v35  ;;  %v3512_v41 = vpop.f32.mrb[18].mxu0  ;;  %v5926_v37 = vld [vmem:[%s9066_s0 + $0x448] ss:$16 sps:$4 sm:$0xff]  }
 0x138   :  { %v2697_v42 = vpop.f32.mrb[19].mxu1  ;;  %v6316_v44 = vpop.eup %6315  ;;  %v4275_v45 = vmul.f32 %v7192_v17, %v3510_v36  ;;  %v3513_v46 = vadd.f32 %v3512_v41, %v2695_v38  ;;  %v5927_v38 = vld [vmem:[%s9066_s0 + $0x464] ss:$16 sps:$4 sm:$0xff]   ;;  %v5929_v41 = vld [vmem:[%s9066_s0 + $0x46c] ss:$16 sps:$4 sm:$0xff]  }
 0x139   :  { %v3514_v47 = vpop.f32.mrb[19].mxu0  ;;  %4867 = vst [vmem:[%s9069_s4 + $0x28] sm:$0xff] %v6316_v44  ;;  %2907 = vmatmul.mubr.bf16.gmra.mrb[124].mxu1 %v5907_v34 }
 0x13a   :  { %v4478_v48 = vadd.f32 %v7206_v25, %v4275_v45  ;;  %v4276_v49 = vmul.f32 %v7192_v17, %v3513_v46  ;;  %3724 = vmatmul.mubr.bf16.gmra.mrb[124].mxu0 %v5908_v39  ;;  %2914 = vmatprep.mubr.bf16.mxu1 %v5909_v40 }
 0x13b   :  { %3731 = vmatprep.mubr.bf16.mxu0 %v5911_v43 }
 0x13c   :  { %6321 = vtanh.f32 %v4478_v48  ;;  %v4479_v50 = vadd.f32 %v7206_v25, %v4276_v49  ;;  %v2700_v51 = vpop.f32.mrb[20].mxu1 }
 0x13d   :  { %v3517_v52 = vpop.f32.mrb[20].mxu0  ;;  %v2702_v53 = vpop.f32.mrb[21].mxu1 }
 0x13e   :  { %v6318_v55 = vpop.eup %6317  ;;  %6323 = vtanh.f32 %v4479_v50  ;;  %v3518_v56 = vadd.f32 %v3517_v52, %v2700_v51  ;;  %v3519_v57 = vpop.f32.mrb[21].mxu0  ;;  %v5931_v52 = vld [vmem:[%s9066_s0 + $0x460] ss:$16 sps:$4 sm:$0xff]  }
 0x13f   :  { %v2703_v58 = vpop.f32.mrb[22].mxu1  ;;  %4868 = vst [vmem:[%s9069_s4 + $0x30] sm:$0xff] %v6318_v55  ;;  %v3520_v61 = vpop.f32.mrb[22].mxu0  ;;  %v5932_v57 = vld [vmem:[%s9066_s0 + $0x468] ss:$16 sps:$4 sm:$0xff]  }
 0x140   :  { %v2705_v62 = vpop.f32.mrb[23].mxu1  ;;  %v6320_v0 = vpop.eup %6319  ;;  %v4277_v1 = vmul.f32 %v7192_v17, %v3518_v56  ;;  %v3521_v2 = vadd.f32 %v3520_v61, %v2703_v58  ;;  %v5933_v58 = vld [vmem:[%s9066_s0 + $0x484] ss:$16 sps:$4 sm:$0xff]   ;;  %v5935_v61 = vld [vmem:[%s9066_s0 + $0x48c] ss:$16 sps:$4 sm:$0xff]  }
 0x141   :  { %v3522_v3 = vpop.f32.mrb[23].mxu0  ;;  %4869 = vst [vmem:[%s9069_s4 + $0x38] sm:$0xff] %v6320_v0  ;;  %2915 = vmatmul.mubr.bf16.gmra.mrb[128].mxu1 %v5913_v54 }
 0x142   :  { %v4480_v4 = vadd.f32 %v7206_v25, %v4277_v1  ;;  %v4278_v5 = vmul.f32 %v7192_v17, %v3521_v2  ;;  %3732 = vmatmul.mubr.bf16.gmra.mrb[128].mxu0 %v5914_v59  ;;  %2922 = vmatprep.mubr.bf16.mxu1 %v5915_v60 }
 0x143   :  { %3739 = vmatprep.mubr.bf16.mxu0 %v5917_v63 }
 0x144   :  { %6325 = vtanh.f32 %v4480_v4  ;;  %v4481_v6 = vadd.f32 %v7206_v25, %v4278_v5  ;;  %v2708_v7 = vpop.f32.mrb[24].mxu1 }
 0x145   :  { %v3525_v8 = vpop.f32.mrb[24].mxu0  ;;  %v2710_v9 = vpop.f32.mrb[25].mxu1 }
 0x146   :  { %v6322_v11 = vpop.eup %6321  ;;  %6327 = vtanh.f32 %v4481_v6  ;;  %v3526_v12 = vadd.f32 %v3525_v8, %v2708_v7  ;;  %v3527_v13 = vpop.f32.mrb[25].mxu0  ;;  %v5937_v8 = vld [vmem:[%s9066_s0 + $0x480] ss:$16 sps:$4 sm:$0xff]  }
 0x147   :  { %v2711_v14 = vpop.f32.mrb[26].mxu1  ;;  %4870 = vst [vmem:[%s9069_s4 + $0x40] sm:$0xff] %v6322_v11  ;;  %v3528_v18 = vpop.f32.mrb[26].mxu0  ;;  %v5938_v13 = vld [vmem:[%s9066_s0 + $0x488] ss:$16 sps:$4 sm:$0xff]  }
 0x148   :  { %v2713_v19 = vpop.f32.mrb[27].mxu1  ;;  %v6324_v21 = vpop.eup %6323  ;;  %v4279_v22 = vmul.f32 %v7192_v17, %v3526_v12  ;;  %v3529_v23 = vadd.f32 %v3528_v18, %v2711_v14  ;;  %v5939_v14 = vld [vmem:[%s9066_s0 + $0x4a4] ss:$16 sps:$4 sm:$0xff]   ;;  %v5941_v18 = vld [vmem:[%s9066_s0 + $0x4ac] ss:$16 sps:$4 sm:$0xff]  }
 0x149   :  { %v3530_v24 = vpop.f32.mrb[27].mxu0  ;;  %4871 = vst [vmem:[%s9069_s4 + $0x48] sm:$0xff] %v6324_v21  ;;  %2923 = vmatmul.mubr.bf16.gmra.mrb[132].mxu1 %v5919_v10 }
 0x14a   :  { %v4482_v26 = vadd.f32 %v7206_v25, %v4279_v22  ;;  %v4280_v27 = vmul.f32 %v7192_v17, %v3529_v23  ;;  %3740 = vmatmul.mubr.bf16.gmra.mrb[132].mxu0 %v5920_v15  ;;  %2930 = vmatprep.mubr.bf16.mxu1 %v5921_v16 }
 0x14b   :  { %3747 = vmatprep.mubr.bf16.mxu0 %v5923_v20 }
 0x14c   :  { %6329 = vtanh.f32 %v4482_v26  ;;  %v4483_v28 = vadd.f32 %v7206_v25, %v4280_v27  ;;  %v2716_v29 = vpop.f32.mrb[28].mxu1 }
 0x14d   :  { %v3533_v30 = vpop.f32.mrb[28].mxu0  ;;  %v2718_v31 = vpop.f32.mrb[29].mxu1 }
 0x14e   :  { %v6326_v33 = vpop.eup %6325  ;;  %6331 = vtanh.f32 %v4483_v28  ;;  %v3534_v34 = vadd.f32 %v3533_v30, %v2716_v29  ;;  %v3535_v35 = vpop.f32.mrb[29].mxu0  ;;  %v5943_v30 = vld [vmem:[%s9066_s0 + $0x4a0] ss:$16 sps:$4 sm:$0xff]  }
 0x14f   :  { %v2719_v36 = vpop.f32.mrb[30].mxu1  ;;  %4872 = vst [vmem:[%s9069_s4 + $0x50] sm:$0xff] %v6326_v33  ;;  %v3536_v39 = vpop.f32.mrb[30].mxu0  ;;  %v5944_v35 = vld [vmem:[%s9066_s0 + $0x4a8] ss:$16 sps:$4 sm:$0xff]  }
 0x150   :  { %v2721_v40 = vpop.f32.mrb[31].mxu1  ;;  %v6328_v42 = vpop.eup %6327  ;;  %v4281_v43 = vmul.f32 %v7192_v17, %v3534_v34  ;;  %v3537_v44 = vadd.f32 %v3536_v39, %v2719_v36  ;;  %v5945_v36 = vld [vmem:[%s9066_s0 + $0x4c4] ss:$16 sps:$4 sm:$0xff]   ;;  %v5947_v39 = vld [vmem:[%s9066_s0 + $0x4cc] ss:$16 sps:$4 sm:$0xff]  }
 0x151   :  { %v3538_v45 = vpop.f32.mrb[31].mxu0  ;;  %4873 = vst [vmem:[%s9069_s4 + $0x58] sm:$0xff] %v6328_v42  ;;  %2931 = vmatmul.mubr.bf16.gmra.mrb[136].mxu1 %v5925_v32 }
 0x152   :  { %v4484_v46 = vadd.f32 %v7206_v25, %v4281_v43  ;;  %v4282_v47 = vmul.f32 %v7192_v17, %v3537_v44  ;;  %3748 = vmatmul.mubr.bf16.gmra.mrb[136].mxu0 %v5926_v37  ;;  %2938 = vmatprep.mubr.bf16.mxu1 %v5927_v38 }
 0x153   :  { %3755 = vmatprep.mubr.bf16.mxu0 %v5929_v41 }
 0x154   :  { %6333 = vtanh.f32 %v4484_v46  ;;  %v4485_v48 = vadd.f32 %v7206_v25, %v4282_v47  ;;  %v2724_v49 = vpop.f32.mrb[32].mxu1 }
 0x155   :  { %v3541_v50 = vpop.f32.mrb[32].mxu0  ;;  %v2726_v51 = vpop.f32.mrb[33].mxu1 }
 0x156   :  { %v6330_v53 = vpop.eup %6329  ;;  %6335 = vtanh.f32 %v4485_v48  ;;  %v3542_v54 = vadd.f32 %v3541_v50, %v2724_v49  ;;  %v3543_v55 = vpop.f32.mrb[33].mxu0  ;;  %v5949_v50 = vld [vmem:[%s9066_s0 + $0x4c0] ss:$16 sps:$4 sm:$0xff]  }
 0x157   :  { %v2727_v56 = vpop.f32.mrb[34].mxu1  ;;  %4874 = vst [vmem:[%s9069_s4 + $0x60] sm:$0xff] %v6330_v53  ;;  %v3544_v59 = vpop.f32.mrb[34].mxu0  ;;  %v5950_v55 = vld [vmem:[%s9066_s0 + $0x4c8] ss:$16 sps:$4 sm:$0xff]  }
 0x158   :  { %v2729_v60 = vpop.f32.mrb[35].mxu1  ;;  %v6332_v62 = vpop.eup %6331  ;;  %v4283_v63 = vmul.f32 %v7192_v17, %v3542_v54  ;;  %v3545_v0 = vadd.f32 %v3544_v59, %v2727_v56  ;;  %v5951_v56 = vld [vmem:[%s9066_s0 + $0x4e4] ss:$16 sps:$4 sm:$0xff]   ;;  %v5953_v59 = vld [vmem:[%s9066_s0 + $0x4ec] ss:$16 sps:$4 sm:$0xff]  }
 0x159   :  { %v3546_v1 = vpop.f32.mrb[35].mxu0  ;;  %4875 = vst [vmem:[%s9069_s4 + $0x68] sm:$0xff] %v6332_v62  ;;  %2939 = vmatmul.mubr.bf16.gmra.mrb[140].mxu1 %v5931_v52 }
 0x15a   :  { %v4486_v2 = vadd.f32 %v7206_v25, %v4283_v63  ;;  %v4284_v3 = vmul.f32 %v7192_v17, %v3545_v0  ;;  %3756 = vmatmul.mubr.bf16.gmra.mrb[140].mxu0 %v5932_v57  ;;  %2946 = vmatprep.mubr.bf16.mxu1 %v5933_v58 }
 0x15b   :  { %3763 = vmatprep.mubr.bf16.mxu0 %v5935_v61 }
 0x15c   :  { %6337 = vtanh.f32 %v4486_v2  ;;  %v4487_v4 = vadd.f32 %v7206_v25, %v4284_v3  ;;  %v2732_v5 = vpop.f32.mrb[36].mxu1 }
 0x15d   :  { %v3549_v6 = vpop.f32.mrb[36].mxu0  ;;  %v2734_v7 = vpop.f32.mrb[37].mxu1 }
 0x15e   :  { %v6334_v9 = vpop.eup %6333  ;;  %6339 = vtanh.f32 %v4487_v4  ;;  %v3550_v10 = vadd.f32 %v3549_v6, %v2732_v5  ;;  %v3551_v11 = vpop.f32.mrb[37].mxu0  ;;  %v5955_v6 = vld [vmem:[%s9066_s0 + $0x4e0] ss:$16 sps:$4 sm:$0xff]  }
 0x15f   :  { %v2735_v12 = vpop.f32.mrb[38].mxu1  ;;  %4876 = vst [vmem:[%s9069_s4 + $0x70] sm:$0xff] %v6334_v9  ;;  %v3552_v15 = vpop.f32.mrb[38].mxu0  ;;  %v5956_v11 = vld [vmem:[%s9066_s0 + $0x4e8] ss:$16 sps:$4 sm:$0xff]  }
 0x160   :  { %v2737_v16 = vpop.f32.mrb[39].mxu1  ;;  %v6336_v19 = vpop.eup %6335  ;;  %v4285_v20 = vmul.f32 %v7192_v17, %v3550_v10  ;;  %v3553_v21 = vadd.f32 %v3552_v15, %v2735_v12  ;;  %v5957_v12 = vld [vmem:[%s9066_s0 + $0x504] ss:$16 sps:$4 sm:$0xff]   ;;  %v5959_v15 = vld [vmem:[%s9066_s0 + $0x50c] ss:$16 sps:$4 sm:$0xff]  }
 0x161   :  { %v3554_v22 = vpop.f32.mrb[39].mxu0  ;;  %4877 = vst [vmem:[%s9069_s4 + $0x78] sm:$0xff] %v6336_v19  ;;  %2947 = vmatmul.mubr.bf16.gmra.mrb[144].mxu1 %v5937_v8 }
 0x162   :  { %v4488_v23 = vadd.f32 %v7206_v25, %v4285_v20  ;;  %v4286_v24 = vmul.f32 %v7192_v17, %v3553_v21  ;;  %3764 = vmatmul.mubr.bf16.gmra.mrb[144].mxu0 %v5938_v13  ;;  %2954 = vmatprep.mubr.bf16.mxu1 %v5939_v14 }
 0x163   :  { %3771 = vmatprep.mubr.bf16.mxu0 %v5941_v18 }
 0x164   :  { %6341 = vtanh.f32 %v4488_v23  ;;  %v4489_v26 = vadd.f32 %v7206_v25, %v4286_v24  ;;  %v2740_v27 = vpop.f32.mrb[40].mxu1 }
 0x165   :  { %v3557_v28 = vpop.f32.mrb[40].mxu0  ;;  %v2742_v29 = vpop.f32.mrb[41].mxu1 }
 0x166   :  { %v6338_v31 = vpop.eup %6337  ;;  %6343 = vtanh.f32 %v4489_v26  ;;  %v3558_v32 = vadd.f32 %v3557_v28, %v2740_v27  ;;  %v3559_v33 = vpop.f32.mrb[41].mxu0  ;;  %v5961_v28 = vld [vmem:[%s9066_s0 + $0x500] ss:$16 sps:$4 sm:$0xff]  }
 0x167   :  { %v2743_v34 = vpop.f32.mrb[42].mxu1  ;;  %4878 = vst [vmem:[%s9069_s4 + $0x80] sm:$0xff] %v6338_v31  ;;  %v3560_v37 = vpop.f32.mrb[42].mxu0  ;;  %v5962_v33 = vld [vmem:[%s9066_s0 + $0x508] ss:$16 sps:$4 sm:$0xff]  }
 0x168   :  { %v2745_v38 = vpop.f32.mrb[43].mxu1  ;;  %v6340_v40 = vpop.eup %6339  ;;  %v4287_v41 = vmul.f32 %v7192_v17, %v3558_v32  ;;  %v3561_v42 = vadd.f32 %v3560_v37, %v2743_v34  ;;  %v5963_v34 = vld [vmem:[%s9066_s0 + $0x524] ss:$16 sps:$4 sm:$0xff]   ;;  %v5965_v37 = vld [vmem:[%s9066_s0 + $0x52c] ss:$16 sps:$4 sm:$0xff]  }
 0x169   :  { %v3562_v43 = vpop.f32.mrb[43].mxu0  ;;  %4879 = vst [vmem:[%s9069_s4 + $0x88] sm:$0xff] %v6340_v40  ;;  %2955 = vmatmul.mubr.bf16.gmra.mrb[148].mxu1 %v5943_v30 }
 0x16a   :  { %v4490_v44 = vadd.f32 %v7206_v25, %v4287_v41  ;;  %v4288_v45 = vmul.f32 %v7192_v17, %v3561_v42  ;;  %3772 = vmatmul.mubr.bf16.gmra.mrb[148].mxu0 %v5944_v35  ;;  %2962 = vmatprep.mubr.bf16.mxu1 %v5945_v36 }
 0x16b   :  { %3779 = vmatprep.mubr.bf16.mxu0 %v5947_v39 }
 0x16c   :  { %6345 = vtanh.f32 %v4490_v44  ;;  %v4491_v46 = vadd.f32 %v7206_v25, %v4288_v45  ;;  %v2748_v47 = vpop.f32.mrb[44].mxu1 }
 0x16d   :  { %v3565_v48 = vpop.f32.mrb[44].mxu0  ;;  %v2750_v49 = vpop.f32.mrb[45].mxu1 }
 0x16e   :  { %v6342_v51 = vpop.eup %6341  ;;  %6347 = vtanh.f32 %v4491_v46  ;;  %v3566_v52 = vadd.f32 %v3565_v48, %v2748_v47  ;;  %v3567_v53 = vpop.f32.mrb[45].mxu0  ;;  %v5967_v48 = vld [vmem:[%s9066_s0 + $0x520] ss:$16 sps:$4 sm:$0xff]  }
 0x16f   :  { %v2751_v54 = vpop.f32.mrb[46].mxu1  ;;  %4880 = vst [vmem:[%s9069_s4 + $0x90] sm:$0xff] %v6342_v51  ;;  %v3568_v57 = vpop.f32.mrb[46].mxu0  ;;  %v5968_v53 = vld [vmem:[%s9066_s0 + $0x528] ss:$16 sps:$4 sm:$0xff]  }
 0x170   :  { %v2753_v58 = vpop.f32.mrb[47].mxu1  ;;  %v6344_v60 = vpop.eup %6343  ;;  %v4289_v61 = vmul.f32 %v7192_v17, %v3566_v52  ;;  %v3569_v62 = vadd.f32 %v3568_v57, %v2751_v54  ;;  %v5969_v54 = vld [vmem:[%s9066_s0 + $0x544] ss:$16 sps:$4 sm:$0xff]   ;;  %v5971_v57 = vld [vmem:[%s9066_s0 + $0x54c] ss:$16 sps:$4 sm:$0xff]  }
 0x171   :  { %v3570_v63 = vpop.f32.mrb[47].mxu0  ;;  %4881 = vst [vmem:[%s9069_s4 + $0x98] sm:$0xff] %v6344_v60  ;;  %2963 = vmatmul.mubr.bf16.gmra.mrb[152].mxu1 %v5949_v50 }
 0x172   :  { %v4492_v0 = vadd.f32 %v7206_v25, %v4289_v61  ;;  %v4290_v1 = vmul.f32 %v7192_v17, %v3569_v62  ;;  %3780 = vmatmul.mubr.bf16.gmra.mrb[152].mxu0 %v5950_v55  ;;  %2970 = vmatprep.mubr.bf16.mxu1 %v5951_v56 }
 0x173   :  { %3787 = vmatprep.mubr.bf16.mxu0 %v5953_v59 }
 0x174   :  { %6349 = vtanh.f32 %v4492_v0  ;;  %v4493_v2 = vadd.f32 %v7206_v25, %v4290_v1  ;;  %v2756_v3 = vpop.f32.mrb[48].mxu1 }
 0x175   :  { %v3573_v4 = vpop.f32.mrb[48].mxu0  ;;  %v2758_v5 = vpop.f32.mrb[49].mxu1 }
 0x176   :  { %v6346_v7 = vpop.eup %6345  ;;  %6351 = vtanh.f32 %v4493_v2  ;;  %v3574_v8 = vadd.f32 %v3573_v4, %v2756_v3  ;;  %v3575_v9 = vpop.f32.mrb[49].mxu0  ;;  %v5973_v4 = vld [vmem:[%s9066_s0 + $0x540] ss:$16 sps:$4 sm:$0xff]  }
 0x177   :  { %v2759_v10 = vpop.f32.mrb[50].mxu1  ;;  %4882 = vst [vmem:[%s9069_s4 + $0xa0] sm:$0xff] %v6346_v7  ;;  %v3576_v13 = vpop.f32.mrb[50].mxu0  ;;  %v5974_v9 = vld [vmem:[%s9066_s0 + $0x548] ss:$16 sps:$4 sm:$0xff]  }
 0x178   :  { %v2761_v14 = vpop.f32.mrb[51].mxu1  ;;  %v6348_v16 = vpop.eup %6347  ;;  %v4291_v18 = vmul.f32 %v7192_v17, %v3574_v8  ;;  %v3577_v19 = vadd.f32 %v3576_v13, %v2759_v10  ;;  %v5975_v10 = vld [vmem:[%s9066_s0 + $0x564] ss:$16 sps:$4 sm:$0xff]   ;;  %v5977_v13 = vld [vmem:[%s9066_s0 + $0x56c] ss:$16 sps:$4 sm:$0xff]  }
 0x179   :  { %v3578_v20 = vpop.f32.mrb[51].mxu0  ;;  %4883 = vst [vmem:[%s9069_s4 + $0xa8] sm:$0xff] %v6348_v16  ;;  %2971 = vmatmul.mubr.bf16.gmra.mrb[156].mxu1 %v5955_v6 }
 0x17a   :  { %v4494_v21 = vadd.f32 %v7206_v25, %v4291_v18  ;;  %v4292_v22 = vmul.f32 %v7192_v17, %v3577_v19  ;;  %3788 = vmatmul.mubr.bf16.gmra.mrb[156].mxu0 %v5956_v11  ;;  %2978 = vmatprep.mubr.bf16.mxu1 %v5957_v12 }
 0x17b   :  { %3795 = vmatprep.mubr.bf16.mxu0 %v5959_v15 }
 0x17c   :  { %6353 = vtanh.f32 %v4494_v21  ;;  %v4495_v23 = vadd.f32 %v7206_v25, %v4292_v22  ;;  %v2764_v24 = vpop.f32.mrb[52].mxu1 }
 0x17d   :  { %v3581_v26 = vpop.f32.mrb[52].mxu0  ;;  %v2766_v27 = vpop.f32.mrb[53].mxu1 }
 0x17e   :  { %v6350_v29 = vpop.eup %6349  ;;  %6355 = vtanh.f32 %v4495_v23  ;;  %v3582_v30 = vadd.f32 %v3581_v26, %v2764_v24  ;;  %v3583_v31 = vpop.f32.mrb[53].mxu0  ;;  %v5979_v26 = vld [vmem:[%s9066_s0 + $0x560] ss:$16 sps:$4 sm:$0xff]  }
 0x17f   :  { %v2767_v32 = vpop.f32.mrb[54].mxu1  ;;  %4884 = vst [vmem:[%s9069_s4 + $0xb0] sm:$0xff] %v6350_v29  ;;  %v3584_v35 = vpop.f32.mrb[54].mxu0  ;;  %v5980_v31 = vld [vmem:[%s9066_s0 + $0x568] ss:$16 sps:$4 sm:$0xff]  }
 0x180   :  { %v2769_v36 = vpop.f32.mrb[55].mxu1  ;;  %v6352_v38 = vpop.eup %6351  ;;  %v4293_v39 = vmul.f32 %v7192_v17, %v3582_v30  ;;  %v3585_v40 = vadd.f32 %v3584_v35, %v2767_v32  ;;  %v5981_v32 = vld [vmem:[%s9066_s0 + $0x584] ss:$16 sps:$4 sm:$0xff]   ;;  %v5983_v35 = vld [vmem:[%s9066_s0 + $0x58c] ss:$16 sps:$4 sm:$0xff]  }
 0x181   :  { %v3586_v41 = vpop.f32.mrb[55].mxu0  ;;  %4885 = vst [vmem:[%s9069_s4 + $0xb8] sm:$0xff] %v6352_v38  ;;  %2979 = vmatmul.mubr.bf16.gmra.mrb[160].mxu1 %v5961_v28 }
 0x182   :  { %v4496_v42 = vadd.f32 %v7206_v25, %v4293_v39  ;;  %v4294_v43 = vmul.f32 %v7192_v17, %v3585_v40  ;;  %3796 = vmatmul.mubr.bf16.gmra.mrb[160].mxu0 %v5962_v33  ;;  %2986 = vmatprep.mubr.bf16.mxu1 %v5963_v34 }
 0x183   :  { %3803 = vmatprep.mubr.bf16.mxu0 %v5965_v37 }
 0x184   :  { %6357 = vtanh.f32 %v4496_v42  ;;  %v4497_v44 = vadd.f32 %v7206_v25, %v4294_v43  ;;  %v2772_v45 = vpop.f32.mrb[56].mxu1 }
 0x185   :  { %v3589_v46 = vpop.f32.mrb[56].mxu0  ;;  %v2774_v47 = vpop.f32.mrb[57].mxu1 }
 0x186   :  { %v6354_v49 = vpop.eup %6353  ;;  %6359 = vtanh.f32 %v4497_v44  ;;  %v3590_v50 = vadd.f32 %v3589_v46, %v2772_v45  ;;  %v3591_v51 = vpop.f32.mrb[57].mxu0  ;;  %v5985_v46 = vld [vmem:[%s9066_s0 + $0x580] ss:$16 sps:$4 sm:$0xff]  }
 0x187   :  { %v2775_v52 = vpop.f32.mrb[58].mxu1  ;;  %4886 = vst [vmem:[%s9069_s4 + $0xc0] sm:$0xff] %v6354_v49  ;;  %v3592_v55 = vpop.f32.mrb[58].mxu0  ;;  %v5986_v51 = vld [vmem:[%s9066_s0 + $0x588] ss:$16 sps:$4 sm:$0xff]  }
 0x188   :  { %v2777_v56 = vpop.f32.mrb[59].mxu1  ;;  %v6356_v58 = vpop.eup %6355  ;;  %v4295_v59 = vmul.f32 %v7192_v17, %v3590_v50  ;;  %v3593_v60 = vadd.f32 %v3592_v55, %v2775_v52  ;;  %v5987_v52 = vld [vmem:[%s9066_s0 + $0x5a4] ss:$16 sps:$4 sm:$0xff]   ;;  %v5989_v55 = vld [vmem:[%s9066_s0 + $0x5ac] ss:$16 sps:$4 sm:$0xff]  }
 0x189   :  { %v3594_v61 = vpop.f32.mrb[59].mxu0  ;;  %4887 = vst [vmem:[%s9069_s4 + $0xc8] sm:$0xff] %v6356_v58  ;;  %2987 = vmatmul.mubr.bf16.gmra.mrb[164].mxu1 %v5967_v48 }
 0x18a   :  { %v4498_v62 = vadd.f32 %v7206_v25, %v4295_v59  ;;  %v4296_v63 = vmul.f32 %v7192_v17, %v3593_v60  ;;  %3804 = vmatmul.mubr.bf16.gmra.mrb[164].mxu0 %v5968_v53  ;;  %2994 = vmatprep.mubr.bf16.mxu1 %v5969_v54 }
 0x18b   :  { %3811 = vmatprep.mubr.bf16.mxu0 %v5971_v57 }
 0x18c   :  { %6361 = vtanh.f32 %v4498_v62  ;;  %v4499_v0 = vadd.f32 %v7206_v25, %v4296_v63  ;;  %v2780_v1 = vpop.f32.mrb[60].mxu1 }
 0x18d   :  { %v3597_v2 = vpop.f32.mrb[60].mxu0  ;;  %v2782_v3 = vpop.f32.mrb[61].mxu1 }
 0x18e   :  { %v6358_v5 = vpop.eup %6357  ;;  %6363 = vtanh.f32 %v4499_v0  ;;  %v3598_v6 = vadd.f32 %v3597_v2, %v2780_v1  ;;  %v3599_v7 = vpop.f32.mrb[61].mxu0  ;;  %v5991_v2 = vld [vmem:[%s9066_s0 + $0x5a0] ss:$16 sps:$4 sm:$0xff]  }
 0x18f   :  { %v2783_v8 = vpop.f32.mrb[62].mxu1  ;;  %4888 = vst [vmem:[%s9069_s4 + $0xd0] sm:$0xff] %v6358_v5  ;;  %v3600_v11 = vpop.f32.mrb[62].mxu0  ;;  %v5993_v7 = vld [vmem:[%s9066_s0 + $0x5c4] ss:$16 sps:$4 sm:$0xff]  }
 0x190   :  { %v2785_v12 = vpop.f32.mrb[63].mxu1  ;;  %v6360_v14 = vpop.eup %6359  ;;  %v4297_v15 = vmul.f32 %v7192_v17, %v3598_v6  ;;  %v3601_v16 = vadd.f32 %v3600_v11, %v2783_v8 }
 0x191   :  { %v3602_v18 = vpop.f32.mrb[63].mxu0  ;;  %4889 = vst [vmem:[%s9069_s4 + $0xd8] sm:$0xff] %v6360_v14  ;;  %2995 = vmatmul.mubr.bf16.gmra.mrb[168].mxu1 %v5973_v4  ;;  %v7601_v12 = vld [vmem:[%s9067_s2] ss:$0 sm:$0xff] }
 0x192   :  { %v4500_v19 = vadd.f32 %v7206_v25, %v4297_v15  ;;  %v4298_v20 = vmul.f32 %v7192_v17, %v3601_v16  ;;  %3812 = vmatmul.mubr.bf16.gmra.mrb[168].mxu0 %v5974_v9  ;;  %3002 = vmatprep.mubr.bf16.mxu1 %v5975_v10  ;;  %v5995_v10 = vld [vmem:[%s9066_s0 + $0x5cc] ss:$16 sps:$4 sm:$0xff]  }
 0x193   :  { %3819 = vmatprep.mubr.bf16.mxu0 %v5977_v13 }
 0x194   :  { %6365 = vtanh.f32 %v4500_v19  ;;  %v4501_v21 = vadd.f32 %v7206_v25, %v4298_v20  ;;  %v2788_v22 = vpop.f32.mrb[64].mxu1  ;;  %v7612_v19 = vld [vmem:[%s9068_s3] ss:$0 sm:$0xff] }
 0x195   :  { %v3605_v23 = vpop.f32.mrb[64].mxu0  ;;  %v2790_v24 = vpop.f32.mrb[65].mxu1 }
 0x196   :  { %v6362_v27 = vpop.eup %6361  ;;  %6367 = vtanh.f32 %v4501_v21  ;;  %v3606_v28 = vadd.f32 %v3605_v23, %v2788_v22  ;;  %v3607_v29 = vpop.f32.mrb[65].mxu0 }
 0x197   :  { %v2791_v30 = vpop.f32.mrb[66].mxu1  ;;  %4890 = vst [vmem:[%s9069_s4 + $0xe0] sm:$0xff] %v6362_v27  ;;  %v3608_v33 = vpop.f32.mrb[66].mxu0  ;;  %v5998_v29 = vld [vmem:[%s9066_s0 + $0x5c8] ss:$16 sps:$4 sm:$0xff]  }
 0x198   :  { %v2793_v34 = vpop.f32.mrb[67].mxu1  ;;  %v6364_v36 = vpop.eup %6363  ;;  %v4299_v37 = vmul.f32 %v7192_v17, %v3606_v28  ;;  %v3609_v38 = vadd.f32 %v3608_v33, %v2791_v30  ;;  %v5999_v30 = vld [vmem:[%s9066_s0 + $0x5e4] ss:$16 sps:$4 sm:$0xff]   ;;  %v6001_v33 = vld [vmem:[%s9066_s0 + $0x5ec] ss:$16 sps:$4 sm:$0xff]  }
 0x199   :  { %v3610_v39 = vpop.f32.mrb[67].mxu0  ;;  %4891 = vst [vmem:[%s9069_s4 + $0xe8] sm:$0xff] %v6364_v36  ;;  %3003 = vmatmul.mubr.bf16.gmra.mrb[172].mxu1 %v5979_v26 }
 0x19a   :  { %v4502_v40 = vadd.f32 %v7206_v25, %v4299_v37  ;;  %v4300_v41 = vmul.f32 %v7192_v17, %v3609_v38  ;;  %3820 = vmatmul.mubr.bf16.gmra.mrb[172].mxu0 %v5980_v31  ;;  %3010 = vmatprep.mubr.bf16.mxu1 %v5981_v32 }
 0x19b   :  { %3827 = vmatprep.mubr.bf16.mxu0 %v5983_v35 }
 0x19c   :  { %6369 = vtanh.f32 %v4502_v40  ;;  %v4503_v42 = vadd.f32 %v7206_v25, %v4300_v41  ;;  %v2796_v43 = vpop.f32.mrb[68].mxu1 }
 0x19d   :  { %v3613_v44 = vpop.f32.mrb[68].mxu0  ;;  %v2798_v45 = vpop.f32.mrb[69].mxu1 }
 0x19e   :  { %v6366_v47 = vpop.eup %6365  ;;  %6371 = vtanh.f32 %v4503_v42  ;;  %v3614_v48 = vadd.f32 %v3613_v44, %v2796_v43  ;;  %v3615_v49 = vpop.f32.mrb[69].mxu0  ;;  %v6003_v44 = vld [vmem:[%s9066_s0 + $0x5e0] ss:$16 sps:$4 sm:$0xff]  }
 0x19f   :  { %v2799_v50 = vpop.f32.mrb[70].mxu1  ;;  %4892 = vst [vmem:[%s9069_s4 + $0xf0] sm:$0xff] %v6366_v47  ;;  %v3616_v53 = vpop.f32.mrb[70].mxu0  ;;  %v6004_v49 = vld [vmem:[%s9066_s0 + $0x5e8] ss:$16 sps:$4 sm:$0xff]  }
 0x1a0   :  { %v2801_v54 = vpop.f32.mrb[71].mxu1  ;;  %v6368_v56 = vpop.eup %6367  ;;  %v4301_v57 = vmul.f32 %v7192_v17, %v3614_v48  ;;  %v3617_v58 = vadd.f32 %v3616_v53, %v2799_v50  ;;  %v6005_v50 = vld [vmem:[%s9066_s0 + $0x604] ss:$16 sps:$4 sm:$0xff]   ;;  %v6007_v53 = vld [vmem:[%s9066_s0 + $0x60c] ss:$16 sps:$4 sm:$0xff]  }
 0x1a1   :  { %v3618_v59 = vpop.f32.mrb[71].mxu0  ;;  %4893 = vst [vmem:[%s9069_s4 + $0xf8] sm:$0xff] %v6368_v56  ;;  %3011 = vmatmul.mubr.bf16.gmra.mrb[176].mxu1 %v5985_v46 }
 0x1a2   :  { %v4504_v60 = vadd.f32 %v7206_v25, %v4301_v57  ;;  %v4302_v61 = vmul.f32 %v7192_v17, %v3617_v58  ;;  %3828 = vmatmul.mubr.bf16.gmra.mrb[176].mxu0 %v5986_v51  ;;  %3018 = vmatprep.mubr.bf16.mxu1 %v5987_v52  ;;  %v5992_v17 = vld [vmem:[%s9066_s0 + $0x5a8] ss:$16 sps:$4 sm:$0xff]  }
 0x1a3   :  { %3835 = vmatprep.mubr.bf16.mxu0 %v5989_v55 }
 0x1a4   :  { %6373 = vtanh.f32 %v4504_v60  ;;  %v4505_v62 = vadd.f32 %v7206_v25, %v4302_v61  ;;  %v2804_v63 = vpop.f32.mrb[72].mxu1 }
 0x1a5   :  { %v3621_v0 = vpop.f32.mrb[72].mxu0  ;;  %v2806_v1 = vpop.f32.mrb[73].mxu1 }
 0x1a6   :  { %v6370_v3 = vpop.eup %6369  ;;  %6375 = vtanh.f32 %v4505_v62  ;;  %v3622_v4 = vadd.f32 %v3621_v0, %v2804_v63  ;;  %v3623_v5 = vpop.f32.mrb[73].mxu0  ;;  %v6009_v0 = vld [vmem:[%s9066_s0 + $0x600] ss:$16 sps:$4 sm:$0xff]  }
 0x1a7   :  { %v2807_v6 = vpop.f32.mrb[74].mxu1  ;;  %4894 = vst [vmem:[%s9069_s4 + $0x100] sm:$0xff] %v6370_v3  ;;  %v3624_v8 = vpop.f32.mrb[74].mxu0  ;;  %v6010_v5 = vld [vmem:[%s9066_s0 + $0x608] ss:$16 sps:$4 sm:$0xff]  }
 0x1a8   :  { %v2809_v9 = vpop.f32.mrb[75].mxu1  ;;  %v6372_v11 = vpop.eup %6371  ;;  %v4303_v13 = vmul.f32 %v7601_v12, %v3622_v4  ;;  %v3625_v14 = vadd.f32 %v3624_v8, %v2807_v6  ;;  %v6011_v6 = vld [vmem:[%s9066_s0 + $0x624] ss:$16 sps:$4 sm:$0xff]   ;;  %v6013_v8 = vld [vmem:[%s9066_s0 + $0x62c] ss:$16 sps:$4 sm:$0xff]  }
 0x1a9   :  { %v3626_v15 = vpop.f32.mrb[75].mxu0  ;;  %4895 = vst [vmem:[%s9069_s4 + $0x108] sm:$0xff] %v6372_v11  ;;  %3019 = vmatmul.mubr.bf16.gmra.mrb[180].mxu1 %v5991_v2 }
 0x1aa   :  { %v4506_v16 = vadd.f32 %v7206_v25, %v4303_v13  ;;  %v4304_v18 = vmul.f32 %v7601_v12, %v3625_v14  ;;  %3836 = vmatmul.mubr.bf16.gmra.mrb[180].mxu0 %v5992_v17  ;;  %3026 = vmatprep.mubr.bf16.mxu1 %v5993_v7  ;;  %v5997_v25 = vld [vmem:[%s9066_s0 + $0x5c0] ss:$16 sps:$4 sm:$0xff]  }
 0x1ab   :  { %3843 = vmatprep.mubr.bf16.mxu0 %v5995_v10 }
 0x1ac   :  { %6377 = vtanh.f32 %v4506_v16  ;;  %v4507_v20 = vadd.f32 %v7612_v19, %v4304_v18  ;;  %v2812_v21 = vpop.f32.mrb[76].mxu1 }
 0x1ad   :  { %v3629_v22 = vpop.f32.mrb[76].mxu0  ;;  %v2814_v23 = vpop.f32.mrb[77].mxu1 }
 0x1ae   :  { %v6374_v24 = vpop.eup %6373  ;;  %6379 = vtanh.f32 %v4507_v20  ;;  %v3630_v26 = vadd.f32 %v3629_v22, %v2812_v21  ;;  %v3631_v27 = vpop.f32.mrb[77].mxu0  ;;  %v6015_v22 = vld [vmem:[%s9066_s0 + $0x620] ss:$16 sps:$4 sm:$0xff]  }
 0x1af   :  { %v2815_v28 = vpop.f32.mrb[78].mxu1  ;;  %4896 = vst [vmem:[%s9069_s4 + $0x110] sm:$0xff] %v6374_v24  ;;  %v3632_v31 = vpop.f32.mrb[78].mxu0  ;;  %v6016_v27 = vld [vmem:[%s9066_s0 + $0x628] ss:$16 sps:$4 sm:$0xff]  }
 0x1b0   :  { %v2817_v32 = vpop.f32.mrb[79].mxu1  ;;  %v6376_v34 = vpop.eup %6375  ;;  %v4305_v35 = vmul.f32 %v7601_v12, %v3630_v26  ;;  %v3633_v36 = vadd.f32 %v3632_v31, %v2815_v28  ;;  %v6017_v28 = vld [vmem:[%s9066_s0 + $0x644] ss:$16 sps:$4 sm:$0xff]   ;;  %v6019_v31 = vld [vmem:[%s9066_s0 + $0x64c] ss:$16 sps:$4 sm:$0xff]  }
 0x1b1   :  { %v3634_v37 = vpop.f32.mrb[79].mxu0  ;;  %4897 = vst [vmem:[%s9069_s4 + $0x118] sm:$0xff] %v6376_v34  ;;  %3027 = vmatmul.mubr.bf16.gmra.mrb[184].mxu1 %v5997_v25 }
 0x1b2   :  { %v4508_v38 = vadd.f32 %v7612_v19, %v4305_v35  ;;  %v4306_v39 = vmul.f32 %v7601_v12, %v3633_v36  ;;  %3844 = vmatmul.mubr.bf16.gmra.mrb[184].mxu0 %v5998_v29  ;;  %3034 = vmatprep.mubr.bf16.mxu1 %v5999_v30 }
 0x1b3   :  { %3851 = vmatprep.mubr.bf16.mxu0 %v6001_v33 }
 0x1b4   :  { %6381 = vtanh.f32 %v4508_v38  ;;  %v4509_v40 = vadd.f32 %v7612_v19, %v4306_v39  ;;  %v2820_v41 = vpop.f32.mrb[80].mxu1 }
 0x1b5   :  { %v3637_v42 = vpop.f32.mrb[80].mxu0  ;;  %v2822_v43 = vpop.f32.mrb[81].mxu1 }
 0x1b6   :  { %v6378_v45 = vpop.eup %6377  ;;  %6383 = vtanh.f32 %v4509_v40  ;;  %v3638_v46 = vadd.f32 %v3637_v42, %v2820_v41  ;;  %v3639_v47 = vpop.f32.mrb[81].mxu0  ;;  %v6021_v42 = vld [vmem:[%s9066_s0 + $0x640] ss:$16 sps:$4 sm:$0xff]  }
 0x1b7   :  { %v2823_v48 = vpop.f32.mrb[82].mxu1  ;;  %4898 = vst [vmem:[%s9069_s4 + $0x120] sm:$0xff] %v6378_v45  ;;  %v3640_v51 = vpop.f32.mrb[82].mxu0  ;;  %v6022_v47 = vld [vmem:[%s9066_s0 + $0x648] ss:$16 sps:$4 sm:$0xff]  }
 0x1b8   :  { %v2825_v52 = vpop.f32.mrb[83].mxu1  ;;  %v6380_v54 = vpop.eup %6379  ;;  %v4307_v55 = vmul.f32 %v7601_v12, %v3638_v46  ;;  %v3641_v56 = vadd.f32 %v3640_v51, %v2823_v48  ;;  %v6023_v48 = vld [vmem:[%s9066_s0 + $0x664] ss:$16 sps:$4 sm:$0xff]   ;;  %v6025_v51 = vld [vmem:[%s9066_s0 + $0x66c] ss:$16 sps:$4 sm:$0xff]  }
 0x1b9   :  { %v3642_v57 = vpop.f32.mrb[83].mxu0  ;;  %4899 = vst [vmem:[%s9069_s4 + $0x128] sm:$0xff] %v6380_v54  ;;  %3035 = vmatmul.mubr.bf16.gmra.mrb[188].mxu1 %v6003_v44 }
 0x1ba   :  { %v4510_v58 = vadd.f32 %v7612_v19, %v4307_v55  ;;  %v4308_v59 = vmul.f32 %v7601_v12, %v3641_v56  ;;  %3852 = vmatmul.mubr.bf16.gmra.mrb[188].mxu0 %v6004_v49  ;;  %3042 = vmatprep.mubr.bf16.mxu1 %v6005_v50 }
 0x1bb   :  { %3859 = vmatprep.mubr.bf16.mxu0 %v6007_v53 }
 0x1bc   :  { %6385 = vtanh.f32 %v4510_v58  ;;  %v4511_v60 = vadd.f32 %v7612_v19, %v4308_v59  ;;  %v2828_v61 = vpop.f32.mrb[84].mxu1 }
 0x1bd   :  { %v3645_v62 = vpop.f32.mrb[84].mxu0  ;;  %v2830_v63 = vpop.f32.mrb[85].mxu1 }
 0x1be   :  { %v6382_v1 = vpop.eup %6381  ;;  %6387 = vtanh.f32 %v4511_v60  ;;  %v3646_v2 = vadd.f32 %v3645_v62, %v2828_v61  ;;  %v3647_v3 = vpop.f32.mrb[85].mxu0  ;;  %v6027_v62 = vld [vmem:[%s9066_s0 + $0x660] ss:$16 sps:$4 sm:$0xff]  }
 0x1bf   :  { %v2831_v4 = vpop.f32.mrb[86].mxu1  ;;  %4900 = vst [vmem:[%s9069_s4 + $0x130] sm:$0xff] %v6382_v1  ;;  %v3648_v17 = vpop.f32.mrb[86].mxu0  ;;  %v6028_v3 = vld [vmem:[%s9066_s0 + $0x668] ss:$16 sps:$4 sm:$0xff]  }
 0x1c0   :  { %v2833_v7 = vpop.f32.mrb[87].mxu1  ;;  %v6384_v9 = vpop.eup %6383  ;;  %v4309_v10 = vmul.f32 %v7601_v12, %v3646_v2  ;;  %v3649_v11 = vadd.f32 %v3648_v17, %v2831_v4  ;;  %v6029_v4 = vld [vmem:[%s9066_s0 + $0x684] ss:$16 sps:$4 sm:$0xff]   ;;  %v6031_v17 = vld [vmem:[%s9066_s0 + $0x68c] ss:$16 sps:$4 sm:$0xff]  }
 0x1c1   :  { %v3650_v13 = vpop.f32.mrb[87].mxu0  ;;  %4901 = vst [vmem:[%s9069_s4 + $0x138] sm:$0xff] %v6384_v9  ;;  %3043 = vmatmul.mubr.bf16.gmra.mrb[192].mxu1 %v6009_v0 }
 0x1c2   :  { %v4512_v14 = vadd.f32 %v7612_v19, %v4309_v10  ;;  %v4310_v15 = vmul.f32 %v7601_v12, %v3649_v11  ;;  %3860 = vmatmul.mubr.bf16.gmra.mrb[192].mxu0 %v6010_v5  ;;  %3050 = vmatprep.mubr.bf16.mxu1 %v6011_v6 }
 0x1c3   :  { %3867 = vmatprep.mubr.bf16.mxu0 %v6013_v8 }
 0x1c4   :  { %6389 = vtanh.f32 %v4512_v14  ;;  %v4513_v16 = vadd.f32 %v7612_v19, %v4310_v15  ;;  %v2836_v18 = vpop.f32.mrb[88].mxu1 }
 0x1c5   :  { %v3653_v20 = vpop.f32.mrb[88].mxu0  ;;  %v2838_v21 = vpop.f32.mrb[89].mxu1 }
 0x1c6   :  { %v6386_v23 = vpop.eup %6385  ;;  %6391 = vtanh.f32 %v4513_v16  ;;  %v3654_v25 = vadd.f32 %v3653_v20, %v2836_v18  ;;  %v3655_v24 = vpop.f32.mrb[89].mxu0  ;;  %v6033_v20 = vld [vmem:[%s9066_s0 + $0x680] ss:$16 sps:$4 sm:$0xff]  }
 0x1c7   :  { %v2839_v26 = vpop.f32.mrb[90].mxu1  ;;  %4902 = vst [vmem:[%s9069_s4 + $0x140] sm:$0xff] %v6386_v23  ;;  %v3656_v29 = vpop.f32.mrb[90].mxu0  ;;  %v6034_v24 = vld [vmem:[%s9066_s0 + $0x688] ss:$16 sps:$4 sm:$0xff]  }
 0x1c8   :  { %v2841_v30 = vpop.f32.mrb[91].mxu1  ;;  %v6388_v32 = vpop.eup %6387  ;;  %v4311_v33 = vmul.f32 %v7601_v12, %v3654_v25  ;;  %v3657_v34 = vadd.f32 %v3656_v29, %v2839_v26  ;;  %v6035_v26 = vld [vmem:[%s9066_s0 + $0x6a4] ss:$16 sps:$4 sm:$0xff]   ;;  %v6037_v29 = vld [vmem:[%s9066_s0 + $0x6ac] ss:$16 sps:$4 sm:$0xff]  }
 0x1c9   :  { %v3658_v35 = vpop.f32.mrb[91].mxu0  ;;  %4903 = vst [vmem:[%s9069_s4 + $0x148] sm:$0xff] %v6388_v32  ;;  %3051 = vmatmul.mubr.bf16.gmra.mrb[196].mxu1 %v6015_v22 }
 0x1ca   :  { %v4514_v36 = vadd.f32 %v7612_v19, %v4311_v33  ;;  %v4312_v37 = vmul.f32 %v7601_v12, %v3657_v34  ;;  %3868 = vmatmul.mubr.bf16.gmra.mrb[196].mxu0 %v6016_v27  ;;  %3058 = vmatprep.mubr.bf16.mxu1 %v6017_v28 }
 0x1cb   :  { %3875 = vmatprep.mubr.bf16.mxu0 %v6019_v31 }
 0x1cc   :  { %6393 = vtanh.f32 %v4514_v36  ;;  %v4515_v38 = vadd.f32 %v7612_v19, %v4312_v37  ;;  %v2844_v39 = vpop.f32.mrb[92].mxu1 }
 0x1cd   :  { %v3661_v40 = vpop.f32.mrb[92].mxu0  ;;  %v2846_v41 = vpop.f32.mrb[93].mxu1 }
 0x1ce   :  { %v6390_v43 = vpop.eup %6389  ;;  %6395 = vtanh.f32 %v4515_v38  ;;  %v3662_v44 = vadd.f32 %v3661_v40, %v2844_v39  ;;  %v3663_v45 = vpop.f32.mrb[93].mxu0  ;;  %v6039_v40 = vld [vmem:[%s9066_s0 + $0x6a0] ss:$16 sps:$4 sm:$0xff]  }
 0x1cf   :  { %v2847_v46 = vpop.f32.mrb[94].mxu1  ;;  %4904 = vst [vmem:[%s9069_s4 + $0x150] sm:$0xff] %v6390_v43  ;;  %v3664_v49 = vpop.f32.mrb[94].mxu0  ;;  %v6040_v45 = vld [vmem:[%s9066_s0 + $0x6a8] ss:$16 sps:$4 sm:$0xff]  }
 0x1d0   :  { %v2849_v50 = vpop.f32.mrb[95].mxu1  ;;  %v6392_v52 = vpop.eup %6391  ;;  %v4313_v53 = vmul.f32 %v7601_v12, %v3662_v44  ;;  %v3665_v54 = vadd.f32 %v3664_v49, %v2847_v46  ;;  %v6041_v46 = vld [vmem:[%s9066_s0 + $0x6c4] ss:$16 sps:$4 sm:$0xff]   ;;  %v6043_v49 = vld [vmem:[%s9066_s0 + $0x6cc] ss:$16 sps:$4 sm:$0xff]  }
 0x1d1   :  { %v3666_v55 = vpop.f32.mrb[95].mxu0  ;;  %4905 = vst [vmem:[%s9069_s4 + $0x158] sm:$0xff] %v6392_v52  ;;  %3059 = vmatmul.mubr.bf16.gmra.mrb[200].mxu1 %v6021_v42 }
 0x1d2   :  { %v4516_v56 = vadd.f32 %v7612_v19, %v4313_v53  ;;  %v4314_v57 = vmul.f32 %v7601_v12, %v3665_v54  ;;  %3876 = vmatmul.mubr.bf16.gmra.mrb[200].mxu0 %v6022_v47  ;;  %3066 = vmatprep.mubr.bf16.mxu1 %v6023_v48 }
 0x1d3   :  { %3883 = vmatprep.mubr.bf16.mxu0 %v6025_v51 }
 0x1d4   :  { %6397 = vtanh.f32 %v4516_v56  ;;  %v4517_v58 = vadd.f32 %v7612_v19, %v4314_v57  ;;  %v2852_v59 = vpop.f32.mrb[96].mxu1 }
 0x1d5   :  { %v3669_v60 = vpop.f32.mrb[96].mxu0  ;;  %v2854_v61 = vpop.f32.mrb[97].mxu1 }
 0x1d6   :  { %v6394_v63 = vpop.eup %6393  ;;  %6399 = vtanh.f32 %v4517_v58  ;;  %v3670_v0 = vadd.f32 %v3669_v60, %v2852_v59  ;;  %v3671_v1 = vpop.f32.mrb[97].mxu0  ;;  %v6045_v60 = vld [vmem:[%s9066_s0 + $0x6c0] ss:$16 sps:$4 sm:$0xff]  }
 0x1d7   :  { %v2855_v2 = vpop.f32.mrb[98].mxu1  ;;  %4906 = vst [vmem:[%s9069_s4 + $0x160] sm:$0xff] %v6394_v63  ;;  %v3672_v5 = vpop.f32.mrb[98].mxu0  ;;  %v6046_v1 = vld [vmem:[%s9066_s0 + $0x6c8] ss:$16 sps:$4 sm:$0xff]  }
 0x1d8   :  { %v2857_v6 = vpop.f32.mrb[99].mxu1  ;;  %v6396_v7 = vpop.eup %6395  ;;  %v4315_v8 = vmul.f32 %v7601_v12, %v3670_v0  ;;  %v3673_v9 = vadd.f32 %v3672_v5, %v2855_v2  ;;  %v6047_v2 = vld [vmem:[%s9066_s0 + $0x6e4] ss:$16 sps:$4 sm:$0xff]   ;;  %v6049_v5 = vld [vmem:[%s9066_s0 + $0x6ec] ss:$16 sps:$4 sm:$0xff]  }
 0x1d9   :  { %v3674_v10 = vpop.f32.mrb[99].mxu0  ;;  %4907 = vst [vmem:[%s9069_s4 + $0x168] sm:$0xff] %v6396_v7  ;;  %3067 = vmatmul.mubr.bf16.gmra.mrb[204].mxu1 %v6027_v62 }
 0x1da   :  { %v4518_v11 = vadd.f32 %v7612_v19, %v4315_v8  ;;  %v4316_v13 = vmul.f32 %v7601_v12, %v3673_v9  ;;  %3884 = vmatmul.mubr.bf16.gmra.mrb[204].mxu0 %v6028_v3  ;;  %3074 = vmatprep.mubr.bf16.mxu1 %v6029_v4 }
 0x1db   :  { %3891 = vmatprep.mubr.bf16.mxu0 %v6031_v17 }
 0x1dc   :  { %6401 = vtanh.f32 %v4518_v11  ;;  %v4519_v14 = vadd.f32 %v7612_v19, %v4316_v13  ;;  %v2860_v15 = vpop.f32.mrb[100].mxu1 }
 0x1dd   :  { %v3677_v16 = vpop.f32.mrb[100].mxu0  ;;  %v2862_v18 = vpop.f32.mrb[101].mxu1 }
 0x1de   :  { %v6398_v21 = vpop.eup %6397  ;;  %6403 = vtanh.f32 %v4519_v14  ;;  %v3678_v22 = vadd.f32 %v3677_v16, %v2860_v15  ;;  %v3679_v23 = vpop.f32.mrb[101].mxu0  ;;  %v6051_v16 = vld [vmem:[%s9066_s0 + $0x6e0] ss:$16 sps:$4 sm:$0xff]  }
 0x1df   :  { %v2863_v25 = vpop.f32.mrb[102].mxu1  ;;  %4908 = vst [vmem:[%s9069_s4 + $0x170] sm:$0xff] %v6398_v21  ;;  %v3680_v27 = vpop.f32.mrb[102].mxu0  ;;  %v6052_v23 = vld [vmem:[%s9066_s0 + $0x6e8] ss:$16 sps:$4 sm:$0xff]  }
 0x1e0   :  { %v2865_v28 = vpop.f32.mrb[103].mxu1  ;;  %v6400_v30 = vpop.eup %6399  ;;  %v4317_v31 = vmul.f32 %v7601_v12, %v3678_v22  ;;  %v3681_v32 = vadd.f32 %v3680_v27, %v2863_v25  ;;  %v6053_v25 = vld [vmem:[%s9066_s0 + $0x704] ss:$16 sps:$4 sm:$0xff]   ;;  %v6055_v27 = vld [vmem:[%s9066_s0 + $0x70c] ss:$16 sps:$4 sm:$0xff]  }
 0x1e1   :  { %v3682_v33 = vpop.f32.mrb[103].mxu0  ;;  %4909 = vst [vmem:[%s9069_s4 + $0x178] sm:$0xff] %v6400_v30  ;;  %3075 = vmatmul.mubr.bf16.gmra.mrb[208].mxu1 %v6033_v20 }
 0x1e2   :  { %v4520_v34 = vadd.f32 %v7612_v19, %v4317_v31  ;;  %v4318_v35 = vmul.f32 %v7601_v12, %v3681_v32  ;;  %3892 = vmatmul.mubr.bf16.gmra.mrb[208].mxu0 %v6034_v24  ;;  %3082 = vmatprep.mubr.bf16.mxu1 %v6035_v26 }
 0x1e3   :  { %3899 = vmatprep.mubr.bf16.mxu0 %v6037_v29 }
 0x1e4   :  { %6405 = vtanh.f32 %v4520_v34  ;;  %v4521_v36 = vadd.f32 %v7612_v19, %v4318_v35  ;;  %v2868_v37 = vpop.f32.mrb[104].mxu1 }
 0x1e5   :  { %v3685_v38 = vpop.f32.mrb[104].mxu0  ;;  %v2870_v39 = vpop.f32.mrb[105].mxu1 }
 0x1e6   :  { %v6402_v41 = vpop.eup %6401  ;;  %6407 = vtanh.f32 %v4521_v36  ;;  %v3686_v42 = vadd.f32 %v3685_v38, %v2868_v37  ;;  %v3687_v43 = vpop.f32.mrb[105].mxu0  ;;  %v6057_v38 = vld [vmem:[%s9066_s0 + $0x700] ss:$16 sps:$4 sm:$0xff]  }
 0x1e7   :  { %v2871_v44 = vpop.f32.mrb[106].mxu1  ;;  %4910 = vst [vmem:[%s9069_s4 + $0x180] sm:$0xff] %v6402_v41  ;;  %v3688_v47 = vpop.f32.mrb[106].mxu0  ;;  %v6058_v43 = vld [vmem:[%s9066_s0 + $0x708] ss:$16 sps:$4 sm:$0xff]  }
 0x1e8   :  { %v2873_v48 = vpop.f32.mrb[107].mxu1  ;;  %v6404_v50 = vpop.eup %6403  ;;  %v4319_v51 = vmul.f32 %v7601_v12, %v3686_v42  ;;  %v3689_v52 = vadd.f32 %v3688_v47, %v2871_v44  ;;  %v6059_v44 = vld [vmem:[%s9066_s0 + $0x724] ss:$16 sps:$4 sm:$0xff]   ;;  %v6061_v47 = vld [vmem:[%s9066_s0 + $0x72c] ss:$16 sps:$4 sm:$0xff]  }
 0x1e9   :  { %v3690_v53 = vpop.f32.mrb[107].mxu0  ;;  %4911 = vst [vmem:[%s9069_s4 + $0x188] sm:$0xff] %v6404_v50  ;;  %3083 = vmatmul.mubr.bf16.gmra.mrb[212].mxu1 %v6039_v40 }
 0x1ea   :  { %v4522_v54 = vadd.f32 %v7612_v19, %v4319_v51  ;;  %v4320_v55 = vmul.f32 %v7601_v12, %v3689_v52  ;;  %3900 = vmatmul.mubr.bf16.gmra.mrb[212].mxu0 %v6040_v45  ;;  %3090 = vmatprep.mubr.bf16.mxu1 %v6041_v46 }
 0x1eb   :  { %3907 = vmatprep.mubr.bf16.mxu0 %v6043_v49 }
 0x1ec   :  { %6409 = vtanh.f32 %v4522_v54  ;;  %v4523_v56 = vadd.f32 %v7612_v19, %v4320_v55  ;;  %v2876_v57 = vpop.f32.mrb[108].mxu1 }
 0x1ed   :  { %v3693_v58 = vpop.f32.mrb[108].mxu0  ;;  %v2878_v59 = vpop.f32.mrb[109].mxu1 }
 0x1ee   :  { %v6406_v61 = vpop.eup %6405  ;;  %6411 = vtanh.f32 %v4523_v56  ;;  %v3694_v62 = vadd.f32 %v3693_v58, %v2876_v57  ;;  %v3695_v63 = vpop.f32.mrb[109].mxu0  ;;  %v6063_v58 = vld [vmem:[%s9066_s0 + $0x720] ss:$16 sps:$4 sm:$0xff]  }
 0x1ef   :  { %v2879_v0 = vpop.f32.mrb[110].mxu1  ;;  %4912 = vst [vmem:[%s9069_s4 + $0x190] sm:$0xff] %v6406_v61  ;;  %v3696_v3 = vpop.f32.mrb[110].mxu0  ;;  %v6064_v63 = vld [vmem:[%s9066_s0 + $0x728] ss:$16 sps:$4 sm:$0xff]  }
 0x1f0   :  { %v2881_v4 = vpop.f32.mrb[111].mxu1  ;;  %v6408_v6 = vpop.eup %6407  ;;  %v4321_v17 = vmul.f32 %v7601_v12, %v3694_v62  ;;  %v3697_v7 = vadd.f32 %v3696_v3, %v2879_v0  ;;  %v6065_v0 = vld [vmem:[%s9066_s0 + $0x744] ss:$16 sps:$4 sm:$0xff]   ;;  %v6067_v3 = vld [vmem:[%s9066_s0 + $0x74c] ss:$16 sps:$4 sm:$0xff]  }
 0x1f1   :  { %v3698_v8 = vpop.f32.mrb[111].mxu0  ;;  %4913 = vst [vmem:[%s9069_s4 + $0x198] sm:$0xff] %v6408_v6  ;;  %3091 = vmatmul.mubr.bf16.gmra.mrb[216].mxu1 %v6045_v60 }
 0x1f2   :  { %v4524_v9 = vadd.f32 %v7612_v19, %v4321_v17  ;;  %v4322_v10 = vmul.f32 %v7601_v12, %v3697_v7  ;;  %3908 = vmatmul.mubr.bf16.gmra.mrb[216].mxu0 %v6046_v1  ;;  %3098 = vmatprep.mubr.bf16.mxu1 %v6047_v2 }
 0x1f3   :  { %3915 = vmatprep.mubr.bf16.mxu0 %v6049_v5 }
 0x1f4   :  { %6413 = vtanh.f32 %v4524_v9  ;;  %v4525_v11 = vadd.f32 %v7612_v19, %v4322_v10  ;;  %v2884_v13 = vpop.f32.mrb[112].mxu1 }
 0x1f5   :  { %v3701_v14 = vpop.f32.mrb[112].mxu0  ;;  %v2886_v15 = vpop.f32.mrb[113].mxu1 }
 0x1f6   :  { %v6410_v18 = vpop.eup %6409  ;;  %6415 = vtanh.f32 %v4525_v11  ;;  %v3702_v20 = vadd.f32 %v3701_v14, %v2884_v13  ;;  %v3703_v21 = vpop.f32.mrb[113].mxu0  ;;  %v6069_v14 = vld [vmem:[%s9066_s0 + $0x740] ss:$16 sps:$4 sm:$0xff]  }
 0x1f7   :  { %v2887_v22 = vpop.f32.mrb[114].mxu1  ;;  %4914 = vst [vmem:[%s9069_s4 + $0x1a0] sm:$0xff] %v6410_v18  ;;  %v3704_v24 = vpop.f32.mrb[114].mxu0  ;;  %v6070_v21 = vld [vmem:[%s9066_s0 + $0x748] ss:$16 sps:$4 sm:$0xff]  }
 0x1f8   :  { %v2889_v26 = vpop.f32.mrb[115].mxu1  ;;  %v6412_v28 = vpop.eup %6411  ;;  %v4323_v29 = vmul.f32 %v7601_v12, %v3702_v20  ;;  %v3705_v30 = vadd.f32 %v3704_v24, %v2887_v22  ;;  %v6071_v22 = vld [vmem:[%s9066_s0 + $0x764] ss:$16 sps:$4 sm:$0xff]   ;;  %v6073_v24 = vld [vmem:[%s9066_s0 + $0x76c] ss:$16 sps:$4 sm:$0xff]  }
 0x1f9   :  { %v3706_v31 = vpop.f32.mrb[115].mxu0  ;;  %4915 = vst [vmem:[%s9069_s4 + $0x1a8] sm:$0xff] %v6412_v28  ;;  %3099 = vmatmul.mubr.bf16.gmra.mrb[220].mxu1 %v6051_v16 }
 0x1fa   :  { %v4526_v32 = vadd.f32 %v7612_v19, %v4323_v29  ;;  %v4324_v33 = vmul.f32 %v7601_v12, %v3705_v30  ;;  %3916 = vmatmul.mubr.bf16.gmra.mrb[220].mxu0 %v6052_v23  ;;  %3106 = vmatprep.mubr.bf16.mxu1 %v6053_v25 }
 0x1fb   :  { %3923 = vmatprep.mubr.bf16.mxu0 %v6055_v27 }
 0x1fc   :  { %6417 = vtanh.f32 %v4526_v32  ;;  %v4527_v34 = vadd.f32 %v7612_v19, %v4324_v33  ;;  %v2892_v35 = vpop.f32.mrb[116].mxu1 }
 0x1fd   :  { %v3709_v36 = vpop.f32.mrb[116].mxu0  ;;  %v2894_v37 = vpop.f32.mrb[117].mxu1 }
 0x1fe   :  { %v6414_v39 = vpop.eup %6413  ;;  %6419 = vtanh.f32 %v4527_v34  ;;  %v3710_v40 = vadd.f32 %v3709_v36, %v2892_v35  ;;  %v3711_v41 = vpop.f32.mrb[117].mxu0  ;;  %v6075_v36 = vld [vmem:[%s9066_s0 + $0x760] ss:$16 sps:$4 sm:$0xff]  }
 0x1ff   :  { %v2895_v42 = vpop.f32.mrb[118].mxu1  ;;  %4916 = vst [vmem:[%s9069_s4 + $0x1b0] sm:$0xff] %v6414_v39  ;;  %v3712_v45 = vpop.f32.mrb[118].mxu0  ;;  %v6076_v41 = vld [vmem:[%s9066_s0 + $0x768] ss:$16 sps:$4 sm:$0xff]  }
 0x200   :  { %v2897_v46 = vpop.f32.mrb[119].mxu1  ;;  %v6416_v48 = vpop.eup %6415  ;;  %v4325_v49 = vmul.f32 %v7601_v12, %v3710_v40  ;;  %v3713_v50 = vadd.f32 %v3712_v45, %v2895_v42  ;;  %v6077_v42 = vld [vmem:[%s9066_s0 + $0x784] ss:$16 sps:$4 sm:$0xff]   ;;  %v6079_v45 = vld [vmem:[%s9066_s0 + $0x78c] ss:$16 sps:$4 sm:$0xff]  }
 0x201   :  { %v3714_v51 = vpop.f32.mrb[119].mxu0  ;;  %4917 = vst [vmem:[%s9069_s4 + $0x1b8] sm:$0xff] %v6416_v48  ;;  %3107 = vmatmul.mubr.bf16.gmra.mrb[224].mxu1 %v6057_v38 }
 0x202   :  { %v4528_v52 = vadd.f32 %v7612_v19, %v4325_v49  ;;  %v4326_v53 = vmul.f32 %v7601_v12, %v3713_v50  ;;  %3924 = vmatmul.mubr.bf16.gmra.mrb[224].mxu0 %v6058_v43  ;;  %3114 = vmatprep.mubr.bf16.mxu1 %v6059_v44 }
 0x203   :  { %3931 = vmatprep.mubr.bf16.mxu0 %v6061_v47 }
 0x204   :  { %6421 = vtanh.f32 %v4528_v52  ;;  %v4529_v54 = vadd.f32 %v7612_v19, %v4326_v53  ;;  %v2900_v55 = vpop.f32.mrb[120].mxu1 }
 0x205   :  { %v3717_v56 = vpop.f32.mrb[120].mxu0  ;;  %v2902_v57 = vpop.f32.mrb[121].mxu1 }
 0x206   :  { %v6418_v59 = vpop.eup %6417  ;;  %6423 = vtanh.f32 %v4529_v54  ;;  %v3718_v60 = vadd.f32 %v3717_v56, %v2900_v55  ;;  %v3719_v61 = vpop.f32.mrb[121].mxu0  ;;  %v6081_v56 = vld [vmem:[%s9066_s0 + $0x780] ss:$16 sps:$4 sm:$0xff]  }
 0x207   :  { %v2903_v62 = vpop.f32.mrb[122].mxu1  ;;  %4918 = vst [vmem:[%s9069_s4 + $0x1c0] sm:$0xff] %v6418_v59  ;;  %v3720_v1 = vpop.f32.mrb[122].mxu0  ;;  %v6082_v61 = vld [vmem:[%s9066_s0 + $0x788] ss:$16 sps:$4 sm:$0xff]  }
 0x208   :  { %v2905_v2 = vpop.f32.mrb[123].mxu1  ;;  %v6420_v4 = vpop.eup %6419  ;;  %v4327_v5 = vmul.f32 %v7601_v12, %v3718_v60  ;;  %v3721_v6 = vadd.f32 %v3720_v1, %v2903_v62  ;;  %v6083_v62 = vld [vmem:[%s9066_s0 + $0x7a4] ss:$16 sps:$4 sm:$0xff]   ;;  %v6085_v1 = vld [vmem:[%s9066_s0 + $0x7ac] ss:$16 sps:$4 sm:$0xff]  }
 0x209   :  { %v3722_v17 = vpop.f32.mrb[123].mxu0  ;;  %4919 = vst [vmem:[%s9069_s4 + $0x1c8] sm:$0xff] %v6420_v4  ;;  %3115 = vmatmul.mubr.bf16.gmra.mrb[228].mxu1 %v6063_v58 }
 0x20a   :  { %v4530_v7 = vadd.f32 %v7612_v19, %v4327_v5  ;;  %v4328_v8 = vmul.f32 %v7601_v12, %v3721_v6  ;;  %3932 = vmatmul.mubr.bf16.gmra.mrb[228].mxu0 %v6064_v63  ;;  %3122 = vmatprep.mubr.bf16.mxu1 %v6065_v0 }
 0x20b   :  { %3939 = vmatprep.mubr.bf16.mxu0 %v6067_v3 }
 0x20c   :  { %6425 = vtanh.f32 %v4530_v7  ;;  %v4531_v9 = vadd.f32 %v7612_v19, %v4328_v8  ;;  %v2908_v10 = vpop.f32.mrb[124].mxu1 }
 0x20d   :  { %v3725_v11 = vpop.f32.mrb[124].mxu0  ;;  %v2910_v13 = vpop.f32.mrb[125].mxu1 }
 0x20e   :  { %v6422_v15 = vpop.eup %6421  ;;  %6427 = vtanh.f32 %v4531_v9  ;;  %v3726_v16 = vadd.f32 %v3725_v11, %v2908_v10  ;;  %v3727_v18 = vpop.f32.mrb[125].mxu0  ;;  %v6087_v11 = vld [vmem:[%s9066_s0 + $0x7a0] ss:$16 sps:$4 sm:$0xff]  }
 0x20f   :  { %v2911_v20 = vpop.f32.mrb[126].mxu1  ;;  %4920 = vst [vmem:[%s9069_s4 + $0x1d0] sm:$0xff] %v6422_v15  ;;  %v3728_v23 = vpop.f32.mrb[126].mxu0  ;;  %v6088_v18 = vld [vmem:[%s9066_s0 + $0x7a8] ss:$16 sps:$4 sm:$0xff]  }
 0x210   :  { %v2913_v25 = vpop.f32.mrb[127].mxu1  ;;  %v6424_v26 = vpop.eup %6423  ;;  %v4329_v27 = vmul.f32 %v7601_v12, %v3726_v16  ;;  %v3729_v28 = vadd.f32 %v3728_v23, %v2911_v20  ;;  %v6089_v20 = vld [vmem:[%s9066_s0 + $0x7c4] ss:$16 sps:$4 sm:$0xff]   ;;  %v6091_v23 = vld [vmem:[%s9066_s0 + $0x7cc] ss:$16 sps:$4 sm:$0xff]  }
 0x211   :  { %v3730_v29 = vpop.f32.mrb[127].mxu0  ;;  %4921 = vst [vmem:[%s9069_s4 + $0x1d8] sm:$0xff] %v6424_v26  ;;  %3123 = vmatmul.mubr.bf16.gmra.mrb[232].mxu1 %v6069_v14 }
 0x212   :  { %v4532_v30 = vadd.f32 %v7612_v19, %v4329_v27  ;;  %v4330_v31 = vmul.f32 %v7601_v12, %v3729_v28  ;;  %3940 = vmatmul.mubr.bf16.gmra.mrb[232].mxu0 %v6070_v21  ;;  %3130 = vmatprep.mubr.bf16.mxu1 %v6071_v22 }
 0x213   :  { %3947 = vmatprep.mubr.bf16.mxu0 %v6073_v24 }
 0x214   :  { %6429 = vtanh.f32 %v4532_v30  ;;  %v4533_v32 = vadd.f32 %v7612_v19, %v4330_v31  ;;  %v2916_v33 = vpop.f32.mrb[128].mxu1 }
 0x215   :  { %v3733_v34 = vpop.f32.mrb[128].mxu0  ;;  %v2918_v35 = vpop.f32.mrb[129].mxu1 }
 0x216   :  { %v6426_v37 = vpop.eup %6425  ;;  %6431 = vtanh.f32 %v4533_v32  ;;  %v3734_v38 = vadd.f32 %v3733_v34, %v2916_v33  ;;  %v3735_v39 = vpop.f32.mrb[129].mxu0  ;;  %v6093_v34 = vld [vmem:[%s9066_s0 + $0x7c0] ss:$16 sps:$4 sm:$0xff]  }
 0x217   :  { %v2919_v40 = vpop.f32.mrb[130].mxu1  ;;  %4922 = vst [vmem:[%s9069_s4 + $0x1e0] sm:$0xff] %v6426_v37  ;;  %v3736_v43 = vpop.f32.mrb[130].mxu0  ;;  %v6094_v39 = vld [vmem:[%s9066_s0 + $0x7c8] ss:$16 sps:$4 sm:$0xff]  }
 0x218   :  { %v2921_v44 = vpop.f32.mrb[131].mxu1  ;;  %v6428_v46 = vpop.eup %6427  ;;  %v4331_v47 = vmul.f32 %v7601_v12, %v3734_v38  ;;  %v3737_v48 = vadd.f32 %v3736_v43, %v2919_v40  ;;  %v6095_v40 = vld [vmem:[%s9066_s0 + $0x7e4] ss:$16 sps:$4 sm:$0xff]   ;;  %v6097_v43 = vld [vmem:[%s9066_s0 + $0x7ec] ss:$16 sps:$4 sm:$0xff]  }
 0x219   :  { %v3738_v49 = vpop.f32.mrb[131].mxu0  ;;  %4923 = vst [vmem:[%s9069_s4 + $0x1e8] sm:$0xff] %v6428_v46  ;;  %3131 = vmatmul.mubr.bf16.gmra.mrb[236].mxu1 %v6075_v36 }
 0x21a   :  { %v4534_v50 = vadd.f32 %v7612_v19, %v4331_v47  ;;  %v4332_v51 = vmul.f32 %v7601_v12, %v3737_v48  ;;  %3948 = vmatmul.mubr.bf16.gmra.mrb[236].mxu0 %v6076_v41  ;;  %3138 = vmatprep.mubr.bf16.mxu1 %v6077_v42 }
 0x21b   :  { %3955 = vmatprep.mubr.bf16.mxu0 %v6079_v45 }
 0x21c   :  { %6433 = vtanh.f32 %v4534_v50  ;;  %v4535_v52 = vadd.f32 %v7612_v19, %v4332_v51  ;;  %v2924_v53 = vpop.f32.mrb[132].mxu1 }
 0x21d   :  { %v3741_v54 = vpop.f32.mrb[132].mxu0  ;;  %v2926_v55 = vpop.f32.mrb[133].mxu1 }
 0x21e   :  { %v6430_v57 = vpop.eup %6429  ;;  %6435 = vtanh.f32 %v4535_v52  ;;  %v3742_v58 = vadd.f32 %v3741_v54, %v2924_v53  ;;  %v3743_v59 = vpop.f32.mrb[133].mxu0  ;;  %v6099_v54 = vld [vmem:[%s9066_s0 + $0x7e0] ss:$16 sps:$4 sm:$0xff]  }
 0x21f   :  { %v2927_v60 = vpop.f32.mrb[134].mxu1  ;;  %4924 = vst [vmem:[%s9069_s4 + $0x1f0] sm:$0xff] %v6430_v57  ;;  %v3744_v63 = vpop.f32.mrb[134].mxu0  ;;  %v6100_v59 = vld [vmem:[%s9066_s0 + $0x7e8] ss:$16 sps:$4 sm:$0xff]  }
 0x220   :  { %v2929_v0 = vpop.f32.mrb[135].mxu1  ;;  %v6432_v2 = vpop.eup %6431  ;;  %v4333_v3 = vmul.f32 %v7601_v12, %v3742_v58  ;;  %v3745_v4 = vadd.f32 %v3744_v63, %v2927_v60  ;;  %v6103_v60 = vld [vmem:[%s9066_s0 + $0x804] ss:$16 sps:$4 sm:$0xff]   ;;  %v6106_v63 = vld [vmem:[%s9066_s0 + $0x80c] ss:$16 sps:$4 sm:$0xff]  }
 0x221   :  { %v3746_v5 = vpop.f32.mrb[135].mxu0  ;;  %4925 = vst [vmem:[%s9069_s4 + $0x1f8] sm:$0xff] %v6432_v2  ;;  %3139 = vmatmul.mubr.bf16.gmra.mrb[240].mxu1 %v6081_v56 }
 0x222   :  { %v4536_v6 = vadd.f32 %v7612_v19, %v4333_v3  ;;  %v4334_v17 = vmul.f32 %v7601_v12, %v3745_v4  ;;  %3956 = vmatmul.mubr.bf16.gmra.mrb[240].mxu0 %v6082_v61  ;;  %3146 = vmatprep.mubr.bf16.mxu1 %v6083_v62 }
 0x223   :  { %3963 = vmatprep.mubr.bf16.mxu0 %v6085_v1 }
 0x224   :  { %6437 = vtanh.f32 %v4536_v6  ;;  %v4537_v7 = vadd.f32 %v7612_v19, %v4334_v17  ;;  %v2932_v8 = vpop.f32.mrb[136].mxu1 }
 0x225   :  { %v3749_v9 = vpop.f32.mrb[136].mxu0  ;;  %v2934_v10 = vpop.f32.mrb[137].mxu1 }
 0x226   :  { %v6434_v13 = vpop.eup %6433  ;;  %6439 = vtanh.f32 %v4537_v7  ;;  %v3750_v14 = vadd.f32 %v3749_v9, %v2932_v8  ;;  %v3751_v15 = vpop.f32.mrb[137].mxu0  ;;  %v6101_v9 = vld [vmem:[%s9066_s0 + $0x800] ss:$16 sps:$4 sm:$0xff]  }
 0x227   :  { %v2935_v16 = vpop.f32.mrb[138].mxu1  ;;  %4926 = vst [vmem:[%s9069_s4 + $0x200] sm:$0xff] %v6434_v13  ;;  %v3752_v21 = vpop.f32.mrb[138].mxu0 }
 0x228   :  { %v2937_v22 = vpop.f32.mrb[139].mxu1  ;;  %v6436_v25 = vpop.eup %6435  ;;  %v4335_v24 = vmul.f32 %v7601_v12, %v3750_v14  ;;  %v3753_v26 = vadd.f32 %v3752_v21, %v2935_v16  ;;  %v8029_v21 = vld [vmem:[%s9067_s2] ss:$0 sm:$0xff] }
 0x229   :  { %v3754_v27 = vpop.f32.mrb[139].mxu0  ;;  %4927 = vst [vmem:[%s9069_s4 + $0x208] sm:$0xff] %v6436_v25  ;;  %3147 = vmatmul.mubr.bf16.gmra.mrb[244].mxu1 %v6087_v11 }
 0x22a   :  { %v4538_v28 = vadd.f32 %v7612_v19, %v4335_v24  ;;  %v4336_v29 = vmul.f32 %v7601_v12, %v3753_v26  ;;  %3964 = vmatmul.mubr.bf16.gmra.mrb[244].mxu0 %v6088_v18  ;;  %3154 = vmatprep.mubr.bf16.mxu1 %v6089_v20  ;;  %v6112_v18 = vld [vmem:[%s9066_s0 + $0x82c] ss:$16 sps:$4 sm:$0xff]   ;;  %v8038_v24 = vld [vmem:[%s9068_s3] ss:$0 sm:$0xff] }
 0x22b   :  { %3971 = vmatprep.mubr.bf16.mxu0 %v6091_v23 }
 0x22c   :  { %6441 = vtanh.f32 %v4538_v28  ;;  %v4539_v30 = vadd.f32 %v7612_v19, %v4336_v29  ;;  %v2940_v31 = vpop.f32.mrb[140].mxu1 }
 0x22d   :  { %v3757_v32 = vpop.f32.mrb[140].mxu0  ;;  %v2942_v33 = vpop.f32.mrb[141].mxu1 }
 0x22e   :  { %v6438_v35 = vpop.eup %6437  ;;  %6443 = vtanh.f32 %v4539_v30  ;;  %v3758_v36 = vadd.f32 %v3757_v32, %v2940_v31  ;;  %v3759_v37 = vpop.f32.mrb[141].mxu0  ;;  %v6107_v32 = vld [vmem:[%s9066_s0 + $0x820] ss:$16 sps:$4 sm:$0xff]  }
 0x22f   :  { %v2943_v38 = vpop.f32.mrb[142].mxu1  ;;  %4928 = vst [vmem:[%s9069_s4 + $0x210] sm:$0xff] %v6438_v35  ;;  %v3760_v41 = vpop.f32.mrb[142].mxu0  ;;  %v6110_v37 = vld [vmem:[%s9066_s0 + $0x828] ss:$16 sps:$4 sm:$0xff]  }
 0x230   :  { %v2945_v42 = vpop.f32.mrb[143].mxu1  ;;  %v6440_v44 = vpop.eup %6439  ;;  %v4337_v45 = vmul.f32 %v7601_v12, %v3758_v36  ;;  %v3761_v46 = vadd.f32 %v3760_v41, %v2943_v38  ;;  %v6115_v38 = vld [vmem:[%s9066_s0 + $0x844] ss:$16 sps:$4 sm:$0xff]   ;;  %v6118_v41 = vld [vmem:[%s9066_s0 + $0x84c] ss:$16 sps:$4 sm:$0xff]  }
 0x231   :  { %v3762_v47 = vpop.f32.mrb[143].mxu0  ;;  %4929 = vst [vmem:[%s9069_s4 + $0x218] sm:$0xff] %v6440_v44  ;;  %3155 = vmatmul.mubr.bf16.gmra.mrb[248].mxu1 %v6093_v34 }
 0x232   :  { %v4540_v48 = vadd.f32 %v7612_v19, %v4337_v45  ;;  %v4338_v49 = vmul.f32 %v7601_v12, %v3761_v46  ;;  %3972 = vmatmul.mubr.bf16.gmra.mrb[248].mxu0 %v6094_v39  ;;  %3162 = vmatprep.mubr.bf16.mxu1 %v6095_v40 }
 0x233   :  { %3979 = vmatprep.mubr.bf16.mxu0 %v6097_v43 }
 0x234   :  { %6445 = vtanh.f32 %v4540_v48  ;;  %v4541_v50 = vadd.f32 %v7612_v19, %v4338_v49  ;;  %v2948_v51 = vpop.f32.mrb[144].mxu1 }
 0x235   :  { %v3765_v52 = vpop.f32.mrb[144].mxu0  ;;  %v2950_v53 = vpop.f32.mrb[145].mxu1 }
 0x236   :  { %v6442_v55 = vpop.eup %6441  ;;  %6447 = vtanh.f32 %v4541_v50  ;;  %v3766_v56 = vadd.f32 %v3765_v52, %v2948_v51  ;;  %v3767_v57 = vpop.f32.mrb[145].mxu0  ;;  %v6113_v52 = vld [vmem:[%s9066_s0 + $0x840] ss:$16 sps:$4 sm:$0xff]  }
 0x237   :  { %v2951_v58 = vpop.f32.mrb[146].mxu1  ;;  %4930 = vst [vmem:[%s9069_s4 + $0x220] sm:$0xff] %v6442_v55  ;;  %v3768_v61 = vpop.f32.mrb[146].mxu0  ;;  %v6116_v57 = vld [vmem:[%s9066_s0 + $0x848] ss:$16 sps:$4 sm:$0xff]  }
 0x238   :  { %v2953_v62 = vpop.f32.mrb[147].mxu1  ;;  %v6444_v0 = vpop.eup %6443  ;;  %v4339_v1 = vmul.f32 %v7601_v12, %v3766_v56  ;;  %v3769_v2 = vadd.f32 %v3768_v61, %v2951_v58  ;;  %v6121_v58 = vld [vmem:[%s9066_s0 + $0x864] ss:$16 sps:$4 sm:$0xff]   ;;  %v6124_v61 = vld [vmem:[%s9066_s0 + $0x86c] ss:$16 sps:$4 sm:$0xff]  }
 0x239   :  { %v3770_v3 = vpop.f32.mrb[147].mxu0  ;;  %4931 = vst [vmem:[%s9069_s4 + $0x228] sm:$0xff] %v6444_v0  ;;  %3163 = vmatmul.mubr.bf16.gmra.mrb[252].mxu1 %v6099_v54 }
 0x23a   :  { %v4542_v4 = vadd.f32 %v7612_v19, %v4339_v1  ;;  %v4340_v5 = vmul.f32 %v7601_v12, %v3769_v2  ;;  %3980 = vmatmul.mubr.bf16.gmra.mrb[252].mxu0 %v6100_v59  ;;  %3170 = vmatprep.mubr.bf16.mxu1 %v6103_v60  ;;  %v6104_v12 = vld [vmem:[%s9066_s0 + $0x808] ss:$16 sps:$4 sm:$0xff]  }
 0x23b   :  { %3987 = vmatprep.mubr.bf16.mxu0 %v6106_v63 }
 0x23c   :  { %6449 = vtanh.f32 %v4542_v4  ;;  %v4543_v6 = vadd.f32 %v7612_v19, %v4340_v5  ;;  %v2956_v17 = vpop.f32.mrb[148].mxu1  ;;  %v6109_v19 = vld [vmem:[%s9066_s0 + $0x824] ss:$16 sps:$4 sm:$0xff]  }
 0x23d   :  { %v3773_v7 = vpop.f32.mrb[148].mxu0  ;;  %v2958_v8 = vpop.f32.mrb[149].mxu1 }
 0x23e   :  { %v6446_v10 = vpop.eup %6445  ;;  %6451 = vtanh.f32 %v4543_v6  ;;  %v3774_v11 = vadd.f32 %v3773_v7, %v2956_v17  ;;  %v3775_v13 = vpop.f32.mrb[149].mxu0  ;;  %v6119_v7 = vld [vmem:[%s9066_s0 + $0x860] ss:$16 sps:$4 sm:$0xff]  }
 0x23f   :  { %v2959_v14 = vpop.f32.mrb[150].mxu1  ;;  %4932 = vst [vmem:[%s9069_s4 + $0x230] sm:$0xff] %v6446_v10  ;;  %v3776_v15 = vpop.f32.mrb[150].mxu0  ;;  %v6122_v13 = vld [vmem:[%s9066_s0 + $0x868] ss:$16 sps:$4 sm:$0xff]  }
 0x240   :  { %v2961_v16 = vpop.f32.mrb[151].mxu1  ;;  %v6448_v20 = vpop.eup %6447  ;;  %v4341_v22 = vmul.f32 %v8029_v21, %v3774_v11  ;;  %v3777_v23 = vadd.f32 %v3776_v15, %v2959_v14  ;;  %v6127_v14 = vld [vmem:[%s9066_s0 + $0x884] ss:$16 sps:$4 sm:$0xff]   ;;  %v6130_v15 = vld [vmem:[%s9066_s0 + $0x88c] ss:$16 sps:$4 sm:$0xff]  }
 0x241   :  { %v3778_v25 = vpop.f32.mrb[151].mxu0  ;;  %4933 = vst [vmem:[%s9069_s4 + $0x238] sm:$0xff] %v6448_v20  ;;  %3171 = vmatmul.mubr.bf16.gmra.mrb[148].mxu1 %v6101_v9 }
 0x242   :  { %v4544_v26 = vadd.f32 %v8038_v24, %v4341_v22  ;;  %v4342_v27 = vmul.f32 %v8029_v21, %v3777_v23  ;;  %3988 = vmatmul.mubr.bf16.gmra.mrb[0].mxu0 %v6104_v12  ;;  %3178 = vmatprep.mubr.bf16.mxu1 %v6109_v19 }
 0x243   :  { %3995 = vmatprep.mubr.bf16.mxu0 %v6112_v18 }
 0x244   :  { %6453 = vtanh.f32 %v4544_v26  ;;  %v4545_v28 = vadd.f32 %v8038_v24, %v4342_v27  ;;  %v2964_v29 = vpop.f32.mrb[152].mxu1 }
 0x245   :  { %v3781_v30 = vpop.f32.mrb[152].mxu0  ;;  %v2966_v31 = vpop.f32.mrb[153].mxu1 }
 0x246   :  { %v6450_v33 = vpop.eup %6449  ;;  %6455 = vtanh.f32 %v4545_v28  ;;  %v3782_v34 = vadd.f32 %v3781_v30, %v2964_v29  ;;  %v3783_v35 = vpop.f32.mrb[153].mxu0  ;;  %v6125_v30 = vld [vmem:[%s9066_s0 + $0x880] ss:$16 sps:$4 sm:$0xff]  }
 0x247   :  { %v2967_v36 = vpop.f32.mrb[154].mxu1  ;;  %4934 = vst [vmem:[%s9069_s4 + $0x240] sm:$0xff] %v6450_v33  ;;  %v3784_v39 = vpop.f32.mrb[154].mxu0  ;;  %v6128_v35 = vld [vmem:[%s9066_s0 + $0x888] ss:$16 sps:$4 sm:$0xff]  }
 0x248   :  { %v2969_v40 = vpop.f32.mrb[155].mxu1  ;;  %v6452_v42 = vpop.eup %6451  ;;  %v4343_v43 = vmul.f32 %v8029_v21, %v3782_v34  ;;  %v3785_v44 = vadd.f32 %v3784_v39, %v2967_v36  ;;  %v6133_v36 = vld [vmem:[%s9066_s0 + $0x8a4] ss:$16 sps:$4 sm:$0xff]   ;;  %v6136_v39 = vld [vmem:[%s9066_s0 + $0x8ac] ss:$16 sps:$4 sm:$0xff]  }
 0x249   :  { %v3786_v45 = vpop.f32.mrb[155].mxu0  ;;  %4935 = vst [vmem:[%s9069_s4 + $0x248] sm:$0xff] %v6452_v42  ;;  %3179 = vmatmul.mubr.bf16.gmra.mrb[152].mxu1 %v6107_v32 }
 0x24a   :  { %v4546_v46 = vadd.f32 %v8038_v24, %v4343_v43  ;;  %v4344_v47 = vmul.f32 %v8029_v21, %v3785_v44  ;;  %3996 = vmatmul.mubr.bf16.gmra.mrb[4].mxu0 %v6110_v37  ;;  %3186 = vmatprep.mubr.bf16.mxu1 %v6115_v38 }
 0x24b   :  { %4003 = vmatprep.mubr.bf16.mxu0 %v6118_v41 }
 0x24c   :  { %6457 = vtanh.f32 %v4546_v46  ;;  %v4547_v48 = vadd.f32 %v8038_v24, %v4344_v47  ;;  %v2972_v49 = vpop.f32.mrb[156].mxu1 }
 0x24d   :  { %v3789_v50 = vpop.f32.mrb[156].mxu0  ;;  %v2974_v51 = vpop.f32.mrb[157].mxu1 }
 0x24e   :  { %v6454_v53 = vpop.eup %6453  ;;  %6459 = vtanh.f32 %v4547_v48  ;;  %v3790_v54 = vadd.f32 %v3789_v50, %v2972_v49  ;;  %v3791_v55 = vpop.f32.mrb[157].mxu0  ;;  %v6131_v50 = vld [vmem:[%s9066_s0 + $0x8a0] ss:$16 sps:$4 sm:$0xff]  }
 0x24f   :  { %v2975_v56 = vpop.f32.mrb[158].mxu1  ;;  %4936 = vst [vmem:[%s9069_s4 + $0x250] sm:$0xff] %v6454_v53  ;;  %v3792_v59 = vpop.f32.mrb[158].mxu0  ;;  %v6134_v55 = vld [vmem:[%s9066_s0 + $0x8a8] ss:$16 sps:$4 sm:$0xff]  }
 0x250   :  { %v2977_v60 = vpop.f32.mrb[159].mxu1  ;;  %v6456_v62 = vpop.eup %6455  ;;  %v4345_v63 = vmul.f32 %v8029_v21, %v3790_v54  ;;  %v3793_v0 = vadd.f32 %v3792_v59, %v2975_v56  ;;  %v6139_v56 = vld [vmem:[%s9066_s0 + $0x8c4] ss:$16 sps:$4 sm:$0xff]   ;;  %v6142_v59 = vld [vmem:[%s9066_s0 + $0x8cc] ss:$16 sps:$4 sm:$0xff]  }
 0x251   :  { %v3794_v1 = vpop.f32.mrb[159].mxu0  ;;  %4937 = vst [vmem:[%s9069_s4 + $0x258] sm:$0xff] %v6456_v62  ;;  %3187 = vmatmul.mubr.bf16.gmra.mrb[156].mxu1 %v6113_v52 }
 0x252   :  { %v4548_v2 = vadd.f32 %v8038_v24, %v4345_v63  ;;  %v4346_v3 = vmul.f32 %v8029_v21, %v3793_v0  ;;  %4004 = vmatmul.mubr.bf16.gmra.mrb[8].mxu0 %v6116_v57  ;;  %3194 = vmatprep.mubr.bf16.mxu1 %v6121_v58 }
 0x253   :  { %4011 = vmatprep.mubr.bf16.mxu0 %v6124_v61 }
 0x254   :  { %6461 = vtanh.f32 %v4548_v2  ;;  %v4549_v4 = vadd.f32 %v8038_v24, %v4346_v3  ;;  %v2980_v5 = vpop.f32.mrb[160].mxu1 }
 0x255   :  { %v3797_v6 = vpop.f32.mrb[160].mxu0  ;;  %v2982_v17 = vpop.f32.mrb[161].mxu1 }
 0x256   :  { %v6458_v8 = vpop.eup %6457  ;;  %6463 = vtanh.f32 %v4549_v4  ;;  %v3798_v9 = vadd.f32 %v3797_v6, %v2980_v5  ;;  %v3799_v10 = vpop.f32.mrb[161].mxu0  ;;  %v6137_v6 = vld [vmem:[%s9066_s0 + $0x8c0] ss:$16 sps:$4 sm:$0xff]  }
 0x257   :  { %v2983_v11 = vpop.f32.mrb[162].mxu1  ;;  %4938 = vst [vmem:[%s9069_s4 + $0x260] sm:$0xff] %v6458_v8  ;;  %v3800_v12 = vpop.f32.mrb[162].mxu0  ;;  %v6140_v10 = vld [vmem:[%s9066_s0 + $0x8c8] ss:$16 sps:$4 sm:$0xff]  }
 0x258   :  { %v2985_v19 = vpop.f32.mrb[163].mxu1  ;;  %v6460_v16 = vpop.eup %6459  ;;  %v4347_v18 = vmul.f32 %v8029_v21, %v3798_v9  ;;  %v3801_v20 = vadd.f32 %v3800_v12, %v2983_v11  ;;  %v6145_v11 = vld [vmem:[%s9066_s0 + $0x8e4] ss:$16 sps:$4 sm:$0xff]   ;;  %v6148_v12 = vld [vmem:[%s9066_s0 + $0x8ec] ss:$16 sps:$4 sm:$0xff]  }
 0x259   :  { %v3802_v22 = vpop.f32.mrb[163].mxu0  ;;  %4939 = vst [vmem:[%s9069_s4 + $0x268] sm:$0xff] %v6460_v16  ;;  %3195 = vmatmul.mubr.bf16.gmra.mrb[160].mxu1 %v6119_v7 }
 0x25a   :  { %v4550_v23 = vadd.f32 %v8038_v24, %v4347_v18  ;;  %v4348_v25 = vmul.f32 %v8029_v21, %v3801_v20  ;;  %4012 = vmatmul.mubr.bf16.gmra.mrb[12].mxu0 %v6122_v13  ;;  %3202 = vmatprep.mubr.bf16.mxu1 %v6127_v14 }
 0x25b   :  { %4019 = vmatprep.mubr.bf16.mxu0 %v6130_v15 }
 0x25c   :  { %6465 = vtanh.f32 %v4550_v23  ;;  %v4551_v26 = vadd.f32 %v8038_v24, %v4348_v25  ;;  %v2988_v27 = vpop.f32.mrb[164].mxu1 }
 0x25d   :  { %v3805_v28 = vpop.f32.mrb[164].mxu0  ;;  %v2990_v29 = vpop.f32.mrb[165].mxu1 }
 0x25e   :  { %v6462_v31 = vpop.eup %6461  ;;  %6467 = vtanh.f32 %v4551_v26  ;;  %v3806_v32 = vadd.f32 %v3805_v28, %v2988_v27  ;;  %v3807_v33 = vpop.f32.mrb[165].mxu0  ;;  %v6143_v28 = vld [vmem:[%s9066_s0 + $0x8e0] ss:$16 sps:$4 sm:$0xff]  }
 0x25f   :  { %v2991_v34 = vpop.f32.mrb[166].mxu1  ;;  %4940 = vst [vmem:[%s9069_s4 + $0x270] sm:$0xff] %v6462_v31  ;;  %v3808_v37 = vpop.f32.mrb[166].mxu0  ;;  %v6146_v33 = vld [vmem:[%s9066_s0 + $0x8e8] ss:$16 sps:$4 sm:$0xff]  }
 0x260   :  { %v2993_v38 = vpop.f32.mrb[167].mxu1  ;;  %v6464_v40 = vpop.eup %6463  ;;  %v4349_v41 = vmul.f32 %v8029_v21, %v3806_v32  ;;  %v3809_v42 = vadd.f32 %v3808_v37, %v2991_v34  ;;  %v6151_v34 = vld [vmem:[%s9066_s0 + $0x904] ss:$16 sps:$4 sm:$0xff]   ;;  %v6154_v37 = vld [vmem:[%s9066_s0 + $0x90c] ss:$16 sps:$4 sm:$0xff]  }
 0x261   :  { %v3810_v43 = vpop.f32.mrb[167].mxu0  ;;  %4941 = vst [vmem:[%s9069_s4 + $0x278] sm:$0xff] %v6464_v40  ;;  %3203 = vmatmul.mubr.bf16.gmra.mrb[164].mxu1 %v6125_v30 }
 0x262   :  { %v4552_v44 = vadd.f32 %v8038_v24, %v4349_v41  ;;  %v4350_v45 = vmul.f32 %v8029_v21, %v3809_v42  ;;  %4020 = vmatmul.mubr.bf16.gmra.mrb[16].mxu0 %v6128_v35  ;;  %3210 = vmatprep.mubr.bf16.mxu1 %v6133_v36 }
 0x263   :  { %4027 = vmatprep.mubr.bf16.mxu0 %v6136_v39 }
 0x264   :  { %6469 = vtanh.f32 %v4552_v44  ;;  %v4553_v46 = vadd.f32 %v8038_v24, %v4350_v45  ;;  %v2996_v47 = vpop.f32.mrb[168].mxu1 }
 0x265   :  { %v3813_v48 = vpop.f32.mrb[168].mxu0  ;;  %v2998_v49 = vpop.f32.mrb[169].mxu1 }
 0x266   :  { %v6466_v51 = vpop.eup %6465  ;;  %6471 = vtanh.f32 %v4553_v46  ;;  %v3814_v52 = vadd.f32 %v3813_v48, %v2996_v47  ;;  %v3815_v53 = vpop.f32.mrb[169].mxu0  ;;  %v6149_v48 = vld [vmem:[%s9066_s0 + $0x900] ss:$16 sps:$4 sm:$0xff]  }
 0x267   :  { %v2999_v54 = vpop.f32.mrb[170].mxu1  ;;  %4942 = vst [vmem:[%s9069_s4 + $0x280] sm:$0xff] %v6466_v51  ;;  %v3816_v57 = vpop.f32.mrb[170].mxu0  ;;  %v6152_v53 = vld [vmem:[%s9066_s0 + $0x908] ss:$16 sps:$4 sm:$0xff]  }
 0x268   :  { %v3001_v58 = vpop.f32.mrb[171].mxu1  ;;  %v6468_v60 = vpop.eup %6467  ;;  %v4351_v61 = vmul.f32 %v8029_v21, %v3814_v52  ;;  %v3817_v62 = vadd.f32 %v3816_v57, %v2999_v54  ;;  %v6157_v54 = vld [vmem:[%s9066_s0 + $0x924] ss:$16 sps:$4 sm:$0xff]   ;;  %v6160_v57 = vld [vmem:[%s9066_s0 + $0x92c] ss:$16 sps:$4 sm:$0xff]  }
 0x269   :  { %v3818_v63 = vpop.f32.mrb[171].mxu0  ;;  %4943 = vst [vmem:[%s9069_s4 + $0x288] sm:$0xff] %v6468_v60  ;;  %3211 = vmatmul.mubr.bf16.gmra.mrb[168].mxu1 %v6131_v50 }
 0x26a   :  { %v4554_v0 = vadd.f32 %v8038_v24, %v4351_v61  ;;  %v4352_v1 = vmul.f32 %v8029_v21, %v3817_v62  ;;  %4028 = vmatmul.mubr.bf16.gmra.mrb[20].mxu0 %v6134_v55  ;;  %3218 = vmatprep.mubr.bf16.mxu1 %v6139_v56 }
 0x26b   :  { %4035 = vmatprep.mubr.bf16.mxu0 %v6142_v59 }
 0x26c   :  { %6473 = vtanh.f32 %v4554_v0  ;;  %v4555_v2 = vadd.f32 %v8038_v24, %v4352_v1  ;;  %v3004_v3 = vpop.f32.mrb[172].mxu1 }
 0x26d   :  { %v3821_v4 = vpop.f32.mrb[172].mxu0  ;;  %v3006_v5 = vpop.f32.mrb[173].mxu1 }
 0x26e   :  { %v6470_v17 = vpop.eup %6469  ;;  %6475 = vtanh.f32 %v4555_v2  ;;  %v3822_v7 = vadd.f32 %v3821_v4, %v3004_v3  ;;  %v3823_v8 = vpop.f32.mrb[173].mxu0  ;;  %v6155_v4 = vld [vmem:[%s9066_s0 + $0x920] ss:$16 sps:$4 sm:$0xff]  }
 0x26f   :  { %v3007_v9 = vpop.f32.mrb[174].mxu1  ;;  %4944 = vst [vmem:[%s9069_s4 + $0x290] sm:$0xff] %v6470_v17  ;;  %v3824_v13 = vpop.f32.mrb[174].mxu0  ;;  %v6158_v8 = vld [vmem:[%s9066_s0 + $0x928] ss:$16 sps:$4 sm:$0xff]  }
 0x270   :  { %v3009_v14 = vpop.f32.mrb[175].mxu1  ;;  %v6472_v19 = vpop.eup %6471  ;;  %v4353_v15 = vmul.f32 %v8029_v21, %v3822_v7  ;;  %v3825_v16 = vadd.f32 %v3824_v13, %v3007_v9  ;;  %v6163_v9 = vld [vmem:[%s9066_s0 + $0x944] ss:$16 sps:$4 sm:$0xff]   ;;  %v6166_v13 = vld [vmem:[%s9066_s0 + $0x94c] ss:$16 sps:$4 sm:$0xff]  }
 0x271   :  { %v3826_v18 = vpop.f32.mrb[175].mxu0  ;;  %4945 = vst [vmem:[%s9069_s4 + $0x298] sm:$0xff] %v6472_v19  ;;  %3219 = vmatmul.mubr.bf16.gmra.mrb[172].mxu1 %v6137_v6 }
 0x272   :  { %v4556_v20 = vadd.f32 %v8038_v24, %v4353_v15  ;;  %v4354_v22 = vmul.f32 %v8029_v21, %v3825_v16  ;;  %4036 = vmatmul.mubr.bf16.gmra.mrb[24].mxu0 %v6140_v10  ;;  %3226 = vmatprep.mubr.bf16.mxu1 %v6145_v11 }
 0x273   :  { %4043 = vmatprep.mubr.bf16.mxu0 %v6148_v12 }
 0x274   :  { %6477 = vtanh.f32 %v4556_v20  ;;  %v4557_v23 = vadd.f32 %v8038_v24, %v4354_v22  ;;  %v3012_v25 = vpop.f32.mrb[176].mxu1 }
 0x275   :  { %v3829_v26 = vpop.f32.mrb[176].mxu0  ;;  %v3014_v27 = vpop.f32.mrb[177].mxu1 }
 0x276   :  { %v6474_v29 = vpop.eup %6473  ;;  %6479 = vtanh.f32 %v4557_v23  ;;  %v3830_v30 = vadd.f32 %v3829_v26, %v3012_v25  ;;  %v3831_v31 = vpop.f32.mrb[177].mxu0  ;;  %v6161_v26 = vld [vmem:[%s9066_s0 + $0x940] ss:$16 sps:$4 sm:$0xff]  }
 0x277   :  { %v3015_v32 = vpop.f32.mrb[178].mxu1  ;;  %4946 = vst [vmem:[%s9069_s4 + $0x2a0] sm:$0xff] %v6474_v29  ;;  %v3832_v35 = vpop.f32.mrb[178].mxu0  ;;  %v6164_v31 = vld [vmem:[%s9066_s0 + $0x948] ss:$16 sps:$4 sm:$0xff]  }
 0x278   :  { %v3017_v36 = vpop.f32.mrb[179].mxu1  ;;  %v6476_v38 = vpop.eup %6475  ;;  %v4355_v39 = vmul.f32 %v8029_v21, %v3830_v30  ;;  %v3833_v40 = vadd.f32 %v3832_v35, %v3015_v32  ;;  %v6169_v32 = vld [vmem:[%s9066_s0 + $0x964] ss:$16 sps:$4 sm:$0xff]   ;;  %v6172_v35 = vld [vmem:[%s9066_s0 + $0x96c] ss:$16 sps:$4 sm:$0xff]  }
 0x279   :  { %v3834_v41 = vpop.f32.mrb[179].mxu0  ;;  %4947 = vst [vmem:[%s9069_s4 + $0x2a8] sm:$0xff] %v6476_v38  ;;  %3227 = vmatmul.mubr.bf16.gmra.mrb[176].mxu1 %v6143_v28 }
 0x27a   :  { %v4558_v42 = vadd.f32 %v8038_v24, %v4355_v39  ;;  %v4356_v43 = vmul.f32 %v8029_v21, %v3833_v40  ;;  %4044 = vmatmul.mubr.bf16.gmra.mrb[28].mxu0 %v6146_v33  ;;  %3234 = vmatprep.mubr.bf16.mxu1 %v6151_v34 }
 0x27b   :  { %4051 = vmatprep.mubr.bf16.mxu0 %v6154_v37 }
 0x27c   :  { %6481 = vtanh.f32 %v4558_v42  ;;  %v4559_v44 = vadd.f32 %v8038_v24, %v4356_v43  ;;  %v3020_v45 = vpop.f32.mrb[180].mxu1 }
 0x27d   :  { %v3837_v46 = vpop.f32.mrb[180].mxu0  ;;  %v3022_v47 = vpop.f32.mrb[181].mxu1 }
 0x27e   :  { %v6478_v49 = vpop.eup %6477  ;;  %6483 = vtanh.f32 %v4559_v44  ;;  %v3838_v50 = vadd.f32 %v3837_v46, %v3020_v45  ;;  %v3839_v51 = vpop.f32.mrb[181].mxu0  ;;  %v6167_v46 = vld [vmem:[%s9066_s0 + $0x960] ss:$16 sps:$4 sm:$0xff]  }
 0x27f   :  { %v3023_v52 = vpop.f32.mrb[182].mxu1  ;;  %4948 = vst [vmem:[%s9069_s4 + $0x2b0] sm:$0xff] %v6478_v49  ;;  %v3840_v55 = vpop.f32.mrb[182].mxu0  ;;  %v6170_v51 = vld [vmem:[%s9066_s0 + $0x968] ss:$16 sps:$4 sm:$0xff]  }
 0x280   :  { %v3025_v56 = vpop.f32.mrb[183].mxu1  ;;  %v6480_v58 = vpop.eup %6479  ;;  %v4357_v59 = vmul.f32 %v8029_v21, %v3838_v50  ;;  %v3841_v60 = vadd.f32 %v3840_v55, %v3023_v52  ;;  %v6175_v52 = vld [vmem:[%s9066_s0 + $0x984] ss:$16 sps:$4 sm:$0xff]   ;;  %v6178_v55 = vld [vmem:[%s9066_s0 + $0x98c] ss:$16 sps:$4 sm:$0xff]  }
 0x281   :  { %v3842_v61 = vpop.f32.mrb[183].mxu0  ;;  %4949 = vst [vmem:[%s9069_s4 + $0x2b8] sm:$0xff] %v6480_v58  ;;  %3235 = vmatmul.mubr.bf16.gmra.mrb[180].mxu1 %v6149_v48 }
 0x282   :  { %v4560_v62 = vadd.f32 %v8038_v24, %v4357_v59  ;;  %v4358_v63 = vmul.f32 %v8029_v21, %v3841_v60  ;;  %4052 = vmatmul.mubr.bf16.gmra.mrb[32].mxu0 %v6152_v53  ;;  %3242 = vmatprep.mubr.bf16.mxu1 %v6157_v54 }
 0x283   :  { %4059 = vmatprep.mubr.bf16.mxu0 %v6160_v57 }
 0x284   :  { %6485 = vtanh.f32 %v4560_v62  ;;  %v4561_v0 = vadd.f32 %v8038_v24, %v4358_v63  ;;  %v3028_v1 = vpop.f32.mrb[184].mxu1 }
 0x285   :  { %v3845_v2 = vpop.f32.mrb[184].mxu0  ;;  %v3030_v3 = vpop.f32.mrb[185].mxu1 }
 0x286   :  { %v6482_v5 = vpop.eup %6481  ;;  %6487 = vtanh.f32 %v4561_v0  ;;  %v3846_v6 = vadd.f32 %v3845_v2, %v3028_v1  ;;  %v3847_v17 = vpop.f32.mrb[185].mxu0  ;;  %v6173_v2 = vld [vmem:[%s9066_s0 + $0x980] ss:$16 sps:$4 sm:$0xff]  }
 0x287   :  { %v3031_v7 = vpop.f32.mrb[186].mxu1  ;;  %4950 = vst [vmem:[%s9069_s4 + $0x2c0] sm:$0xff] %v6482_v5  ;;  %v3848_v10 = vpop.f32.mrb[186].mxu0  ;;  %v6176_v17 = vld [vmem:[%s9066_s0 + $0x988] ss:$16 sps:$4 sm:$0xff]  }
 0x288   :  { %v3033_v11 = vpop.f32.mrb[187].mxu1  ;;  %v6484_v14 = vpop.eup %6483  ;;  %v4359_v12 = vmul.f32 %v8029_v21, %v3846_v6  ;;  %v3849_v19 = vadd.f32 %v3848_v10, %v3031_v7  ;;  %v6181_v7 = vld [vmem:[%s9066_s0 + $0x9a4] ss:$16 sps:$4 sm:$0xff]   ;;  %v6184_v10 = vld [vmem:[%s9066_s0 + $0x9ac] ss:$16 sps:$4 sm:$0xff]  }
 0x289   :  { %v3850_v15 = vpop.f32.mrb[187].mxu0  ;;  %4951 = vst [vmem:[%s9069_s4 + $0x2c8] sm:$0xff] %v6484_v14  ;;  %3243 = vmatmul.mubr.bf16.gmra.mrb[184].mxu1 %v6155_v4 }
 0x28a   :  { %v4562_v16 = vadd.f32 %v8038_v24, %v4359_v12  ;;  %v4360_v18 = vmul.f32 %v8029_v21, %v3849_v19  ;;  %4060 = vmatmul.mubr.bf16.gmra.mrb[36].mxu0 %v6158_v8  ;;  %3250 = vmatprep.mubr.bf16.mxu1 %v6163_v9 }
 0x28b   :  { %4067 = vmatprep.mubr.bf16.mxu0 %v6166_v13 }
 0x28c   :  { %6489 = vtanh.f32 %v4562_v16  ;;  %v4563_v20 = vadd.f32 %v8038_v24, %v4360_v18  ;;  %v3036_v22 = vpop.f32.mrb[188].mxu1 }
 0x28d   :  { %v3853_v23 = vpop.f32.mrb[188].mxu0  ;;  %v3038_v25 = vpop.f32.mrb[189].mxu1 }
 0x28e   :  { %v6486_v27 = vpop.eup %6485  ;;  %6491 = vtanh.f32 %v4563_v20  ;;  %v3854_v28 = vadd.f32 %v3853_v23, %v3036_v22  ;;  %v3855_v29 = vpop.f32.mrb[189].mxu0  ;;  %v6179_v23 = vld [vmem:[%s9066_s0 + $0x9a0] ss:$16 sps:$4 sm:$0xff]  }
 0x28f   :  { %v3039_v30 = vpop.f32.mrb[190].mxu1  ;;  %4952 = vst [vmem:[%s9069_s4 + $0x2d0] sm:$0xff] %v6486_v27  ;;  %v3856_v33 = vpop.f32.mrb[190].mxu0  ;;  %v6182_v29 = vld [vmem:[%s9066_s0 + $0x9a8] ss:$16 sps:$4 sm:$0xff]  }
 0x290   :  { %v3041_v34 = vpop.f32.mrb[191].mxu1  ;;  %v6488_v36 = vpop.eup %6487  ;;  %v4361_v37 = vmul.f32 %v8029_v21, %v3854_v28  ;;  %v3857_v38 = vadd.f32 %v3856_v33, %v3039_v30  ;;  %v6187_v30 = vld [vmem:[%s9066_s0 + $0x9c4] ss:$16 sps:$4 sm:$0xff]   ;;  %v6190_v33 = vld [vmem:[%s9066_s0 + $0x9cc] ss:$16 sps:$4 sm:$0xff]  }
 0x291   :  { %v3858_v39 = vpop.f32.mrb[191].mxu0  ;;  %4953 = vst [vmem:[%s9069_s4 + $0x2d8] sm:$0xff] %v6488_v36  ;;  %3251 = vmatmul.mubr.bf16.gmra.mrb[188].mxu1 %v6161_v26 }
 0x292   :  { %v4564_v40 = vadd.f32 %v8038_v24, %v4361_v37  ;;  %v4362_v41 = vmul.f32 %v8029_v21, %v3857_v38  ;;  %4068 = vmatmul.mubr.bf16.gmra.mrb[40].mxu0 %v6164_v31  ;;  %3258 = vmatprep.mubr.bf16.mxu1 %v6169_v32 }
 0x293   :  { %4075 = vmatprep.mubr.bf16.mxu0 %v6172_v35 }
 0x294   :  { %6493 = vtanh.f32 %v4564_v40  ;;  %v4565_v42 = vadd.f32 %v8038_v24, %v4362_v41  ;;  %v3044_v43 = vpop.f32.mrb[192].mxu1 }
 0x295   :  { %v3861_v44 = vpop.f32.mrb[192].mxu0  ;;  %v3046_v45 = vpop.f32.mrb[193].mxu1 }
 0x296   :  { %v6490_v47 = vpop.eup %6489  ;;  %6495 = vtanh.f32 %v4565_v42  ;;  %v3862_v48 = vadd.f32 %v3861_v44, %v3044_v43  ;;  %v3863_v49 = vpop.f32.mrb[193].mxu0  ;;  %v6185_v44 = vld [vmem:[%s9066_s0 + $0x9c0] ss:$16 sps:$4 sm:$0xff]  }
 0x297   :  { %v3047_v50 = vpop.f32.mrb[194].mxu1  ;;  %4954 = vst [vmem:[%s9069_s4 + $0x2e0] sm:$0xff] %v6490_v47  ;;  %v3864_v53 = vpop.f32.mrb[194].mxu0  ;;  %v6188_v49 = vld [vmem:[%s9066_s0 + $0x9c8] ss:$16 sps:$4 sm:$0xff]  }
 0x298   :  { %v3049_v54 = vpop.f32.mrb[195].mxu1  ;;  %v6492_v56 = vpop.eup %6491  ;;  %v4363_v57 = vmul.f32 %v8029_v21, %v3862_v48  ;;  %v3865_v58 = vadd.f32 %v3864_v53, %v3047_v50  ;;  %v6193_v50 = vld [vmem:[%s9066_s0 + $0x9e4] ss:$16 sps:$4 sm:$0xff]   ;;  %v6196_v53 = vld [vmem:[%s9066_s0 + $0x9ec] ss:$16 sps:$4 sm:$0xff]  }
 0x299   :  { %v3866_v59 = vpop.f32.mrb[195].mxu0  ;;  %4955 = vst [vmem:[%s9069_s4 + $0x2e8] sm:$0xff] %v6492_v56  ;;  %3259 = vmatmul.mubr.bf16.gmra.mrb[192].mxu1 %v6167_v46 }
 0x29a   :  { %v4566_v60 = vadd.f32 %v8038_v24, %v4363_v57  ;;  %v4364_v61 = vmul.f32 %v8029_v21, %v3865_v58  ;;  %4076 = vmatmul.mubr.bf16.gmra.mrb[44].mxu0 %v6170_v51  ;;  %3266 = vmatprep.mubr.bf16.mxu1 %v6175_v52 }
 0x29b   :  { %4083 = vmatprep.mubr.bf16.mxu0 %v6178_v55 }
 0x29c   :  { %6497 = vtanh.f32 %v4566_v60  ;;  %v4567_v62 = vadd.f32 %v8038_v24, %v4364_v61  ;;  %v3052_v63 = vpop.f32.mrb[196].mxu1 }
 0x29d   :  { %v3869_v0 = vpop.f32.mrb[196].mxu0  ;;  %v3054_v1 = vpop.f32.mrb[197].mxu1 }
 0x29e   :  { %v6494_v3 = vpop.eup %6493  ;;  %6499 = vtanh.f32 %v4567_v62  ;;  %v3870_v4 = vadd.f32 %v3869_v0, %v3052_v63  ;;  %v3871_v5 = vpop.f32.mrb[197].mxu0  ;;  %v6191_v0 = vld [vmem:[%s9066_s0 + $0x9e0] ss:$16 sps:$4 sm:$0xff]  }
 0x29f   :  { %v3055_v6 = vpop.f32.mrb[198].mxu1  ;;  %4956 = vst [vmem:[%s9069_s4 + $0x2f0] sm:$0xff] %v6494_v3  ;;  %v3872_v8 = vpop.f32.mrb[198].mxu0  ;;  %v6194_v5 = vld [vmem:[%s9066_s0 + $0x9e8] ss:$16 sps:$4 sm:$0xff]  }
 0x2a0   :  { %v3057_v9 = vpop.f32.mrb[199].mxu1  ;;  %v6496_v11 = vpop.eup %6495  ;;  %v4365_v13 = vmul.f32 %v8029_v21, %v3870_v4  ;;  %v3873_v14 = vadd.f32 %v3872_v8, %v3055_v6  ;;  %v6199_v6 = vld [vmem:[%s9066_s0 + $0xa04] ss:$16 sps:$4 sm:$0xff]   ;;  %v6202_v8 = vld [vmem:[%s9066_s0 + $0xa0c] ss:$16 sps:$4 sm:$0xff]  }
 0x2a1   :  { %v3874_v12 = vpop.f32.mrb[199].mxu0  ;;  %4957 = vst [vmem:[%s9069_s4 + $0x2f8] sm:$0xff] %v6496_v11  ;;  %3267 = vmatmul.mubr.bf16.gmra.mrb[196].mxu1 %v6173_v2 }
 0x2a2   :  { %v4568_v19 = vadd.f32 %v8038_v24, %v4365_v13  ;;  %v4366_v15 = vmul.f32 %v8029_v21, %v3873_v14  ;;  %4084 = vmatmul.mubr.bf16.gmra.mrb[48].mxu0 %v6176_v17  ;;  %3274 = vmatprep.mubr.bf16.mxu1 %v6181_v7 }
 0x2a3   :  { %4091 = vmatprep.mubr.bf16.mxu0 %v6184_v10 }
 0x2a4   :  { %6501 = vtanh.f32 %v4568_v19  ;;  %v4569_v16 = vadd.f32 %v8038_v24, %v4366_v15  ;;  %v3060_v18 = vpop.f32.mrb[200].mxu1 }
 0x2a5   :  { %v3877_v20 = vpop.f32.mrb[200].mxu0  ;;  %v3062_v22 = vpop.f32.mrb[201].mxu1 }
 0x2a6   :  { %v6498_v25 = vpop.eup %6497  ;;  %6503 = vtanh.f32 %v4569_v16  ;;  %v3878_v26 = vadd.f32 %v3877_v20, %v3060_v18  ;;  %v3879_v27 = vpop.f32.mrb[201].mxu0  ;;  %v6197_v20 = vld [vmem:[%s9066_s0 + $0xa00] ss:$16 sps:$4 sm:$0xff]  }
 0x2a7   :  { %v3063_v28 = vpop.f32.mrb[202].mxu1  ;;  %4958 = vst [vmem:[%s9069_s4 + $0x300] sm:$0xff] %v6498_v25  ;;  %v3880_v31 = vpop.f32.mrb[202].mxu0  ;;  %v6200_v27 = vld [vmem:[%s9066_s0 + $0xa08] ss:$16 sps:$4 sm:$0xff]  }
 0x2a8   :  { %v3065_v32 = vpop.f32.mrb[203].mxu1  ;;  %v6500_v34 = vpop.eup %6499  ;;  %v4367_v35 = vmul.f32 %v8029_v21, %v3878_v26  ;;  %v3881_v36 = vadd.f32 %v3880_v31, %v3063_v28  ;;  %v6205_v28 = vld [vmem:[%s9066_s0 + $0xa24] ss:$16 sps:$4 sm:$0xff]   ;;  %v6208_v31 = vld [vmem:[%s9066_s0 + $0xa2c] ss:$16 sps:$4 sm:$0xff]  }
 0x2a9   :  { %v3882_v37 = vpop.f32.mrb[203].mxu0  ;;  %4959 = vst [vmem:[%s9069_s4 + $0x308] sm:$0xff] %v6500_v34  ;;  %3275 = vmatmul.mubr.bf16.gmra.mrb[200].mxu1 %v6179_v23 }
 0x2aa   :  { %v4570_v38 = vadd.f32 %v8038_v24, %v4367_v35  ;;  %v4368_v39 = vmul.f32 %v8029_v21, %v3881_v36  ;;  %4092 = vmatmul.mubr.bf16.gmra.mrb[52].mxu0 %v6182_v29  ;;  %3282 = vmatprep.mubr.bf16.mxu1 %v6187_v30 }
 0x2ab   :  { %4099 = vmatprep.mubr.bf16.mxu0 %v6190_v33 }
 0x2ac   :  { %6505 = vtanh.f32 %v4570_v38  ;;  %v4571_v40 = vadd.f32 %v8038_v24, %v4368_v39  ;;  %v3068_v41 = vpop.f32.mrb[204].mxu1 }
 0x2ad   :  { %v3885_v42 = vpop.f32.mrb[204].mxu0  ;;  %v3070_v43 = vpop.f32.mrb[205].mxu1 }
 0x2ae   :  { %v6502_v45 = vpop.eup %6501  ;;  %6507 = vtanh.f32 %v4571_v40  ;;  %v3886_v46 = vadd.f32 %v3885_v42, %v3068_v41  ;;  %v3887_v47 = vpop.f32.mrb[205].mxu0  ;;  %v6203_v42 = vld [vmem:[%s9066_s0 + $0xa20] ss:$16 sps:$4 sm:$0xff]  }
 0x2af   :  { %v3071_v48 = vpop.f32.mrb[206].mxu1  ;;  %4960 = vst [vmem:[%s9069_s4 + $0x310] sm:$0xff] %v6502_v45  ;;  %v3888_v51 = vpop.f32.mrb[206].mxu0  ;;  %v6206_v47 = vld [vmem:[%s9066_s0 + $0xa28] ss:$16 sps:$4 sm:$0xff]  }
 0x2b0   :  { %v3073_v52 = vpop.f32.mrb[207].mxu1  ;;  %v6504_v54 = vpop.eup %6503  ;;  %v4369_v55 = vmul.f32 %v8029_v21, %v3886_v46  ;;  %v3889_v56 = vadd.f32 %v3888_v51, %v3071_v48  ;;  %v6211_v48 = vld [vmem:[%s9066_s0 + $0xa44] ss:$16 sps:$4 sm:$0xff]   ;;  %v6214_v51 = vld [vmem:[%s9066_s0 + $0xa4c] ss:$16 sps:$4 sm:$0xff]  }
 0x2b1   :  { %v3890_v57 = vpop.f32.mrb[207].mxu0  ;;  %4961 = vst [vmem:[%s9069_s4 + $0x318] sm:$0xff] %v6504_v54  ;;  %3283 = vmatmul.mubr.bf16.gmra.mrb[204].mxu1 %v6185_v44 }
 0x2b2   :  { %v4572_v58 = vadd.f32 %v8038_v24, %v4369_v55  ;;  %v4370_v59 = vmul.f32 %v8029_v21, %v3889_v56  ;;  %4100 = vmatmul.mubr.bf16.gmra.mrb[56].mxu0 %v6188_v49  ;;  %3290 = vmatprep.mubr.bf16.mxu1 %v6193_v50 }
 0x2b3   :  { %4107 = vmatprep.mubr.bf16.mxu0 %v6196_v53 }
 0x2b4   :  { %6509 = vtanh.f32 %v4572_v58  ;;  %v4573_v60 = vadd.f32 %v8038_v24, %v4370_v59  ;;  %v3076_v61 = vpop.f32.mrb[208].mxu1 }
 0x2b5   :  { %v3893_v62 = vpop.f32.mrb[208].mxu0  ;;  %v3078_v63 = vpop.f32.mrb[209].mxu1 }
 0x2b6   :  { %v6506_v1 = vpop.eup %6505  ;;  %6511 = vtanh.f32 %v4573_v60  ;;  %v3894_v2 = vadd.f32 %v3893_v62, %v3076_v61  ;;  %v3895_v3 = vpop.f32.mrb[209].mxu0  ;;  %v6209_v62 = vld [vmem:[%s9066_s0 + $0xa40] ss:$16 sps:$4 sm:$0xff]  }
 0x2b7   :  { %v3079_v4 = vpop.f32.mrb[210].mxu1  ;;  %4962 = vst [vmem:[%s9069_s4 + $0x320] sm:$0xff] %v6506_v1  ;;  %v3896_v17 = vpop.f32.mrb[210].mxu0  ;;  %v6212_v3 = vld [vmem:[%s9066_s0 + $0xa48] ss:$16 sps:$4 sm:$0xff]  }
 0x2b8   :  { %v3081_v7 = vpop.f32.mrb[211].mxu1  ;;  %v6508_v9 = vpop.eup %6507  ;;  %v4371_v10 = vmul.f32 %v8029_v21, %v3894_v2  ;;  %v3897_v11 = vadd.f32 %v3896_v17, %v3079_v4  ;;  %v6217_v4 = vld [vmem:[%s9066_s0 + $0xa64] ss:$16 sps:$4 sm:$0xff]   ;;  %v6220_v17 = vld [vmem:[%s9066_s0 + $0xa6c] ss:$16 sps:$4 sm:$0xff]  }
 0x2b9   :  { %v3898_v13 = vpop.f32.mrb[211].mxu0  ;;  %4963 = vst [vmem:[%s9069_s4 + $0x328] sm:$0xff] %v6508_v9  ;;  %3291 = vmatmul.mubr.bf16.gmra.mrb[208].mxu1 %v6191_v0 }
 0x2ba   :  { %v4574_v14 = vadd.f32 %v8038_v24, %v4371_v10  ;;  %v4372_v12 = vmul.f32 %v8029_v21, %v3897_v11  ;;  %4108 = vmatmul.mubr.bf16.gmra.mrb[60].mxu0 %v6194_v5  ;;  %3298 = vmatprep.mubr.bf16.mxu1 %v6199_v6 }
 0x2bb   :  { %4115 = vmatprep.mubr.bf16.mxu0 %v6202_v8 }
 0x2bc   :  { %6513 = vtanh.f32 %v4574_v14  ;;  %v4575_v19 = vadd.f32 %v8038_v24, %v4372_v12  ;;  %v3084_v15 = vpop.f32.mrb[212].mxu1 }
 0x2bd   :  { %v3901_v16 = vpop.f32.mrb[212].mxu0  ;;  %v3086_v18 = vpop.f32.mrb[213].mxu1 }
 0x2be   :  { %v6510_v22 = vpop.eup %6509  ;;  %6515 = vtanh.f32 %v4575_v19  ;;  %v3902_v23 = vadd.f32 %v3901_v16, %v3084_v15  ;;  %v3903_v25 = vpop.f32.mrb[213].mxu0  ;;  %v6215_v16 = vld [vmem:[%s9066_s0 + $0xa60] ss:$16 sps:$4 sm:$0xff]  }
 0x2bf   :  { %v3087_v26 = vpop.f32.mrb[214].mxu1  ;;  %4964 = vst [vmem:[%s9069_s4 + $0x330] sm:$0xff] %v6510_v22  ;;  %v3904_v29 = vpop.f32.mrb[214].mxu0 }
 0x2c0   :  { %v3089_v30 = vpop.f32.mrb[215].mxu1  ;;  %v6512_v32 = vpop.eup %6511  ;;  %v4373_v33 = vmul.f32 %v8029_v21, %v3902_v23  ;;  %v3905_v34 = vadd.f32 %v3904_v29, %v3087_v26  ;;  %v8457_v29 = vld [vmem:[%s9067_s2] ss:$0 sm:$0xff] }
 0x2c1   :  { %v3906_v35 = vpop.f32.mrb[215].mxu0  ;;  %4965 = vst [vmem:[%s9069_s4 + $0x338] sm:$0xff] %v6512_v32  ;;  %3299 = vmatmul.mubr.bf16.gmra.mrb[212].mxu1 %v6197_v20 }
 0x2c2   :  { %v4576_v36 = vadd.f32 %v8038_v24, %v4373_v33  ;;  %v4374_v37 = vmul.f32 %v8029_v21, %v3905_v34  ;;  %4116 = vmatmul.mubr.bf16.gmra.mrb[64].mxu0 %v6200_v27  ;;  %3306 = vmatprep.mubr.bf16.mxu1 %v6205_v28  ;;  %v6226_v27 = vld [vmem:[%s9066_s0 + $0xa8c] ss:$16 sps:$4 sm:$0xff]   ;;  %v8466_v33 = vld [vmem:[%s9068_s3] ss:$0 sm:$0xff] }
 0x2c3   :  { %4123 = vmatprep.mubr.bf16.mxu0 %v6208_v31 }
 0x2c4   :  { %6517 = vtanh.f32 %v4576_v36  ;;  %v4577_v38 = vadd.f32 %v8038_v24, %v4374_v37  ;;  %v3092_v39 = vpop.f32.mrb[216].mxu1 }
 0x2c5   :  { %v3909_v40 = vpop.f32.mrb[216].mxu0  ;;  %v3094_v41 = vpop.f32.mrb[217].mxu1 }
 0x2c6   :  { %v6514_v43 = vpop.eup %6513  ;;  %6519 = vtanh.f32 %v4577_v38  ;;  %v3910_v44 = vadd.f32 %v3909_v40, %v3092_v39  ;;  %v3911_v45 = vpop.f32.mrb[217].mxu0  ;;  %v6221_v40 = vld [vmem:[%s9066_s0 + $0xa80] ss:$16 sps:$4 sm:$0xff]  }
 0x2c7   :  { %v3095_v46 = vpop.f32.mrb[218].mxu1  ;;  %4966 = vst [vmem:[%s9069_s4 + $0x340] sm:$0xff] %v6514_v43  ;;  %v3912_v49 = vpop.f32.mrb[218].mxu0  ;;  %v6224_v45 = vld [vmem:[%s9066_s0 + $0xa88] ss:$16 sps:$4 sm:$0xff]  }
 0x2c8   :  { %v3097_v50 = vpop.f32.mrb[219].mxu1  ;;  %v6516_v52 = vpop.eup %6515  ;;  %v4375_v53 = vmul.f32 %v8029_v21, %v3910_v44  ;;  %v3913_v54 = vadd.f32 %v3912_v49, %v3095_v46  ;;  %v6229_v46 = vld [vmem:[%s9066_s0 + $0xaa4] ss:$16 sps:$4 sm:$0xff]   ;;  %v6232_v49 = vld [vmem:[%s9066_s0 + $0xaac] ss:$16 sps:$4 sm:$0xff]  }
 0x2c9   :  { %v3914_v55 = vpop.f32.mrb[219].mxu0  ;;  %4967 = vst [vmem:[%s9069_s4 + $0x348] sm:$0xff] %v6516_v52  ;;  %3307 = vmatmul.mubr.bf16.gmra.mrb[216].mxu1 %v6203_v42 }
 0x2ca   :  { %v4578_v56 = vadd.f32 %v8038_v24, %v4375_v53  ;;  %v4376_v57 = vmul.f32 %v8029_v21, %v3913_v54  ;;  %4124 = vmatmul.mubr.bf16.gmra.mrb[68].mxu0 %v6206_v47  ;;  %3314 = vmatprep.mubr.bf16.mxu1 %v6211_v48 }
 0x2cb   :  { %4131 = vmatprep.mubr.bf16.mxu0 %v6214_v51 }
 0x2cc   :  { %6521 = vtanh.f32 %v4578_v56  ;;  %v4579_v58 = vadd.f32 %v8038_v24, %v4376_v57  ;;  %v3100_v59 = vpop.f32.mrb[220].mxu1 }
 0x2cd   :  { %v3917_v60 = vpop.f32.mrb[220].mxu0  ;;  %v3102_v61 = vpop.f32.mrb[221].mxu1 }
 0x2ce   :  { %v6518_v63 = vpop.eup %6517  ;;  %6523 = vtanh.f32 %v4579_v58  ;;  %v3918_v0 = vadd.f32 %v3917_v60, %v3100_v59  ;;  %v3919_v1 = vpop.f32.mrb[221].mxu0  ;;  %v6227_v60 = vld [vmem:[%s9066_s0 + $0xaa0] ss:$16 sps:$4 sm:$0xff]  }
 0x2cf   :  { %v3103_v2 = vpop.f32.mrb[222].mxu1  ;;  %4968 = vst [vmem:[%s9069_s4 + $0x350] sm:$0xff] %v6518_v63  ;;  %v3920_v5 = vpop.f32.mrb[222].mxu0  ;;  %v6230_v1 = vld [vmem:[%s9066_s0 + $0xaa8] ss:$16 sps:$4 sm:$0xff]  }
 0x2d0   :  { %v3105_v6 = vpop.f32.mrb[223].mxu1  ;;  %v6520_v7 = vpop.eup %6519  ;;  %v4377_v8 = vmul.f32 %v8029_v21, %v3918_v0  ;;  %v3921_v9 = vadd.f32 %v3920_v5, %v3103_v2  ;;  %v6235_v2 = vld [vmem:[%s9066_s0 + $0xac4] ss:$16 sps:$4 sm:$0xff]   ;;  %v6238_v5 = vld [vmem:[%s9066_s0 + $0xacc] ss:$16 sps:$4 sm:$0xff]  }
 0x2d1   :  { %v3922_v10 = vpop.f32.mrb[223].mxu0  ;;  %4969 = vst [vmem:[%s9069_s4 + $0x358] sm:$0xff] %v6520_v7  ;;  %3315 = vmatmul.mubr.bf16.gmra.mrb[220].mxu1 %v6209_v62 }
 0x2d2   :  { %v4580_v11 = vadd.f32 %v8038_v24, %v4377_v8  ;;  %v4378_v13 = vmul.f32 %v8029_v21, %v3921_v9  ;;  %4132 = vmatmul.mubr.bf16.gmra.mrb[72].mxu0 %v6212_v3  ;;  %3322 = vmatprep.mubr.bf16.mxu1 %v6217_v4  ;;  %v6218_v21 = vld [vmem:[%s9066_s0 + $0xa68] ss:$16 sps:$4 sm:$0xff]  }
 0x2d3   :  { %4139 = vmatprep.mubr.bf16.mxu0 %v6220_v17 }
 0x2d4   :  { %6525 = vtanh.f32 %v4580_v11  ;;  %v4581_v14 = vadd.f32 %v8038_v24, %v4378_v13  ;;  %v3108_v12 = vpop.f32.mrb[224].mxu1  ;;  %v6223_v24 = vld [vmem:[%s9066_s0 + $0xa84] ss:$16 sps:$4 sm:$0xff]  }
 0x2d5   :  { %v3925_v19 = vpop.f32.mrb[224].mxu0  ;;  %v3110_v15 = vpop.f32.mrb[225].mxu1 }
 0x2d6   :  { %v6522_v18 = vpop.eup %6521  ;;  %6527 = vtanh.f32 %v4581_v14  ;;  %v3926_v20 = vadd.f32 %v3925_v19, %v3108_v12  ;;  %v3927_v22 = vpop.f32.mrb[225].mxu0  ;;  %v6233_v19 = vld [vmem:[%s9066_s0 + $0xac0] ss:$16 sps:$4 sm:$0xff]  }
 0x2d7   :  { %v3111_v23 = vpop.f32.mrb[226].mxu1  ;;  %4970 = vst [vmem:[%s9069_s4 + $0x360] sm:$0xff] %v6522_v18  ;;  %v3928_v25 = vpop.f32.mrb[226].mxu0  ;;  %v6236_v22 = vld [vmem:[%s9066_s0 + $0xac8] ss:$16 sps:$4 sm:$0xff]  }
 0x2d8   :  { %v3113_v26 = vpop.f32.mrb[227].mxu1  ;;  %v6524_v28 = vpop.eup %6523  ;;  %v4379_v30 = vmul.f32 %v8457_v29, %v3926_v20  ;;  %v3929_v31 = vadd.f32 %v3928_v25, %v3111_v23  ;;  %v6241_v23 = vld [vmem:[%s9066_s0 + $0xae4] ss:$16 sps:$4 sm:$0xff]   ;;  %v6244_v25 = vld [vmem:[%s9066_s0 + $0xaec] ss:$16 sps:$4 sm:$0xff]  }
 0x2d9   :  { %v3930_v32 = vpop.f32.mrb[227].mxu0  ;;  %4971 = vst [vmem:[%s9069_s4 + $0x368] sm:$0xff] %v6524_v28  ;;  %3323 = vmatmul.mubr.bf16.gmra.mrb[224].mxu1 %v6215_v16 }
 0x2da   :  { %v4582_v34 = vadd.f32 %v8466_v33, %v4379_v30  ;;  %v4380_v35 = vmul.f32 %v8457_v29, %v3929_v31  ;;  %4140 = vmatmul.mubr.bf16.gmra.mrb[76].mxu0 %v6218_v21  ;;  %3330 = vmatprep.mubr.bf16.mxu1 %v6223_v24 }
 0x2db   :  { %4147 = vmatprep.mubr.bf16.mxu0 %v6226_v27 }
 0x2dc   :  { %6529 = vtanh.f32 %v4582_v34  ;;  %v4583_v36 = vadd.f32 %v8466_v33, %v4380_v35  ;;  %v3116_v37 = vpop.f32.mrb[228].mxu1 }
 0x2dd   :  { %v3933_v38 = vpop.f32.mrb[228].mxu0  ;;  %v3118_v39 = vpop.f32.mrb[229].mxu1 }
 0x2de   :  { %v6526_v41 = vpop.eup %6525  ;;  %6531 = vtanh.f32 %v4583_v36  ;;  %v3934_v42 = vadd.f32 %v3933_v38, %v3116_v37  ;;  %v3935_v43 = vpop.f32.mrb[229].mxu0  ;;  %v6239_v38 = vld [vmem:[%s9066_s0 + $0xae0] ss:$16 sps:$4 sm:$0xff]  }
 0x2df   :  { %v3119_v44 = vpop.f32.mrb[230].mxu1  ;;  %4972 = vst [vmem:[%s9069_s4 + $0x370] sm:$0xff] %v6526_v41  ;;  %v3936_v47 = vpop.f32.mrb[230].mxu0  ;;  %v6242_v43 = vld [vmem:[%s9066_s0 + $0xae8] ss:$16 sps:$4 sm:$0xff]  }
 0x2e0   :  { %v3121_v48 = vpop.f32.mrb[231].mxu1  ;;  %v6528_v50 = vpop.eup %6527  ;;  %v4381_v51 = vmul.f32 %v8457_v29, %v3934_v42  ;;  %v3937_v52 = vadd.f32 %v3936_v47, %v3119_v44  ;;  %v6247_v44 = vld [vmem:[%s9066_s0 + $0xb04] ss:$16 sps:$4 sm:$0xff]   ;;  %v6250_v47 = vld [vmem:[%s9066_s0 + $0xb0c] ss:$16 sps:$4 sm:$0xff]  }
 0x2e1   :  { %v3938_v53 = vpop.f32.mrb[231].mxu0  ;;  %4973 = vst [vmem:[%s9069_s4 + $0x378] sm:$0xff] %v6528_v50  ;;  %3331 = vmatmul.mubr.bf16.gmra.mrb[228].mxu1 %v6221_v40 }
 0x2e2   :  { %v4584_v54 = vadd.f32 %v8466_v33, %v4381_v51  ;;  %v4382_v55 = vmul.f32 %v8457_v29, %v3937_v52  ;;  %4148 = vmatmul.mubr.bf16.gmra.mrb[80].mxu0 %v6224_v45  ;;  %3338 = vmatprep.mubr.bf16.mxu1 %v6229_v46 }
 0x2e3   :  { %4155 = vmatprep.mubr.bf16.mxu0 %v6232_v49 }
 0x2e4   :  { %6533 = vtanh.f32 %v4584_v54  ;;  %v4585_v56 = vadd.f32 %v8466_v33, %v4382_v55  ;;  %v3124_v57 = vpop.f32.mrb[232].mxu1 }
 0x2e5   :  { %v3941_v58 = vpop.f32.mrb[232].mxu0  ;;  %v3126_v59 = vpop.f32.mrb[233].mxu1 }
 0x2e6   :  { %v6530_v61 = vpop.eup %6529  ;;  %6535 = vtanh.f32 %v4585_v56  ;;  %v3942_v62 = vadd.f32 %v3941_v58, %v3124_v57  ;;  %v3943_v63 = vpop.f32.mrb[233].mxu0  ;;  %v6245_v58 = vld [vmem:[%s9066_s0 + $0xb00] ss:$16 sps:$4 sm:$0xff]  }
 0x2e7   :  { %v3127_v0 = vpop.f32.mrb[234].mxu1  ;;  %4974 = vst [vmem:[%s9069_s4 + $0x380] sm:$0xff] %v6530_v61  ;;  %v3944_v3 = vpop.f32.mrb[234].mxu0  ;;  %v6248_v63 = vld [vmem:[%s9066_s0 + $0xb08] ss:$16 sps:$4 sm:$0xff]  }
 0x2e8   :  { %v3129_v4 = vpop.f32.mrb[235].mxu1  ;;  %v6532_v6 = vpop.eup %6531  ;;  %v4383_v17 = vmul.f32 %v8457_v29, %v3942_v62  ;;  %v3945_v7 = vadd.f32 %v3944_v3, %v3127_v0  ;;  %v6253_v0 = vld [vmem:[%s9066_s0 + $0xb24] ss:$16 sps:$4 sm:$0xff]   ;;  %v6256_v3 = vld [vmem:[%s9066_s0 + $0xb2c] ss:$16 sps:$4 sm:$0xff]  }
 0x2e9   :  { %v3946_v8 = vpop.f32.mrb[235].mxu0  ;;  %4975 = vst [vmem:[%s9069_s4 + $0x388] sm:$0xff] %v6532_v6  ;;  %3339 = vmatmul.mubr.bf16.gmra.mrb[232].mxu1 %v6227_v60 }
 0x2ea   :  { %v4586_v9 = vadd.f32 %v8466_v33, %v4383_v17  ;;  %v4384_v10 = vmul.f32 %v8457_v29, %v3945_v7  ;;  %4156 = vmatmul.mubr.bf16.gmra.mrb[84].mxu0 %v6230_v1  ;;  %3346 = vmatprep.mubr.bf16.mxu1 %v6235_v2 }
 0x2eb   :  { %4163 = vmatprep.mubr.bf16.mxu0 %v6238_v5 }
 0x2ec   :  { %6537 = vtanh.f32 %v4586_v9  ;;  %v4587_v11 = vadd.f32 %v8466_v33, %v4384_v10  ;;  %v3132_v13 = vpop.f32.mrb[236].mxu1 }
 0x2ed   :  { %v3949_v14 = vpop.f32.mrb[236].mxu0  ;;  %v3134_v12 = vpop.f32.mrb[237].mxu1 }
 0x2ee   :  { %v6534_v15 = vpop.eup %6533  ;;  %6539 = vtanh.f32 %v4587_v11  ;;  %v3950_v16 = vadd.f32 %v3949_v14, %v3132_v13  ;;  %v3951_v18 = vpop.f32.mrb[237].mxu0  ;;  %v6251_v14 = vld [vmem:[%s9066_s0 + $0xb20] ss:$16 sps:$4 sm:$0xff]  }
 0x2ef   :  { %v3135_v20 = vpop.f32.mrb[238].mxu1  ;;  %4976 = vst [vmem:[%s9069_s4 + $0x390] sm:$0xff] %v6534_v15  ;;  %v3952_v21 = vpop.f32.mrb[238].mxu0  ;;  %v6254_v18 = vld [vmem:[%s9066_s0 + $0xb28] ss:$16 sps:$4 sm:$0xff]  }
 0x2f0   :  { %v3137_v24 = vpop.f32.mrb[239].mxu1  ;;  %v6536_v26 = vpop.eup %6535  ;;  %v4385_v27 = vmul.f32 %v8457_v29, %v3950_v16  ;;  %v3953_v28 = vadd.f32 %v3952_v21, %v3135_v20  ;;  %v6259_v20 = vld [vmem:[%s9066_s0 + $0xb44] ss:$16 sps:$4 sm:$0xff]   ;;  %v6262_v21 = vld [vmem:[%s9066_s0 + $0xb4c] ss:$16 sps:$4 sm:$0xff]  }
 0x2f1   :  { %v3954_v30 = vpop.f32.mrb[239].mxu0  ;;  %4977 = vst [vmem:[%s9069_s4 + $0x398] sm:$0xff] %v6536_v26  ;;  %3347 = vmatmul.mubr.bf16.gmra.mrb[236].mxu1 %v6233_v19 }
 0x2f2   :  { %v4588_v31 = vadd.f32 %v8466_v33, %v4385_v27  ;;  %v4386_v32 = vmul.f32 %v8457_v29, %v3953_v28  ;;  %4164 = vmatmul.mubr.bf16.gmra.mrb[88].mxu0 %v6236_v22  ;;  %3354 = vmatprep.mubr.bf16.mxu1 %v6241_v23 }
 0x2f3   :  { %4171 = vmatprep.mubr.bf16.mxu0 %v6244_v25 }
 0x2f4   :  { %6541 = vtanh.f32 %v4588_v31  ;;  %v4589_v34 = vadd.f32 %v8466_v33, %v4386_v32  ;;  %v3140_v35 = vpop.f32.mrb[240].mxu1 }
 0x2f5   :  { %v3957_v36 = vpop.f32.mrb[240].mxu0  ;;  %v3142_v37 = vpop.f32.mrb[241].mxu1 }
 0x2f6   :  { %v6538_v39 = vpop.eup %6537  ;;  %6543 = vtanh.f32 %v4589_v34  ;;  %v3958_v40 = vadd.f32 %v3957_v36, %v3140_v35  ;;  %v3959_v41 = vpop.f32.mrb[241].mxu0  ;;  %v6257_v36 = vld [vmem:[%s9066_s0 + $0xb40] ss:$16 sps:$4 sm:$0xff]  }
 0x2f7   :  { %v3143_v42 = vpop.f32.mrb[242].mxu1  ;;  %4978 = vst [vmem:[%s9069_s4 + $0x3a0] sm:$0xff] %v6538_v39  ;;  %v3960_v45 = vpop.f32.mrb[242].mxu0  ;;  %v6260_v41 = vld [vmem:[%s9066_s0 + $0xb48] ss:$16 sps:$4 sm:$0xff]  }
 0x2f8   :  { %v3145_v46 = vpop.f32.mrb[243].mxu1  ;;  %v6540_v48 = vpop.eup %6539  ;;  %v4387_v49 = vmul.f32 %v8457_v29, %v3958_v40  ;;  %v3961_v50 = vadd.f32 %v3960_v45, %v3143_v42  ;;  %v6265_v42 = vld [vmem:[%s9066_s0 + $0xb64] ss:$16 sps:$4 sm:$0xff]   ;;  %v6268_v45 = vld [vmem:[%s9066_s0 + $0xb6c] ss:$16 sps:$4 sm:$0xff]  }
 0x2f9   :  { %v3962_v51 = vpop.f32.mrb[243].mxu0  ;;  %4979 = vst [vmem:[%s9069_s4 + $0x3a8] sm:$0xff] %v6540_v48  ;;  %3355 = vmatmul.mubr.bf16.gmra.mrb[240].mxu1 %v6239_v38 }
 0x2fa   :  { %v4590_v52 = vadd.f32 %v8466_v33, %v4387_v49  ;;  %v4388_v53 = vmul.f32 %v8457_v29, %v3961_v50  ;;  %4172 = vmatmul.mubr.bf16.gmra.mrb[92].mxu0 %v6242_v43  ;;  %3362 = vmatprep.mubr.bf16.mxu1 %v6247_v44 }
 0x2fb   :  { %4179 = vmatprep.mubr.bf16.mxu0 %v6250_v47 }
 0x2fc   :  { %6545 = vtanh.f32 %v4590_v52  ;;  %v4591_v54 = vadd.f32 %v8466_v33, %v4388_v53  ;;  %v3148_v55 = vpop.f32.mrb[244].mxu1 }
 0x2fd   :  { %v3965_v56 = vpop.f32.mrb[244].mxu0  ;;  %v3150_v57 = vpop.f32.mrb[245].mxu1 }
 0x2fe   :  { %v6542_v59 = vpop.eup %6541  ;;  %6547 = vtanh.f32 %v4591_v54  ;;  %v3966_v60 = vadd.f32 %v3965_v56, %v3148_v55  ;;  %v3967_v61 = vpop.f32.mrb[245].mxu0  ;;  %v6263_v56 = vld [vmem:[%s9066_s0 + $0xb60] ss:$16 sps:$4 sm:$0xff]  }
 0x2ff   :  { %v3151_v62 = vpop.f32.mrb[246].mxu1  ;;  %4980 = vst [vmem:[%s9069_s4 + $0x3b0] sm:$0xff] %v6542_v59  ;;  %v3968_v1 = vpop.f32.mrb[246].mxu0  ;;  %v6266_v61 = vld [vmem:[%s9066_s0 + $0xb68] ss:$16 sps:$4 sm:$0xff]  }
 0x300   :  { %v3153_v2 = vpop.f32.mrb[247].mxu1  ;;  %v6544_v4 = vpop.eup %6543  ;;  %v4389_v5 = vmul.f32 %v8457_v29, %v3966_v60  ;;  %v3969_v6 = vadd.f32 %v3968_v1, %v3151_v62  ;;  %v6271_v62 = vld [vmem:[%s9066_s0 + $0xb84] ss:$16 sps:$4 sm:$0xff]   ;;  %v6274_v1 = vld [vmem:[%s9066_s0 + $0xb8c] ss:$16 sps:$4 sm:$0xff]  }
 0x301   :  { %v3970_v17 = vpop.f32.mrb[247].mxu0  ;;  %4981 = vst [vmem:[%s9069_s4 + $0x3b8] sm:$0xff] %v6544_v4  ;;  %3363 = vmatmul.mubr.bf16.gmra.mrb[244].mxu1 %v6245_v58 }
 0x302   :  { %v4592_v7 = vadd.f32 %v8466_v33, %v4389_v5  ;;  %v4390_v8 = vmul.f32 %v8457_v29, %v3969_v6  ;;  %4180 = vmatmul.mubr.bf16.gmra.mrb[96].mxu0 %v6248_v63  ;;  %3370 = vmatprep.mubr.bf16.mxu1 %v6253_v0 }
 0x303   :  { %4187 = vmatprep.mubr.bf16.mxu0 %v6256_v3 }
 0x304   :  { %6549 = vtanh.f32 %v4592_v7  ;;  %v4593_v9 = vadd.f32 %v8466_v33, %v4390_v8  ;;  %v3156_v10 = vpop.f32.mrb[248].mxu1 }
 0x305   :  { %v3973_v11 = vpop.f32.mrb[248].mxu0  ;;  %v3158_v13 = vpop.f32.mrb[249].mxu1 }
 0x306   :  { %v6546_v12 = vpop.eup %6545  ;;  %6551 = vtanh.f32 %v4593_v9  ;;  %v3974_v19 = vadd.f32 %v3973_v11, %v3156_v10  ;;  %v3975_v15 = vpop.f32.mrb[249].mxu0  ;;  %v6269_v11 = vld [vmem:[%s9066_s0 + $0xb80] ss:$16 sps:$4 sm:$0xff]  }
 0x307   :  { %v3159_v16 = vpop.f32.mrb[250].mxu1  ;;  %4982 = vst [vmem:[%s9069_s4 + $0x3c0] sm:$0xff] %v6546_v12  ;;  %v3976_v22 = vpop.f32.mrb[250].mxu0  ;;  %v6272_v15 = vld [vmem:[%s9066_s0 + $0xb88] ss:$16 sps:$4 sm:$0xff]  }
 0x308   :  { %v3161_v23 = vpop.f32.mrb[251].mxu1  ;;  %v6548_v24 = vpop.eup %6547  ;;  %v4391_v25 = vmul.f32 %v8457_v29, %v3974_v19  ;;  %v3977_v26 = vadd.f32 %v3976_v22, %v3159_v16  ;;  %v6277_v16 = vld [vmem:[%s9066_s0 + $0xba4] ss:$16 sps:$4 sm:$0xff]   ;;  %v6280_v22 = vld [vmem:[%s9066_s0 + $0xbac] ss:$16 sps:$4 sm:$0xff]  }
 0x309   :  { %v3978_v27 = vpop.f32.mrb[251].mxu0  ;;  %4983 = vst [vmem:[%s9069_s4 + $0x3c8] sm:$0xff] %v6548_v24  ;;  %3371 = vmatmul.mubr.bf16.gmra.mrb[248].mxu1 %v6251_v14 }
 0x30a   :  { %v4594_v28 = vadd.f32 %v8466_v33, %v4391_v25  ;;  %v4392_v30 = vmul.f32 %v8457_v29, %v3977_v26  ;;  %4188 = vmatmul.mubr.bf16.gmra.mrb[100].mxu0 %v6254_v18  ;;  %3378 = vmatprep.mubr.bf16.mxu1 %v6259_v20 }
 0x30b   :  { %4195 = vmatprep.mubr.bf16.mxu0 %v6262_v21 }
 0x30c   :  { %6553 = vtanh.f32 %v4594_v28  ;;  %v4595_v31 = vadd.f32 %v8466_v33, %v4392_v30  ;;  %v3164_v32 = vpop.f32.mrb[252].mxu1 }
 0x30d   :  { %v3981_v34 = vpop.f32.mrb[252].mxu0  ;;  %v3166_v35 = vpop.f32.mrb[253].mxu1 }
 0x30e   :  { %v6550_v37 = vpop.eup %6549  ;;  %6555 = vtanh.f32 %v4595_v31  ;;  %v3982_v38 = vadd.f32 %v3981_v34, %v3164_v32  ;;  %v3983_v39 = vpop.f32.mrb[253].mxu0  ;;  %v6275_v34 = vld [vmem:[%s9066_s0 + $0xba0] ss:$16 sps:$4 sm:$0xff]  }
 0x30f   :  { %v3167_v40 = vpop.f32.mrb[254].mxu1  ;;  %4984 = vst [vmem:[%s9069_s4 + $0x3d0] sm:$0xff] %v6550_v37  ;;  %v3984_v43 = vpop.f32.mrb[254].mxu0  ;;  %v6278_v39 = vld [vmem:[%s9066_s0 + $0xba8] ss:$16 sps:$4 sm:$0xff]  }
 0x310   :  { %v3169_v44 = vpop.f32.mrb[255].mxu1  ;;  %v6552_v46 = vpop.eup %6551  ;;  %v4393_v47 = vmul.f32 %v8457_v29, %v3982_v38  ;;  %v3985_v48 = vadd.f32 %v3984_v43, %v3167_v40  ;;  %v6283_v40 = vld [vmem:[%s9066_s0 + $0xbc4] ss:$16 sps:$4 sm:$0xff]   ;;  %v6286_v43 = vld [vmem:[%s9066_s0 + $0xbcc] ss:$16 sps:$4 sm:$0xff]  }
 0x311   :  { %v3986_v49 = vpop.f32.mrb[255].mxu0  ;;  %4985 = vst [vmem:[%s9069_s4 + $0x3d8] sm:$0xff] %v6552_v46  ;;  %3379 = vmatmul.mubr.bf16.gmra.mrb[252].mxu1 %v6257_v36 }
 0x312   :  { %v4596_v50 = vadd.f32 %v8466_v33, %v4393_v47  ;;  %v4394_v51 = vmul.f32 %v8457_v29, %v3985_v48  ;;  %4196 = vmatmul.mubr.bf16.gmra.mrb[104].mxu0 %v6260_v41  ;;  %3386 = vmatprep.mubr.bf16.mxu1 %v6265_v42 }
 0x313   :  { %4203 = vmatprep.mubr.bf16.mxu0 %v6268_v45 }
 0x314   :  { %6557 = vtanh.f32 %v4596_v50  ;;  %v4597_v52 = vadd.f32 %v8466_v33, %v4394_v51  ;;  %v3172_v53 = vpop.f32.mrb[148].mxu1 }
 0x315   :  { %v3989_v54 = vpop.f32.mrb[0].mxu0  ;;  %v3174_v55 = vpop.f32.mrb[149].mxu1 }
 0x316   :  { %v6554_v57 = vpop.eup %6553  ;;  %6559 = vtanh.f32 %v4597_v52  ;;  %v3990_v58 = vadd.f32 %v3989_v54, %v3172_v53  ;;  %v3991_v59 = vpop.f32.mrb[1].mxu0  ;;  %v6281_v54 = vld [vmem:[%s9066_s0 + $0xbc0] ss:$16 sps:$4 sm:$0xff]  }
 0x317   :  { %v3175_v60 = vpop.f32.mrb[150].mxu1  ;;  %4986 = vst [vmem:[%s9069_s4 + $0x3e0] sm:$0xff] %v6554_v57  ;;  %v3992_v63 = vpop.f32.mrb[2].mxu0  ;;  %v6284_v59 = vld [vmem:[%s9066_s0 + $0xbc8] ss:$16 sps:$4 sm:$0xff]  }
 0x318   :  { %v3177_v0 = vpop.f32.mrb[151].mxu1  ;;  %v6556_v2 = vpop.eup %6555  ;;  %v4395_v3 = vmul.f32 %v8457_v29, %v3990_v58  ;;  %v3993_v4 = vadd.f32 %v3992_v63, %v3175_v60  ;;  %v6289_v60 = vld [vmem:[%s9066_s0 + $0xbe4] ss:$16 sps:$4 sm:$0xff]   ;;  %v6292_v63 = vld [vmem:[%s9066_s0 + $0xbec] ss:$16 sps:$4 sm:$0xff]  }
 0x319   :  { %v3994_v5 = vpop.f32.mrb[3].mxu0  ;;  %4987 = vst [vmem:[%s9069_s4 + $0x3e8] sm:$0xff] %v6556_v2  ;;  %3387 = vmatmul.mubr.bf16.gmra.mrb[148].mxu1 %v6263_v56 }
 0x31a   :  { %v4598_v6 = vadd.f32 %v8466_v33, %v4395_v3  ;;  %v4396_v17 = vmul.f32 %v8457_v29, %v3993_v4  ;;  %4204 = vmatmul.mubr.bf16.gmra.mrb[108].mxu0 %v6266_v61  ;;  %3394 = vmatprep.mubr.bf16.mxu1 %v6271_v62 }
 0x31b   :  { %4211 = vmatprep.mubr.bf16.mxu0 %v6274_v1 }
 0x31c   :  { %6561 = vtanh.f32 %v4598_v6  ;;  %v4599_v7 = vadd.f32 %v8466_v33, %v4396_v17  ;;  %v3180_v8 = vpop.f32.mrb[152].mxu1 }
 0x31d   :  { %v3997_v9 = vpop.f32.mrb[4].mxu0  ;;  %v3182_v10 = vpop.f32.mrb[153].mxu1 }
 0x31e   :  { %v6558_v13 = vpop.eup %6557  ;;  %6563 = vtanh.f32 %v4599_v7  ;;  %v3998_v14 = vadd.f32 %v3997_v9, %v3180_v8  ;;  %v3999_v12 = vpop.f32.mrb[5].mxu0  ;;  %v6287_v9 = vld [vmem:[%s9066_s0 + $0xbe0] ss:$16 sps:$4 sm:$0xff]  }
 0x31f   :  { %v3183_v19 = vpop.f32.mrb[154].mxu1  ;;  %4988 = vst [vmem:[%s9069_s4 + $0x3f0] sm:$0xff] %v6558_v13  ;;  %v4000_v18 = vpop.f32.mrb[6].mxu0  ;;  %v6290_v12 = vld [vmem:[%s9066_s0 + $0xbe8] ss:$16 sps:$4 sm:$0xff]  }
 0x320   :  { %v3185_v20 = vpop.f32.mrb[155].mxu1  ;;  %v6560_v23 = vpop.eup %6559  ;;  %v4397_v21 = vmul.f32 %v8457_v29, %v3998_v14  ;;  %v4001_v24 = vadd.f32 %v4000_v18, %v3183_v19  ;;  %v6295_v19 = vld [vmem:[%s9066_s0 + $0xc04] ss:$16 sps:$4 sm:$0xff]   ;;  %v6298_v18 = vld [vmem:[%s9066_s0 + $0xc0c] ss:$16 sps:$4 sm:$0xff]  }
 0x321   :  { %v4002_v25 = vpop.f32.mrb[7].mxu0  ;;  %4989 = vst [vmem:[%s9069_s4 + $0x3f8] sm:$0xff] %v6560_v23  ;;  %3395 = vmatmul.mubr.bf16.gmra.mrb[152].mxu1 %v6269_v11 }
 0x322   :  { %v4600_v26 = vadd.f32 %v8466_v33, %v4397_v21  ;;  %v4398_v27 = vmul.f32 %v8457_v29, %v4001_v24  ;;  %4212 = vmatmul.mubr.bf16.gmra.mrb[112].mxu0 %v6272_v15  ;;  %3402 = vmatprep.mubr.bf16.mxu1 %v6277_v16 }
 0x323   :  { %4219 = vmatprep.mubr.bf16.mxu0 %v6280_v22 }
 0x324   :  { %6565 = vtanh.f32 %v4600_v26  ;;  %v4601_v28 = vadd.f32 %v8466_v33, %v4398_v27  ;;  %v3188_v30 = vpop.f32.mrb[156].mxu1 }
 0x325   :  { %v4005_v31 = vpop.f32.mrb[8].mxu0  ;;  %v3190_v32 = vpop.f32.mrb[157].mxu1 }
 0x326   :  { %v6562_v35 = vpop.eup %6561  ;;  %6567 = vtanh.f32 %v4601_v28  ;;  %v4006_v36 = vadd.f32 %v4005_v31, %v3188_v30  ;;  %v4007_v37 = vpop.f32.mrb[9].mxu0  ;;  %v6293_v31 = vld [vmem:[%s9066_s0 + $0xc00] ss:$16 sps:$4 sm:$0xff]  }
 0x327   :  { %v3191_v38 = vpop.f32.mrb[158].mxu1  ;;  %4990 = vst [vmem:[%s9069_s4 + $0x400] sm:$0xff] %v6562_v35  ;;  %v4008_v41 = vpop.f32.mrb[10].mxu0  ;;  %v6296_v37 = vld [vmem:[%s9066_s0 + $0xc08] ss:$16 sps:$4 sm:$0xff]  }
 0x328   :  { %v3193_v42 = vpop.f32.mrb[159].mxu1  ;;  %v6564_v44 = vpop.eup %6563  ;;  %v4399_v45 = vmul.f32 %v8457_v29, %v4006_v36  ;;  %v4009_v46 = vadd.f32 %v4008_v41, %v3191_v38  ;;  %v6301_v38 = vld [vmem:[%s9066_s0 + $0xc24] ss:$16 sps:$4 sm:$0xff]   ;;  %v6304_v41 = vld [vmem:[%s9066_s0 + $0xc2c] ss:$16 sps:$4 sm:$0xff]  }
 0x329   :  { %v4010_v47 = vpop.f32.mrb[11].mxu0  ;;  %4991 = vst [vmem:[%s9069_s4 + $0x408] sm:$0xff] %v6564_v44  ;;  %3403 = vmatmul.mubr.bf16.gmra.mrb[156].mxu1 %v6275_v34 }
 0x32a   :  { %v4602_v48 = vadd.f32 %v8466_v33, %v4399_v45  ;;  %v4400_v49 = vmul.f32 %v8457_v29, %v4009_v46  ;;  %4220 = vmatmul.mubr.bf16.gmra.mrb[116].mxu0 %v6278_v39  ;;  %3410 = vmatprep.mubr.bf16.mxu1 %v6283_v40 }
 0x32b   :  { %4227 = vmatprep.mubr.bf16.mxu0 %v6286_v43 }
 0x32c   :  { %6569 = vtanh.f32 %v4602_v48  ;;  %v4603_v50 = vadd.f32 %v8466_v33, %v4400_v49  ;;  %v3196_v51 = vpop.f32.mrb[160].mxu1 }
 0x32d   :  { %v4013_v52 = vpop.f32.mrb[12].mxu0  ;;  %v3198_v53 = vpop.f32.mrb[161].mxu1 }
 0x32e   :  { %v6566_v55 = vpop.eup %6565  ;;  %6571 = vtanh.f32 %v4603_v50  ;;  %v4014_v56 = vadd.f32 %v4013_v52, %v3196_v51  ;;  %v4015_v57 = vpop.f32.mrb[13].mxu0  ;;  %v6299_v52 = vld [vmem:[%s9066_s0 + $0xc20] ss:$16 sps:$4 sm:$0xff]  }
 0x32f   :  { %v3199_v58 = vpop.f32.mrb[162].mxu1  ;;  %4992 = vst [vmem:[%s9069_s4 + $0x410] sm:$0xff] %v6566_v55  ;;  %v4016_v61 = vpop.f32.mrb[14].mxu0  ;;  %v6302_v57 = vld [vmem:[%s9066_s0 + $0xc28] ss:$16 sps:$4 sm:$0xff]  }
 0x330   :  { %v3201_v62 = vpop.f32.mrb[163].mxu1  ;;  %v6568_v0 = vpop.eup %6567  ;;  %v4401_v1 = vmul.f32 %v8457_v29, %v4014_v56  ;;  %v4017_v2 = vadd.f32 %v4016_v61, %v3199_v58 }
 0x331   :  { %v4018_v3 = vpop.f32.mrb[15].mxu0  ;;  %4993 = vst [vmem:[%s9069_s4 + $0x418] sm:$0xff] %v6568_v0  ;;  %3411 = vmatmul.mubr.bf16.gmra.mrb[160].mxu1 %v6281_v54 }
 0x332   :  { %v4604_v4 = vadd.f32 %v8466_v33, %v4401_v1  ;;  %v4402_v5 = vmul.f32 %v8457_v29, %v4017_v2  ;;  %4228 = vmatmul.mubr.bf16.gmra.mrb[120].mxu0 %v6284_v59  ;;  %3418 = vmatprep.mubr.bf16.mxu1 %v6289_v60 }
 0x333   :  { %4235 = vmatprep.mubr.bf16.mxu0 %v6292_v63 }
 0x334   :  { %6573 = vtanh.f32 %v4604_v4  ;;  %v4605_v6 = vadd.f32 %v8466_v33, %v4402_v5  ;;  %v3204_v17 = vpop.f32.mrb[164].mxu1 }
 0x335   :  { %v4021_v7 = vpop.f32.mrb[16].mxu0  ;;  %v3206_v8 = vpop.f32.mrb[165].mxu1 }
 0x336   :  { %v6570_v10 = vpop.eup %6569  ;;  %6575 = vtanh.f32 %v4605_v6  ;;  %v4022_v11 = vadd.f32 %v4021_v7, %v3204_v17  ;;  %v4023_v13 = vpop.f32.mrb[17].mxu0 }
 0x337   :  { %v3207_v14 = vpop.f32.mrb[166].mxu1  ;;  %4994 = vst [vmem:[%s9069_s4 + $0x420] sm:$0xff] %v6570_v10  ;;  %v4024_v15 = vpop.f32.mrb[18].mxu0 }
 0x338   :  { %v3209_v16 = vpop.f32.mrb[167].mxu1  ;;  %v6572_v20 = vpop.eup %6571  ;;  %v4403_v22 = vmul.f32 %v8457_v29, %v4022_v11  ;;  %v4025_v23 = vadd.f32 %v4024_v15, %v3207_v14 }
 0x339   :  { %v4026_v21 = vpop.f32.mrb[19].mxu0  ;;  %4995 = vst [vmem:[%s9069_s4 + $0x428] sm:$0xff] %v6572_v20  ;;  %3419 = vmatmul.mubr.bf16.gmra.mrb[164].mxu1 %v6287_v9 }
 0x33a   :  { %v4606_v24 = vadd.f32 %v8466_v33, %v4403_v22  ;;  %v4404_v25 = vmul.f32 %v8457_v29, %v4025_v23  ;;  %4236 = vmatmul.mubr.bf16.gmra.mrb[124].mxu0 %v6290_v12  ;;  %3426 = vmatprep.mubr.bf16.mxu1 %v6295_v19 }
 0x33b   :  { %4243 = vmatprep.mubr.bf16.mxu0 %v6298_v18 }
 0x33c   :  { %6577 = vtanh.f32 %v4606_v24  ;;  %v4607_v26 = vadd.f32 %v8466_v33, %v4404_v25  ;;  %v3212_v27 = vpop.f32.mrb[168].mxu1 }
 0x33d   :  { %v4029_v28 = vpop.f32.mrb[20].mxu0  ;;  %v3214_v30 = vpop.f32.mrb[169].mxu1 }
 0x33e   :  { %v6574_v32 = vpop.eup %6573  ;;  %6579 = vtanh.f32 %v4607_v26  ;;  %v4030_v34 = vadd.f32 %v4029_v28, %v3212_v27  ;;  %v4031_v35 = vpop.f32.mrb[21].mxu0 }
 0x33f   :  { %v3215_v36 = vpop.f32.mrb[170].mxu1  ;;  %4996 = vst [vmem:[%s9069_s4 + $0x430] sm:$0xff] %v6574_v32  ;;  %v4032_v39 = vpop.f32.mrb[22].mxu0 }
 0x340   :  { %v3217_v40 = vpop.f32.mrb[171].mxu1  ;;  %v6576_v42 = vpop.eup %6575  ;;  %v4405_v43 = vmul.f32 %v8457_v29, %v4030_v34  ;;  %v4033_v44 = vadd.f32 %v4032_v39, %v3215_v36 }
 0x341   :  { %v4034_v45 = vpop.f32.mrb[23].mxu0  ;;  %4997 = vst [vmem:[%s9069_s4 + $0x438] sm:$0xff] %v6576_v42  ;;  %3427 = vmatmul.mubr.bf16.gmra.mrb[168].mxu1 %v6293_v31 }
 0x342   :  { %v4608_v46 = vadd.f32 %v8466_v33, %v4405_v43  ;;  %v4406_v47 = vmul.f32 %v8457_v29, %v4033_v44  ;;  %4244 = vmatmul.mubr.bf16.gmra.mrb[128].mxu0 %v6296_v37  ;;  %3434 = vmatprep.mubr.bf16.mxu1 %v6301_v38 }
 0x343   :  { %4251 = vmatprep.mubr.bf16.mxu0 %v6304_v41 }
 0x344   :  { %6581 = vtanh.f32 %v4608_v46  ;;  %v4609_v48 = vadd.f32 %v8466_v33, %v4406_v47  ;;  %v3220_v49 = vpop.f32.mrb[172].mxu1 }
 0x345   :  { %v4037_v50 = vpop.f32.mrb[24].mxu0  ;;  %v3222_v51 = vpop.f32.mrb[173].mxu1 }
 0x346   :  { %v6578_v53 = vpop.eup %6577  ;;  %6583 = vtanh.f32 %v4609_v48  ;;  %v4038_v54 = vadd.f32 %v4037_v50, %v3220_v49  ;;  %v4039_v55 = vpop.f32.mrb[25].mxu0 }
 0x347   :  { %v3223_v56 = vpop.f32.mrb[174].mxu1  ;;  %4998 = vst [vmem:[%s9069_s4 + $0x440] sm:$0xff] %v6578_v53  ;;  %v4040_v58 = vpop.f32.mrb[26].mxu0 }
 0x348   :  { %v3225_v59 = vpop.f32.mrb[175].mxu1  ;;  %v6580_v60 = vpop.eup %6579  ;;  %v4407_v61 = vmul.f32 %v8457_v29, %v4038_v54  ;;  %v4041_v62 = vadd.f32 %v4040_v58, %v3223_v56 }
 0x349   :  { %v4042_v63 = vpop.f32.mrb[27].mxu0  ;;  %4999 = vst [vmem:[%s9069_s4 + $0x448] sm:$0xff] %v6580_v60  ;;  %3435 = vmatmul.mubr.bf16.gmra.mrb[172].mxu1 %v6299_v52 }
 0x34a   :  { %v4610_v0 = vadd.f32 %v8466_v33, %v4407_v61  ;;  %v4408_v1 = vmul.f32 %v8457_v29, %v4041_v62  ;;  %4252 = vmatmul.mubr.bf16.gmra.mrb[132].mxu0 %v6302_v57 }
 0x34c   :  { %6585 = vtanh.f32 %v4610_v0  ;;  %v4611_v2 = vadd.f32 %v8466_v33, %v4408_v1  ;;  %v3228_v3 = vpop.f32.mrb[176].mxu1 }
 0x34d   :  { %v4045_v4 = vpop.f32.mrb[28].mxu0  ;;  %v3230_v5 = vpop.f32.mrb[177].mxu1 }
 0x34e   :  { %v6582_v6 = vpop.eup %6581  ;;  %6587 = vtanh.f32 %v4611_v2  ;;  %v4046_v17 = vadd.f32 %v4045_v4, %v3228_v3  ;;  %v4047_v7 = vpop.f32.mrb[29].mxu0 }
 0x34f   :  { %v3231_v8 = vpop.f32.mrb[178].mxu1  ;;  %5000 = vst [vmem:[%s9069_s4 + $0x450] sm:$0xff] %v6582_v6  ;;  %v4048_v9 = vpop.f32.mrb[30].mxu0 }
 0x350   :  { %v3233_v10 = vpop.f32.mrb[179].mxu1  ;;  %v6584_v11 = vpop.eup %6583  ;;  %v4409_v13 = vmul.f32 %v8457_v29, %v4046_v17  ;;  %v4049_v14 = vadd.f32 %v4048_v9, %v3231_v8 }
 0x351   :  { %v4050_v12 = vpop.f32.mrb[31].mxu0  ;;  %5001 = vst [vmem:[%s9069_s4 + $0x458] sm:$0xff] %v6584_v11 }
 0x352   :  { %v4612_v19 = vadd.f32 %v8466_v33, %v4409_v13  ;;  %v4410_v15 = vmul.f32 %v8457_v29, %v4049_v14 }
 0x354   :  { %6589 = vtanh.f32 %v4612_v19  ;;  %v4613_v16 = vadd.f32 %v8466_v33, %v4410_v15  ;;  %v3236_v18 = vpop.f32.mrb[180].mxu1 }
 0x355   :  { %v4053_v20 = vpop.f32.mrb[32].mxu0  ;;  %v3238_v22 = vpop.f32.mrb[181].mxu1 }
 0x356   :  { %v6586_v23 = vpop.eup %6585  ;;  %6591 = vtanh.f32 %v4613_v16  ;;  %v4054_v21 = vadd.f32 %v4053_v20, %v3236_v18  ;;  %v4055_v24 = vpop.f32.mrb[33].mxu0 }
 0x357   :  { %v3239_v25 = vpop.f32.mrb[182].mxu1  ;;  %5002 = vst [vmem:[%s9069_s4 + $0x460] sm:$0xff] %v6586_v23  ;;  %v4056_v26 = vpop.f32.mrb[34].mxu0 }
 0x358   :  { %v3241_v27 = vpop.f32.mrb[183].mxu1  ;;  %v6588_v28 = vpop.eup %6587  ;;  %v4411_v30 = vmul.f32 %v8457_v29, %v4054_v21  ;;  %v4057_v31 = vadd.f32 %v4056_v26, %v3239_v25 }
 0x359   :  { %v4058_v32 = vpop.f32.mrb[35].mxu0  ;;  %5003 = vst [vmem:[%s9069_s4 + $0x468] sm:$0xff] %v6588_v28 }
 0x35a   :  { %v4614_v34 = vadd.f32 %v8466_v33, %v4411_v30  ;;  %v4412_v35 = vmul.f32 %v8457_v29, %v4057_v31 }
 0x35c   :  { %6593 = vtanh.f32 %v4614_v34  ;;  %v4615_v36 = vadd.f32 %v8466_v33, %v4412_v35  ;;  %v3244_v37 = vpop.f32.mrb[184].mxu1 }
 0x35d   :  { %v4061_v38 = vpop.f32.mrb[36].mxu0  ;;  %v3246_v39 = vpop.f32.mrb[185].mxu1 }
 0x35e   :  { %v6590_v40 = vpop.eup %6589  ;;  %6595 = vtanh.f32 %v4615_v36  ;;  %v4062_v41 = vadd.f32 %v4061_v38, %v3244_v37  ;;  %v4063_v42 = vpop.f32.mrb[37].mxu0  ;;  %v8840_v38 = vld [vmem:[%s9068_s3] ss:$0 sm:$0xff] }
 0x35f   :  { %v3247_v43 = vpop.f32.mrb[186].mxu1  ;;  %5004 = vst [vmem:[%s9069_s4 + $0x470] sm:$0xff] %v6590_v40  ;;  %v4064_v44 = vpop.f32.mrb[38].mxu0 }
 0x360   :  { %v3249_v45 = vpop.f32.mrb[187].mxu1  ;;  %v6592_v46 = vpop.eup %6591  ;;  %v4413_v47 = vmul.f32 %v8457_v29, %v4062_v41  ;;  %v4065_v48 = vadd.f32 %v4064_v44, %v3247_v43 }
 0x361   :  { %v4066_v49 = vpop.f32.mrb[39].mxu0  ;;  %5005 = vst [vmem:[%s9069_s4 + $0x478] sm:$0xff] %v6592_v46 }
 0x362   :  { %v4616_v50 = vadd.f32 %v8466_v33, %v4413_v47  ;;  %v4414_v51 = vmul.f32 %v8457_v29, %v4065_v48 }
 0x364   :  { %6597 = vtanh.f32 %v4616_v50  ;;  %v4617_v52 = vadd.f32 %v8466_v33, %v4414_v51  ;;  %v3252_v53 = vpop.f32.mrb[188].mxu1 }
 0x365   :  { %v4069_v54 = vpop.f32.mrb[40].mxu0  ;;  %v3254_v55 = vpop.f32.mrb[189].mxu1 }
 0x366   :  { %v6594_v56 = vpop.eup %6593  ;;  %6599 = vtanh.f32 %v4617_v52  ;;  %v4070_v57 = vadd.f32 %v4069_v54, %v3252_v53  ;;  %v4071_v58 = vpop.f32.mrb[41].mxu0 }
 0x367   :  { %v3255_v59 = vpop.f32.mrb[190].mxu1  ;;  %5006 = vst [vmem:[%s9069_s4 + $0x480] sm:$0xff] %v6594_v56  ;;  %v4072_v60 = vpop.f32.mrb[42].mxu0 }
 0x368   :  { %v3257_v61 = vpop.f32.mrb[191].mxu1  ;;  %v6596_v62 = vpop.eup %6595  ;;  %v4415_v63 = vmul.f32 %v8457_v29, %v4070_v57  ;;  %v4073_v0 = vadd.f32 %v4072_v60, %v3255_v59 }
 0x369   :  { %v4074_v1 = vpop.f32.mrb[43].mxu0  ;;  %5007 = vst [vmem:[%s9069_s4 + $0x488] sm:$0xff] %v6596_v62 }
 0x36a   :  { %v4618_v2 = vadd.f32 %v8466_v33, %v4415_v63  ;;  %v4416_v3 = vmul.f32 %v8457_v29, %v4073_v0 }
 0x36c   :  { %6601 = vtanh.f32 %v4618_v2  ;;  %v4619_v4 = vadd.f32 %v8466_v33, %v4416_v3  ;;  %v3260_v5 = vpop.f32.mrb[192].mxu1 }
 0x36d   :  { %v4077_v6 = vpop.f32.mrb[44].mxu0  ;;  %v3262_v17 = vpop.f32.mrb[193].mxu1 }
 0x36e   :  { %v6598_v7 = vpop.eup %6597  ;;  %6603 = vtanh.f32 %v4619_v4  ;;  %v4078_v8 = vadd.f32 %v4077_v6, %v3260_v5  ;;  %v4079_v9 = vpop.f32.mrb[45].mxu0 }
 0x36f   :  { %v3263_v10 = vpop.f32.mrb[194].mxu1  ;;  %5008 = vst [vmem:[%s9069_s4 + $0x490] sm:$0xff] %v6598_v7  ;;  %v4080_v11 = vpop.f32.mrb[46].mxu0 }
 0x370   :  { %v3265_v13 = vpop.f32.mrb[195].mxu1  ;;  %v6600_v14 = vpop.eup %6599  ;;  %v4417_v12 = vmul.f32 %v8457_v29, %v4078_v8  ;;  %v4081_v19 = vadd.f32 %v4080_v11, %v3263_v10 }
 0x371   :  { %v4082_v15 = vpop.f32.mrb[47].mxu0  ;;  %5009 = vst [vmem:[%s9069_s4 + $0x498] sm:$0xff] %v6600_v14 }
 0x372   :  { %v4620_v16 = vadd.f32 %v8466_v33, %v4417_v12  ;;  %v4418_v18 = vmul.f32 %v8457_v29, %v4081_v19  ;;  %v8829_v29 = vld [vmem:[%s9067_s2] ss:$0 sm:$0xff] }
 0x374   :  { %6605 = vtanh.f32 %v4620_v16  ;;  %v4621_v20 = vadd.f32 %v8466_v33, %v4418_v18  ;;  %v3268_v22 = vpop.f32.mrb[196].mxu1 }
 0x375   :  { %v4085_v23 = vpop.f32.mrb[48].mxu0  ;;  %v3270_v21 = vpop.f32.mrb[197].mxu1 }
 0x376   :  { %v6602_v24 = vpop.eup %6601  ;;  %6607 = vtanh.f32 %v4621_v20  ;;  %v4086_v25 = vadd.f32 %v4085_v23, %v3268_v22  ;;  %v4087_v26 = vpop.f32.mrb[49].mxu0 }
 0x377   :  { %v3271_v27 = vpop.f32.mrb[198].mxu1  ;;  %5010 = vst [vmem:[%s9069_s4 + $0x4a0] sm:$0xff] %v6602_v24  ;;  %v4088_v28 = vpop.f32.mrb[50].mxu0 }
 0x378   :  { %v3273_v30 = vpop.f32.mrb[199].mxu1  ;;  %v6604_v31 = vpop.eup %6603  ;;  %v4419_v32 = vmul.f32 %v8829_v29, %v4086_v25  ;;  %v4089_v34 = vadd.f32 %v4088_v28, %v3271_v27 }
 0x379   :  { %v4090_v35 = vpop.f32.mrb[51].mxu0  ;;  %5011 = vst [vmem:[%s9069_s4 + $0x4a8] sm:$0xff] %v6604_v31 }
 0x37a   :  { %v4622_v36 = vadd.f32 %v8466_v33, %v4419_v32  ;;  %v4420_v37 = vmul.f32 %v8829_v29, %v4089_v34 }
 0x37c   :  { %6609 = vtanh.f32 %v4622_v36  ;;  %v4623_v39 = vadd.f32 %v8840_v38, %v4420_v37  ;;  %v3276_v40 = vpop.f32.mrb[200].mxu1 }
 0x37d   :  { %v4093_v41 = vpop.f32.mrb[52].mxu0  ;;  %v3278_v42 = vpop.f32.mrb[201].mxu1 }
 0x37e   :  { %v6606_v43 = vpop.eup %6605  ;;  %6611 = vtanh.f32 %v4623_v39  ;;  %v4094_v44 = vadd.f32 %v4093_v41, %v3276_v40  ;;  %v4095_v45 = vpop.f32.mrb[53].mxu0 }
 0x37f   :  { %v3279_v46 = vpop.f32.mrb[202].mxu1  ;;  %5012 = vst [vmem:[%s9069_s4 + $0x4b0] sm:$0xff] %v6606_v43  ;;  %v4096_v33 = vpop.f32.mrb[54].mxu0 }
 0x380   :  { %v3281_v47 = vpop.f32.mrb[203].mxu1  ;;  %v6608_v48 = vpop.eup %6607  ;;  %v4421_v49 = vmul.f32 %v8829_v29, %v4094_v44  ;;  %v4097_v50 = vadd.f32 %v4096_v33, %v3279_v46 }
 0x381   :  { %v4098_v51 = vpop.f32.mrb[55].mxu0  ;;  %5013 = vst [vmem:[%s9069_s4 + $0x4b8] sm:$0xff] %v6608_v48 }
 0x382   :  { %v4624_v52 = vadd.f32 %v8840_v38, %v4421_v49  ;;  %v4422_v53 = vmul.f32 %v8829_v29, %v4097_v50 }
 0x384   :  { %6613 = vtanh.f32 %v4624_v52  ;;  %v4625_v54 = vadd.f32 %v8840_v38, %v4422_v53  ;;  %v3284_v55 = vpop.f32.mrb[204].mxu1 }
 0x385   :  { %v4101_v56 = vpop.f32.mrb[56].mxu0  ;;  %v3286_v57 = vpop.f32.mrb[205].mxu1 }
 0x386   :  { %v6610_v58 = vpop.eup %6609  ;;  %6615 = vtanh.f32 %v4625_v54  ;;  %v4102_v59 = vadd.f32 %v4101_v56, %v3284_v55  ;;  %v4103_v60 = vpop.f32.mrb[57].mxu0 }
 0x387   :  { %v3287_v61 = vpop.f32.mrb[206].mxu1  ;;  %5014 = vst [vmem:[%s9069_s4 + $0x4c0] sm:$0xff] %v6610_v58  ;;  %v4104_v62 = vpop.f32.mrb[58].mxu0 }
 0x388   :  { %v3289_v63 = vpop.f32.mrb[207].mxu1  ;;  %v6612_v0 = vpop.eup %6611  ;;  %v4423_v1 = vmul.f32 %v8829_v29, %v4102_v59  ;;  %v4105_v2 = vadd.f32 %v4104_v62, %v3287_v61 }
 0x389   :  { %v4106_v3 = vpop.f32.mrb[59].mxu0  ;;  %5015 = vst [vmem:[%s9069_s4 + $0x4c8] sm:$0xff] %v6612_v0 }
 0x38a   :  { %v4626_v4 = vadd.f32 %v8840_v38, %v4423_v1  ;;  %v4424_v5 = vmul.f32 %v8829_v29, %v4105_v2 }
 0x38c   :  { %6617 = vtanh.f32 %v4626_v4  ;;  %v4627_v6 = vadd.f32 %v8840_v38, %v4424_v5  ;;  %v3292_v17 = vpop.f32.mrb[208].mxu1 }
 0x38d   :  { %v4109_v7 = vpop.f32.mrb[60].mxu0  ;;  %v3294_v8 = vpop.f32.mrb[209].mxu1 }
 0x38e   :  { %v6614_v9 = vpop.eup %6613  ;;  %6619 = vtanh.f32 %v4627_v6  ;;  %v4110_v10 = vadd.f32 %v4109_v7, %v3292_v17  ;;  %v4111_v11 = vpop.f32.mrb[61].mxu0 }
 0x38f   :  { %v3295_v13 = vpop.f32.mrb[210].mxu1  ;;  %5016 = vst [vmem:[%s9069_s4 + $0x4d0] sm:$0xff] %v6614_v9  ;;  %v4112_v14 = vpop.f32.mrb[62].mxu0 }
 0x390   :  { %v3297_v12 = vpop.f32.mrb[211].mxu1  ;;  %v6616_v19 = vpop.eup %6615  ;;  %v4425_v15 = vmul.f32 %v8829_v29, %v4110_v10  ;;  %v4113_v16 = vadd.f32 %v4112_v14, %v3295_v13 }
 0x391   :  { %v4114_v18 = vpop.f32.mrb[63].mxu0  ;;  %5017 = vst [vmem:[%s9069_s4 + $0x4d8] sm:$0xff] %v6616_v19 }
 0x392   :  { %v4628_v20 = vadd.f32 %v8840_v38, %v4425_v15  ;;  %v4426_v22 = vmul.f32 %v8829_v29, %v4113_v16 }
 0x394   :  { %6621 = vtanh.f32 %v4628_v20  ;;  %v4629_v23 = vadd.f32 %v8840_v38, %v4426_v22  ;;  %v3300_v21 = vpop.f32.mrb[212].mxu1 }
 0x395   :  { %v4117_v24 = vpop.f32.mrb[64].mxu0  ;;  %v3302_v25 = vpop.f32.mrb[213].mxu1 }
 0x396   :  { %v6618_v26 = vpop.eup %6617  ;;  %6623 = vtanh.f32 %v4629_v23  ;;  %v4118_v27 = vadd.f32 %v4117_v24, %v3300_v21  ;;  %v4119_v28 = vpop.f32.mrb[65].mxu0 }
 0x397   :  { %v3303_v30 = vpop.f32.mrb[214].mxu1  ;;  %5018 = vst [vmem:[%s9069_s4 + $0x4e0] sm:$0xff] %v6618_v26  ;;  %v4120_v31 = vpop.f32.mrb[66].mxu0 }
 0x398   :  { %v3305_v32 = vpop.f32.mrb[215].mxu1  ;;  %v6620_v34 = vpop.eup %6619  ;;  %v4427_v35 = vmul.f32 %v8829_v29, %v4118_v27  ;;  %v4121_v36 = vadd.f32 %v4120_v31, %v3303_v30 }
 0x399   :  { %v4122_v37 = vpop.f32.mrb[67].mxu0  ;;  %5019 = vst [vmem:[%s9069_s4 + $0x4e8] sm:$0xff] %v6620_v34 }
 0x39a   :  { %v4630_v39 = vadd.f32 %v8840_v38, %v4427_v35  ;;  %v4428_v40 = vmul.f32 %v8829_v29, %v4121_v36 }
 0x39c   :  { %6625 = vtanh.f32 %v4630_v39  ;;  %v4631_v41 = vadd.f32 %v8840_v38, %v4428_v40  ;;  %v3308_v42 = vpop.f32.mrb[216].mxu1 }
 0x39d   :  { %v4125_v43 = vpop.f32.mrb[68].mxu0  ;;  %v3310_v44 = vpop.f32.mrb[217].mxu1 }
 0x39e   :  { %v6622_v45 = vpop.eup %6621  ;;  %6627 = vtanh.f32 %v4631_v41  ;;  %v4126_v46 = vadd.f32 %v4125_v43, %v3308_v42  ;;  %v4127_v33 = vpop.f32.mrb[69].mxu0 }
 0x39f   :  { %v3311_v47 = vpop.f32.mrb[218].mxu1  ;;  %5020 = vst [vmem:[%s9069_s4 + $0x4f0] sm:$0xff] %v6622_v45  ;;  %v4128_v48 = vpop.f32.mrb[70].mxu0 }
 0x3a0   :  { %v3313_v49 = vpop.f32.mrb[219].mxu1  ;;  %v6624_v50 = vpop.eup %6623  ;;  %v4429_v51 = vmul.f32 %v8829_v29, %v4126_v46  ;;  %v4129_v52 = vadd.f32 %v4128_v48, %v3311_v47 }
 0x3a1   :  { %v4130_v53 = vpop.f32.mrb[71].mxu0  ;;  %5021 = vst [vmem:[%s9069_s4 + $0x4f8] sm:$0xff] %v6624_v50 }
 0x3a2   :  { %v4632_v54 = vadd.f32 %v8840_v38, %v4429_v51  ;;  %v4430_v55 = vmul.f32 %v8829_v29, %v4129_v52 }
 0x3a4   :  { %6629 = vtanh.f32 %v4632_v54  ;;  %v4633_v56 = vadd.f32 %v8840_v38, %v4430_v55  ;;  %v3316_v57 = vpop.f32.mrb[220].mxu1 }
 0x3a5   :  { %v4133_v58 = vpop.f32.mrb[72].mxu0  ;;  %v3318_v59 = vpop.f32.mrb[221].mxu1 }
 0x3a6   :  { %v6626_v60 = vpop.eup %6625  ;;  %6631 = vtanh.f32 %v4633_v56  ;;  %v4134_v61 = vadd.f32 %v4133_v58, %v3316_v57  ;;  %v4135_v62 = vpop.f32.mrb[73].mxu0 }
 0x3a7   :  { %v3319_v63 = vpop.f32.mrb[222].mxu1  ;;  %5022 = vst [vmem:[%s9069_s4 + $0x500] sm:$0xff] %v6626_v60  ;;  %v4136_v0 = vpop.f32.mrb[74].mxu0 }
 0x3a8   :  { %v3321_v1 = vpop.f32.mrb[223].mxu1  ;;  %v6628_v2 = vpop.eup %6627  ;;  %v4431_v3 = vmul.f32 %v8829_v29, %v4134_v61  ;;  %v4137_v4 = vadd.f32 %v4136_v0, %v3319_v63 }
 0x3a9   :  { %v4138_v5 = vpop.f32.mrb[75].mxu0  ;;  %5023 = vst [vmem:[%s9069_s4 + $0x508] sm:$0xff] %v6628_v2 }
 0x3aa   :  { %v4634_v6 = vadd.f32 %v8840_v38, %v4431_v3  ;;  %v4432_v17 = vmul.f32 %v8829_v29, %v4137_v4 }
 0x3ac   :  { %6633 = vtanh.f32 %v4634_v6  ;;  %v4635_v7 = vadd.f32 %v8840_v38, %v4432_v17  ;;  %v3324_v8 = vpop.f32.mrb[224].mxu1 }
 0x3ad   :  { %v4141_v9 = vpop.f32.mrb[76].mxu0  ;;  %v3326_v10 = vpop.f32.mrb[225].mxu1 }
 0x3ae   :  { %v6630_v11 = vpop.eup %6629  ;;  %6635 = vtanh.f32 %v4635_v7  ;;  %v4142_v13 = vadd.f32 %v4141_v9, %v3324_v8  ;;  %v4143_v14 = vpop.f32.mrb[77].mxu0 }
 0x3af   :  { %v3327_v12 = vpop.f32.mrb[226].mxu1  ;;  %5024 = vst [vmem:[%s9069_s4 + $0x510] sm:$0xff] %v6630_v11  ;;  %v4144_v19 = vpop.f32.mrb[78].mxu0 }
 0x3b0   :  { %v3329_v15 = vpop.f32.mrb[227].mxu1  ;;  %v6632_v16 = vpop.eup %6631  ;;  %v4433_v18 = vmul.f32 %v8829_v29, %v4142_v13  ;;  %v4145_v20 = vadd.f32 %v4144_v19, %v3327_v12 }
 0x3b1   :  { %v4146_v22 = vpop.f32.mrb[79].mxu0  ;;  %5025 = vst [vmem:[%s9069_s4 + $0x518] sm:$0xff] %v6632_v16 }
 0x3b2   :  { %v4636_v23 = vadd.f32 %v8840_v38, %v4433_v18  ;;  %v4434_v21 = vmul.f32 %v8829_v29, %v4145_v20 }
 0x3b4   :  { %6637 = vtanh.f32 %v4636_v23  ;;  %v4637_v24 = vadd.f32 %v8840_v38, %v4434_v21  ;;  %v3332_v25 = vpop.f32.mrb[228].mxu1 }
 0x3b5   :  { %v4149_v26 = vpop.f32.mrb[80].mxu0  ;;  %v3334_v27 = vpop.f32.mrb[229].mxu1 }
 0x3b6   :  { %v6634_v28 = vpop.eup %6633  ;;  %6639 = vtanh.f32 %v4637_v24  ;;  %v4150_v30 = vadd.f32 %v4149_v26, %v3332_v25  ;;  %v4151_v31 = vpop.f32.mrb[81].mxu0 }
 0x3b7   :  { %v3335_v32 = vpop.f32.mrb[230].mxu1  ;;  %5026 = vst [vmem:[%s9069_s4 + $0x520] sm:$0xff] %v6634_v28  ;;  %v4152_v34 = vpop.f32.mrb[82].mxu0 }
 0x3b8   :  { %v3337_v35 = vpop.f32.mrb[231].mxu1  ;;  %v6636_v36 = vpop.eup %6635  ;;  %v4435_v37 = vmul.f32 %v8829_v29, %v4150_v30  ;;  %v4153_v39 = vadd.f32 %v4152_v34, %v3335_v32 }
 0x3b9   :  { %v4154_v40 = vpop.f32.mrb[83].mxu0  ;;  %5027 = vst [vmem:[%s9069_s4 + $0x528] sm:$0xff] %v6636_v36 }
 0x3ba   :  { %v4638_v41 = vadd.f32 %v8840_v38, %v4435_v37  ;;  %v4436_v42 = vmul.f32 %v8829_v29, %v4153_v39 }
 0x3bc   :  { %6641 = vtanh.f32 %v4638_v41  ;;  %v4639_v43 = vadd.f32 %v8840_v38, %v4436_v42  ;;  %v3340_v44 = vpop.f32.mrb[232].mxu1 }
 0x3bd   :  { %v4157_v45 = vpop.f32.mrb[84].mxu0  ;;  %v3342_v46 = vpop.f32.mrb[233].mxu1 }
 0x3be   :  { %v6638_v33 = vpop.eup %6637  ;;  %6643 = vtanh.f32 %v4639_v43  ;;  %v4158_v47 = vadd.f32 %v4157_v45, %v3340_v44  ;;  %v4159_v48 = vpop.f32.mrb[85].mxu0 }
 0x3bf   :  { %v3343_v49 = vpop.f32.mrb[234].mxu1  ;;  %5028 = vst [vmem:[%s9069_s4 + $0x530] sm:$0xff] %v6638_v33  ;;  %v4160_v50 = vpop.f32.mrb[86].mxu0 }
 0x3c0   :  { %v3345_v51 = vpop.f32.mrb[235].mxu1  ;;  %v6640_v52 = vpop.eup %6639  ;;  %v4437_v53 = vmul.f32 %v8829_v29, %v4158_v47  ;;  %v4161_v54 = vadd.f32 %v4160_v50, %v3343_v49 }
 0x3c1   :  { %v4162_v55 = vpop.f32.mrb[87].mxu0  ;;  %5029 = vst [vmem:[%s9069_s4 + $0x538] sm:$0xff] %v6640_v52 }
 0x3c2   :  { %v4640_v56 = vadd.f32 %v8840_v38, %v4437_v53  ;;  %v4438_v57 = vmul.f32 %v8829_v29, %v4161_v54 }
 0x3c4   :  { %6645 = vtanh.f32 %v4640_v56  ;;  %v4641_v58 = vadd.f32 %v8840_v38, %v4438_v57  ;;  %v3348_v59 = vpop.f32.mrb[236].mxu1 }
 0x3c5   :  { %v4165_v60 = vpop.f32.mrb[88].mxu0  ;;  %v3350_v61 = vpop.f32.mrb[237].mxu1 }
 0x3c6   :  { %v6642_v62 = vpop.eup %6641  ;;  %6647 = vtanh.f32 %v4641_v58  ;;  %v4166_v63 = vadd.f32 %v4165_v60, %v3348_v59  ;;  %v4167_v0 = vpop.f32.mrb[89].mxu0 }
 0x3c7   :  { %v3351_v1 = vpop.f32.mrb[238].mxu1  ;;  %5030 = vst [vmem:[%s9069_s4 + $0x540] sm:$0xff] %v6642_v62  ;;  %v4168_v2 = vpop.f32.mrb[90].mxu0 }
 0x3c8   :  { %v3353_v3 = vpop.f32.mrb[239].mxu1  ;;  %v6644_v4 = vpop.eup %6643  ;;  %v4439_v5 = vmul.f32 %v8829_v29, %v4166_v63  ;;  %v4169_v6 = vadd.f32 %v4168_v2, %v3351_v1 }
 0x3c9   :  { %v4170_v17 = vpop.f32.mrb[91].mxu0  ;;  %5031 = vst [vmem:[%s9069_s4 + $0x548] sm:$0xff] %v6644_v4 }
 0x3ca   :  { %v4642_v7 = vadd.f32 %v8840_v38, %v4439_v5  ;;  %v4440_v8 = vmul.f32 %v8829_v29, %v4169_v6 }
 0x3cc   :  { %6649 = vtanh.f32 %v4642_v7  ;;  %v4643_v9 = vadd.f32 %v8840_v38, %v4440_v8  ;;  %v3356_v10 = vpop.f32.mrb[240].mxu1 }
 0x3cd   :  { %v4173_v11 = vpop.f32.mrb[92].mxu0  ;;  %v3358_v13 = vpop.f32.mrb[241].mxu1 }
 0x3ce   :  { %v6646_v14 = vpop.eup %6645  ;;  %6651 = vtanh.f32 %v4643_v9  ;;  %v4174_v12 = vadd.f32 %v4173_v11, %v3356_v10  ;;  %v4175_v19 = vpop.f32.mrb[93].mxu0 }
 0x3cf   :  { %v3359_v15 = vpop.f32.mrb[242].mxu1  ;;  %5032 = vst [vmem:[%s9069_s4 + $0x550] sm:$0xff] %v6646_v14  ;;  %v4176_v16 = vpop.f32.mrb[94].mxu0 }
 0x3d0   :  { %v3361_v18 = vpop.f32.mrb[243].mxu1  ;;  %v6648_v20 = vpop.eup %6647  ;;  %v4441_v22 = vmul.f32 %v8829_v29, %v4174_v12  ;;  %v4177_v23 = vadd.f32 %v4176_v16, %v3359_v15 }
 0x3d1   :  { %v4178_v21 = vpop.f32.mrb[95].mxu0  ;;  %5033 = vst [vmem:[%s9069_s4 + $0x558] sm:$0xff] %v6648_v20 }
 0x3d2   :  { %v4644_v24 = vadd.f32 %v8840_v38, %v4441_v22  ;;  %v4442_v25 = vmul.f32 %v8829_v29, %v4177_v23 }
 0x3d4   :  { %6653 = vtanh.f32 %v4644_v24  ;;  %v4645_v26 = vadd.f32 %v8840_v38, %v4442_v25  ;;  %v3364_v27 = vpop.f32.mrb[244].mxu1 }
 0x3d5   :  { %v4181_v28 = vpop.f32.mrb[96].mxu0  ;;  %v3366_v30 = vpop.f32.mrb[245].mxu1 }
 0x3d6   :  { %v6650_v31 = vpop.eup %6649  ;;  %6655 = vtanh.f32 %v4645_v26  ;;  %v4182_v32 = vadd.f32 %v4181_v28, %v3364_v27  ;;  %v4183_v34 = vpop.f32.mrb[97].mxu0 }
 0x3d7   :  { %v3367_v35 = vpop.f32.mrb[246].mxu1  ;;  %5034 = vst [vmem:[%s9069_s4 + $0x560] sm:$0xff] %v6650_v31  ;;  %v4184_v36 = vpop.f32.mrb[98].mxu0 }
 0x3d8   :  { %v3369_v37 = vpop.f32.mrb[247].mxu1  ;;  %v6652_v39 = vpop.eup %6651  ;;  %v4443_v40 = vmul.f32 %v8829_v29, %v4182_v32  ;;  %v4185_v41 = vadd.f32 %v4184_v36, %v3367_v35 }
 0x3d9   :  { %v4186_v42 = vpop.f32.mrb[99].mxu0  ;;  %5035 = vst [vmem:[%s9069_s4 + $0x568] sm:$0xff] %v6652_v39 }
 0x3da   :  { %v4646_v43 = vadd.f32 %v8840_v38, %v4443_v40  ;;  %v4444_v44 = vmul.f32 %v8829_v29, %v4185_v41 }
 0x3dc   :  { %6657 = vtanh.f32 %v4646_v43  ;;  %v4647_v45 = vadd.f32 %v8840_v38, %v4444_v44  ;;  %v3372_v46 = vpop.f32.mrb[248].mxu1 }
 0x3dd   :  { %v4189_v33 = vpop.f32.mrb[100].mxu0  ;;  %v3374_v47 = vpop.f32.mrb[249].mxu1 }
 0x3de   :  { %v6654_v48 = vpop.eup %6653  ;;  %6659 = vtanh.f32 %v4647_v45  ;;  %v4190_v49 = vadd.f32 %v4189_v33, %v3372_v46  ;;  %v4191_v50 = vpop.f32.mrb[101].mxu0 }
 0x3df   :  { %v3375_v51 = vpop.f32.mrb[250].mxu1  ;;  %5036 = vst [vmem:[%s9069_s4 + $0x570] sm:$0xff] %v6654_v48  ;;  %v4192_v52 = vpop.f32.mrb[102].mxu0 }
 0x3e0   :  { %v3377_v53 = vpop.f32.mrb[251].mxu1  ;;  %v6656_v54 = vpop.eup %6655  ;;  %v4445_v55 = vmul.f32 %v8829_v29, %v4190_v49  ;;  %v4193_v56 = vadd.f32 %v4192_v52, %v3375_v51 }
 0x3e1   :  { %v4194_v57 = vpop.f32.mrb[103].mxu0  ;;  %5037 = vst [vmem:[%s9069_s4 + $0x578] sm:$0xff] %v6656_v54 }
 0x3e2   :  { %v4648_v58 = vadd.f32 %v8840_v38, %v4445_v55  ;;  %v4446_v59 = vmul.f32 %v8829_v29, %v4193_v56 }
 0x3e4   :  { %6661 = vtanh.f32 %v4648_v58  ;;  %v4649_v60 = vadd.f32 %v8840_v38, %v4446_v59  ;;  %v3380_v61 = vpop.f32.mrb[252].mxu1 }
 0x3e5   :  { %v4197_v62 = vpop.f32.mrb[104].mxu0  ;;  %v3382_v63 = vpop.f32.mrb[253].mxu1 }
 0x3e6   :  { %v6658_v0 = vpop.eup %6657  ;;  %6663 = vtanh.f32 %v4649_v60  ;;  %v4198_v1 = vadd.f32 %v4197_v62, %v3380_v61  ;;  %v4199_v2 = vpop.f32.mrb[105].mxu0 }
 0x3e7   :  { %v3383_v3 = vpop.f32.mrb[254].mxu1  ;;  %5038 = vst [vmem:[%s9069_s4 + $0x580] sm:$0xff] %v6658_v0  ;;  %v4200_v4 = vpop.f32.mrb[106].mxu0 }
 0x3e8   :  { %v3385_v5 = vpop.f32.mrb[255].mxu1  ;;  %v6660_v6 = vpop.eup %6659  ;;  %v4447_v17 = vmul.f32 %v8829_v29, %v4198_v1  ;;  %v4201_v7 = vadd.f32 %v4200_v4, %v3383_v3 }
 0x3e9   :  { %v4202_v8 = vpop.f32.mrb[107].mxu0  ;;  %5039 = vst [vmem:[%s9069_s4 + $0x588] sm:$0xff] %v6660_v6 }
 0x3ea   :  { %v4650_v9 = vadd.f32 %v8840_v38, %v4447_v17  ;;  %v4448_v10 = vmul.f32 %v8829_v29, %v4201_v7 }
 0x3ec   :  { %6665 = vtanh.f32 %v4650_v9  ;;  %v4651_v11 = vadd.f32 %v8840_v38, %v4448_v10  ;;  %v3388_v13 = vpop.f32.mrb[148].mxu1 }
 0x3ed   :  { %v4205_v14 = vpop.f32.mrb[108].mxu0  ;;  %v3390_v12 = vpop.f32.mrb[149].mxu1 }
 0x3ee   :  { %v6662_v19 = vpop.eup %6661  ;;  %6667 = vtanh.f32 %v4651_v11  ;;  %v4206_v15 = vadd.f32 %v4205_v14, %v3388_v13  ;;  %v4207_v16 = vpop.f32.mrb[109].mxu0 }
 0x3ef   :  { %v3391_v18 = vpop.f32.mrb[150].mxu1  ;;  %5040 = vst [vmem:[%s9069_s4 + $0x590] sm:$0xff] %v6662_v19  ;;  %v4208_v20 = vpop.f32.mrb[110].mxu0 }
 0x3f0   :  { %v3393_v22 = vpop.f32.mrb[151].mxu1  ;;  %v6664_v23 = vpop.eup %6663  ;;  %v4449_v21 = vmul.f32 %v8829_v29, %v4206_v15  ;;  %v4209_v24 = vadd.f32 %v4208_v20, %v3391_v18 }
 0x3f1   :  { %v4210_v25 = vpop.f32.mrb[111].mxu0  ;;  %5041 = vst [vmem:[%s9069_s4 + $0x598] sm:$0xff] %v6664_v23 }
 0x3f2   :  { %v4652_v26 = vadd.f32 %v8840_v38, %v4449_v21  ;;  %v4450_v27 = vmul.f32 %v8829_v29, %v4209_v24 }
 0x3f4   :  { %6669 = vtanh.f32 %v4652_v26  ;;  %v4653_v28 = vadd.f32 %v8840_v38, %v4450_v27  ;;  %v3396_v30 = vpop.f32.mrb[152].mxu1 }
 0x3f5   :  { %v4213_v31 = vpop.f32.mrb[112].mxu0  ;;  %v3398_v32 = vpop.f32.mrb[153].mxu1 }
 0x3f6   :  { %v6666_v34 = vpop.eup %6665  ;;  %6671 = vtanh.f32 %v4653_v28  ;;  %v4214_v35 = vadd.f32 %v4213_v31, %v3396_v30  ;;  %v4215_v36 = vpop.f32.mrb[113].mxu0 }
 0x3f7   :  { %v3399_v37 = vpop.f32.mrb[154].mxu1  ;;  %5042 = vst [vmem:[%s9069_s4 + $0x5a0] sm:$0xff] %v6666_v34  ;;  %v4216_v39 = vpop.f32.mrb[114].mxu0 }
 0x3f8   :  { %v3401_v40 = vpop.f32.mrb[155].mxu1  ;;  %v6668_v41 = vpop.eup %6667  ;;  %v4451_v42 = vmul.f32 %v8829_v29, %v4214_v35  ;;  %v4217_v43 = vadd.f32 %v4216_v39, %v3399_v37 }
 0x3f9   :  { %v4218_v44 = vpop.f32.mrb[115].mxu0  ;;  %5043 = vst [vmem:[%s9069_s4 + $0x5a8] sm:$0xff] %v6668_v41 }
 0x3fa   :  { %v4654_v45 = vadd.f32 %v8840_v38, %v4451_v42  ;;  %v4452_v46 = vmul.f32 %v8829_v29, %v4217_v43 }
 0x3fc   :  { %6673 = vtanh.f32 %v4654_v45  ;;  %v4655_v33 = vadd.f32 %v8840_v38, %v4452_v46  ;;  %v3404_v47 = vpop.f32.mrb[156].mxu1 }
 0x3fd   :  { %v4221_v48 = vpop.f32.mrb[116].mxu0  ;;  %v3406_v49 = vpop.f32.mrb[157].mxu1 }
 0x3fe   :  { %v6670_v50 = vpop.eup %6669  ;;  %6675 = vtanh.f32 %v4655_v33  ;;  %v4222_v51 = vadd.f32 %v4221_v48, %v3404_v47  ;;  %v4223_v52 = vpop.f32.mrb[117].mxu0 }
 0x3ff   :  { %v3407_v53 = vpop.f32.mrb[158].mxu1  ;;  %5044 = vst [vmem:[%s9069_s4 + $0x5b0] sm:$0xff] %v6670_v50  ;;  %v4224_v54 = vpop.f32.mrb[118].mxu0 }
 0x400   :  { %v3409_v55 = vpop.f32.mrb[159].mxu1  ;;  %v6672_v56 = vpop.eup %6671  ;;  %v4453_v57 = vmul.f32 %v8829_v29, %v4222_v51  ;;  %v4225_v58 = vadd.f32 %v4224_v54, %v3407_v53 }
 0x401   :  { %v4226_v59 = vpop.f32.mrb[119].mxu0  ;;  %5045 = vst [vmem:[%s9069_s4 + $0x5b8] sm:$0xff] %v6672_v56 }
 0x402   :  { %v4656_v60 = vadd.f32 %v8840_v38, %v4453_v57  ;;  %v4454_v61 = vmul.f32 %v8829_v29, %v4225_v58 }
 0x404   :  { %6677 = vtanh.f32 %v4656_v60  ;;  %v4657_v62 = vadd.f32 %v8840_v38, %v4454_v61  ;;  %v3412_v63 = vpop.f32.mrb[160].mxu1 }
 0x405   :  { %v4229_v0 = vpop.f32.mrb[120].mxu0  ;;  %v3414_v1 = vpop.f32.mrb[161].mxu1 }
 0x406   :  { %v6674_v2 = vpop.eup %6673  ;;  %6679 = vtanh.f32 %v4657_v62  ;;  %v4230_v3 = vadd.f32 %v4229_v0, %v3412_v63  ;;  %v4231_v4 = vpop.f32.mrb[121].mxu0 }
 0x407   :  { %v3415_v5 = vpop.f32.mrb[162].mxu1  ;;  %5046 = vst [vmem:[%s9069_s4 + $0x5c0] sm:$0xff] %v6674_v2  ;;  %v4232_v6 = vpop.f32.mrb[122].mxu0 }
 0x408   :  { %v3417_v17 = vpop.f32.mrb[163].mxu1  ;;  %v6676_v7 = vpop.eup %6675  ;;  %v4455_v8 = vmul.f32 %v8829_v29, %v4230_v3  ;;  %v4233_v9 = vadd.f32 %v4232_v6, %v3415_v5 }
 0x409   :  { %v4234_v10 = vpop.f32.mrb[123].mxu0  ;;  %5047 = vst [vmem:[%s9069_s4 + $0x5c8] sm:$0xff] %v6676_v7 }
 0x40a   :  { %v4658_v11 = vadd.f32 %v8840_v38, %v4455_v8  ;;  %v4456_v13 = vmul.f32 %v8829_v29, %v4233_v9 }
 0x40c   :  { %6681 = vtanh.f32 %v4658_v11  ;;  %v4659_v14 = vadd.f32 %v8840_v38, %v4456_v13  ;;  %v3420_v12 = vpop.f32.mrb[164].mxu1 }
 0x40d   :  { %v4237_v19 = vpop.f32.mrb[124].mxu0  ;;  %v3422_v15 = vpop.f32.mrb[165].mxu1 }
 0x40e   :  { %v6678_v16 = vpop.eup %6677  ;;  %6683 = vtanh.f32 %v4659_v14  ;;  %v4238_v18 = vadd.f32 %v4237_v19, %v3420_v12  ;;  %v4239_v20 = vpop.f32.mrb[125].mxu0 }
 0x40f   :  { %v3423_v22 = vpop.f32.mrb[166].mxu1  ;;  %5048 = vst [vmem:[%s9069_s4 + $0x5d0] sm:$0xff] %v6678_v16  ;;  %v4240_v23 = vpop.f32.mrb[126].mxu0 }
 0x410   :  { %v3425_v21 = vpop.f32.mrb[167].mxu1  ;;  %v6680_v24 = vpop.eup %6679  ;;  %v4457_v25 = vmul.f32 %v8829_v29, %v4238_v18  ;;  %v4241_v26 = vadd.f32 %v4240_v23, %v3423_v22 }
 0x411   :  { %v4242_v27 = vpop.f32.mrb[127].mxu0  ;;  %5049 = vst [vmem:[%s9069_s4 + $0x5d8] sm:$0xff] %v6680_v24 }
 0x412   :  { %v4660_v28 = vadd.f32 %v8840_v38, %v4457_v25  ;;  %v4458_v30 = vmul.f32 %v8829_v29, %v4241_v26 }
 0x414   :  { %6685 = vtanh.f32 %v4660_v28  ;;  %v4661_v31 = vadd.f32 %v8840_v38, %v4458_v30  ;;  %v3428_v32 = vpop.f32.mrb[168].mxu1 }
 0x415   :  { %v4245_v34 = vpop.f32.mrb[128].mxu0  ;;  %v3430_v35 = vpop.f32.mrb[169].mxu1 }
 0x416   :  { %v6682_v36 = vpop.eup %6681  ;;  %6687 = vtanh.f32 %v4661_v31  ;;  %v4246_v37 = vadd.f32 %v4245_v34, %v3428_v32  ;;  %v4247_v39 = vpop.f32.mrb[129].mxu0 }
 0x417   :  { %v3431_v40 = vpop.f32.mrb[170].mxu1  ;;  %5050 = vst [vmem:[%s9069_s4 + $0x5e0] sm:$0xff] %v6682_v36  ;;  %v4248_v41 = vpop.f32.mrb[130].mxu0 }
 0x418   :  { %v3433_v42 = vpop.f32.mrb[171].mxu1  ;;  %v6684_v43 = vpop.eup %6683  ;;  %v4459_v44 = vmul.f32 %v8829_v29, %v4246_v37  ;;  %v4249_v45 = vadd.f32 %v4248_v41, %v3431_v40 }
 0x419   :  { %v4250_v46 = vpop.f32.mrb[131].mxu0  ;;  %5051 = vst [vmem:[%s9069_s4 + $0x5e8] sm:$0xff] %v6684_v43 }
 0x41a   :  { %v4662_v33 = vadd.f32 %v8840_v38, %v4459_v44  ;;  %v4460_v47 = vmul.f32 %v8829_v29, %v4249_v45 }
 0x41c   :  { %6689 = vtanh.f32 %v4662_v33  ;;  %v4663_v48 = vadd.f32 %v8840_v38, %v4460_v47  ;;  %v3436_v49 = vpop.f32.mrb[172].mxu1 }
 0x41d   :  { %v4253_v50 = vpop.f32.mrb[132].mxu0  ;;  %v3438_v51 = vpop.f32.mrb[173].mxu1 }
 0x41e   :  { %v6686_v52 = vpop.eup %6685  ;;  %6691 = vtanh.f32 %v4663_v48  ;;  %v4254_v53 = vadd.f32 %v4253_v50, %v3436_v49  ;;  %v4255_v54 = vpop.f32.mrb[133].mxu0 }
 0x41f   :  { %v3439_v55 = vpop.f32.mrb[174].mxu1  ;;  %5052 = vst [vmem:[%s9069_s4 + $0x5f0] sm:$0xff] %v6686_v52  ;;  %v4256_v56 = vpop.f32.mrb[134].mxu0 }
 0x420   :  { %v3441_v57 = vpop.f32.mrb[175].mxu1  ;;  %v6688_v58 = vpop.eup %6687  ;;  %v4461_v59 = vmul.f32 %v8829_v29, %v4254_v53  ;;  %v4257_v60 = vadd.f32 %v4256_v56, %v3439_v55 }
 0x421   :  { %v4258_v61 = vpop.f32.mrb[135].mxu0  ;;  %5053 = vst [vmem:[%s9069_s4 + $0x5f8] sm:$0xff] %v6688_v58 }
 0x422   :  { %v4664_v62 = vadd.f32 %v8840_v38, %v4461_v59  ;;  %v4462_v63 = vmul.f32 %v8829_v29, %v4257_v60 }
 0x424   :  { %6693 = vtanh.f32 %v4664_v62  ;;  %v4665_v0 = vadd.f32 %v8840_v38, %v4462_v63 }
 0x426   :  { %v6690_v1 = vpop.eup %6689  ;;  %6695 = vtanh.f32 %v4665_v0 }
 0x427   :  { %5054 = vst [vmem:[%s9069_s4 + $0x600] sm:$0xff] %v6690_v1 }
 0x428   :  { %v6692_v2 = vpop.eup %6691 }
 0x429   :  { %5055 = vst [vmem:[%s9069_s4 + $0x608] sm:$0xff] %v6692_v2 }
 0x42e   :  { %v6694_v3 = vpop.eup %6693 }
 0x42f   :  { %5056 = vst [vmem:[%s9069_s4 + $0x610] sm:$0xff] %v6694_v3 }
 0x430   :  { %v6696_v29 = vpop.eup %6695 }
 0x431   :  { %5057 = vst [vmem:[%s9069_s4 + $0x618] sm:$0xff] %v6696_v29 }

</bundles_post_ra>
